<compile_context>
chip_gen: v7x
topology: tpu7x:2x2x1
jax: 0.10.0
libtpu: 0.0.40
codegen_flags: <defaults>
</compile_context>

<pallas_src>
import functools

import jax
import jax.numpy as jnp
from jax.experimental import pallas as pl
from jax.experimental.pallas import tpu as pltpu


def _round_up(x, m):
    return ((x + m - 1) // m) * m


def _pick_tm(m):
    """Row-tile size: big tiles for large M, >=2 grid steps when possible (v7x 2 TCs)."""
    if m >= 4096:
        return 512
    for c in (256, 128, 64, 32, 16, 8):
        if m % c == 0 and m // c >= 2:
            return c
    return min(512, _round_up(m, 8))


_COMPILER_PARAMS = pltpu.CompilerParams(
    dimension_semantics=("parallel",),
    vmem_limit_bytes=32 * 1024 * 1024,
)


# ----------------------------- Pallas kernels -----------------------------

def _matmul_kernel(*refs, k, has_pre, has_bias, relu, stats, small_k, out_dtype):
    it = iter(refs)
    a_ref = next(it)
    b_ref = next(it)
    ps_ref = next(it) if has_pre else None
    pt_ref = next(it) if has_pre else None
    bias_ref = next(it) if has_bias else None
    o_ref = next(it)
    sum_ref = next(it) if stats else None
    ssq_ref = next(it) if stats else None

    a = a_ref[...]
    if has_pre:
        # fused BN+ReLU of the producing layer, applied per-K-column on the A tile
        a = jnp.maximum(a.astype(jnp.float32) * ps_ref[...] + pt_ref[...], 0.0)
        if not small_k:
            a = a.astype(jnp.bfloat16)

    if small_k:
        # tiny contraction: VPU broadcast multiply-adds, no MXU padding waste
        af = a.astype(jnp.float32)
        bf = b_ref[...].astype(jnp.float32)
        acc = af[:, 0:1] * bf[0:1, :]
        for kk in range(1, k):
            acc = acc + af[:, kk:kk + 1] * bf[kk:kk + 1, :]
    else:
        acc = jnp.dot(a, b_ref[...], preferred_element_type=jnp.float32)

    if stats:
        # BatchNorm batch statistics of the raw conv output.  Stats mode is only used
        # with no bias / no pre-activation, so zero-padded M rows contribute zero.
        sum_ref[0] = jnp.sum(acc, axis=0, keepdims=True)
        ssq_ref[0] = jnp.sum(acc * acc, axis=0, keepdims=True)

    if has_bias:
        acc = acc + bias_ref[...]
    if relu:
        acc = jnp.maximum(acc, 0.0)
    o_ref[...] = acc.astype(out_dtype)


def fused_matmul(a, b, *, bias=None, pre_scale=None, pre_shift=None, relu=False,
                 compute_stats=False, out_dtype=jnp.bfloat16):
    """out = act((pre-act?(A)) @ B + bias); optionally also returns per-channel
    sum / sum-of-squares of the raw A@B product (fused BatchNorm statistics).

    A:(M,K), B:(K,N) weights, bias:(N,), pre_scale/pre_shift:(K,) applied as
    relu(A*s + t) before the contraction."""
    M, K = a.shape
    K2, N = b.shape
    assert K == K2
    if compute_stats:
        assert bias is None and pre_scale is None
    has_pre = pre_scale is not None
    has_bias = bias is not None
    small_k = K <= 8
    if not small_k:
        assert K % 128 == 0, "pad K (inside the im2col) to a multiple of 128"

    tm = _pick_tm(M)
    Mp = _round_up(M, tm)
    Np = _round_up(N, 128)
    nblk = Mp // tm

    a_dtype = jnp.float32 if small_k else jnp.bfloat16
    a_p = a.astype(a_dtype)
    if Mp != M:
        a_p = jnp.pad(a_p, ((0, Mp - M), (0, 0)))
    b_p = b.astype(a_dtype)
    if Np != N:
        b_p = jnp.pad(b_p, ((0, 0), (0, Np - N)))  # weights are jit constants

    operands = [a_p, b_p]
    in_specs = [
        pl.BlockSpec((tm, K), lambda i: (i, 0)),
        pl.BlockSpec((K, Np), lambda i: (0, 0)),
    ]
    if has_pre:
        operands += [pre_scale.astype(jnp.float32).reshape(1, K),
                     pre_shift.astype(jnp.float32).reshape(1, K)]
        in_specs += [pl.BlockSpec((1, K), lambda i: (0, 0)),
                     pl.BlockSpec((1, K), lambda i: (0, 0))]
    if has_bias:
        bias_p = bias.astype(jnp.float32)
        if Np != N:
            bias_p = jnp.pad(bias_p, (0, Np - N))
        operands.append(bias_p.reshape(1, Np))
        in_specs.append(pl.BlockSpec((1, Np), lambda i: (0, 0)))

    out_shapes = [jax.ShapeDtypeStruct((Mp, Np), out_dtype)]
    out_specs = [pl.BlockSpec((tm, Np), lambda i: (i, 0))]
    if compute_stats:
        out_shapes += [jax.ShapeDtypeStruct((nblk, 1, Np), jnp.float32),
                       jax.ShapeDtypeStruct((nblk, 1, Np), jnp.float32)]
        out_specs += [pl.BlockSpec((1, 1, Np), lambda i: (i, 0, 0)),
                      pl.BlockSpec((1, 1, Np), lambda i: (i, 0, 0))]

    kernel = functools.partial(
        _matmul_kernel, k=K, has_pre=has_pre, has_bias=has_bias,
        relu=relu, stats=compute_stats, small_k=small_k, out_dtype=out_dtype)

    res = pl.pallas_call(
        kernel,
        out_shape=tuple(out_shapes) if len(out_shapes) > 1 else out_shapes[0],
        grid=(nblk,),
        in_specs=in_specs,
        out_specs=tuple(out_specs) if len(out_specs) > 1 else out_specs[0],
        compiler_params=_COMPILER_PARAMS,
    )(*operands)

    if compute_stats:
        out, sums, ssqs = res
    else:
        out = res
    if Mp != M or Np != N:
        out = out[:M, :N]
    if compute_stats:
        return out, jnp.sum(sums, axis=(0, 1))[:N], jnp.sum(ssqs, axis=(0, 1))[:N]
    return out


def _scale_shift_relu_kernel(x_ref, s_ref, t_ref, o_ref):
    x = x_ref[...].astype(jnp.float32)
    o_ref[...] = jnp.maximum(x * s_ref[...] + t_ref[...], 0.0).astype(o_ref.dtype)


def scale_shift_relu(x, scale, shift, out_dtype=jnp.bfloat16):
    """y = relu(x * scale + shift), per-channel (last dim)."""
    M, C = x.shape
    tm = _pick_tm(M)
    Mp = _round_up(M, tm)
    if Mp != M:
        x = jnp.pad(x, ((0, Mp - M), (0, 0)))
    out = pl.pallas_call(
        _scale_shift_relu_kernel,
        out_shape=jax.ShapeDtypeStruct((Mp, C), out_dtype),
        grid=(Mp // tm,),
        in_specs=[pl.BlockSpec((tm, C), lambda i: (i, 0)),
                  pl.BlockSpec((1, C), lambda i: (0, 0)),
                  pl.BlockSpec((1, C), lambda i: (0, 0))],
        out_specs=pl.BlockSpec((tm, C), lambda i: (i, 0)),
        compiler_params=_COMPILER_PARAMS,
    )(x, scale.astype(jnp.float32).reshape(1, C),
      shift.astype(jnp.float32).reshape(1, C))
    return out[:M] if Mp != M else out


def _bn_relu_dot1_kernel(x_ref, s_ref, t_ref, w_ref, b_ref, o_ref):
    x = x_ref[...].astype(jnp.float32)
    y = jnp.maximum(x * s_ref[...] + t_ref[...], 0.0)      # BN + ReLU
    red = jnp.sum(y * w_ref[...], axis=1, keepdims=True)   # 1x1 conv (VPU/XLU reduce)
    o_ref[...] = jnp.maximum(red + b_ref[...], 0.0)        # bias + final ReLU


def bn_relu_conv1x1(x, scale, shift, w, b):
    """relu(conv1x1(relu(x*scale+shift)) + b) with Cout=1, fully fused on the VPU."""
    M, C = x.shape
    tm = _pick_tm(M)
    Mp = _round_up(M, tm)
    if Mp != M:
        x = jnp.pad(x, ((0, Mp - M), (0, 0)))
    out = pl.pallas_call(
        _bn_relu_dot1_kernel,
        out_shape=jax.ShapeDtypeStruct((Mp, 1), jnp.float32),
        grid=(Mp // tm,),
        in_specs=[pl.BlockSpec((tm, C), lambda i: (i, 0)),
                  pl.BlockSpec((1, C), lambda i: (0, 0)),
                  pl.BlockSpec((1, C), lambda i: (0, 0)),
                  pl.BlockSpec((1, C), lambda i: (0, 0)),
                  pl.BlockSpec((1, 1), lambda i: (0, 0))],
        out_specs=pl.BlockSpec((tm, 1), lambda i: (i, 0)),
        compiler_params=_COMPILER_PARAMS,
    )(x, scale.astype(jnp.float32).reshape(1, C),
      shift.astype(jnp.float32).reshape(1, C),
      w.astype(jnp.float32).reshape(1, C),
      b.astype(jnp.float32).reshape(1, 1))
    out = out[:M] if Mp != M else out
    return out[:, 0]


# ------------------------------ layer helpers ------------------------------

def _bn_scale_shift(sumv, ssq, count, gamma, beta, eps=1e-5):
    """Training-mode BatchNorm (batch statistics, biased variance) as scale/shift."""
    mean = sumv / count
    var = jnp.maximum(ssq / count - mean * mean, 0.0)
    scale = gamma * jax.lax.rsqrt(var + eps)
    shift = beta - mean * scale
    return scale, shift


def conv1d(x, w, b):
    """x:(B,L,Cin) w:(k,Cin,Cout) b:(Cout,), stride 1, no padding, ReLU fused."""
    B, L, Cin = x.shape
    k, _, Cout = w.shape
    Lo = L - k + 1
    cols = [x[:, i:i + Lo, :] for i in range(k)]
    a = jnp.concatenate(cols, axis=-1).reshape(B * Lo, k * Cin)
    out = fused_matmul(a, w.reshape(k * Cin, Cout), bias=b, relu=True)
    return out.reshape(B, Lo, Cout)


def maxpool1d(x, k, s):
    B, L, C = x.shape
    Lo = (L - k) // s + 1
    cols = [x[:, j: j + s * (Lo - 1) + 1: s, :] for j in range(k)]
    return jnp.max(jnp.stack(cols, axis=0), axis=0)


def _im2col_3x3(x, k_pad):
    """stride-1 / pad-1 3x3 im2col; K padded to k_pad inside the concat (no extra pass)."""
    B, H, W, C = x.shape
    xp = jnp.pad(x, ((0, 0), (1, 1), (1, 1), (0, 0)))
    cols = [xp[:, di:di + H, dj:dj + W, :] for di in range(3) for dj in range(3)]
    if k_pad > 9 * C:
        cols.append(jnp.zeros((B, H, W, k_pad - 9 * C), x.dtype))
    return jnp.concatenate(cols, axis=-1).reshape(B * H * W, k_pad)


def conv2d_3x3_stats(x, w):
    """3x3 conv (stride 1, pad 1, bias=False) returning the raw output plus fused
    per-channel sum / sum-of-squares (BatchNorm batch statistics)."""
    B, H, W, C = x.shape
    Cout = w.shape[-1]
    Kp = _round_up(9 * C, 128)
    a = _im2col_3x3(x, Kp)
    wk = w.reshape(9 * C, Cout)
    if Kp != 9 * C:
        wk = jnp.pad(wk, ((0, Kp - 9 * C), (0, 0)))        # constant weight padding
    out, s, ss = fused_matmul(a, wk, compute_stats=True)
    return out.reshape(B, H, W, Cout), s, ss


def double_conv2d_apply(x, p):
    """Conv3x3(no bias) -> BN -> ReLU -> Conv3x3; returns the second conv's RAW output
    plus its BN scale/shift so the caller can fuse (or apply) the final BN+ReLU."""
    B, H, W, _ = x.shape
    n = B * H * W
    y1, s1, ss1 = conv2d_3x3_stats(x, p['w1'])
    sc1, sh1 = _bn_scale_shift(s1, ss1, n, p['g1'], p['b1'])
    # BN1+ReLU must be applied before the next 3x3 conv's zero padding, so it cannot
    # be fused into that conv's A-load; use the standalone fused scale-shift-relu.
    a1 = scale_shift_relu(y1.reshape(n, -1), sc1, sh1).reshape(y1.shape)
    y2, s2, ss2 = conv2d_3x3_stats(a1, p['w2'])
    sc2, sh2 = _bn_scale_shift(s2, ss2, n, p['g2'], p['b2'])
    return y2, sc2, sh2


def maxpool2d_2x2(x):
    B, H, W, C = x.shape
    return x.reshape(B, H // 2, 2, W // 2, 2, C).max(axis=(2, 4))


def conv_transpose2d_2x2_s2(x, w, b, pre_scale=None, pre_shift=None):
    """x:(B,H,W,Cin) w:(Cin,2,2,Cout) b:(Cout,) -> (B,2H,2W,Cout); optionally fuses a
    preceding per-channel BN+ReLU into the matmul (no spatial padding involved)."""
    B, H, W, Cin = x.shape
    Cout = w.shape[-1]
    a = x.reshape(B * H * W, Cin)
    out = fused_matmul(a, w.reshape(Cin, 4 * Cout), bias=jnp.tile(b, 4),
                       pre_scale=pre_scale, pre_shift=pre_shift, relu=False)
    out = out.reshape(B, H, W, 2, 2, Cout).transpose(0, 1, 3, 2, 4, 5)
    return out.reshape(B, 2 * H, 2 * W, Cout)


def time_encoder_apply(x, p):
    """x:(M, nt, 1) channels-last; equivalent to PyTorch (M, 1, nt)."""
    x = conv1d(x, p['w1'], p['b1']); x = maxpool1d(x, 2, 2)
    x = conv1d(x, p['w2'], p['b2']); x = maxpool1d(x, 2, 2)
    x = conv1d(x, p['w3'], p['b3']); x = maxpool1d(x, 2, 2)
    x = conv1d(x, p['w4'], p['b4']); x = maxpool1d(x, 4, 1)
    M, L, C = x.shape
    # PyTorch Flatten of (M, C, L) is channel-major; our layout is (M, L, C).
    return x.transpose(0, 2, 1).reshape(M, C * L)


def egnet_forward(x, params, nt):
    """x: (B, ny, nx, nt) -> (B, ny, nx)."""
    B, ny, nx, nt_in = x.shape
    assert nt_in == nt, "Please provide a consistent number of time steps"
    p = params

    xt = x.astype(jnp.bfloat16).reshape(B * ny * nx, nt, 1)
    feat = time_encoder_apply(xt, p['te'])                  # (M, 64)
    assert feat.shape[1] == 64, "inconsistent time-encoding channel count"

    h = feat.reshape(B, ny, nx, 64)                         # NHWC

    # down block: skip feeds both the concat and the pooled path, so its BN+ReLU is
    # applied once with the standalone fused kernel.
    d_raw, d_sc, d_sh = double_conv2d_apply(h, p['down'])
    skip = scale_shift_relu(d_raw.reshape(B * ny * nx, -1), d_sc, d_sh)
    skip = skip.reshape(B, ny, nx, -1)                      # (B,ny,nx,128)

    pool = maxpool2d_2x2(skip)                              # (B,ny/2,nx/2,128)

    bn_raw, bn_sc, bn_sh = double_conv2d_apply(pool, p['bottleneck'])
    # bottleneck BN+ReLU fused into the transposed-conv matmul (pre-activation on A)
    up = conv_transpose2d_2x2_s2(bn_raw, p['up_w'], p['up_b'],
                                 pre_scale=bn_sc, pre_shift=bn_sh)   # (B,ny,nx,64)

    cat = jnp.concatenate([skip, up.astype(skip.dtype)], axis=-1)    # skip first, as torch.cat

    u_raw, u_sc, u_sh = double_conv2d_apply(cat, p['up_conv'])       # (B,ny,nx,64) raw
    # up_conv BN+ReLU + final 1x1 conv + bias + ReLU fused in one VPU kernel
    out = bn_relu_conv1x1(u_raw.reshape(B * ny * nx, -1), u_sc, u_sh,
                          p['last_w'], p['last_b'])
    return out.reshape(B, ny, nx)


# --------------------------- deterministic params ---------------------------

def init_params(key):
    keys = jax.random.split(key, 20)

    def nrm(k, shape, scale=0.05):
        return scale * jax.random.normal(k, shape, jnp.float32)

    te = {
        'w1': nrm(keys[0], (4, 1, 32)), 'b1': nrm(keys[1], (32,), 0.01),
        'w2': nrm(keys[2], (4, 32, 64)), 'b2': nrm(keys[3], (64,), 0.01),
        'w3': nrm(keys[4], (4, 64, 64)), 'b3': nrm(keys[5], (64,), 0.01),
        'w4': nrm(keys[6], (4, 64, 64)), 'b4': nrm(keys[7], (64,), 0.01),
    }

    def dc(k1, k2, cin, cout):
        return {'w1': nrm(k1, (3, 3, cin, cout)),
                'g1': jnp.ones((cout,), jnp.float32), 'b1': jnp.zeros((cout,), jnp.float32),
                'w2': nrm(k2, (3, 3, cout, cout)),
                'g2': jnp.ones((cout,), jnp.float32), 'b2': jnp.zeros((cout,), jnp.float32)}

    return {
        'te': te,
        'down': dc(keys[8], keys[9], 64, 128),
        'bottleneck': dc(keys[10], keys[11], 128, 128),
        # NOTE: PyTorch ConvTranspose2d stores (Cin, Cout, kh, kw); ours is (Cin, kh, kw, Cout),
        # consistent with how it is consumed here.
        'up_w': nrm(keys[12], (128, 2, 2, 64)),
        'up_b': nrm(keys[13], (64,), 0.01),
        'up_conv': dc(keys[14], keys[15], 128 + 64, 64),
        'last_w': nrm(keys[16], (64, 1)),
        'last_b': nrm(keys[17], (1,), 0.01),
    }


if __name__ == "__main__":
    # nt must make the time encoder collapse to length 1 (64 features): nt=80 works
    # (80 -> 77 -> 38 -> 35 -> 17 -> 14 -> 7 -> 4 -> 1).
    nt = 80
    B, ny, nx = 2, 8, 8

    key = jax.random.PRNGKey(0)
    kx, kp = jax.random.split(key)
    x = jax.random.normal(kx, (B, ny, nx, nt), jnp.float32)
    params = init_params(kp)

    fwd = jax.jit(lambda inp: egnet_forward(inp, params, nt))
    out = fwd(x)
    jax.block_until_ready(out)
    assert out.shape == (B, ny, nx)
    assert bool(jnp.all(jnp.isfinite(out)))
    print("KERNEL_OK")
</pallas_src>

<mosaic_0001>
module attributes {stable_mosaic.version = 11 : i64} {
  func.func @_matmul_kernel(%arg0: i32, %arg1: memref<512x4xf32, #tpu.memory_space<vmem>>, %arg2: memref<4x128xf32, #tpu.memory_space<vmem>>, %arg3: memref<1x128xf32, #tpu.memory_space<vmem>>, %arg4: memref<512x128xbf16, #tpu.memory_space<vmem>>) attributes {dimension_semantics = [#tpu.dimension_semantics<parallel>], iteration_bounds = array<i64: 20>, scalar_prefetch = 0 : i64, scratch_operands = 0 : i64, tpu.core_type = #tpu.core_type<tc>, window_params = [{transform_indices = @transform_0, window_bounds = array<i64: 512, 4>}, {pipeline_mode = #tpu.pipeline_mode<synchronous>, transform_indices = @transform_1, window_bounds = array<i64: 4, 128>}, {pipeline_mode = #tpu.pipeline_mode<synchronous>, transform_indices = @transform_2, window_bounds = array<i64: 1, 128>}, {transform_indices = @transform_3, window_bounds = array<i64: 512, 128>}]} {
    %c0 = arith.constant 0 : index
    %c0_0 = arith.constant 0 : index
    %0 = vector.load %arg1[%c0, %c0_0] : memref<512x4xf32, #tpu.memory_space<vmem>>, vector<512x4xf32>
    %c0_1 = arith.constant 0 : index
    %c0_2 = arith.constant 0 : index
    %1 = vector.load %arg2[%c0_1, %c0_2] : memref<4x128xf32, #tpu.memory_space<vmem>>, vector<4x128xf32>
    %2 = vector.extract_strided_slice %0 {offsets = [0, 0], sizes = [512, 1], strides = [1, 1]} : vector<512x4xf32> to vector<512x1xf32>
    %3 = vector.extract_strided_slice %1 {offsets = [0, 0], sizes = [1, 128], strides = [1, 1]} : vector<4x128xf32> to vector<1x128xf32>
    %4 = vector.broadcast %2 : vector<512x1xf32> to vector<512x128xf32>
    %5 = vector.broadcast %3 : vector<1x128xf32> to vector<512x128xf32>
    %6 = arith.mulf %4, %5 : vector<512x128xf32>
    %7 = vector.extract_strided_slice %0 {offsets = [0, 1], sizes = [512, 1], strides = [1, 1]} : vector<512x4xf32> to vector<512x1xf32>
    %8 = vector.extract_strided_slice %1 {offsets = [1, 0], sizes = [1, 128], strides = [1, 1]} : vector<4x128xf32> to vector<1x128xf32>
    %9 = vector.broadcast %7 : vector<512x1xf32> to vector<512x128xf32>
    %10 = vector.broadcast %8 : vector<1x128xf32> to vector<512x128xf32>
    %11 = arith.mulf %9, %10 : vector<512x128xf32>
    %12 = arith.addf %6, %11 : vector<512x128xf32>
    %13 = vector.extract_strided_slice %0 {offsets = [0, 2], sizes = [512, 1], strides = [1, 1]} : vector<512x4xf32> to vector<512x1xf32>
    %14 = vector.extract_strided_slice %1 {offsets = [2, 0], sizes = [1, 128], strides = [1, 1]} : vector<4x128xf32> to vector<1x128xf32>
    %15 = vector.broadcast %13 : vector<512x1xf32> to vector<512x128xf32>
    %16 = vector.broadcast %14 : vector<1x128xf32> to vector<512x128xf32>
    %17 = arith.mulf %15, %16 : vector<512x128xf32>
    %18 = arith.addf %12, %17 : vector<512x128xf32>
    %19 = vector.extract_strided_slice %0 {offsets = [0, 3], sizes = [512, 1], strides = [1, 1]} : vector<512x4xf32> to vector<512x1xf32>
    %20 = vector.extract_strided_slice %1 {offsets = [3, 0], sizes = [1, 128], strides = [1, 1]} : vector<4x128xf32> to vector<1x128xf32>
    %21 = vector.broadcast %19 : vector<512x1xf32> to vector<512x128xf32>
    %22 = vector.broadcast %20 : vector<1x128xf32> to vector<512x128xf32>
    %23 = arith.mulf %21, %22 : vector<512x128xf32>
    %24 = arith.addf %18, %23 : vector<512x128xf32>
    %c0_3 = arith.constant 0 : index
    %c0_4 = arith.constant 0 : index
    %25 = vector.load %arg3[%c0_3, %c0_4] : memref<1x128xf32, #tpu.memory_space<vmem>>, vector<1x128xf32>
    %26 = vector.broadcast %25 : vector<1x128xf32> to vector<512x128xf32>
    %27 = arith.addf %24, %26 : vector<512x128xf32>
    %cst = arith.constant 0.000000e+00 : f32
    %28 = vector.broadcast %cst : f32 to vector<512x128xf32>
    %29 = arith.maximumf %27, %28 : vector<512x128xf32>
    %30 = arith.truncf %29 : vector<512x128xf32> to vector<512x128xbf16>
    %c0_5 = arith.constant 0 : index
    %c0_6 = arith.constant 0 : index
    %31 = vector.load %arg4[%c0_5, %c0_6] : memref<512x128xbf16, #tpu.memory_space<vmem>>, vector<512x128xbf16>
    tpu.vector_store %arg4[%c0_5, %c0_6], %30 {strides = array<i32>} : memref<512x128xbf16, #tpu.memory_space<vmem>>, vector<512x128xbf16>,
    return
  }
  func.func @transform_0(%arg0: i32) -> (i32, i32) {
    %c0_i32 = arith.constant 0 : i32
    %c0_i32_0 = arith.constant 0 : i32
    return %arg0, %c0_i32 : i32, i32
  }
  func.func @transform_1(%arg0: i32) -> (i32, i32) {
    %c0_i32 = arith.constant 0 : i32
    %c0_i32_0 = arith.constant 0 : i32
    %c0_i32_1 = arith.constant 0 : i32
    return %c0_i32, %c0_i32_0 : i32, i32
  }
  func.func @transform_2(%arg0: i32) -> (i32, i32) {
    %c0_i32 = arith.constant 0 : i32
    %c0_i32_0 = arith.constant 0 : i32
    %c0_i32_1 = arith.constant 0 : i32
    return %c0_i32, %c0_i32_0 : i32, i32
  }
  func.func @transform_3(%arg0: i32) -> (i32, i32) {
    %c0_i32 = arith.constant 0 : i32
    %c0_i32_0 = arith.constant 0 : i32
    return %arg0, %c0_i32 : i32, i32
  }
}

module attributes {stable_mosaic.version = 11 : i64} {
  func.func @_matmul_kernel(%arg0: i32, %arg1: memref<512x128xbf16, #tpu.memory_space<vmem>>, %arg2: memref<128x128xbf16, #tpu.memory_space<vmem>>, %arg3: memref<1x128xf32, #tpu.memory_space<vmem>>, %arg4: memref<512x128xbf16, #tpu.memory_space<vmem>>) attributes {dimension_semantics = [#tpu.dimension_semantics<parallel>], iteration_bounds = array<i64: 9>, scalar_prefetch = 0 : i64, scratch_operands = 0 : i64, tpu.core_type = #tpu.core_type<tc>, window_params = [{transform_indices = @transform_0, window_bounds = array<i64: 512, 128>}, {pipeline_mode = #tpu.pipeline_mode<synchronous>, transform_indices = @transform_1, window_bounds = array<i64: 128, 128>}, {pipeline_mode = #tpu.pipeline_mode<synchronous>, transform_indices = @transform_2, window_bounds = array<i64: 1, 128>}, {transform_indices = @transform_3, window_bounds = array<i64: 512, 128>}]} {
    %c0 = arith.constant 0 : index
    %c0_0 = arith.constant 0 : index
    %0 = vector.load %arg1[%c0, %c0_0] : memref<512x128xbf16, #tpu.memory_space<vmem>>, vector<512x128xbf16>
    %c0_1 = arith.constant 0 : index
    %c0_2 = arith.constant 0 : index
    %1 = vector.load %arg2[%c0_1, %c0_2] : memref<128x128xbf16, #tpu.memory_space<vmem>>, vector<128x128xbf16>
    %cst = arith.constant dense<0.000000e+00> : vector<512x128xf32>
    %2 = tpu.matmul %0, %1, %cst {dimension_numbers = #tpu.dot_dimension_numbers<[1], [0], [0], [1], [0, 0, 1, 1], [], []>} : vector<512x128xbf16>, vector<128x128xbf16>, vector<512x128xf32> -> vector<512x128xf32>
    %c0_3 = arith.constant 0 : index
    %c0_4 = arith.constant 0 : index
    %3 = vector.load %arg3[%c0_3, %c0_4] : memref<1x128xf32, #tpu.memory_space<vmem>>, vector<1x128xf32>
    %4 = vector.broadcast %3 : vector<1x128xf32> to vector<512x128xf32>
    %5 = arith.addf %2, %4 : vector<512x128xf32>
    %cst_5 = arith.constant 0.000000e+00 : f32
    %6 = vector.broadcast %cst_5 : f32 to vector<512x128xf32>
    %7 = arith.maximumf %5, %6 : vector<512x128xf32>
    %8 = arith.truncf %7 : vector<512x128xf32> to vector<512x128xbf16>
    %c0_6 = arith.constant 0 : index
    %c0_7 = arith.constant 0 : index
    %9 = vector.load %arg4[%c0_6, %c0_7] : memref<512x128xbf16, #tpu.memory_space<vmem>>, vector<512x128xbf16>
    tpu.vector_store %arg4[%c0_6, %c0_7], %8 {strides = array<i32>} : memref<512x128xbf16, #tpu.memory_space<vmem>>, vector<512x128xbf16>,
    return
  }
  func.func @transform_0(%arg0: i32) -> (i32, i32) {
    %c0_i32 = arith.constant 0 : i32
    %c0_i32_0 = arith.constant 0 : i32
    return %arg0, %c0_i32 : i32, i32
  }
  func.func @transform_1(%arg0: i32) -> (i32, i32) {
    %c0_i32 = arith.constant 0 : i32
    %c0_i32_0 = arith.constant 0 : i32
    %c0_i32_1 = arith.constant 0 : i32
    return %c0_i32, %c0_i32_0 : i32, i32
  }
  func.func @transform_2(%arg0: i32) -> (i32, i32) {
    %c0_i32 = arith.constant 0 : i32
    %c0_i32_0 = arith.constant 0 : i32
    %c0_i32_1 = arith.constant 0 : i32
    return %c0_i32, %c0_i32_0 : i32, i32
  }
  func.func @transform_3(%arg0: i32) -> (i32, i32) {
    %c0_i32 = arith.constant 0 : i32
    %c0_i32_0 = arith.constant 0 : i32
    return %arg0, %c0_i32 : i32, i32
  }
}

module attributes {stable_mosaic.version = 11 : i64} {
  func.func @_matmul_kernel(%arg0: i32, %arg1: memref<256x256xbf16, #tpu.memory_space<vmem>>, %arg2: memref<256x128xbf16, #tpu.memory_space<vmem>>, %arg3: memref<1x128xf32, #tpu.memory_space<vmem>>, %arg4: memref<256x128xbf16, #tpu.memory_space<vmem>>) attributes {dimension_semantics = [#tpu.dimension_semantics<parallel>], iteration_bounds = array<i64: 7>, scalar_prefetch = 0 : i64, scratch_operands = 0 : i64, tpu.core_type = #tpu.core_type<tc>, window_params = [{transform_indices = @transform_0, window_bounds = array<i64: 256, 256>}, {pipeline_mode = #tpu.pipeline_mode<synchronous>, transform_indices = @transform_1, window_bounds = array<i64: 256, 128>}, {pipeline_mode = #tpu.pipeline_mode<synchronous>, transform_indices = @transform_2, window_bounds = array<i64: 1, 128>}, {transform_indices = @transform_3, window_bounds = array<i64: 256, 128>}]} {
    %c0 = arith.constant 0 : index
    %c0_0 = arith.constant 0 : index
    %0 = vector.load %arg1[%c0, %c0_0] : memref<256x256xbf16, #tpu.memory_space<vmem>>, vector<256x256xbf16>
    %c0_1 = arith.constant 0 : index
    %c0_2 = arith.constant 0 : index
    %1 = vector.load %arg2[%c0_1, %c0_2] : memref<256x128xbf16, #tpu.memory_space<vmem>>, vector<256x128xbf16>
    %cst = arith.constant dense<0.000000e+00> : vector<256x128xf32>
    %2 = tpu.matmul %0, %1, %cst {dimension_numbers = #tpu.dot_dimension_numbers<[1], [0], [0], [1], [0, 0, 1, 1], [], []>} : vector<256x256xbf16>, vector<256x128xbf16>, vector<256x128xf32> -> vector<256x128xf32>
    %c0_3 = arith.constant 0 : index
    %c0_4 = arith.constant 0 : index
    %3 = vector.load %arg3[%c0_3, %c0_4] : memref<1x128xf32, #tpu.memory_space<vmem>>, vector<1x128xf32>
    %4 = vector.broadcast %3 : vector<1x128xf32> to vector<256x128xf32>
    %5 = arith.addf %2, %4 : vector<256x128xf32>
    %cst_5 = arith.constant 0.000000e+00 : f32
    %6 = vector.broadcast %cst_5 : f32 to vector<256x128xf32>
    %7 = arith.maximumf %5, %6 : vector<256x128xf32>
    %8 = arith.truncf %7 : vector<256x128xf32> to vector<256x128xbf16>
    %c0_6 = arith.constant 0 : index
    %c0_7 = arith.constant 0 : index
    %9 = vector.load %arg4[%c0_6, %c0_7] : memref<256x128xbf16, #tpu.memory_space<vmem>>, vector<256x128xbf16>
    tpu.vector_store %arg4[%c0_6, %c0_7], %8 {strides = array<i32>} : memref<256x128xbf16, #tpu.memory_space<vmem>>, vector<256x128xbf16>,
    return
  }
  func.func @transform_0(%arg0: i32) -> (i32, i32) {
    %c0_i32 = arith.constant 0 : i32
    %c0_i32_0 = arith.constant 0 : i32
    return %arg0, %c0_i32 : i32, i32
  }
  func.func @transform_1(%arg0: i32) -> (i32, i32) {
    %c0_i32 = arith.constant 0 : i32
    %c0_i32_0 = arith.constant 0 : i32
    %c0_i32_1 = arith.constant 0 : i32
    return %c0_i32, %c0_i32_0 : i32, i32
  }
  func.func @transform_2(%arg0: i32) -> (i32, i32) {
    %c0_i32 = arith.constant 0 : i32
    %c0_i32_0 = arith.constant 0 : i32
    %c0_i32_1 = arith.constant 0 : i32
    return %c0_i32, %c0_i32_0 : i32, i32
  }
  func.func @transform_3(%arg0: i32) -> (i32, i32) {
    %c0_i32 = arith.constant 0 : i32
    %c0_i32_0 = arith.constant 0 : i32
    return %arg0, %c0_i32 : i32, i32
  }
}

module attributes {stable_mosaic.version = 11 : i64} {
  func.func @_matmul_kernel(%arg0: i32, %arg1: memref<256x256xbf16, #tpu.memory_space<vmem>>, %arg2: memref<256x128xbf16, #tpu.memory_space<vmem>>, %arg3: memref<1x128xf32, #tpu.memory_space<vmem>>, %arg4: memref<256x128xbf16, #tpu.memory_space<vmem>>) attributes {dimension_semantics = [#tpu.dimension_semantics<parallel>], iteration_bounds = array<i64: 2>, scalar_prefetch = 0 : i64, scratch_operands = 0 : i64, tpu.core_type = #tpu.core_type<tc>, window_params = [{transform_indices = @transform_0, window_bounds = array<i64: 256, 256>}, {pipeline_mode = #tpu.pipeline_mode<synchronous>, transform_indices = @transform_1, window_bounds = array<i64: 256, 128>}, {pipeline_mode = #tpu.pipeline_mode<synchronous>, transform_indices = @transform_2, window_bounds = array<i64: 1, 128>}, {transform_indices = @transform_3, window_bounds = array<i64: 256, 128>}]} {
    %c0 = arith.constant 0 : index
    %c0_0 = arith.constant 0 : index
    %0 = vector.load %arg1[%c0, %c0_0] : memref<256x256xbf16, #tpu.memory_space<vmem>>, vector<256x256xbf16>
    %c0_1 = arith.constant 0 : index
    %c0_2 = arith.constant 0 : index
    %1 = vector.load %arg2[%c0_1, %c0_2] : memref<256x128xbf16, #tpu.memory_space<vmem>>, vector<256x128xbf16>
    %cst = arith.constant dense<0.000000e+00> : vector<256x128xf32>
    %2 = tpu.matmul %0, %1, %cst {dimension_numbers = #tpu.dot_dimension_numbers<[1], [0], [0], [1], [0, 0, 1, 1], [], []>} : vector<256x256xbf16>, vector<256x128xbf16>, vector<256x128xf32> -> vector<256x128xf32>
    %c0_3 = arith.constant 0 : index
    %c0_4 = arith.constant 0 : index
    %3 = vector.load %arg3[%c0_3, %c0_4] : memref<1x128xf32, #tpu.memory_space<vmem>>, vector<1x128xf32>
    %4 = vector.broadcast %3 : vector<1x128xf32> to vector<256x128xf32>
    %5 = arith.addf %2, %4 : vector<256x128xf32>
    %cst_5 = arith.constant 0.000000e+00 : f32
    %6 = vector.broadcast %cst_5 : f32 to vector<256x128xf32>
    %7 = arith.maximumf %5, %6 : vector<256x128xf32>
    %8 = arith.truncf %7 : vector<256x128xf32> to vector<256x128xbf16>
    %c0_6 = arith.constant 0 : index
    %c0_7 = arith.constant 0 : index
    %9 = vector.load %arg4[%c0_6, %c0_7] : memref<256x128xbf16, #tpu.memory_space<vmem>>, vector<256x128xbf16>
    tpu.vector_store %arg4[%c0_6, %c0_7], %8 {strides = array<i32>} : memref<256x128xbf16, #tpu.memory_space<vmem>>, vector<256x128xbf16>,
    return
  }
  func.func @transform_0(%arg0: i32) -> (i32, i32) {
    %c0_i32 = arith.constant 0 : i32
    %c0_i32_0 = arith.constant 0 : i32
    return %arg0, %c0_i32 : i32, i32
  }
  func.func @transform_1(%arg0: i32) -> (i32, i32) {
    %c0_i32 = arith.constant 0 : i32
    %c0_i32_0 = arith.constant 0 : i32
    %c0_i32_1 = arith.constant 0 : i32
    return %c0_i32, %c0_i32_0 : i32, i32
  }
  func.func @transform_2(%arg0: i32) -> (i32, i32) {
    %c0_i32 = arith.constant 0 : i32
    %c0_i32_0 = arith.constant 0 : i32
    %c0_i32_1 = arith.constant 0 : i32
    return %c0_i32, %c0_i32_0 : i32, i32
  }
  func.func @transform_3(%arg0: i32) -> (i32, i32) {
    %c0_i32 = arith.constant 0 : i32
    %c0_i32_0 = arith.constant 0 : i32
    return %arg0, %c0_i32 : i32, i32
  }
}

module attributes {stable_mosaic.version = 11 : i64} {
  func.func @_matmul_kernel(%arg0: i32, %arg1: memref<64x640xbf16, #tpu.memory_space<vmem>>, %arg2: memref<640x128xbf16, #tpu.memory_space<vmem>>, %arg3: memref<64x128xbf16, #tpu.memory_space<vmem>>, %arg4: memref<1x1x128xf32, #tpu.memory_space<vmem>>, %arg5: memref<1x1x128xf32, #tpu.memory_space<vmem>>) attributes {dimension_semantics = [#tpu.dimension_semantics<parallel>], iteration_bounds = array<i64: 2>, scalar_prefetch = 0 : i64, scratch_operands = 0 : i64, tpu.core_type = #tpu.core_type<tc>, window_params = [{transform_indices = @transform_0, window_bounds = array<i64: 64, 640>}, {pipeline_mode = #tpu.pipeline_mode<synchronous>, transform_indices = @transform_1, window_bounds = array<i64: 640, 128>}, {transform_indices = @transform_2, window_bounds = array<i64: 64, 128>}, {transform_indices = @transform_3, window_bounds = array<i64: 1, 1, 128>}, {transform_indices = @transform_4, window_bounds = array<i64: 1, 1, 128>}]} {
    %c0 = arith.constant 0 : index
    %c0_0 = arith.constant 0 : index
    %0 = vector.load %arg1[%c0, %c0_0] : memref<64x640xbf16, #tpu.memory_space<vmem>>, vector<64x640xbf16>
    %c0_1 = arith.constant 0 : index
    %c0_2 = arith.constant 0 : index
    %1 = vector.load %arg2[%c0_1, %c0_2] : memref<640x128xbf16, #tpu.memory_space<vmem>>, vector<640x128xbf16>
    %cst = arith.constant dense<0.000000e+00> : vector<64x128xf32>
    %2 = tpu.matmul %0, %1, %cst {dimension_numbers = #tpu.dot_dimension_numbers<[1], [0], [0], [1], [0, 0, 1, 1], [], []>} : vector<64x640xbf16>, vector<640x128xbf16>, vector<64x128xf32> -> vector<64x128xf32>
    %cst_3 = arith.constant dense<0.000000e+00> : vector<128xf32>
    %3 = vector.multi_reduction <add>, %2, %cst_3 [0] : vector<64x128xf32> to vector<128xf32>
    %4 = vector.shape_cast %3 : vector<128xf32> to vector<1x128xf32>
    %c0_4 = arith.constant 0 : index
    %c0_5 = arith.constant 0 : index
    %c0_6 = arith.constant 0 : index
    %5 = vector.load %arg4[%c0_4, %c0_5, %c0_6] : memref<1x1x128xf32, #tpu.memory_space<vmem>>, vector<1x1x128xf32>
    %6 = vector.shape_cast %5 : vector<1x1x128xf32> to vector<1x128xf32>
    %7 = vector.shape_cast %4 : vector<1x128xf32> to vector<1x1x128xf32>
    tpu.vector_store %arg4[%c0_4, %c0_5, %c0_6], %7 {strides = array<i32>} : memref<1x1x128xf32, #tpu.memory_space<vmem>>, vector<1x1x128xf32>,
    %8 = arith.mulf %2, %2 : vector<64x128xf32>
    %cst_7 = arith.constant dense<0.000000e+00> : vector<128xf32>
    %9 = vector.multi_reduction <add>, %8, %cst_7 [0] : vector<64x128xf32> to vector<128xf32>
    %10 = vector.shape_cast %9 : vector<128xf32> to vector<1x128xf32>
    %c0_8 = arith.constant 0 : index
    %c0_9 = arith.constant 0 : index
    %c0_10 = arith.constant 0 : index
    %11 = vector.load %arg5[%c0_8, %c0_9, %c0_10] : memref<1x1x128xf32, #tpu.memory_space<vmem>>, vector<1x1x128xf32>
    %12 = vector.shape_cast %11 : vector<1x1x128xf32> to vector<1x128xf32>
    %13 = vector.shape_cast %10 : vector<1x128xf32> to vector<1x1x128xf32>
    tpu.vector_store %arg5[%c0_8, %c0_9, %c0_10], %13 {strides = array<i32>} : memref<1x1x128xf32, #tpu.memory_space<vmem>>, vector<1x1x128xf32>,
    %14 = arith.truncf %2 : vector<64x128xf32> to vector<64x128xbf16>
    %c0_11 = arith.constant 0 : index
    %c0_12 = arith.constant 0 : index
    %15 = vector.load %arg3[%c0_11, %c0_12] : memref<64x128xbf16, #tpu.memory_space<vmem>>, vector<64x128xbf16>
    tpu.vector_store %arg3[%c0_11, %c0_12], %14 {strides = array<i32>} : memref<64x128xbf16, #tpu.memory_space<vmem>>, vector<64x128xbf16>,
    return
  }
  func.func @transform_0(%arg0: i32) -> (i32, i32) {
    %c0_i32 = arith.constant 0 : i32
    %c0_i32_0 = arith.constant 0 : i32
    return %arg0, %c0_i32 : i32, i32
  }
  func.func @transform_1(%arg0: i32) -> (i32, i32) {
    %c0_i32 = arith.constant 0 : i32
    %c0_i32_0 = arith.constant 0 : i32
    %c0_i32_1 = arith.constant 0 : i32
    return %c0_i32, %c0_i32_0 : i32, i32
  }
  func.func @transform_2(%arg0: i32) -> (i32, i32) {
    %c0_i32 = arith.constant 0 : i32
    %c0_i32_0 = arith.constant 0 : i32
    return %arg0, %c0_i32 : i32, i32
  }
  func.func @transform_3(%arg0: i32) -> (i32, i32, i32) {
    %c0_i32 = arith.constant 0 : i32
    %c0_i32_0 = arith.constant 0 : i32
    %c0_i32_1 = arith.constant 0 : i32
    return %arg0, %c0_i32, %c0_i32_0 : i32, i32, i32
  }
  func.func @transform_4(%arg0: i32) -> (i32, i32, i32) {
    %c0_i32 = arith.constant 0 : i32
    %c0_i32_0 = arith.constant 0 : i32
    %c0_i32_1 = arith.constant 0 : i32
    return %arg0, %c0_i32, %c0_i32_0 : i32, i32, i32
  }
}

module attributes {stable_mosaic.version = 11 : i64} {
  func.func @_scale_shift_relu_kernel(%arg0: i32, %arg1: memref<64x128xbf16, #tpu.memory_space<vmem>>, %arg2: memref<1x128xf32, #tpu.memory_space<vmem>>, %arg3: memref<1x128xf32, #tpu.memory_space<vmem>>, %arg4: memref<64x128xbf16, #tpu.memory_space<vmem>>) attributes {dimension_semantics = [#tpu.dimension_semantics<parallel>], iteration_bounds = array<i64: 2>, scalar_prefetch = 0 : i64, scratch_operands = 0 : i64, tpu.core_type = #tpu.core_type<tc>, window_params = [{transform_indices = @transform_0, window_bounds = array<i64: 64, 128>}, {pipeline_mode = #tpu.pipeline_mode<synchronous>, transform_indices = @transform_1, window_bounds = array<i64: 1, 128>}, {pipeline_mode = #tpu.pipeline_mode<synchronous>, transform_indices = @transform_2, window_bounds = array<i64: 1, 128>}, {transform_indices = @transform_3, window_bounds = array<i64: 64, 128>}]} {
    %c0 = arith.constant 0 : index
    %c0_0 = arith.constant 0 : index
    %0 = vector.load %arg1[%c0, %c0_0] : memref<64x128xbf16, #tpu.memory_space<vmem>>, vector<64x128xbf16>
    %1 = arith.extf %0 : vector<64x128xbf16> to vector<64x128xf32>
    %c0_1 = arith.constant 0 : index
    %c0_2 = arith.constant 0 : index
    %2 = vector.load %arg2[%c0_1, %c0_2] : memref<1x128xf32, #tpu.memory_space<vmem>>, vector<1x128xf32>
    %3 = vector.broadcast %2 : vector<1x128xf32> to vector<64x128xf32>
    %4 = arith.mulf %1, %3 : vector<64x128xf32>
    %c0_3 = arith.constant 0 : index
    %c0_4 = arith.constant 0 : index
    %5 = vector.load %arg3[%c0_3, %c0_4] : memref<1x128xf32, #tpu.memory_space<vmem>>, vector<1x128xf32>
    %6 = vector.broadcast %5 : vector<1x128xf32> to vector<64x128xf32>
    %7 = arith.addf %4, %6 : vector<64x128xf32>
    %cst = arith.constant 0.000000e+00 : f32
    %8 = vector.broadcast %cst : f32 to vector<64x128xf32>
    %9 = arith.maximumf %7, %8 : vector<64x128xf32>
    %10 = arith.truncf %9 : vector<64x128xf32> to vector<64x128xbf16>
    %c0_5 = arith.constant 0 : index
    %c0_6 = arith.constant 0 : index
    %11 = vector.load %arg4[%c0_5, %c0_6] : memref<64x128xbf16, #tpu.memory_space<vmem>>, vector<64x128xbf16>
    tpu.vector_store %arg4[%c0_5, %c0_6], %10 {strides = array<i32>} : memref<64x128xbf16, #tpu.memory_space<vmem>>, vector<64x128xbf16>,
    return
  }
  func.func @transform_0(%arg0: i32) -> (i32, i32) {
    %c0_i32 = arith.constant 0 : i32
    %c0_i32_0 = arith.constant 0 : i32
    return %arg0, %c0_i32 : i32, i32
  }
  func.func @transform_1(%arg0: i32) -> (i32, i32) {
    %c0_i32 = arith.constant 0 : i32
    %c0_i32_0 = arith.constant 0 : i32
    %c0_i32_1 = arith.constant 0 : i32
    return %c0_i32, %c0_i32_0 : i32, i32
  }
  func.func @transform_2(%arg0: i32) -> (i32, i32) {
    %c0_i32 = arith.constant 0 : i32
    %c0_i32_0 = arith.constant 0 : i32
    %c0_i32_1 = arith.constant 0 : i32
    return %c0_i32, %c0_i32_0 : i32, i32
  }
  func.func @transform_3(%arg0: i32) -> (i32, i32) {
    %c0_i32 = arith.constant 0 : i32
    %c0_i32_0 = arith.constant 0 : i32
    return %arg0, %c0_i32 : i32, i32
  }
}

module attributes {stable_mosaic.version = 11 : i64} {
  func.func @_matmul_kernel(%arg0: i32, %arg1: memref<64x1152xbf16, #tpu.memory_space<vmem>>, %arg2: memref<1152x128xbf16, #tpu.memory_space<vmem>>, %arg3: memref<64x128xbf16, #tpu.memory_space<vmem>>, %arg4: memref<1x1x128xf32, #tpu.memory_space<vmem>>, %arg5: memref<1x1x128xf32, #tpu.memory_space<vmem>>) attributes {dimension_semantics = [#tpu.dimension_semantics<parallel>], iteration_bounds = array<i64: 2>, scalar_prefetch = 0 : i64, scratch_operands = 0 : i64, tpu.core_type = #tpu.core_type<tc>, window_params = [{transform_indices = @transform_0, window_bounds = array<i64: 64, 1152>}, {pipeline_mode = #tpu.pipeline_mode<synchronous>, transform_indices = @transform_1, window_bounds = array<i64: 1152, 128>}, {transform_indices = @transform_2, window_bounds = array<i64: 64, 128>}, {transform_indices = @transform_3, window_bounds = array<i64: 1, 1, 128>}, {transform_indices = @transform_4, window_bounds = array<i64: 1, 1, 128>}]} {
    %c0 = arith.constant 0 : index
    %c0_0 = arith.constant 0 : index
    %0 = vector.load %arg1[%c0, %c0_0] : memref<64x1152xbf16, #tpu.memory_space<vmem>>, vector<64x1152xbf16>
    %c0_1 = arith.constant 0 : index
    %c0_2 = arith.constant 0 : index
    %1 = vector.load %arg2[%c0_1, %c0_2] : memref<1152x128xbf16, #tpu.memory_space<vmem>>, vector<1152x128xbf16>
    %cst = arith.constant dense<0.000000e+00> : vector<64x128xf32>
    %2 = tpu.matmul %0, %1, %cst {dimension_numbers = #tpu.dot_dimension_numbers<[1], [0], [0], [1], [0, 0, 1, 1], [], []>} : vector<64x1152xbf16>, vector<1152x128xbf16>, vector<64x128xf32> -> vector<64x128xf32>
    %cst_3 = arith.constant dense<0.000000e+00> : vector<128xf32>
    %3 = vector.multi_reduction <add>, %2, %cst_3 [0] : vector<64x128xf32> to vector<128xf32>
    %4 = vector.shape_cast %3 : vector<128xf32> to vector<1x128xf32>
    %c0_4 = arith.constant 0 : index
    %c0_5 = arith.constant 0 : index
    %c0_6 = arith.constant 0 : index
    %5 = vector.load %arg4[%c0_4, %c0_5, %c0_6] : memref<1x1x128xf32, #tpu.memory_space<vmem>>, vector<1x1x128xf32>
    %6 = vector.shape_cast %5 : vector<1x1x128xf32> to vector<1x128xf32>
    %7 = vector.shape_cast %4 : vector<1x128xf32> to vector<1x1x128xf32>
    tpu.vector_store %arg4[%c0_4, %c0_5, %c0_6], %7 {strides = array<i32>} : memref<1x1x128xf32, #tpu.memory_space<vmem>>, vector<1x1x128xf32>,
    %8 = arith.mulf %2, %2 : vector<64x128xf32>
    %cst_7 = arith.constant dense<0.000000e+00> : vector<128xf32>
    %9 = vector.multi_reduction <add>, %8, %cst_7 [0] : vector<64x128xf32> to vector<128xf32>
    %10 = vector.shape_cast %9 : vector<128xf32> to vector<1x128xf32>
    %c0_8 = arith.constant 0 : index
    %c0_9 = arith.constant 0 : index
    %c0_10 = arith.constant 0 : index
    %11 = vector.load %arg5[%c0_8, %c0_9, %c0_10] : memref<1x1x128xf32, #tpu.memory_space<vmem>>, vector<1x1x128xf32>
    %12 = vector.shape_cast %11 : vector<1x1x128xf32> to vector<1x128xf32>
    %13 = vector.shape_cast %10 : vector<1x128xf32> to vector<1x1x128xf32>
    tpu.vector_store %arg5[%c0_8, %c0_9, %c0_10], %13 {strides = array<i32>} : memref<1x1x128xf32, #tpu.memory_space<vmem>>, vector<1x1x128xf32>,
    %14 = arith.truncf %2 : vector<64x128xf32> to vector<64x128xbf16>
    %c0_11 = arith.constant 0 : index
    %c0_12 = arith.constant 0 : index
    %15 = vector.load %arg3[%c0_11, %c0_12] : memref<64x128xbf16, #tpu.memory_space<vmem>>, vector<64x128xbf16>
    tpu.vector_store %arg3[%c0_11, %c0_12], %14 {strides = array<i32>} : memref<64x128xbf16, #tpu.memory_space<vmem>>, vector<64x128xbf16>,
    return
  }
  func.func @transform_0(%arg0: i32) -> (i32, i32) {
    %c0_i32 = arith.constant 0 : i32
    %c0_i32_0 = arith.constant 0 : i32
    return %arg0, %c0_i32 : i32, i32
  }
  func.func @transform_1(%arg0: i32) -> (i32, i32) {
    %c0_i32 = arith.constant 0 : i32
    %c0_i32_0 = arith.constant 0 : i32
    %c0_i32_1 = arith.constant 0 : i32
    return %c0_i32, %c0_i32_0 : i32, i32
  }
  func.func @transform_2(%arg0: i32) -> (i32, i32) {
    %c0_i32 = arith.constant 0 : i32
    %c0_i32_0 = arith.constant 0 : i32
    return %arg0, %c0_i32 : i32, i32
  }
  func.func @transform_3(%arg0: i32) -> (i32, i32, i32) {
    %c0_i32 = arith.constant 0 : i32
    %c0_i32_0 = arith.constant 0 : i32
    %c0_i32_1 = arith.constant 0 : i32
    return %arg0, %c0_i32, %c0_i32_0 : i32, i32, i32
  }
  func.func @transform_4(%arg0: i32) -> (i32, i32, i32) {
    %c0_i32 = arith.constant 0 : i32
    %c0_i32_0 = arith.constant 0 : i32
    %c0_i32_1 = arith.constant 0 : i32
    return %arg0, %c0_i32, %c0_i32_0 : i32, i32, i32
  }
}

module attributes {stable_mosaic.version = 11 : i64} {
  func.func @_matmul_kernel(%arg0: i32, %arg1: memref<16x1152xbf16, #tpu.memory_space<vmem>>, %arg2: memref<1152x128xbf16, #tpu.memory_space<vmem>>, %arg3: memref<16x128xbf16, #tpu.memory_space<vmem>>, %arg4: memref<1x1x128xf32, #tpu.memory_space<vmem>>, %arg5: memref<1x1x128xf32, #tpu.memory_space<vmem>>) attributes {dimension_semantics = [#tpu.dimension_semantics<parallel>], iteration_bounds = array<i64: 2>, scalar_prefetch = 0 : i64, scratch_operands = 0 : i64, tpu.core_type = #tpu.core_type<tc>, window_params = [{transform_indices = @transform_0, window_bounds = array<i64: 16, 1152>}, {pipeline_mode = #tpu.pipeline_mode<synchronous>, transform_indices = @transform_1, window_bounds = array<i64: 1152, 128>}, {transform_indices = @transform_2, window_bounds = array<i64: 16, 128>}, {transform_indices = @transform_3, window_bounds = array<i64: 1, 1, 128>}, {transform_indices = @transform_4, window_bounds = array<i64: 1, 1, 128>}]} {
    %c0 = arith.constant 0 : index
    %c0_0 = arith.constant 0 : index
    %0 = vector.load %arg1[%c0, %c0_0] : memref<16x1152xbf16, #tpu.memory_space<vmem>>, vector<16x1152xbf16>
    %c0_1 = arith.constant 0 : index
    %c0_2 = arith.constant 0 : index
    %1 = vector.load %arg2[%c0_1, %c0_2] : memref<1152x128xbf16, #tpu.memory_space<vmem>>, vector<1152x128xbf16>
    %cst = arith.constant dense<0.000000e+00> : vector<16x128xf32>
    %2 = tpu.matmul %0, %1, %cst {dimension_numbers = #tpu.dot_dimension_numbers<[1], [0], [0], [1], [0, 0, 1, 1], [], []>} : vector<16x1152xbf16>, vector<1152x128xbf16>, vector<16x128xf32> -> vector<16x128xf32>
    %cst_3 = arith.constant dense<0.000000e+00> : vector<128xf32>
    %3 = vector.multi_reduction <add>, %2, %cst_3 [0] : vector<16x128xf32> to vector<128xf32>
    %4 = vector.shape_cast %3 : vector<128xf32> to vector<1x128xf32>
    %c0_4 = arith.constant 0 : index
    %c0_5 = arith.constant 0 : index
    %c0_6 = arith.constant 0 : index
    %5 = vector.load %arg4[%c0_4, %c0_5, %c0_6] : memref<1x1x128xf32, #tpu.memory_space<vmem>>, vector<1x1x128xf32>
    %6 = vector.shape_cast %5 : vector<1x1x128xf32> to vector<1x128xf32>
    %7 = vector.shape_cast %4 : vector<1x128xf32> to vector<1x1x128xf32>
    tpu.vector_store %arg4[%c0_4, %c0_5, %c0_6], %7 {strides = array<i32>} : memref<1x1x128xf32, #tpu.memory_space<vmem>>, vector<1x1x128xf32>,
    %8 = arith.mulf %2, %2 : vector<16x128xf32>
    %cst_7 = arith.constant dense<0.000000e+00> : vector<128xf32>
    %9 = vector.multi_reduction <add>, %8, %cst_7 [0] : vector<16x128xf32> to vector<128xf32>
    %10 = vector.shape_cast %9 : vector<128xf32> to vector<1x128xf32>
    %c0_8 = arith.constant 0 : index
    %c0_9 = arith.constant 0 : index
    %c0_10 = arith.constant 0 : index
    %11 = vector.load %arg5[%c0_8, %c0_9, %c0_10] : memref<1x1x128xf32, #tpu.memory_space<vmem>>, vector<1x1x128xf32>
    %12 = vector.shape_cast %11 : vector<1x1x128xf32> to vector<1x128xf32>
    %13 = vector.shape_cast %10 : vector<1x128xf32> to vector<1x1x128xf32>
    tpu.vector_store %arg5[%c0_8, %c0_9, %c0_10], %13 {strides = array<i32>} : memref<1x1x128xf32, #tpu.memory_space<vmem>>, vector<1x1x128xf32>,
    %14 = arith.truncf %2 : vector<16x128xf32> to vector<16x128xbf16>
    %c0_11 = arith.constant 0 : index
    %c0_12 = arith.constant 0 : index
    %15 = vector.load %arg3[%c0_11, %c0_12] : memref<16x128xbf16, #tpu.memory_space<vmem>>, vector<16x128xbf16>
    tpu.vector_store %arg3[%c0_11, %c0_12], %14 {strides = array<i32>} : memref<16x128xbf16, #tpu.memory_space<vmem>>, vector<16x128xbf16>,
    return
  }
  func.func @transform_0(%arg0: i32) -> (i32, i32) {
    %c0_i32 = arith.constant 0 : i32
    %c0_i32_0 = arith.constant 0 : i32
    return %arg0, %c0_i32 : i32, i32
  }
  func.func @transform_1(%arg0: i32) -> (i32, i32) {
    %c0_i32 = arith.constant 0 : i32
    %c0_i32_0 = arith.constant 0 : i32
    %c0_i32_1 = arith.constant 0 : i32
    return %c0_i32, %c0_i32_0 : i32, i32
  }
  func.func @transform_2(%arg0: i32) -> (i32, i32) {
    %c0_i32 = arith.constant 0 : i32
    %c0_i32_0 = arith.constant 0 : i32
    return %arg0, %c0_i32 : i32, i32
  }
  func.func @transform_3(%arg0: i32) -> (i32, i32, i32) {
    %c0_i32 = arith.constant 0 : i32
    %c0_i32_0 = arith.constant 0 : i32
    %c0_i32_1 = arith.constant 0 : i32
    return %arg0, %c0_i32, %c0_i32_0 : i32, i32, i32
  }
  func.func @transform_4(%arg0: i32) -> (i32, i32, i32) {
    %c0_i32 = arith.constant 0 : i32
    %c0_i32_0 = arith.constant 0 : i32
    %c0_i32_1 = arith.constant 0 : i32
    return %arg0, %c0_i32, %c0_i32_0 : i32, i32, i32
  }
}

module attributes {stable_mosaic.version = 11 : i64} {
  func.func @_scale_shift_relu_kernel(%arg0: i32, %arg1: memref<16x128xbf16, #tpu.memory_space<vmem>>, %arg2: memref<1x128xf32, #tpu.memory_space<vmem>>, %arg3: memref<1x128xf32, #tpu.memory_space<vmem>>, %arg4: memref<16x128xbf16, #tpu.memory_space<vmem>>) attributes {dimension_semantics = [#tpu.dimension_semantics<parallel>], iteration_bounds = array<i64: 2>, scalar_prefetch = 0 : i64, scratch_operands = 0 : i64, tpu.core_type = #tpu.core_type<tc>, window_params = [{transform_indices = @transform_0, window_bounds = array<i64: 16, 128>}, {pipeline_mode = #tpu.pipeline_mode<synchronous>, transform_indices = @transform_1, window_bounds = array<i64: 1, 128>}, {pipeline_mode = #tpu.pipeline_mode<synchronous>, transform_indices = @transform_2, window_bounds = array<i64: 1, 128>}, {transform_indices = @transform_3, window_bounds = array<i64: 16, 128>}]} {
    %c0 = arith.constant 0 : index
    %c0_0 = arith.constant 0 : index
    %0 = vector.load %arg1[%c0, %c0_0] : memref<16x128xbf16, #tpu.memory_space<vmem>>, vector<16x128xbf16>
    %1 = arith.extf %0 : vector<16x128xbf16> to vector<16x128xf32>
    %c0_1 = arith.constant 0 : index
    %c0_2 = arith.constant 0 : index
    %2 = vector.load %arg2[%c0_1, %c0_2] : memref<1x128xf32, #tpu.memory_space<vmem>>, vector<1x128xf32>
    %3 = vector.broadcast %2 : vector<1x128xf32> to vector<16x128xf32>
    %4 = arith.mulf %1, %3 : vector<16x128xf32>
    %c0_3 = arith.constant 0 : index
    %c0_4 = arith.constant 0 : index
    %5 = vector.load %arg3[%c0_3, %c0_4] : memref<1x128xf32, #tpu.memory_space<vmem>>, vector<1x128xf32>
    %6 = vector.broadcast %5 : vector<1x128xf32> to vector<16x128xf32>
    %7 = arith.addf %4, %6 : vector<16x128xf32>
    %cst = arith.constant 0.000000e+00 : f32
    %8 = vector.broadcast %cst : f32 to vector<16x128xf32>
    %9 = arith.maximumf %7, %8 : vector<16x128xf32>
    %10 = arith.truncf %9 : vector<16x128xf32> to vector<16x128xbf16>
    %c0_5 = arith.constant 0 : index
    %c0_6 = arith.constant 0 : index
    %11 = vector.load %arg4[%c0_5, %c0_6] : memref<16x128xbf16, #tpu.memory_space<vmem>>, vector<16x128xbf16>
    tpu.vector_store %arg4[%c0_5, %c0_6], %10 {strides = array<i32>} : memref<16x128xbf16, #tpu.memory_space<vmem>>, vector<16x128xbf16>,
    return
  }
  func.func @transform_0(%arg0: i32) -> (i32, i32) {
    %c0_i32 = arith.constant 0 : i32
    %c0_i32_0 = arith.constant 0 : i32
    return %arg0, %c0_i32 : i32, i32
  }
  func.func @transform_1(%arg0: i32) -> (i32, i32) {
    %c0_i32 = arith.constant 0 : i32
    %c0_i32_0 = arith.constant 0 : i32
    %c0_i32_1 = arith.constant 0 : i32
    return %c0_i32, %c0_i32_0 : i32, i32
  }
  func.func @transform_2(%arg0: i32) -> (i32, i32) {
    %c0_i32 = arith.constant 0 : i32
    %c0_i32_0 = arith.constant 0 : i32
    %c0_i32_1 = arith.constant 0 : i32
    return %c0_i32, %c0_i32_0 : i32, i32
  }
  func.func @transform_3(%arg0: i32) -> (i32, i32) {
    %c0_i32 = arith.constant 0 : i32
    %c0_i32_0 = arith.constant 0 : i32
    return %arg0, %c0_i32 : i32, i32
  }
}

module attributes {stable_mosaic.version = 11 : i64} {
  func.func @_matmul_kernel(%arg0: i32, %arg1: memref<16x128xbf16, #tpu.memory_space<vmem>>, %arg2: memref<128x256xbf16, #tpu.memory_space<vmem>>, %arg3: memref<1x128xf32, #tpu.memory_space<vmem>>, %arg4: memref<1x128xf32, #tpu.memory_space<vmem>>, %arg5: memref<1x256xf32, #tpu.memory_space<vmem>>, %arg6: memref<16x256xbf16, #tpu.memory_space<vmem>>) attributes {dimension_semantics = [#tpu.dimension_semantics<parallel>], iteration_bounds = array<i64: 2>, scalar_prefetch = 0 : i64, scratch_operands = 0 : i64, tpu.core_type = #tpu.core_type<tc>, window_params = [{transform_indices = @transform_0, window_bounds = array<i64: 16, 128>}, {pipeline_mode = #tpu.pipeline_mode<synchronous>, transform_indices = @transform_1, window_bounds = array<i64: 128, 256>}, {pipeline_mode = #tpu.pipeline_mode<synchronous>, transform_indices = @transform_2, window_bounds = array<i64: 1, 128>}, {pipeline_mode = #tpu.pipeline_mode<synchronous>, transform_indices = @transform_3, window_bounds = array<i64: 1, 128>}, {pipeline_mode = #tpu.pipeline_mode<synchronous>, transform_indices = @transform_4, window_bounds = array<i64: 1, 256>}, {transform_indices = @transform_5, window_bounds = array<i64: 16, 256>}]} {
    %c0 = arith.constant 0 : index
    %c0_0 = arith.constant 0 : index
    %0 = vector.load %arg1[%c0, %c0_0] : memref<16x128xbf16, #tpu.memory_space<vmem>>, vector<16x128xbf16>
    %1 = arith.extf %0 : vector<16x128xbf16> to vector<16x128xf32>
    %c0_1 = arith.constant 0 : index
    %c0_2 = arith.constant 0 : index
    %2 = vector.load %arg3[%c0_1, %c0_2] : memref<1x128xf32, #tpu.memory_space<vmem>>, vector<1x128xf32>
    %3 = vector.broadcast %2 : vector<1x128xf32> to vector<16x128xf32>
    %4 = arith.mulf %1, %3 : vector<16x128xf32>
    %c0_3 = arith.constant 0 : index
    %c0_4 = arith.constant 0 : index
    %5 = vector.load %arg4[%c0_3, %c0_4] : memref<1x128xf32, #tpu.memory_space<vmem>>, vector<1x128xf32>
    %6 = vector.broadcast %5 : vector<1x128xf32> to vector<16x128xf32>
    %7 = arith.addf %4, %6 : vector<16x128xf32>
    %cst = arith.constant 0.000000e+00 : f32
    %8 = vector.broadcast %cst : f32 to vector<16x128xf32>
    %9 = arith.maximumf %7, %8 : vector<16x128xf32>
    %10 = arith.truncf %9 : vector<16x128xf32> to vector<16x128xbf16>
    %c0_5 = arith.constant 0 : index
    %c0_6 = arith.constant 0 : index
    %11 = vector.load %arg2[%c0_5, %c0_6] : memref<128x256xbf16, #tpu.memory_space<vmem>>, vector<128x256xbf16>
    %cst_7 = arith.constant dense<0.000000e+00> : vector<16x256xf32>
    %12 = tpu.matmul %10, %11, %cst_7 {dimension_numbers = #tpu.dot_dimension_numbers<[1], [0], [0], [1], [0, 0, 1, 1], [], []>} : vector<16x128xbf16>, vector<128x256xbf16>, vector<16x256xf32> -> vector<16x256xf32>
    %c0_8 = arith.constant 0 : index
    %c0_9 = arith.constant 0 : index
    %13 = vector.load %arg5[%c0_8, %c0_9] : memref<1x256xf32, #tpu.memory_space<vmem>>, vector<1x256xf32>
    %14 = vector.broadcast %13 : vector<1x256xf32> to vector<16x256xf32>
    %15 = arith.addf %12, %14 : vector<16x256xf32>
    %16 = arith.truncf %15 : vector<16x256xf32> to vector<16x256xbf16>
    %c0_10 = arith.constant 0 : index
    %c0_11 = arith.constant 0 : index
    %17 = vector.load %arg6[%c0_10, %c0_11] : memref<16x256xbf16, #tpu.memory_space<vmem>>, vector<16x256xbf16>
    tpu.vector_store %arg6[%c0_10, %c0_11], %16 {strides = array<i32>} : memref<16x256xbf16, #tpu.memory_space<vmem>>, vector<16x256xbf16>,
    return
  }
  func.func @transform_0(%arg0: i32) -> (i32, i32) {
    %c0_i32 = arith.constant 0 : i32
    %c0_i32_0 = arith.constant 0 : i32
    return %arg0, %c0_i32 : i32, i32
  }
  func.func @transform_1(%arg0: i32) -> (i32, i32) {
    %c0_i32 = arith.constant 0 : i32
    %c0_i32_0 = arith.constant 0 : i32
    %c0_i32_1 = arith.constant 0 : i32
    return %c0_i32, %c0_i32_0 : i32, i32
  }
  func.func @transform_2(%arg0: i32) -> (i32, i32) {
    %c0_i32 = arith.constant 0 : i32
    %c0_i32_0 = arith.constant 0 : i32
    %c0_i32_1 = arith.constant 0 : i32
    return %c0_i32, %c0_i32_0 : i32, i32
  }
  func.func @transform_3(%arg0: i32) -> (i32, i32) {
    %c0_i32 = arith.constant 0 : i32
    %c0_i32_0 = arith.constant 0 : i32
    %c0_i32_1 = arith.constant 0 : i32
    return %c0_i32, %c0_i32_0 : i32, i32
  }
  func.func @transform_4(%arg0: i32) -> (i32, i32) {
    %c0_i32 = arith.constant 0 : i32
    %c0_i32_0 = arith.constant 0 : i32
    %c0_i32_1 = arith.constant 0 : i32
    return %c0_i32, %c0_i32_0 : i32, i32
  }
  func.func @transform_5(%arg0: i32) -> (i32, i32) {
    %c0_i32 = arith.constant 0 : i32
    %c0_i32_0 = arith.constant 0 : i32
    return %arg0, %c0_i32 : i32, i32
  }
}

module attributes {stable_mosaic.version = 11 : i64} {
  func.func @_matmul_kernel(%arg0: i32, %arg1: memref<64x1792xbf16, #tpu.memory_space<vmem>>, %arg2: memref<1792x128xbf16, #tpu.memory_space<vmem>>, %arg3: memref<64x128xbf16, #tpu.memory_space<vmem>>, %arg4: memref<1x1x128xf32, #tpu.memory_space<vmem>>, %arg5: memref<1x1x128xf32, #tpu.memory_space<vmem>>) attributes {dimension_semantics = [#tpu.dimension_semantics<parallel>], iteration_bounds = array<i64: 2>, scalar_prefetch = 0 : i64, scratch_operands = 0 : i64, tpu.core_type = #tpu.core_type<tc>, window_params = [{transform_indices = @transform_0, window_bounds = array<i64: 64, 1792>}, {pipeline_mode = #tpu.pipeline_mode<synchronous>, transform_indices = @transform_1, window_bounds = array<i64: 1792, 128>}, {transform_indices = @transform_2, window_bounds = array<i64: 64, 128>}, {transform_indices = @transform_3, window_bounds = array<i64: 1, 1, 128>}, {transform_indices = @transform_4, window_bounds = array<i64: 1, 1, 128>}]} {
    %c0 = arith.constant 0 : index
    %c0_0 = arith.constant 0 : index
    %0 = vector.load %arg1[%c0, %c0_0] : memref<64x1792xbf16, #tpu.memory_space<vmem>>, vector<64x1792xbf16>
    %c0_1 = arith.constant 0 : index
    %c0_2 = arith.constant 0 : index
    %1 = vector.load %arg2[%c0_1, %c0_2] : memref<1792x128xbf16, #tpu.memory_space<vmem>>, vector<1792x128xbf16>
    %cst = arith.constant dense<0.000000e+00> : vector<64x128xf32>
    %2 = tpu.matmul %0, %1, %cst {dimension_numbers = #tpu.dot_dimension_numbers<[1], [0], [0], [1], [0, 0, 1, 1], [], []>} : vector<64x1792xbf16>, vector<1792x128xbf16>, vector<64x128xf32> -> vector<64x128xf32>
    %cst_3 = arith.constant dense<0.000000e+00> : vector<128xf32>
    %3 = vector.multi_reduction <add>, %2, %cst_3 [0] : vector<64x128xf32> to vector<128xf32>
    %4 = vector.shape_cast %3 : vector<128xf32> to vector<1x128xf32>
    %c0_4 = arith.constant 0 : index
    %c0_5 = arith.constant 0 : index
    %c0_6 = arith.constant 0 : index
    %5 = vector.load %arg4[%c0_4, %c0_5, %c0_6] : memref<1x1x128xf32, #tpu.memory_space<vmem>>, vector<1x1x128xf32>
    %6 = vector.shape_cast %5 : vector<1x1x128xf32> to vector<1x128xf32>
    %7 = vector.shape_cast %4 : vector<1x128xf32> to vector<1x1x128xf32>
    tpu.vector_store %arg4[%c0_4, %c0_5, %c0_6], %7 {strides = array<i32>} : memref<1x1x128xf32, #tpu.memory_space<vmem>>, vector<1x1x128xf32>,
    %8 = arith.mulf %2, %2 : vector<64x128xf32>
    %cst_7 = arith.constant dense<0.000000e+00> : vector<128xf32>
    %9 = vector.multi_reduction <add>, %8, %cst_7 [0] : vector<64x128xf32> to vector<128xf32>
    %10 = vector.shape_cast %9 : vector<128xf32> to vector<1x128xf32>
    %c0_8 = arith.constant 0 : index
    %c0_9 = arith.constant 0 : index
    %c0_10 = arith.constant 0 : index
    %11 = vector.load %arg5[%c0_8, %c0_9, %c0_10] : memref<1x1x128xf32, #tpu.memory_space<vmem>>, vector<1x1x128xf32>
    %12 = vector.shape_cast %11 : vector<1x1x128xf32> to vector<1x128xf32>
    %13 = vector.shape_cast %10 : vector<1x128xf32> to vector<1x1x128xf32>
    tpu.vector_store %arg5[%c0_8, %c0_9, %c0_10], %13 {strides = array<i32>} : memref<1x1x128xf32, #tpu.memory_space<vmem>>, vector<1x1x128xf32>,
    %14 = arith.truncf %2 : vector<64x128xf32> to vector<64x128xbf16>
    %c0_11 = arith.constant 0 : index
    %c0_12 = arith.constant 0 : index
    %15 = vector.load %arg3[%c0_11, %c0_12] : memref<64x128xbf16, #tpu.memory_space<vmem>>, vector<64x128xbf16>
    tpu.vector_store %arg3[%c0_11, %c0_12], %14 {strides = array<i32>} : memref<64x128xbf16, #tpu.memory_space<vmem>>, vector<64x128xbf16>,
    return
  }
  func.func @transform_0(%arg0: i32) -> (i32, i32) {
    %c0_i32 = arith.constant 0 : i32
    %c0_i32_0 = arith.constant 0 : i32
    return %arg0, %c0_i32 : i32, i32
  }
  func.func @transform_1(%arg0: i32) -> (i32, i32) {
    %c0_i32 = arith.constant 0 : i32
    %c0_i32_0 = arith.constant 0 : i32
    %c0_i32_1 = arith.constant 0 : i32
    return %c0_i32, %c0_i32_0 : i32, i32
  }
  func.func @transform_2(%arg0: i32) -> (i32, i32) {
    %c0_i32 = arith.constant 0 : i32
    %c0_i32_0 = arith.constant 0 : i32
    return %arg0, %c0_i32 : i32, i32
  }
  func.func @transform_3(%arg0: i32) -> (i32, i32, i32) {
    %c0_i32 = arith.constant 0 : i32
    %c0_i32_0 = arith.constant 0 : i32
    %c0_i32_1 = arith.constant 0 : i32
    return %arg0, %c0_i32, %c0_i32_0 : i32, i32, i32
  }
  func.func @transform_4(%arg0: i32) -> (i32, i32, i32) {
    %c0_i32 = arith.constant 0 : i32
    %c0_i32_0 = arith.constant 0 : i32
    %c0_i32_1 = arith.constant 0 : i32
    return %arg0, %c0_i32, %c0_i32_0 : i32, i32, i32
  }
}

module attributes {stable_mosaic.version = 11 : i64} {
  func.func @_scale_shift_relu_kernel(%arg0: i32, %arg1: memref<64x64xbf16, #tpu.memory_space<vmem>>, %arg2: memref<1x64xf32, #tpu.memory_space<vmem>>, %arg3: memref<1x64xf32, #tpu.memory_space<vmem>>, %arg4: memref<64x64xbf16, #tpu.memory_space<vmem>>) attributes {dimension_semantics = [#tpu.dimension_semantics<parallel>], iteration_bounds = array<i64: 2>, scalar_prefetch = 0 : i64, scratch_operands = 0 : i64, tpu.core_type = #tpu.core_type<tc>, window_params = [{transform_indices = @transform_0, window_bounds = array<i64: 64, 64>}, {pipeline_mode = #tpu.pipeline_mode<synchronous>, transform_indices = @transform_1, window_bounds = array<i64: 1, 64>}, {pipeline_mode = #tpu.pipeline_mode<synchronous>, transform_indices = @transform_2, window_bounds = array<i64: 1, 64>}, {transform_indices = @transform_3, window_bounds = array<i64: 64, 64>}]} {
    %c0 = arith.constant 0 : index
    %c0_0 = arith.constant 0 : index
    %0 = vector.load %arg1[%c0, %c0_0] : memref<64x64xbf16, #tpu.memory_space<vmem>>, vector<64x64xbf16>
    %1 = arith.extf %0 : vector<64x64xbf16> to vector<64x64xf32>
    %c0_1 = arith.constant 0 : index
    %c0_2 = arith.constant 0 : index
    %2 = vector.load %arg2[%c0_1, %c0_2] : memref<1x64xf32, #tpu.memory_space<vmem>>, vector<1x64xf32>
    %3 = vector.broadcast %2 : vector<1x64xf32> to vector<64x64xf32>
    %4 = arith.mulf %1, %3 : vector<64x64xf32>
    %c0_3 = arith.constant 0 : index
    %c0_4 = arith.constant 0 : index
    %5 = vector.load %arg3[%c0_3, %c0_4] : memref<1x64xf32, #tpu.memory_space<vmem>>, vector<1x64xf32>
    %6 = vector.broadcast %5 : vector<1x64xf32> to vector<64x64xf32>
    %7 = arith.addf %4, %6 : vector<64x64xf32>
    %cst = arith.constant 0.000000e+00 : f32
    %8 = vector.broadcast %cst : f32 to vector<64x64xf32>
    %9 = arith.maximumf %7, %8 : vector<64x64xf32>
    %10 = arith.truncf %9 : vector<64x64xf32> to vector<64x64xbf16>
    %c0_5 = arith.constant 0 : index
    %c0_6 = arith.constant 0 : index
    %11 = vector.load %arg4[%c0_5, %c0_6] : memref<64x64xbf16, #tpu.memory_space<vmem>>, vector<64x64xbf16>
    tpu.vector_store %arg4[%c0_5, %c0_6], %10 {strides = array<i32>} : memref<64x64xbf16, #tpu.memory_space<vmem>>, vector<64x64xbf16>,
    return
  }
  func.func @transform_0(%arg0: i32) -> (i32, i32) {
    %c0_i32 = arith.constant 0 : i32
    %c0_i32_0 = arith.constant 0 : i32
    return %arg0, %c0_i32 : i32, i32
  }
  func.func @transform_1(%arg0: i32) -> (i32, i32) {
    %c0_i32 = arith.constant 0 : i32
    %c0_i32_0 = arith.constant 0 : i32
    %c0_i32_1 = arith.constant 0 : i32
    return %c0_i32, %c0_i32_0 : i32, i32
  }
  func.func @transform_2(%arg0: i32) -> (i32, i32) {
    %c0_i32 = arith.constant 0 : i32
    %c0_i32_0 = arith.constant 0 : i32
    %c0_i32_1 = arith.constant 0 : i32
    return %c0_i32, %c0_i32_0 : i32, i32
  }
  func.func @transform_3(%arg0: i32) -> (i32, i32) {
    %c0_i32 = arith.constant 0 : i32
    %c0_i32_0 = arith.constant 0 : i32
    return %arg0, %c0_i32 : i32, i32
  }
}

module attributes {stable_mosaic.version = 11 : i64} {
  func.func @_bn_relu_dot1_kernel(%arg0: i32, %arg1: memref<64x64xbf16, #tpu.memory_space<vmem>>, %arg2: memref<1x64xf32, #tpu.memory_space<vmem>>, %arg3: memref<1x64xf32, #tpu.memory_space<vmem>>, %arg4: memref<1x64xf32, #tpu.memory_space<vmem>>, %arg5: memref<1x1xf32, #tpu.memory_space<vmem>>, %arg6: memref<64x1xf32, #tpu.memory_space<vmem>>) attributes {dimension_semantics = [#tpu.dimension_semantics<parallel>], iteration_bounds = array<i64: 2>, scalar_prefetch = 0 : i64, scratch_operands = 0 : i64, tpu.core_type = #tpu.core_type<tc>, window_params = [{transform_indices = @transform_0, window_bounds = array<i64: 64, 64>}, {pipeline_mode = #tpu.pipeline_mode<synchronous>, transform_indices = @transform_1, window_bounds = array<i64: 1, 64>}, {pipeline_mode = #tpu.pipeline_mode<synchronous>, transform_indices = @transform_2, window_bounds = array<i64: 1, 64>}, {pipeline_mode = #tpu.pipeline_mode<synchronous>, transform_indices = @transform_3, window_bounds = array<i64: 1, 64>}, {pipeline_mode = #tpu.pipeline_mode<synchronous>, transform_indices = @transform_4, window_bounds = array<i64: 1, 1>}, {transform_indices = @transform_5, window_bounds = array<i64: 64, 1>}]} {
    %c0 = arith.constant 0 : index
    %c0_0 = arith.constant 0 : index
    %0 = vector.load %arg1[%c0, %c0_0] : memref<64x64xbf16, #tpu.memory_space<vmem>>, vector<64x64xbf16>
    %1 = arith.extf %0 : vector<64x64xbf16> to vector<64x64xf32>
    %c0_1 = arith.constant 0 : index
    %c0_2 = arith.constant 0 : index
    %2 = vector.load %arg2[%c0_1, %c0_2] : memref<1x64xf32, #tpu.memory_space<vmem>>, vector<1x64xf32>
    %3 = vector.broadcast %2 : vector<1x64xf32> to vector<64x64xf32>
    %4 = arith.mulf %1, %3 : vector<64x64xf32>
    %c0_3 = arith.constant 0 : index
    %c0_4 = arith.constant 0 : index
    %5 = vector.load %arg3[%c0_3, %c0_4] : memref<1x64xf32, #tpu.memory_space<vmem>>, vector<1x64xf32>
    %6 = vector.broadcast %5 : vector<1x64xf32> to vector<64x64xf32>
    %7 = arith.addf %4, %6 : vector<64x64xf32>
    %cst = arith.constant 0.000000e+00 : f32
    %8 = vector.broadcast %cst : f32 to vector<64x64xf32>
    %9 = arith.maximumf %7, %8 : vector<64x64xf32>
    %c0_5 = arith.constant 0 : index
    %c0_6 = arith.constant 0 : index
    %10 = vector.load %arg4[%c0_5, %c0_6] : memref<1x64xf32, #tpu.memory_space<vmem>>, vector<1x64xf32>
    %11 = vector.broadcast %10 : vector<1x64xf32> to vector<64x64xf32>
    %12 = arith.mulf %9, %11 : vector<64x64xf32>
    %cst_7 = arith.constant dense<0.000000e+00> : vector<64xf32>
    %13 = vector.multi_reduction <add>, %12, %cst_7 [1] : vector<64x64xf32> to vector<64xf32>
    %14 = vector.shape_cast %13 : vector<64xf32> to vector<64x1xf32>
    %c0_8 = arith.constant 0 : index
    %c0_9 = arith.constant 0 : index
    %15 = vector.load %arg5[%c0_8, %c0_9] : memref<1x1xf32, #tpu.memory_space<vmem>>, vector<1x1xf32>
    %16 = vector.broadcast %15 : vector<1x1xf32> to vector<64x1xf32>
    %17 = arith.addf %14, %16 : vector<64x1xf32>
    %cst_10 = arith.constant 0.000000e+00 : f32
    %18 = vector.broadcast %cst_10 : f32 to vector<64x1xf32>
    %19 = arith.maximumf %17, %18 : vector<64x1xf32>
    %c0_11 = arith.constant 0 : index
    %c0_12 = arith.constant 0 : index
    %20 = vector.load %arg6[%c0_11, %c0_12] : memref<64x1xf32, #tpu.memory_space<vmem>>, vector<64x1xf32>
    tpu.vector_store %arg6[%c0_11, %c0_12], %19 {strides = array<i32>} : memref<64x1xf32, #tpu.memory_space<vmem>>, vector<64x1xf32>,
    return
  }
  func.func @transform_0(%arg0: i32) -> (i32, i32) {
    %c0_i32 = arith.constant 0 : i32
    %c0_i32_0 = arith.constant 0 : i32
    return %arg0, %c0_i32 : i32, i32
  }
  func.func @transform_1(%arg0: i32) -> (i32, i32) {
    %c0_i32 = arith.constant 0 : i32
    %c0_i32_0 = arith.constant 0 : i32
    %c0_i32_1 = arith.constant 0 : i32
    return %c0_i32, %c0_i32_0 : i32, i32
  }
  func.func @transform_2(%arg0: i32) -> (i32, i32) {
    %c0_i32 = arith.constant 0 : i32
    %c0_i32_0 = arith.constant 0 : i32
    %c0_i32_1 = arith.constant 0 : i32
    return %c0_i32, %c0_i32_0 : i32, i32
  }
  func.func @transform_3(%arg0: i32) -> (i32, i32) {
    %c0_i32 = arith.constant 0 : i32
    %c0_i32_0 = arith.constant 0 : i32
    %c0_i32_1 = arith.constant 0 : i32
    return %c0_i32, %c0_i32_0 : i32, i32
  }
  func.func @transform_4(%arg0: i32) -> (i32, i32) {
    %c0_i32 = arith.constant 0 : i32
    %c0_i32_0 = arith.constant 0 : i32
    %c0_i32_1 = arith.constant 0 : i32
    return %c0_i32, %c0_i32_0 : i32, i32
  }
  func.func @transform_5(%arg0: i32) -> (i32, i32) {
    %c0_i32 = arith.constant 0 : i32
    %c0_i32_0 = arith.constant 0 : i32
    return %arg0, %c0_i32 : i32, i32
  }
}

</mosaic_0001>

<bundles_post_ra>
// kernel: _lambda_.16
= control target key start
LH: loop header
LB: loop body
LE: loop exit
PB: predicated region body
PF: predicated region fallthrough
CT: control target
= control target key end

     0   :  { %s2686_s12 = smov 0   ;;  %s4435_s0 = inlined_call_operand.vmem [shape: f32[10240,4], index: 0, kind: input, shape index: {}]   ;;  %s4436_s1 = inlined_call_operand.vmem [shape: f32[4,128], index: 1, kind: input, shape index: {}]   ;;  %s4437_s2 = inlined_call_operand.vmem [shape: f32[1,128], index: 2, kind: input, shape index: {}]   ;;  %s4438_s3 = inlined_call_operand.vmem [shape: bf16[10240,128], index: 3, kind: output, shape index: {}]  }
   0x1 LB: > { %s2302_s13 = sadd.s32 4294967295, %s2660_s12   ;;  %p2306_p0 = scmp.ge.s32.totalorder %s2660_s12, 1  ;;  %s2660_s12 = sphi %s2686_s12, %s13_s12  }
   0x2   : > { %p138_p1 = scmp.lt.s32.totalorder %s2660_s12, 21 }
   0x4   : > { %p139_p2 = pnand %p2306_p0, %p138_p1 }
   0x6   : > { %142 = sbr.rel (%p139_p2) target bundleno = 682 (0x2aa), region = 32 }
   0xd   : > { %s2307_s14 = sshll.u32 %s2302_s13, 6  ;;  %v2662_v0 = vmov 0  }
   0xe   : > { %2646 = vset.pattern.permute.xlu1 %v2662_v0  ;;  %2645 = vset.pattern.permute.xlu0 %v2662_v0  ;;  %p163_p3 = scmp.lt.s32.totalorder %s2307_s14, 1279 }
  0x10   : > { %s4933_s14 = smov (!%p163_p3, %s2307_s14), 1279 }
  0x11   : > { %s2308_s15 = sshll.u32 %s4933_s14, 3  ;;  %s2310_s23 = sshll.u32 %s4933_s14, 2 }
  0x12   : > { %s2700_s18 = scalar_lea.vmem %s4435_s0, %s2308_s15  ;;  %s3945_s26 = scalar_lea.vmem %s4438_s3, %s2310_s23 }
  0x13   : > { %v2703_v1 = vld [vmem:[%s2700_s18 + $0x10] sm:$0xff]  ;;  %v2706_v2 = vld [vmem:[%s2700_s18] sm:$0xff]  ;;  %v2711_v3 = vld [vmem:[%s2700_s18 + $0x18] sm:$0xff] }
  0x14   : > { %251 = vperm.xlu1 %2646, %v2703_v1   ;;  %241 = vperm.xlu0 %2645, %v2706_v2   ;;  %v2714_v4 = vld [vmem:[%s2700_s18 + $0x8] sm:$0xff]  ;;  %v2722_v6 = vld [vmem:[%s2700_s18 + $0x20] sm:$0xff]  ;;  %v2727_v7 = vld [vmem:[%s2700_s18 + $0x38] sm:$0xff] }
  0x15   : > { %v2719_v5 = vld [vmem:[%s2700_s18 + $0x28] sm:$0xff]  ;;  %v2730_v8 = vld [vmem:[%s2700_s18 + $0x30] sm:$0xff]  ;;  %v2738_v10 = vld [vmem:[%s2700_s18 + $0x40] sm:$0xff] }
  0x16   : > { %v2735_v9 = vld [vmem:[%s2700_s18 + $0x48] sm:$0xff]  ;;  %v2743_v11 = vld [vmem:[%s2700_s18 + $0x58] sm:$0xff]  ;;  %v2746_v12 = vld [vmem:[%s2700_s18 + $0x50] sm:$0xff] }
  0x17   : > { %v2751_v13 = vld [vmem:[%s2700_s18 + $0x68] sm:$0xff]  ;;  %v2754_v14 = vld [vmem:[%s2700_s18 + $0x60] sm:$0xff]  ;;  %v2759_v15 = vld [vmem:[%s2700_s18 + $0x78] sm:$0xff] }
  0x18   : > { %256 = vperm.xlu1 %2646, %v2711_v3   ;;  %246 = vperm.xlu0 %2645, %v2714_v4   ;;  %v2762_v16 = vld [vmem:[%s2700_s18 + $0x70] sm:$0xff]  ;;  %v2767_v17 = vld [vmem:[%s2700_s18 + $0x88] sm:$0xff]  ;;  %v2770_v18 = vld [vmem:[%s2700_s18 + $0x80] sm:$0xff] }
  0x19   : > { %v2775_v19 = vld [vmem:[%s2700_s18 + $0x98] sm:$0xff]  ;;  %v2778_v20 = vld [vmem:[%s2700_s18 + $0x90] sm:$0xff]  ;;  %v2783_v21 = vld [vmem:[%s2700_s18 + $0xa8] sm:$0xff] }
  0x1a   : > { %v2786_v22 = vld [vmem:[%s2700_s18 + $0xa0] sm:$0xff]  ;;  %v2791_v23 = vld [vmem:[%s2700_s18 + $0xb8] sm:$0xff]  ;;  %v2794_v24 = vld [vmem:[%s2700_s18 + $0xb0] sm:$0xff] }
  0x1b   : > { %v2799_v25 = vld [vmem:[%s2700_s18 + $0xc8] sm:$0xff]  ;;  %v2802_v26 = vld [vmem:[%s2700_s18 + $0xc0] sm:$0xff]  ;;  %v2807_v27 = vld [vmem:[%s2700_s18 + $0xd8] sm:$0xff] }
  0x1c   : > { %266 = vperm.xlu1 %2646, %v2719_v5   ;;  %261 = vperm.xlu0 %2645, %v2722_v6   ;;  %v2810_v28 = vld [vmem:[%s2700_s18 + $0xd0] sm:$0xff]  ;;  %v2815_v29 = vld [vmem:[%s2700_s18 + $0xe8] sm:$0xff]  ;;  %v2818_v30 = vld [vmem:[%s2700_s18 + $0xe0] sm:$0xff] }
  0x1d   : > { %v2823_v31 = vld [vmem:[%s2700_s18 + $0xf8] sm:$0xff]  ;;  %v2826_v32 = vld [vmem:[%s2700_s18 + $0xf0] sm:$0xff]  ;;  %v2831_v33 = vld [vmem:[%s2700_s18 + $0x108] sm:$0xff] }
  0x1e   : > { %v2834_v34 = vld [vmem:[%s2700_s18 + $0x100] sm:$0xff]  ;;  %v2839_v35 = vld [vmem:[%s2700_s18 + $0x118] sm:$0xff]  ;;  %v2842_v36 = vld [vmem:[%s2700_s18 + $0x110] sm:$0xff] }
  0x1f   : > { %v2847_v37 = vld [vmem:[%s2700_s18 + $0x128] sm:$0xff]  ;;  %v2850_v38 = vld [vmem:[%s2700_s18 + $0x120] sm:$0xff]  ;;  %v2855_v39 = vld [vmem:[%s2700_s18 + $0x138] sm:$0xff] }
  0x20   : > { %276 = vperm.xlu1 %2646, %v2727_v7   ;;  %271 = vperm.xlu0 %2645, %v2730_v8   ;;  %v2858_v40 = vld [vmem:[%s2700_s18 + $0x130] sm:$0xff]  ;;  %v2863_v41 = vld [vmem:[%s2700_s18 + $0x148] sm:$0xff]  ;;  %v2866_v42 = vld [vmem:[%s2700_s18 + $0x140] sm:$0xff] }
  0x21   : > { %v2871_v43 = vld [vmem:[%s2700_s18 + $0x158] sm:$0xff]  ;;  %v2874_v44 = vld [vmem:[%s2700_s18 + $0x150] sm:$0xff]  ;;  %v2879_v45 = vld [vmem:[%s2700_s18 + $0x168] sm:$0xff] }
  0x22   : > { %v2882_v46 = vld [vmem:[%s2700_s18 + $0x160] sm:$0xff]  ;;  %v2887_v47 = vld [vmem:[%s2700_s18 + $0x178] sm:$0xff]  ;;  %v2890_v48 = vld [vmem:[%s2700_s18 + $0x170] sm:$0xff] }
  0x23   : > { %4467 = vst [vmem:[#allocation2_spill] sm:$0xff] %v2890_v48  ;;  %v2895_v49 = vld [vmem:[%s2700_s18 + $0x188] sm:$0xff]  ;;  %v2898_v50 = vld [vmem:[%s2700_s18 + $0x180] sm:$0xff]  ;;  %v2903_v51 = vld [vmem:[%s2700_s18 + $0x198] sm:$0xff] }
  0x24   : > { %286 = vperm.xlu1 %2646, %v2735_v9   ;;  %281 = vperm.xlu0 %2645, %v2738_v10   ;;  %4468 = vst [vmem:[#allocation3_spill] sm:$0xff] %v2898_v50  ;;  %4469 = vst [vmem:[#allocation4_spill] sm:$0xff] %v2903_v51  ;;  %v2906_v52 = vld [vmem:[%s2700_s18 + $0x190] sm:$0xff]  ;;  %v2911_v53 = vld [vmem:[%s2700_s18 + $0x1a8] sm:$0xff] }
  0x25   : > { %4470 = vst [vmem:[#allocation5_spill] sm:$0xff] %v2906_v52  ;;  %4471 = vst [vmem:[#allocation6_spill] sm:$0xff] %v2911_v53  ;;  %v2914_v54 = vld [vmem:[%s2700_s18 + $0x1a0] sm:$0xff]  ;;  %v2919_v55 = vld [vmem:[%s2700_s18 + $0x1b8] sm:$0xff] }
  0x26   : > { %4472 = vst [vmem:[#allocation7_spill] sm:$0xff] %v2914_v54  ;;  %4473 = vst [vmem:[#allocation8_spill] sm:$0xff] %v2919_v55  ;;  %v2922_v56 = vld [vmem:[%s2700_s18 + $0x1b0] sm:$0xff]  ;;  %v2927_v57 = vld [vmem:[%s2700_s18 + $0x1c8] sm:$0xff] }
  0x27   : > { %4474 = vst [vmem:[#allocation9_spill] sm:$0xff] %v2922_v56  ;;  %4475 = vst [vmem:[#allocation10_spill] sm:$0xff] %v2927_v57  ;;  %v2930_v58 = vld [vmem:[%s2700_s18 + $0x1c0] sm:$0xff]  ;;  %v2935_v59 = vld [vmem:[%s2700_s18 + $0x1d8] sm:$0xff] }
  0x28   : > { %296 = vperm.xlu1 %2646, %v2743_v11   ;;  %291 = vperm.xlu0 %2645, %v2746_v12   ;;  %4476 = vst [vmem:[#allocation11_spill] sm:$0xff] %v2930_v58  ;;  %4477 = vst [vmem:[#allocation12_spill] sm:$0xff] %v2935_v59  ;;  %v2938_v60 = vld [vmem:[%s2700_s18 + $0x1d0] sm:$0xff]  ;;  %v2943_v61 = vld [vmem:[%s2700_s18 + $0x1e8] sm:$0xff] }
  0x29   : > { %4478 = vst [vmem:[#allocation13_spill] sm:$0xff] %v2938_v60  ;;  %4479 = vst [vmem:[#allocation14_spill] sm:$0xff] %v2943_v61  ;;  %v2946_v62 = vld [vmem:[%s2700_s18 + $0x1e0] sm:$0xff]  ;;  %v2951_v63 = vld [vmem:[%s2700_s18 + $0x1f8] sm:$0xff] }
  0x2a   : > { %4480 = vst [vmem:[#allocation15_spill] sm:$0xff] %v2946_v62  ;;  %4481 = vst [vmem:[#allocation16_spill] sm:$0xff] %v2951_v63  ;;  %v2954_v0 = vld [vmem:[%s2700_s18 + $0x1f0] sm:$0xff] }
  0x2c   : > { %306 = vperm.xlu1 %2646, %v2751_v13   ;;  %301 = vperm.xlu0 %2645, %v2754_v14  }
  0x30   : > { %316 = vperm.xlu1 %2646, %v2759_v15   ;;  %311 = vperm.xlu0 %2645, %v2762_v16  }
  0x34   : > { %326 = vperm.xlu1 %2646, %v2767_v17   ;;  %321 = vperm.xlu0 %2645, %v2770_v18  }
  0x38   : > { %336 = vperm.xlu1 %2646, %v2775_v19   ;;  %331 = vperm.xlu0 %2645, %v2778_v20  }
  0x3c   : > { %346 = vperm.xlu1 %2646, %v2783_v21   ;;  %341 = vperm.xlu0 %2645, %v2786_v22  }
  0x40   : > { %356 = vperm.xlu1 %2646, %v2791_v23   ;;  %351 = vperm.xlu0 %2645, %v2794_v24  }
  0x44   : > { %366 = vperm.xlu1 %2646, %v2799_v25   ;;  %361 = vperm.xlu0 %2645, %v2802_v26  }
  0x48   : > { %376 = vperm.xlu1 %2646, %v2807_v27   ;;  %371 = vperm.xlu0 %2645, %v2810_v28  }
  0x4c   : > { %386 = vperm.xlu1 %2646, %v2815_v29   ;;  %381 = vperm.xlu0 %2645, %v2818_v30  }
  0x50   : > { %396 = vperm.xlu1 %2646, %v2823_v31   ;;  %391 = vperm.xlu0 %2645, %v2826_v32  }
  0x54   : > { %406 = vperm.xlu1 %2646, %v2831_v33   ;;  %401 = vperm.xlu0 %2645, %v2834_v34  }
  0x58   : > { %416 = vperm.xlu1 %2646, %v2839_v35   ;;  %411 = vperm.xlu0 %2645, %v2842_v36  }
  0x5c   : > { %426 = vperm.xlu1 %2646, %v2847_v37   ;;  %421 = vperm.xlu0 %2645, %v2850_v38  }
  0x60   : > { %436 = vperm.xlu1 %2646, %v2855_v39   ;;  %431 = vperm.xlu0 %2645, %v2858_v40  }
  0x64   : > { %446 = vperm.xlu1 %2646, %v2863_v41   ;;  %441 = vperm.xlu0 %2645, %v2866_v42  }
  0x68   : > { %456 = vperm.xlu1 %2646, %v2871_v43   ;;  %451 = vperm.xlu0 %2645, %v2874_v44  }
  0x6c   : > { %466 = vperm.xlu1 %2646, %v2879_v45   ;;  %461 = vperm.xlu0 %2645, %v2882_v46  }
  0x70   : > { %476 = vperm.xlu1 %2646, %v2887_v47   ;;  %471 = vperm.xlu0 %2645, %v2890_v48  }
  0x74   : > { %486 = vperm.xlu1 %2646, %v2895_v49   ;;  %481 = vperm.xlu0 %2645, %v2898_v50  }
  0x78   : > { %496 = vperm.xlu1 %2646, %v2903_v51   ;;  %491 = vperm.xlu0 %2645, %v2906_v52  }
  0x7c   : > { %506 = vperm.xlu1 %2646, %v2911_v53   ;;  %501 = vperm.xlu0 %2645, %v2914_v54  }
  0x80   : > { %516 = vperm.xlu1 %2646, %v2919_v55   ;;  %511 = vperm.xlu0 %2645, %v2922_v56  }
  0x84   : > { %526 = vperm.xlu1 %2646, %v2927_v57   ;;  %521 = vperm.xlu0 %2645, %v2930_v58  }
  0x88   : > { %536 = vperm.xlu1 %2646, %v2935_v59   ;;  %531 = vperm.xlu0 %2645, %v2938_v60   ;;  %v2663_v60 = vmov 1  }
  0x8c   : > { %546 = vperm.xlu1 %2646, %v2943_v61   ;;  %541 = vperm.xlu0 %2645, %v2946_v62  }
  0x90   : > { %556 = vperm.xlu1 %2646, %v2951_v63   ;;  %551 = vperm.xlu0 %2645, %v2954_v0  }
  0x93   : > { %v2958_v57 = vpop.permute.xlu1 %251  ;;  %v2960_v59 = vpop.permute.xlu0 %241 }
  0x94   : > { %4482 = vst [vmem:[#allocation17_spill] sm:$0xff] %v2958_v57  ;;  %4483 = vst [vmem:[#allocation18_spill] sm:$0xff] %v2960_v59  ;;  %2648 = vset.pattern.permute.xlu1 %v2663_v60  ;;  %2647 = vset.pattern.permute.xlu0 %v2663_v60 }
  0x95   : > { %632 = vperm.xlu1 %2648, %v2714_v4   ;;  %628 = vperm.xlu0 %2647, %v2706_v2  }
  0x97   : > { %v2964_v61 = vpop.permute.xlu1 %256  ;;  %v2966_v62 = vpop.permute.xlu0 %246 }
  0x98   : > { %4484 = vst [vmem:[#allocation19_spill] sm:$0xff] %v2964_v61  ;;  %4485 = vst [vmem:[#allocation20_spill] sm:$0xff] %v2966_v62 }
  0x99   : > { %636 = vperm.xlu1 %2648, %v2703_v1   ;;  %640 = vperm.xlu0 %2647, %v2711_v3  }
  0x9b   : > { %v2970_v63 = vpop.permute.xlu1 %266  ;;  %v2972_v57 = vpop.permute.xlu0 %261 }
  0x9c   : > { %4486 = vst [vmem:[#allocation21_spill] sm:$0xff] %v2970_v63  ;;  %4487 = vst [vmem:[#allocation22_spill] sm:$0xff] %v2972_v57 }
  0x9d   : > { %644 = vperm.xlu1 %2648, %v2722_v6   ;;  %648 = vperm.xlu0 %2647, %v2719_v5  }
  0x9f   : > { %v2976_v60 = vpop.permute.xlu1 %276  ;;  %v2978_v59 = vpop.permute.xlu0 %271 }
  0xa0   : > { %4488 = vst [vmem:[#allocation23_spill] sm:$0xff] %v2976_v60  ;;  %4489 = vst [vmem:[#allocation24_spill] sm:$0xff] %v2978_v59 }
  0xa1   : > { %652 = vperm.xlu1 %2648, %v2730_v8   ;;  %656 = vperm.xlu0 %2647, %v2727_v7  }
  0xa3   : > { %v2982_v62 = vpop.permute.xlu1 %286  ;;  %v2984_v61 = vpop.permute.xlu0 %281 }
  0xa4   : > { %4490 = vst [vmem:[#allocation25_spill] sm:$0xff] %v2982_v62  ;;  %4491 = vst [vmem:[#allocation26_spill] sm:$0xff] %v2984_v61 }
  0xa5   : > { %660 = vperm.xlu1 %2648, %v2738_v10   ;;  %664 = vperm.xlu0 %2647, %v2735_v9  }
  0xa7   : > { %v2988_v57 = vpop.permute.xlu1 %296  ;;  %v2990_v63 = vpop.permute.xlu0 %291 }
  0xa8   : > { %4492 = vst [vmem:[#allocation27_spill] sm:$0xff] %v2988_v57  ;;  %4493 = vst [vmem:[#allocation28_spill] sm:$0xff] %v2990_v63 }
  0xa9   : > { %668 = vperm.xlu1 %2648, %v2746_v12   ;;  %672 = vperm.xlu0 %2647, %v2743_v11  }
  0xab   : > { %v2994_v59 = vpop.permute.xlu1 %306  ;;  %v2996_v60 = vpop.permute.xlu0 %301 }
  0xac   : > { %4494 = vst [vmem:[#allocation29_spill] sm:$0xff] %v2994_v59  ;;  %4495 = vst [vmem:[#allocation30_spill] sm:$0xff] %v2996_v60 }
  0xad   : > { %676 = vperm.xlu1 %2648, %v2754_v14   ;;  %680 = vperm.xlu0 %2647, %v2751_v13  }
  0xaf   : > { %v3000_v61 = vpop.permute.xlu1 %316  ;;  %v3002_v62 = vpop.permute.xlu0 %311 }
  0xb0   : > { %4496 = vst [vmem:[#allocation31_spill] sm:$0xff] %v3000_v61  ;;  %4497 = vst [vmem:[#allocation32_spill] sm:$0xff] %v3002_v62 }
  0xb1   : > { %684 = vperm.xlu1 %2648, %v2762_v16   ;;  %688 = vperm.xlu0 %2647, %v2759_v15  }
  0xb3   : > { %v3006_v63 = vpop.permute.xlu1 %326  ;;  %v3008_v57 = vpop.permute.xlu0 %321 }
  0xb4   : > { %4498 = vst [vmem:[#allocation33_spill] sm:$0xff] %v3006_v63  ;;  %4499 = vst [vmem:[#allocation34_spill] sm:$0xff] %v3008_v57 }
  0xb5   : > { %692 = vperm.xlu1 %2648, %v2770_v18   ;;  %696 = vperm.xlu0 %2647, %v2767_v17  }
  0xb7   : > { %v3012_v60 = vpop.permute.xlu1 %336  ;;  %v3014_v59 = vpop.permute.xlu0 %331 }
  0xb8   : > { %4500 = vst [vmem:[#allocation35_spill] sm:$0xff] %v3012_v60  ;;  %4501 = vst [vmem:[#allocation36_spill] sm:$0xff] %v3014_v59 }
  0xb9   : > { %700 = vperm.xlu1 %2648, %v2778_v20   ;;  %704 = vperm.xlu0 %2647, %v2775_v19  }
  0xbb   : > { %v3018_v62 = vpop.permute.xlu1 %346  ;;  %v3020_v61 = vpop.permute.xlu0 %341 }
  0xbc   : > { %4502 = vst [vmem:[#allocation37_spill] sm:$0xff] %v3018_v62  ;;  %4503 = vst [vmem:[#allocation38_spill] sm:$0xff] %v3020_v61 }
  0xbd   : > { %708 = vperm.xlu1 %2648, %v2786_v22   ;;  %712 = vperm.xlu0 %2647, %v2783_v21  }
  0xbf   : > { %v3024_v57 = vpop.permute.xlu1 %356  ;;  %v3026_v63 = vpop.permute.xlu0 %351 }
  0xc0   : > { %4504 = vst [vmem:[#allocation39_spill] sm:$0xff] %v3024_v57  ;;  %4505 = vst [vmem:[#allocation40_spill] sm:$0xff] %v3026_v63 }
  0xc1   : > { %716 = vperm.xlu1 %2648, %v2794_v24   ;;  %720 = vperm.xlu0 %2647, %v2791_v23  }
  0xc3   : > { %v3030_v59 = vpop.permute.xlu1 %366  ;;  %v3032_v60 = vpop.permute.xlu0 %361 }
  0xc4   : > { %4506 = vst [vmem:[#allocation41_spill] sm:$0xff] %v3030_v59  ;;  %4507 = vst [vmem:[#allocation42_spill] sm:$0xff] %v3032_v60 }
  0xc5   : > { %724 = vperm.xlu1 %2648, %v2802_v26   ;;  %728 = vperm.xlu0 %2647, %v2799_v25  }
  0xc7   : > { %v3036_v61 = vpop.permute.xlu1 %376  ;;  %v3038_v62 = vpop.permute.xlu0 %371 }
  0xc8   : > { %4508 = vst [vmem:[#allocation43_spill] sm:$0xff] %v3036_v61  ;;  %4509 = vst [vmem:[#allocation44_spill] sm:$0xff] %v3038_v62 }
  0xc9   : > { %732 = vperm.xlu1 %2648, %v2810_v28   ;;  %736 = vperm.xlu0 %2647, %v2807_v27  }
  0xcb   : > { %v3042_v63 = vpop.permute.xlu1 %386  ;;  %v3044_v57 = vpop.permute.xlu0 %381 }
  0xcc   : > { %4510 = vst [vmem:[#allocation45_spill] sm:$0xff] %v3042_v63  ;;  %4511 = vst [vmem:[#allocation46_spill] sm:$0xff] %v3044_v57 }
  0xcd   : > { %740 = vperm.xlu1 %2648, %v2818_v30   ;;  %744 = vperm.xlu0 %2647, %v2815_v29  }
  0xcf   : > { %v3048_v60 = vpop.permute.xlu1 %396  ;;  %v3050_v59 = vpop.permute.xlu0 %391 }
  0xd0   : > { %4512 = vst [vmem:[#allocation47_spill] sm:$0xff] %v3048_v60  ;;  %4513 = vst [vmem:[#allocation48_spill] sm:$0xff] %v3050_v59 }
  0xd1   : > { %748 = vperm.xlu1 %2648, %v2826_v32   ;;  %752 = vperm.xlu0 %2647, %v2823_v31  }
  0xd3   : > { %v3054_v62 = vpop.permute.xlu1 %406  ;;  %v3056_v61 = vpop.permute.xlu0 %401 }
  0xd4   : > { %4514 = vst [vmem:[#allocation49_spill] sm:$0xff] %v3054_v62  ;;  %4515 = vst [vmem:[#allocation50_spill] sm:$0xff] %v3056_v61 }
  0xd5   : > { %756 = vperm.xlu1 %2648, %v2834_v34   ;;  %760 = vperm.xlu0 %2647, %v2831_v33  }
  0xd7   : > { %v3060_v57 = vpop.permute.xlu1 %416  ;;  %v3062_v63 = vpop.permute.xlu0 %411 }
  0xd8   : > { %4516 = vst [vmem:[#allocation51_spill] sm:$0xff] %v3060_v57  ;;  %4517 = vst [vmem:[#allocation52_spill] sm:$0xff] %v3062_v63 }
  0xd9   : > { %764 = vperm.xlu1 %2648, %v2842_v36   ;;  %768 = vperm.xlu0 %2647, %v2839_v35  }
  0xdb   : > { %v3066_v59 = vpop.permute.xlu1 %426  ;;  %v3068_v60 = vpop.permute.xlu0 %421 }
  0xdc   : > { %4518 = vst [vmem:[#allocation53_spill] sm:$0xff] %v3066_v59  ;;  %4519 = vst [vmem:[#allocation54_spill] sm:$0xff] %v3068_v60 }
  0xdd   : > { %772 = vperm.xlu1 %2648, %v2850_v38   ;;  %776 = vperm.xlu0 %2647, %v2847_v37  }
  0xdf   : > { %v3072_v61 = vpop.permute.xlu1 %436  ;;  %v3074_v62 = vpop.permute.xlu0 %431 }
  0xe0   : > { %4520 = vst [vmem:[#allocation55_spill] sm:$0xff] %v3072_v61  ;;  %4521 = vst [vmem:[#allocation56_spill] sm:$0xff] %v3074_v62 }
  0xe1   : > { %780 = vperm.xlu1 %2648, %v2858_v40   ;;  %784 = vperm.xlu0 %2647, %v2855_v39  }
  0xe3   : > { %v3078_v63 = vpop.permute.xlu1 %446  ;;  %v3080_v57 = vpop.permute.xlu0 %441 }
  0xe4   : > { %4522 = vst [vmem:[#allocation57_spill] sm:$0xff] %v3078_v63  ;;  %4523 = vst [vmem:[#allocation58_spill] sm:$0xff] %v3080_v57 }
  0xe5   : > { %788 = vperm.xlu1 %2648, %v2866_v42   ;;  %792 = vperm.xlu0 %2647, %v2863_v41  }
  0xe7   : > { %v3084_v60 = vpop.permute.xlu1 %456  ;;  %v3086_v59 = vpop.permute.xlu0 %451 }
  0xe8   : > { %4524 = vst [vmem:[#allocation59_spill] sm:$0xff] %v3084_v60  ;;  %4525 = vst [vmem:[#allocation60_spill] sm:$0xff] %v3086_v59 }
  0xe9   : > { %796 = vperm.xlu1 %2648, %v2874_v44   ;;  %800 = vperm.xlu0 %2647, %v2871_v43  }
  0xeb   : > { %v3090_v62 = vpop.permute.xlu1 %466  ;;  %v3092_v61 = vpop.permute.xlu0 %461 }
  0xec   : > { %4526 = vst [vmem:[#allocation61_spill] sm:$0xff] %v3090_v62  ;;  %4527 = vst [vmem:[#allocation62_spill] sm:$0xff] %v3092_v61 }
  0xed   : > { %804 = vperm.xlu1 %2648, %v2882_v46   ;;  %808 = vperm.xlu0 %2647, %v2879_v45  }
  0xef   : > { %v3096_v57 = vpop.permute.xlu1 %476  ;;  %v3098_v63 = vpop.permute.xlu0 %471 }
  0xf0   : > { %4528 = vst [vmem:[#allocation63_spill] sm:$0xff] %v3096_v57  ;;  %4529 = vst [vmem:[#allocation64_spill] sm:$0xff] %v3098_v63 }
  0xf1   : > { %812 = vperm.xlu1 %2648, %v2890_v48   ;;  %816 = vperm.xlu0 %2647, %v2887_v47  }
  0xf3   : > { %v3102_v59 = vpop.permute.xlu1 %486  ;;  %v3104_v60 = vpop.permute.xlu0 %481 }
  0xf4   : > { %4530 = vst [vmem:[#allocation65_spill] sm:$0xff] %v3102_v59  ;;  %4531 = vst [vmem:[#allocation66_spill] sm:$0xff] %v3104_v60 }
  0xf5   : > { %820 = vperm.xlu1 %2648, %v2898_v50   ;;  %824 = vperm.xlu0 %2647, %v2895_v49  }
  0xf7   : > { %v3108_v61 = vpop.permute.xlu1 %496  ;;  %v3110_v62 = vpop.permute.xlu0 %491 }
  0xf8   : > { %4532 = vst [vmem:[#allocation67_spill] sm:$0xff] %v3108_v61  ;;  %4533 = vst [vmem:[#allocation68_spill] sm:$0xff] %v3110_v62 }
  0xf9   : > { %828 = vperm.xlu1 %2648, %v2906_v52   ;;  %832 = vperm.xlu0 %2647, %v2903_v51  }
  0xfb   : > { %v3114_v63 = vpop.permute.xlu1 %506  ;;  %v3116_v57 = vpop.permute.xlu0 %501 }
  0xfc   : > { %4534 = vst [vmem:[#allocation69_spill] sm:$0xff] %v3114_v63  ;;  %4535 = vst [vmem:[#allocation70_spill] sm:$0xff] %v3116_v57  ;;  %v4540_v63 = vld [vmem:[#allocation10_spill] sm:$0xff] }
  0xfd   : > { %836 = vperm.xlu1 %2648, %v2914_v54   ;;  %840 = vperm.xlu0 %2647, %v2911_v53   ;;  %v4543_v53 = vld [vmem:[#allocation13_spill] sm:$0xff] }
  0xff   : > { %v3120_v60 = vpop.permute.xlu1 %516  ;;  %v3122_v59 = vpop.permute.xlu0 %511 }
 0x100   : > { %4536 = vst [vmem:[#allocation71_spill] sm:$0xff] %v3120_v60  ;;  %4537 = vst [vmem:[#allocation72_spill] sm:$0xff] %v3122_v59  ;;  %v4544_v60 = vld [vmem:[#allocation12_spill] sm:$0xff] }
 0x101   : > { %844 = vperm.xlu1 %2648, %v2922_v56   ;;  %848 = vperm.xlu0 %2647, %v2919_v55   ;;  %v4547_v55 = vld [vmem:[#allocation15_spill] sm:$0xff] }
 0x103   : > { %v3126_v62 = vpop.permute.xlu1 %526  ;;  %v3128_v61 = vpop.permute.xlu0 %521 }
 0x104   : > { %4538 = vst [vmem:[#allocation73_spill] sm:$0xff] %v3126_v62  ;;  %4539 = vst [vmem:[#allocation74_spill] sm:$0xff] %v3128_v61  ;;  %v4548_v62 = vld [vmem:[#allocation14_spill] sm:$0xff] }
 0x105   : > { %852 = vperm.xlu1 %2648, %v2930_v58   ;;  %856 = vperm.xlu0 %2647, %v4540_v63  }
 0x107   : > { %v3132_v57 = vpop.permute.xlu1 %536  ;;  %v3134_v51 = vpop.permute.xlu0 %531 }
 0x108   : > { %4541 = vst [vmem:[#allocation75_spill] sm:$0xff] %v3132_v57  ;;  %4542 = vst [vmem:[#allocation76_spill] sm:$0xff] %v3134_v51  ;;  %v4551_v57 = vld [vmem:[#allocation16_spill] sm:$0xff] }
 0x109   : > { %860 = vperm.xlu1 %2648, %v4543_v53   ;;  %864 = vperm.xlu0 %2647, %v4544_v60   ;;  %v2664_v60 = vmov 2  }
 0x10b   : > { %v3138_v59 = vpop.permute.xlu1 %546  ;;  %v3140_v56 = vpop.permute.xlu0 %541 }
 0x10c   : > { %4545 = vst [vmem:[#allocation13_spill] sm:$0xff] %v3138_v59  ;;  %4546 = vst [vmem:[#allocation77_spill] sm:$0xff] %v3140_v56 }
 0x10d   : > { %868 = vperm.xlu1 %2648, %v4547_v55   ;;  %872 = vperm.xlu0 %2647, %v4548_v62  }
 0x10f   : > { %v3144_v61 = vpop.permute.xlu1 %556  ;;  %v3146_v58 = vpop.permute.xlu0 %551 }
 0x110   : > { %4549 = vst [vmem:[#allocation14_spill] sm:$0xff] %v3144_v61  ;;  %4550 = vst [vmem:[#allocation78_spill] sm:$0xff] %v3146_v58 }
 0x111   : > { %876 = vperm.xlu1 %2648, %v2954_v0   ;;  %880 = vperm.xlu0 %2647, %v4551_v57  }
 0x114   : > { %v3150_v51 = vpop.permute.xlu1 %632  ;;  %v3152_v63 = vpop.permute.xlu0 %628 }
 0x115   : > { %4552 = vst [vmem:[#allocation16_spill] sm:$0xff] %v3150_v51  ;;  %4553 = vst [vmem:[#allocation79_spill] sm:$0xff] %v3152_v63  ;;  %2649 = vset.pattern.permute.xlu1 %v2664_v60  ;;  %2650 = vset.pattern.permute.xlu0 %v2664_v60  ;;  %v4606_v51 = vld [vmem:[#allocation4_spill] sm:$0xff] }
 0x116   : > { %1016 = vperm.xlu1 %2649, %v2706_v2   ;;  %1020 = vperm.xlu0 %2650, %v2714_v4  }
 0x118   : > { %v3156_v56 = vpop.permute.xlu1 %636  ;;  %v3158_v61 = vpop.permute.xlu0 %640 }
 0x119   : > { %4554 = vst [vmem:[#allocation80_spill] sm:$0xff] %v3156_v56  ;;  %4555 = vst [vmem:[#allocation81_spill] sm:$0xff] %v3158_v61 }
 0x11a   : > { %1024 = vperm.xlu1 %2649, %v2703_v1   ;;  %1032 = vperm.xlu0 %2650, %v2722_v6  }
 0x11c   : > { %v3162_v58 = vpop.permute.xlu1 %644  ;;  %v3164_v59 = vpop.permute.xlu0 %648 }
 0x11d   : > { %4556 = vst [vmem:[#allocation82_spill] sm:$0xff] %v3162_v58  ;;  %4557 = vst [vmem:[#allocation83_spill] sm:$0xff] %v3164_v59 }
 0x11e   : > { %1028 = vperm.xlu1 %2649, %v2711_v3   ;;  %1040 = vperm.xlu0 %2650, %v2730_v8  }
 0x120   : > { %v3168_v60 = vpop.permute.xlu1 %652  ;;  %v3170_v63 = vpop.permute.xlu0 %656 }
 0x121   : > { %4558 = vst [vmem:[#allocation84_spill] sm:$0xff] %v3168_v60  ;;  %4559 = vst [vmem:[#allocation85_spill] sm:$0xff] %v3170_v63 }
 0x122   : > { %1036 = vperm.xlu1 %2649, %v2719_v5   ;;  %1048 = vperm.xlu0 %2650, %v2738_v10  }
 0x124   : > { %v3174_v61 = vpop.permute.xlu1 %660  ;;  %v3176_v56 = vpop.permute.xlu0 %664 }
 0x125   : > { %4560 = vst [vmem:[#allocation86_spill] sm:$0xff] %v3174_v61  ;;  %4561 = vst [vmem:[#allocation87_spill] sm:$0xff] %v3176_v56 }
 0x126   : > { %1044 = vperm.xlu1 %2649, %v2727_v7   ;;  %1056 = vperm.xlu0 %2650, %v2746_v12  }
 0x128   : > { %v3180_v59 = vpop.permute.xlu1 %668  ;;  %v3182_v58 = vpop.permute.xlu0 %672 }
 0x129   : > { %4562 = vst [vmem:[#allocation88_spill] sm:$0xff] %v3180_v59  ;;  %4563 = vst [vmem:[#allocation89_spill] sm:$0xff] %v3182_v58 }
 0x12a   : > { %1052 = vperm.xlu1 %2649, %v2735_v9   ;;  %1064 = vperm.xlu0 %2650, %v2754_v14  }
 0x12c   : > { %v3186_v63 = vpop.permute.xlu1 %676  ;;  %v3188_v60 = vpop.permute.xlu0 %680 }
 0x12d   : > { %4564 = vst [vmem:[#allocation90_spill] sm:$0xff] %v3186_v63  ;;  %4565 = vst [vmem:[#allocation91_spill] sm:$0xff] %v3188_v60 }
 0x12e   : > { %1060 = vperm.xlu1 %2649, %v2743_v11   ;;  %1072 = vperm.xlu0 %2650, %v2762_v16  }
 0x130   : > { %v3192_v56 = vpop.permute.xlu1 %684  ;;  %v3194_v61 = vpop.permute.xlu0 %688 }
 0x131   : > { %4566 = vst [vmem:[#allocation92_spill] sm:$0xff] %v3192_v56  ;;  %4567 = vst [vmem:[#allocation93_spill] sm:$0xff] %v3194_v61 }
 0x132   : > { %1068 = vperm.xlu1 %2649, %v2751_v13   ;;  %1080 = vperm.xlu0 %2650, %v2770_v18  }
 0x134   : > { %v3198_v58 = vpop.permute.xlu1 %692  ;;  %v3200_v59 = vpop.permute.xlu0 %696 }
 0x135   : > { %4568 = vst [vmem:[#allocation94_spill] sm:$0xff] %v3198_v58  ;;  %4569 = vst [vmem:[#allocation95_spill] sm:$0xff] %v3200_v59 }
 0x136   : > { %1076 = vperm.xlu1 %2649, %v2759_v15   ;;  %1088 = vperm.xlu0 %2650, %v2778_v20  }
 0x138   : > { %v3204_v60 = vpop.permute.xlu1 %700  ;;  %v3206_v63 = vpop.permute.xlu0 %704 }
 0x139   : > { %4570 = vst [vmem:[#allocation96_spill] sm:$0xff] %v3204_v60  ;;  %4571 = vst [vmem:[#allocation97_spill] sm:$0xff] %v3206_v63 }
 0x13a   : > { %1084 = vperm.xlu1 %2649, %v2767_v17   ;;  %1096 = vperm.xlu0 %2650, %v2786_v22  }
 0x13c   : > { %v3210_v61 = vpop.permute.xlu1 %708  ;;  %v3212_v56 = vpop.permute.xlu0 %712 }
 0x13d   : > { %4572 = vst [vmem:[#allocation98_spill] sm:$0xff] %v3210_v61  ;;  %4573 = vst [vmem:[#allocation99_spill] sm:$0xff] %v3212_v56 }
 0x13e   : > { %1092 = vperm.xlu1 %2649, %v2775_v19   ;;  %1104 = vperm.xlu0 %2650, %v2794_v24  }
 0x140   : > { %v3216_v59 = vpop.permute.xlu1 %716  ;;  %v3218_v58 = vpop.permute.xlu0 %720 }
 0x141   : > { %4574 = vst [vmem:[#allocation100_spill] sm:$0xff] %v3216_v59  ;;  %4575 = vst [vmem:[#allocation101_spill] sm:$0xff] %v3218_v58 }
 0x142   : > { %1100 = vperm.xlu1 %2649, %v2783_v21   ;;  %1112 = vperm.xlu0 %2650, %v2802_v26  }
 0x144   : > { %v3222_v63 = vpop.permute.xlu1 %724  ;;  %v3224_v60 = vpop.permute.xlu0 %728 }
 0x145   : > { %4576 = vst [vmem:[#allocation102_spill] sm:$0xff] %v3222_v63  ;;  %4577 = vst [vmem:[#allocation103_spill] sm:$0xff] %v3224_v60 }
 0x146   : > { %1108 = vperm.xlu1 %2649, %v2791_v23   ;;  %1120 = vperm.xlu0 %2650, %v2810_v28  }
 0x148   : > { %v3228_v56 = vpop.permute.xlu1 %732  ;;  %v3230_v61 = vpop.permute.xlu0 %736 }
 0x149   : > { %4578 = vst [vmem:[#allocation104_spill] sm:$0xff] %v3228_v56  ;;  %4579 = vst [vmem:[#allocation105_spill] sm:$0xff] %v3230_v61 }
 0x14a   : > { %1116 = vperm.xlu1 %2649, %v2799_v25   ;;  %1128 = vperm.xlu0 %2650, %v2818_v30  }
 0x14c   : > { %v3234_v58 = vpop.permute.xlu1 %740  ;;  %v3236_v59 = vpop.permute.xlu0 %744 }
 0x14d   : > { %4580 = vst [vmem:[#allocation106_spill] sm:$0xff] %v3234_v58  ;;  %4581 = vst [vmem:[#allocation107_spill] sm:$0xff] %v3236_v59 }
 0x14e   : > { %1124 = vperm.xlu1 %2649, %v2807_v27   ;;  %1136 = vperm.xlu0 %2650, %v2826_v32  }
 0x150   : > { %v3240_v60 = vpop.permute.xlu1 %748  ;;  %v3242_v63 = vpop.permute.xlu0 %752 }
 0x151   : > { %4582 = vst [vmem:[#allocation108_spill] sm:$0xff] %v3240_v60  ;;  %4583 = vst [vmem:[#allocation109_spill] sm:$0xff] %v3242_v63 }
 0x152   : > { %1132 = vperm.xlu1 %2649, %v2815_v29   ;;  %1144 = vperm.xlu0 %2650, %v2834_v34  }
 0x154   : > { %v3246_v61 = vpop.permute.xlu1 %756  ;;  %v3248_v56 = vpop.permute.xlu0 %760 }
 0x155   : > { %4584 = vst [vmem:[#allocation110_spill] sm:$0xff] %v3246_v61  ;;  %4585 = vst [vmem:[#allocation111_spill] sm:$0xff] %v3248_v56 }
 0x156   : > { %1140 = vperm.xlu1 %2649, %v2823_v31   ;;  %1152 = vperm.xlu0 %2650, %v2842_v36  }
 0x158   : > { %v3252_v59 = vpop.permute.xlu1 %764  ;;  %v3254_v58 = vpop.permute.xlu0 %768 }
 0x159   : > { %4586 = vst [vmem:[#allocation112_spill] sm:$0xff] %v3252_v59  ;;  %4587 = vst [vmem:[#allocation113_spill] sm:$0xff] %v3254_v58 }
 0x15a   : > { %1148 = vperm.xlu1 %2649, %v2831_v33   ;;  %1160 = vperm.xlu0 %2650, %v2850_v38  }
 0x15c   : > { %v3258_v63 = vpop.permute.xlu1 %772  ;;  %v3260_v60 = vpop.permute.xlu0 %776 }
 0x15d   : > { %4588 = vst [vmem:[#allocation114_spill] sm:$0xff] %v3258_v63  ;;  %4589 = vst [vmem:[#allocation115_spill] sm:$0xff] %v3260_v60 }
 0x15e   : > { %1156 = vperm.xlu1 %2649, %v2839_v35   ;;  %1168 = vperm.xlu0 %2650, %v2858_v40  }
 0x160   : > { %v3264_v56 = vpop.permute.xlu1 %780  ;;  %v3266_v61 = vpop.permute.xlu0 %784 }
 0x161   : > { %4590 = vst [vmem:[#allocation116_spill] sm:$0xff] %v3264_v56  ;;  %4591 = vst [vmem:[#allocation117_spill] sm:$0xff] %v3266_v61 }
 0x162   : > { %1164 = vperm.xlu1 %2649, %v2847_v37   ;;  %1176 = vperm.xlu0 %2650, %v2866_v42  }
 0x164   : > { %v3270_v58 = vpop.permute.xlu1 %788  ;;  %v3272_v59 = vpop.permute.xlu0 %792 }
 0x165   : > { %4592 = vst [vmem:[#allocation118_spill] sm:$0xff] %v3270_v58  ;;  %4593 = vst [vmem:[#allocation119_spill] sm:$0xff] %v3272_v59 }
 0x166   : > { %1172 = vperm.xlu1 %2649, %v2855_v39   ;;  %1184 = vperm.xlu0 %2650, %v2874_v44  }
 0x168   : > { %v3276_v60 = vpop.permute.xlu1 %796  ;;  %v3278_v63 = vpop.permute.xlu0 %800 }
 0x169   : > { %4594 = vst [vmem:[#allocation120_spill] sm:$0xff] %v3276_v60  ;;  %4595 = vst [vmem:[#allocation121_spill] sm:$0xff] %v3278_v63 }
 0x16a   : > { %1180 = vperm.xlu1 %2649, %v2863_v41   ;;  %1192 = vperm.xlu0 %2650, %v2882_v46  }
 0x16c   : > { %v3282_v61 = vpop.permute.xlu1 %804  ;;  %v3284_v56 = vpop.permute.xlu0 %808 }
 0x16d   : > { %4596 = vst [vmem:[#allocation122_spill] sm:$0xff] %v3282_v61  ;;  %4597 = vst [vmem:[#allocation123_spill] sm:$0xff] %v3284_v56 }
 0x16e   : > { %1188 = vperm.xlu1 %2649, %v2871_v43   ;;  %1200 = vperm.xlu0 %2650, %v2890_v48  }
 0x170   : > { %v3288_v59 = vpop.permute.xlu1 %812  ;;  %v3290_v58 = vpop.permute.xlu0 %816 }
 0x171   : > { %4598 = vst [vmem:[#allocation124_spill] sm:$0xff] %v3288_v59  ;;  %4599 = vst [vmem:[#allocation125_spill] sm:$0xff] %v3290_v58 }
 0x172   : > { %1196 = vperm.xlu1 %2649, %v2879_v45   ;;  %1208 = vperm.xlu0 %2650, %v2898_v50  }
 0x174   : > { %v3294_v63 = vpop.permute.xlu1 %820  ;;  %v3296_v60 = vpop.permute.xlu0 %824 }
 0x175   : > { %4600 = vst [vmem:[#allocation126_spill] sm:$0xff] %v3294_v63  ;;  %4601 = vst [vmem:[#allocation127_spill] sm:$0xff] %v3296_v60  ;;  %v4607_v63 = vld [vmem:[#allocation9_spill] sm:$0xff] }
 0x176   : > { %1204 = vperm.xlu1 %2649, %v2887_v47   ;;  %1216 = vperm.xlu0 %2650, %v2906_v52   ;;  %v4610_v52 = vld [vmem:[#allocation6_spill] sm:$0xff] }
 0x178   : > { %v3300_v56 = vpop.permute.xlu1 %828  ;;  %v3302_v61 = vpop.permute.xlu0 %832 }
 0x179   : > { %4602 = vst [vmem:[#allocation128_spill] sm:$0xff] %v3300_v56  ;;  %4603 = vst [vmem:[#allocation129_spill] sm:$0xff] %v3302_v61  ;;  %v4611_v56 = vld [vmem:[#allocation11_spill] sm:$0xff] }
 0x17a   : > { %1212 = vperm.xlu1 %2649, %v2895_v49   ;;  %1224 = vperm.xlu0 %2650, %v2914_v54   ;;  %v4614_v54 = vld [vmem:[#allocation8_spill] sm:$0xff] }
 0x17c   : > { %v3306_v58 = vpop.permute.xlu1 %836  ;;  %v3308_v59 = vpop.permute.xlu0 %840 }
 0x17d   : > { %4604 = vst [vmem:[#allocation130_spill] sm:$0xff] %v3306_v58  ;;  %4605 = vst [vmem:[#allocation131_spill] sm:$0xff] %v3308_v59 }
 0x17e   : > { %1220 = vperm.xlu1 %2649, %v4606_v51   ;;  %1232 = vperm.xlu0 %2650, %v4607_v63   ;;  %v4617_v63 = vld [vmem:[#allocation10_spill] sm:$0xff] }
 0x180   : > { %v3312_v60 = vpop.permute.xlu1 %844  ;;  %v3314_v50 = vpop.permute.xlu0 %848 }
 0x181   : > { %4608 = vst [vmem:[#allocation4_spill] sm:$0xff] %v3312_v60  ;;  %4609 = vst [vmem:[#allocation132_spill] sm:$0xff] %v3314_v50 }
 0x182   : > { %1228 = vperm.xlu1 %2649, %v4610_v52   ;;  %1240 = vperm.xlu0 %2650, %v4611_v56   ;;  %v4620_v56 = vld [vmem:[#allocation12_spill] sm:$0xff] }
 0x184   : > { %v3318_v61 = vpop.permute.xlu1 %852  ;;  %v3320_v48 = vpop.permute.xlu0 %856 }
 0x185   : > { %4612 = vst [vmem:[#allocation6_spill] sm:$0xff] %v3318_v61  ;;  %4613 = vst [vmem:[#allocation133_spill] sm:$0xff] %v3320_v48 }
 0x186   : > { %1236 = vperm.xlu1 %2649, %v4614_v54   ;;  %1248 = vperm.xlu0 %2650, %v4543_v53  }
 0x188   : > { %v3324_v59 = vpop.permute.xlu1 %860  ;;  %v3326_v58 = vpop.permute.xlu0 %864 }
 0x189   : > { %4615 = vst [vmem:[#allocation8_spill] sm:$0xff] %v3324_v59  ;;  %4616 = vst [vmem:[#allocation134_spill] sm:$0xff] %v3326_v58  ;;  %v2665_v59 = vmov 3  }
 0x18a   : > { %1244 = vperm.xlu1 %2649, %v4617_v63   ;;  %1256 = vperm.xlu0 %2650, %v4547_v55  }
 0x18c   : > { %v3330_v50 = vpop.permute.xlu1 %868  ;;  %v3332_v60 = vpop.permute.xlu0 %872 }
 0x18d   : > { %4618 = vst [vmem:[#allocation10_spill] sm:$0xff] %v3330_v50  ;;  %4619 = vst [vmem:[#allocation135_spill] sm:$0xff] %v3332_v60 }
 0x18e   : > { %1252 = vperm.xlu1 %2649, %v4620_v56   ;;  %1264 = vperm.xlu0 %2650, %v2954_v0  }
 0x190   : > { %v3336_v48 = vpop.permute.xlu1 %876  ;;  %v3338_v61 = vpop.permute.xlu0 %880 }
 0x191   : > { %4621 = vst [vmem:[#allocation12_spill] sm:$0xff] %v3336_v48  ;;  %4622 = vst [vmem:[#allocation136_spill] sm:$0xff] %v3338_v61 }
 0x192   : > { %1260 = vperm.xlu1 %2649, %v4548_v62   ;;  %2651 = vset.pattern.permute.xlu0 %v2665_v59 }
 0x193   : > { %1404 = vperm.xlu0 %2651, %v2706_v2  }
 0x195   : > { %v3342_v58 = vpop.permute.xlu1 %1016  ;;  %v3344_v55 = vpop.permute.xlu0 %1020 }
 0x196   : > { %1268 = vperm.xlu1 %2649, %v4551_v57  }
 0x197   : > { %1416 = vperm.xlu0 %2651, %v2711_v3  }
 0x199   : > { %v3348_v50 = vpop.permute.xlu1 %1024  ;;  %v3350_v60 = vpop.permute.xlu0 %1032 }
 0x19a   : > { %2652 = vset.pattern.permute.xlu1 %v2665_v59 }
 0x19b   : > { %1408 = vperm.xlu1 %2652, %v2714_v4   ;;  %1424 = vperm.xlu0 %2651, %v2719_v5  }
 0x19d   : > { %v3354_v48 = vpop.permute.xlu1 %1028  ;;  %v3356_v2 = vpop.permute.xlu0 %1040 }
 0x19f   : > { %1412 = vperm.xlu1 %2652, %v2703_v1   ;;  %1432 = vperm.xlu0 %2651, %v2727_v7  }
 0x1a1   : > { %v3360_v61 = vpop.permute.xlu1 %1036  ;;  %v3362_v3 = vpop.permute.xlu0 %1048 }
 0x1a3   : > { %1420 = vperm.xlu1 %2652, %v2722_v6   ;;  %1440 = vperm.xlu0 %2651, %v2735_v9  }
 0x1a5   : > { %v3366_v59 = vpop.permute.xlu1 %1044  ;;  %v3368_v4 = vpop.permute.xlu0 %1056 }
 0x1a7   : > { %1428 = vperm.xlu1 %2652, %v2730_v8   ;;  %1448 = vperm.xlu0 %2651, %v2743_v11  }
 0x1a9   : > { %v3372_v5 = vpop.permute.xlu1 %1052  ;;  %v3374_v1 = vpop.permute.xlu0 %1064 }
 0x1ab   : > { %1436 = vperm.xlu1 %2652, %v2738_v10   ;;  %1456 = vperm.xlu0 %2651, %v2751_v13  }
 0x1ad   : > { %v3378_v7 = vpop.permute.xlu1 %1060  ;;  %v3380_v6 = vpop.permute.xlu0 %1072 }
 0x1ae   : > { %4623 = vst [vmem:[#allocation137_spill] sm:$0xff] %v3380_v6 }
 0x1af   : > { %1444 = vperm.xlu1 %2652, %v2746_v12   ;;  %1464 = vperm.xlu0 %2651, %v2759_v15  }
 0x1b1   : > { %v3384_v9 = vpop.permute.xlu1 %1068  ;;  %v3386_v8 = vpop.permute.xlu0 %1080 }
 0x1b2   : > { %4624 = vst [vmem:[#allocation138_spill] sm:$0xff] %v3386_v8  ;;  %v4706_v8 = vld [vmem:[#allocation47_spill] sm:$0xff] }
 0x1b3   : > { %1452 = vperm.xlu1 %2652, %v2754_v14   ;;  %1472 = vperm.xlu0 %2651, %v2767_v17  }
 0x1b5   : > { %v3390_v11 = vpop.permute.xlu1 %1076  ;;  %v3392_v10 = vpop.permute.xlu0 %1088 }
 0x1b6   : > { %4625 = vst [vmem:[#allocation139_spill] sm:$0xff] %v3390_v11  ;;  %4626 = vst [vmem:[#allocation140_spill] sm:$0xff] %v3392_v10  ;;  %v4704_v10 = vld [vmem:[#allocation46_spill] sm:$0xff]  ;;  %v4791_v11 = vld [vmem:[#allocation89_spill] sm:$0xff] }
 0x1b7   : > { %1460 = vperm.xlu1 %2652, %v2762_v16   ;;  %1480 = vperm.xlu0 %2651, %v2775_v19  }
 0x1b9   : > { %v3396_v13 = vpop.permute.xlu1 %1084  ;;  %v3398_v12 = vpop.permute.xlu0 %1096 }
 0x1ba   : > { %4627 = vst [vmem:[#allocation141_spill] sm:$0xff] %v3396_v13  ;;  %4628 = vst [vmem:[#allocation142_spill] sm:$0xff] %v3398_v12  ;;  %v4700_v12 = vld [vmem:[#allocation45_spill] sm:$0xff]  ;;  %v4783_v13 = vld [vmem:[#allocation83_spill] sm:$0xff] }
 0x1bb   : > { %1468 = vperm.xlu1 %2652, %v2770_v18   ;;  %1488 = vperm.xlu0 %2651, %v2783_v21  }
 0x1bd   : > { %v3402_v15 = vpop.permute.xlu1 %1092  ;;  %v3404_v14 = vpop.permute.xlu0 %1104 }
 0x1be   : > { %4629 = vst [vmem:[#allocation143_spill] sm:$0xff] %v3402_v15  ;;  %4630 = vst [vmem:[#allocation144_spill] sm:$0xff] %v3404_v14  ;;  %v4695_v14 = vld [vmem:[#allocation42_spill] sm:$0xff]  ;;  %v4708_v15 = vld [vmem:[#allocation48_spill] sm:$0xff] }
 0x1bf   : > { %1476 = vperm.xlu1 %2652, %v2778_v20   ;;  %1496 = vperm.xlu0 %2651, %v2791_v23  }
 0x1c1   : > { %v3408_v17 = vpop.permute.xlu1 %1100  ;;  %v3410_v16 = vpop.permute.xlu0 %1112 }
 0x1c2   : > { %4631 = vst [vmem:[#allocation145_spill] sm:$0xff] %v3408_v17  ;;  %4632 = vst [vmem:[#allocation146_spill] sm:$0xff] %v3410_v16  ;;  %v4692_v16 = vld [vmem:[#allocation39_spill] sm:$0xff] }
 0x1c3   : > { %1484 = vperm.xlu1 %2652, %v2786_v22   ;;  %1504 = vperm.xlu0 %2651, %v2799_v25  }
 0x1c5   : > { %v3414_v19 = vpop.permute.xlu1 %1108  ;;  %v3416_v18 = vpop.permute.xlu0 %1120 }
 0x1c6   : > { %4633 = vst [vmem:[#allocation147_spill] sm:$0xff] %v3414_v19  ;;  %4634 = vst [vmem:[#allocation148_spill] sm:$0xff] %v3416_v18  ;;  %v4690_v18 = vld [vmem:[#allocation7_spill] sm:$0xff]  ;;  %v4698_v19 = vld [vmem:[#allocation44_spill] sm:$0xff] }
 0x1c7   : > { %1492 = vperm.xlu1 %2652, %v2794_v24   ;;  %1512 = vperm.xlu0 %2651, %v2807_v27  }
 0x1c9   : > { %v3420_v21 = vpop.permute.xlu1 %1116  ;;  %v3422_v20 = vpop.permute.xlu0 %1128 }
 0x1ca   : > { %4635 = vst [vmem:[#allocation149_spill] sm:$0xff] %v3420_v21  ;;  %4636 = vst [vmem:[#allocation150_spill] sm:$0xff] %v3422_v20  ;;  %v4687_v20 = vld [vmem:[#allocation35_spill] sm:$0xff]  ;;  %v4694_v21 = vld [vmem:[#allocation41_spill] sm:$0xff] }
 0x1cb   : > { %1500 = vperm.xlu1 %2652, %v2802_v26   ;;  %1520 = vperm.xlu0 %2651, %v2815_v29  }
 0x1cd   : > { %v3426_v23 = vpop.permute.xlu1 %1124  ;;  %v3428_v22 = vpop.permute.xlu0 %1136 }
 0x1ce   : > { %4637 = vst [vmem:[#allocation151_spill] sm:$0xff] %v3426_v23  ;;  %4638 = vst [vmem:[#allocation152_spill] sm:$0xff] %v3428_v22  ;;  %v4685_v22 = vld [vmem:[#allocation33_spill] sm:$0xff]  ;;  %v4693_v23 = vld [vmem:[#allocation40_spill] sm:$0xff] }
 0x1cf   : > { %1508 = vperm.xlu1 %2652, %v2810_v28   ;;  %1528 = vperm.xlu0 %2651, %v2823_v31  }
 0x1d1   : > { %v3432_v25 = vpop.permute.xlu1 %1132  ;;  %v3434_v24 = vpop.permute.xlu0 %1144 }
 0x1d2   : > { %4639 = vst [vmem:[#allocation153_spill] sm:$0xff] %v3432_v25  ;;  %4640 = vst [vmem:[#allocation154_spill] sm:$0xff] %v3434_v24  ;;  %v4689_v25 = vld [vmem:[#allocation37_spill] sm:$0xff] }
 0x1d3   : > { %1516 = vperm.xlu1 %2652, %v2818_v30   ;;  %1536 = vperm.xlu0 %2651, %v2831_v33  }
 0x1d5   : > { %v3438_v27 = vpop.permute.xlu1 %1140  ;;  %v3440_v26 = vpop.permute.xlu0 %1152 }
 0x1d6   : > { %4641 = vst [vmem:[#allocation155_spill] sm:$0xff] %v3438_v27  ;;  %4642 = vst [vmem:[#allocation156_spill] sm:$0xff] %v3440_v26  ;;  %v4680_v26 = vld [vmem:[#allocation30_spill] sm:$0xff] }
 0x1d7   : > { %1524 = vperm.xlu1 %2652, %v2826_v32   ;;  %1544 = vperm.xlu0 %2651, %v2839_v35   ;;  %v4686_v27 = vld [vmem:[#allocation34_spill] sm:$0xff] }
 0x1d9   : > { %v3444_v29 = vpop.permute.xlu1 %1148  ;;  %v3446_v28 = vpop.permute.xlu0 %1160 }
 0x1da   : > { %4643 = vst [vmem:[#allocation157_spill] sm:$0xff] %v3444_v29  ;;  %4644 = vst [vmem:[#allocation158_spill] sm:$0xff] %v3446_v28  ;;  %v4677_v28 = vld [vmem:[#allocation27_spill] sm:$0xff]  ;;  %v4684_v29 = vld [vmem:[#allocation32_spill] sm:$0xff] }
 0x1db   : > { %1532 = vperm.xlu1 %2652, %v2834_v34   ;;  %1552 = vperm.xlu0 %2651, %v2847_v37  }
 0x1dd   : > { %v3450_v31 = vpop.permute.xlu1 %1156  ;;  %v3452_v30 = vpop.permute.xlu0 %1168 }
 0x1de   : > { %4645 = vst [vmem:[#allocation159_spill] sm:$0xff] %v3450_v31  ;;  %4646 = vst [vmem:[#allocation160_spill] sm:$0xff] %v3452_v30  ;;  %v4675_v30 = vld [vmem:[#allocation25_spill] sm:$0xff]  ;;  %v4683_v31 = vld [vmem:[#allocation31_spill] sm:$0xff] }
 0x1df   : > { %1540 = vperm.xlu1 %2652, %v2842_v36   ;;  %1560 = vperm.xlu0 %2651, %v2855_v39  }
 0x1e1   : > { %v3456_v33 = vpop.permute.xlu1 %1164  ;;  %v3458_v32 = vpop.permute.xlu0 %1176 }
 0x1e2   : > { %4647 = vst [vmem:[#allocation161_spill] sm:$0xff] %v3456_v33  ;;  %4648 = vst [vmem:[#allocation162_spill] sm:$0xff] %v3458_v32  ;;  %v4679_v33 = vld [vmem:[#allocation29_spill] sm:$0xff] }
 0x1e3   : > { %1548 = vperm.xlu1 %2652, %v2850_v38   ;;  %1568 = vperm.xlu0 %2651, %v2863_v41   ;;  %v559_v41 = vlaneseq }
 0x1e5   : > { %v3462_v35 = vpop.permute.xlu1 %1172  ;;  %v3464_v34 = vpop.permute.xlu0 %1184 }
 0x1e6   : > { %4649 = vst [vmem:[#allocation163_spill] sm:$0xff] %v3462_v35  ;;  %4650 = vst [vmem:[#allocation164_spill] sm:$0xff] %v3464_v34  ;;  %v3484_v34 = vshrl.u32 %v559_v41, 7  ;;  %v4676_v35 = vld [vmem:[#allocation26_spill] sm:$0xff] }
 0x1e7   : > { %1556 = vperm.xlu1 %2652, %v2858_v40   ;;  %1576 = vperm.xlu0 %2651, %v2871_v43  }
 0x1e9   : > { %v3468_v37 = vpop.permute.xlu1 %1180  ;;  %v3470_v36 = vpop.permute.xlu0 %1192 }
 0x1ea   : > { %4651 = vst [vmem:[#allocation165_spill] sm:$0xff] %v3468_v37  ;;  %4652 = vst [vmem:[#allocation166_spill] sm:$0xff] %v3470_v36  ;;  %v4674_v37 = vld [vmem:[#allocation24_spill] sm:$0xff] }
 0x1eb   : > { %1564 = vperm.xlu1 %2652, %v2866_v42   ;;  %1584 = vperm.xlu0 %2651, %v2879_v45  }
 0x1ed   : > { %v3474_v39 = vpop.permute.xlu1 %1188  ;;  %v3476_v38 = vpop.permute.xlu0 %1200 }
 0x1ee   : > { %4653 = vst [vmem:[#allocation167_spill] sm:$0xff] %v3474_v39  ;;  %4654 = vst [vmem:[#allocation168_spill] sm:$0xff] %v3476_v38  ;;  %v561_v38 = vsub.s32 0, %v3484_v34 }
 0x1ef   : > { %1572 = vperm.xlu1 %2652, %v2874_v44   ;;  %1592 = vperm.xlu0 %2651, %v2887_v47   ;;  %v3496_v44 = vld [vmem:[%s4436_s1] sm:$0xf] }
 0x1f0   : > { %v4659_v47 = vld [vmem:[#allocation2_spill] sm:$0xff] }
 0x1f1   : > { %v3480_v40 = vpop.permute.xlu1 %1196  ;;  %v3482_v43 = vpop.permute.xlu0 %1208 }
 0x1f2   : > { %4655 = vst [vmem:[#allocation169_spill] sm:$0xff] %v3480_v40  ;;  %4656 = vst [vmem:[#allocation170_spill] sm:$0xff] %v3482_v43  ;;  %v4663_v43 = vld [vmem:[#allocation3_spill] sm:$0xff] }
 0x1f3   : > { %1580 = vperm.xlu1 %2652, %v2882_v46   ;;  %1600 = vperm.xlu0 %2651, %v2895_v49   ;;  %v3505_v49 = vrot.slane %v3496_v44, %v561_v38  ;;  %v4668_v38 = vld [vmem:[#allocation19_spill] sm:$0xff] }
 0x1f5   : > { %v3488_v42 = vpop.permute.xlu1 %1204  ;;  %v3490_v45 = vpop.permute.xlu0 %1216  ;;  %4662 = vst [vmem:[#allocation174_spill] sm:$0xff] %v3505_v49  ;;  %v3524_v40 = vmul.f32 %v3505_v49, %v4668_v38  ;;  %v4673_v38 = vld [vmem:[#allocation23_spill] sm:$0xff] }
 0x1f6   : > { %4657 = vst [vmem:[#allocation171_spill] sm:$0xff] %v3488_v42  ;;  %4658 = vst [vmem:[#allocation172_spill] sm:$0xff] %v3490_v45  ;;  %v885_v45 = vsub.s32 1, %v3484_v34 }
 0x1f7   : > { %1588 = vperm.xlu1 %2652, %v4659_v47   ;;  %1608 = vperm.xlu0 %2651, %v4606_v51   ;;  %v4666_v47 = vld [vmem:[#allocation17_spill] sm:$0xff] }
 0x1f8   : > { %v3516_v51 = vmul.f32 %v3505_v49, %v4666_v47  ;;  %v4671_v47 = vld [vmem:[#allocation22_spill] sm:$0xff] }
 0x1f9   : > { %v3500_v41 = vpop.permute.xlu1 %1212  ;;  %v3502_v46 = vpop.permute.xlu0 %1224  ;;  %v3539_v39 = vmul.f32 %v3505_v49, %v4671_v47  ;;  %v3557_v47 = vmul.f32 %v3505_v49, %v4676_v35 }
 0x1fa   : > { %4660 = vst [vmem:[#allocation2_spill] sm:$0xff] %v3500_v41  ;;  %4661 = vst [vmem:[#allocation173_spill] sm:$0xff] %v3502_v46  ;;  %v4667_v41 = vld [vmem:[#allocation18_spill] sm:$0xff] }
 0x1fb   : > { %1596 = vperm.xlu1 %2652, %v4663_v43   ;;  %1616 = vperm.xlu0 %2651, %v4610_v52   ;;  %v3520_v46 = vmul.f32 %v3505_v49, %v4667_v41  ;;  %v3527_v43 = vrot.slane %v3496_v44, %v885_v45  ;;  %v4669_v52 = vld [vmem:[#allocation20_spill] sm:$0xff]  ;;  %v4672_v41 = vld [vmem:[#allocation5_spill] sm:$0xff]  ;;  %v3545_v45 = vmul.f32 %v3505_v49, %v4673_v38 }
 0x1fd   : > { %v3510_v42 = vpop.permute.xlu1 %1220  ;;  %v3512_v36 = vpop.permute.xlu0 %1232 }
 0x1fe   : > { %4664 = vst [vmem:[#allocation3_spill] sm:$0xff] %v3510_v42  ;;  %4665 = vst [vmem:[#allocation175_spill] sm:$0xff] %v3512_v36  ;;  %v3531_v42 = vmul.f32 %v3505_v49, %v4669_v52  ;;  %v4670_v36 = vld [vmem:[#allocation21_spill] sm:$0xff]  ;;  %v3549_v52 = vmul.f32 %v3505_v49, %v4674_v37  ;;  %v3569_v37 = vmul.f32 %v3505_v49, %v4679_v33 }
 0x1ff   : > { %v3535_v32 = vmul.f32 %v3505_v49, %v4670_v36  ;;  %1604 = vperm.xlu1 %2652, %v4672_v41   ;;  %1624 = vperm.xlu0 %2651, %v4614_v54   ;;  %v3553_v36 = vmul.f32 %v3505_v49, %v4675_v30  ;;  %v3561_v41 = vmul.f32 %v3505_v49, %v4677_v28  ;;  %v4678_v54 = vld [vmem:[#allocation28_spill] sm:$0xff] }
 0x200   : > { %v3565_v38 = vmul.f32 %v3505_v49, %v4678_v54  ;;  %v3573_v30 = vmul.f32 %v3505_v49, %v4680_v26  ;;  %v3581_v28 = vmul.f32 %v3505_v49, %v4683_v31  ;;  %v3585_v54 = vmul.f32 %v3505_v49, %v4684_v29 }
 0x201   : > { %v3575_v24 = vpop.permute.xlu1 %1228  ;;  %v3577_v35 = vpop.permute.xlu0 %1240  ;;  %v3589_v33 = vmul.f32 %v3505_v49, %v4685_v22  ;;  %v3593_v26 = vmul.f32 %v3505_v49, %v4686_v27  ;;  %v3605_v29 = vmul.f32 %v3505_v49, %v4689_v25  ;;  %v4691_v22 = vld [vmem:[#allocation38_spill] sm:$0xff]  ;;  %v3623_v25 = vmul.f32 %v3505_v49, %v4694_v21 }
 0x202   : > { %4681 = vst [vmem:[#allocation17_spill] sm:$0xff] %v3575_v24  ;;  %4682 = vst [vmem:[#allocation18_spill] sm:$0xff] %v3577_v35  ;;  %v3597_v24 = vmul.f32 %v3505_v49, %v4687_v20  ;;  %v4688_v35 = vld [vmem:[#allocation36_spill] sm:$0xff]  ;;  %v3611_v27 = vmul.f32 %v3505_v49, %v4691_v22  ;;  %v3615_v20 = vmul.f32 %v3505_v49, %v4692_v16 }
 0x203   : > { %v3601_v31 = vmul.f32 %v3505_v49, %v4688_v35  ;;  %1612 = vperm.xlu1 %2652, %v4690_v18   ;;  %1632 = vperm.xlu0 %2651, %v4617_v63   ;;  %v3619_v35 = vmul.f32 %v3505_v49, %v4693_v23  ;;  %v3627_v18 = vmul.f32 %v3505_v49, %v4695_v14  ;;  %v4696_v63 = vld [vmem:[#allocation43_spill] sm:$0xff] }
 0x204   : > { %v3631_v22 = vmul.f32 %v3505_v49, %v4696_v63  ;;  %v3635_v16 = vmul.f32 %v3505_v49, %v4698_v19  ;;  %v3639_v23 = vmul.f32 %v3505_v49, %v4700_v12  ;;  %v3647_v14 = vmul.f32 %v3505_v49, %v4704_v10 }
 0x205   : > { %v3641_v17 = vpop.permute.xlu1 %1236  ;;  %v3643_v21 = vpop.permute.xlu0 %1248  ;;  %v3651_v63 = vmul.f32 %v3505_v49, %v4706_v8  ;;  %v3655_v19 = vmul.f32 %v3505_v49, %v4708_v15  ;;  %v4719_v15 = vld [vmem:[#allocation53_spill] sm:$0xff] }
 0x206   : > { %4697 = vst [vmem:[#allocation19_spill] sm:$0xff] %v3631_v22  ;;  %4699 = vst [vmem:[#allocation20_spill] sm:$0xff] %v3635_v16  ;;  %v4710_v22 = vld [vmem:[#allocation49_spill] sm:$0xff]  ;;  %v4787_v16 = vld [vmem:[#allocation86_spill] sm:$0xff] }
 0x207   : > { %4701 = vst [vmem:[#allocation21_spill] sm:$0xff] %v3639_v23  ;;  %4702 = vst [vmem:[#allocation22_spill] sm:$0xff] %v3641_v17  ;;  %v3659_v12 = vmul.f32 %v3505_v49, %v4710_v22  ;;  %v4712_v23 = vld [vmem:[#allocation50_spill] sm:$0xff]  ;;  %1640 = vperm.xlu0 %2651, %v4620_v56   ;;  %v3677_v22 = vmul.f32 %v3505_v49, %v4719_v15 }
 0x208   : > { %4703 = vst [vmem:[#allocation5_spill] sm:$0xff] %v3643_v21  ;;  %4705 = vst [vmem:[#allocation23_spill] sm:$0xff] %v3647_v14  ;;  %v3663_v17 = vmul.f32 %v3505_v49, %v4712_v23  ;;  %v4714_v21 = vld [vmem:[#allocation51_spill] sm:$0xff]  ;;  %v4716_v14 = vld [vmem:[#allocation52_spill] sm:$0xff] }
 0x209   : > { %4707 = vst [vmem:[#allocation24_spill] sm:$0xff] %v3651_v63  ;;  %4709 = vst [vmem:[#allocation25_spill] sm:$0xff] %v3655_v19  ;;  %v3667_v10 = vmul.f32 %v3505_v49, %v4714_v21  ;;  %v3671_v8 = vmul.f32 %v3505_v49, %v4716_v14  ;;  %v4718_v63 = vld [vmem:[#allocation9_spill] sm:$0xff]  ;;  %v4729_v56 = vld [vmem:[#allocation58_spill] sm:$0xff] }
 0x20a   : > { %4711 = vst [vmem:[#allocation26_spill] sm:$0xff] %v3659_v12  ;;  %4713 = vst [vmem:[#allocation27_spill] sm:$0xff] %v3663_v17  ;;  %1620 = vperm.xlu1 %2652, %v4718_v63   ;;  %v4721_v12 = vld [vmem:[#allocation54_spill] sm:$0xff]  ;;  %v4723_v17 = vld [vmem:[#allocation55_spill] sm:$0xff]  ;;  %v3697_v15 = vmul.f32 %v3505_v49, %v4729_v56 }
 0x20b   : > { %4715 = vst [vmem:[#allocation28_spill] sm:$0xff] %v3667_v10  ;;  %4717 = vst [vmem:[#allocation29_spill] sm:$0xff] %v3671_v8  ;;  %v3681_v23 = vmul.f32 %v3505_v49, %v4721_v12  ;;  %v3685_v21 = vmul.f32 %v3505_v49, %v4723_v17  ;;  %v4725_v10 = vld [vmem:[#allocation56_spill] sm:$0xff]  ;;  %v4727_v8 = vld [vmem:[#allocation57_spill] sm:$0xff]  ;;  %1648 = vperm.xlu0 %2651, %v4548_v62  }
 0x20c   : > { %4720 = vst [vmem:[#allocation30_spill] sm:$0xff] %v3677_v22  ;;  %v3689_v14 = vmul.f32 %v3505_v49, %v4725_v10  ;;  %v3693_v63 = vmul.f32 %v3505_v49, %v4727_v8  ;;  %4730 = vst [vmem:[#allocation35_spill] sm:$0xff] %v3697_v15  ;;  %v4731_v22 = vld [vmem:[#allocation59_spill] sm:$0xff]  ;;  %v3709_v10 = vpop.permute.xlu0 %1256  ;;  %v4774_v19 = vld [vmem:[#allocation80_spill] sm:$0xff] }
 0x20d   : > { %4722 = vst [vmem:[#allocation31_spill] sm:$0xff] %v3681_v23  ;;  %4724 = vst [vmem:[#allocation32_spill] sm:$0xff] %v3685_v21  ;;  %v3701_v12 = vmul.f32 %v3505_v49, %v4731_v22  ;;  %v4733_v23 = vld [vmem:[#allocation60_spill] sm:$0xff]  ;;  %v3707_v21 = vpop.permute.xlu1 %1244  ;;  %v4741_v15 = vld [vmem:[#allocation63_spill] sm:$0xff] }
 0x20e   : > { %4726 = vst [vmem:[#allocation33_spill] sm:$0xff] %v3689_v14  ;;  %4728 = vst [vmem:[#allocation34_spill] sm:$0xff] %v3693_v63  ;;  %v3705_v17 = vmul.f32 %v3505_v49, %v4733_v23  ;;  %v4737_v14 = vld [vmem:[#allocation61_spill] sm:$0xff]  ;;  %v4739_v63 = vld [vmem:[#allocation62_spill] sm:$0xff]  ;;  %v3721_v22 = vmul.f32 %v3505_v49, %v4741_v15 }
 0x20f   : > { %4732 = vst [vmem:[#allocation36_spill] sm:$0xff] %v3701_v12  ;;  %4735 = vst [vmem:[#allocation7_spill] sm:$0xff] %v3707_v21  ;;  %v3713_v8 = vmul.f32 %v3505_v49, %v4737_v14  ;;  %v3717_v56 = vmul.f32 %v3505_v49, %v4739_v63  ;;  %v1273_v12 = vsub.s32 2, %v3484_v34  ;;  %v4743_v23 = vld [vmem:[#allocation64_spill] sm:$0xff]  ;;  %v4745_v21 = vld [vmem:[#allocation65_spill] sm:$0xff]  ;;  %1656 = vperm.xlu0 %2651, %v4551_v57  }
 0x210   : > { %4734 = vst [vmem:[#allocation37_spill] sm:$0xff] %v3705_v17  ;;  %4736 = vst [vmem:[#allocation38_spill] sm:$0xff] %v3709_v10  ;;  %v3726_v17 = vmul.f32 %v3505_v49, %v4743_v23  ;;  %v3730_v10 = vmul.f32 %v3505_v49, %v4745_v21  ;;  %v4747_v14 = vld [vmem:[#allocation66_spill] sm:$0xff]  ;;  %v4749_v63 = vld [vmem:[#allocation11_spill] sm:$0xff] }
 0x211   : > { %4738 = vst [vmem:[#allocation39_spill] sm:$0xff] %v3713_v8  ;;  %4740 = vst [vmem:[#allocation40_spill] sm:$0xff] %v3717_v56  ;;  %v3734_v8 = vmul.f32 %v3505_v49, %v4747_v14  ;;  %1628 = vperm.xlu1 %2652, %v4749_v63   ;;  %v4750_v15 = vld [vmem:[#allocation67_spill] sm:$0xff]  ;;  %v4752_v56 = vld [vmem:[#allocation68_spill] sm:$0xff] }
 0x212   : > { %4742 = vst [vmem:[#allocation41_spill] sm:$0xff] %v3721_v22  ;;  %4744 = vst [vmem:[#allocation42_spill] sm:$0xff] %v3726_v17  ;;  %v3740_v22 = vmul.f32 %v3505_v49, %v4750_v15  ;;  %v3744_v23 = vmul.f32 %v3505_v49, %v4752_v56  ;;  %v4754_v17 = vld [vmem:[#allocation69_spill] sm:$0xff]  ;;  %v4756_v14 = vld [vmem:[#allocation70_spill] sm:$0xff] }
 0x213   : > { %4746 = vst [vmem:[#allocation43_spill] sm:$0xff] %v3730_v10  ;;  %4748 = vst [vmem:[#allocation44_spill] sm:$0xff] %v3734_v8  ;;  %v3748_v21 = vmul.f32 %v3505_v49, %v4754_v17  ;;  %v1661_v10 = vsub.s32 3, %v3484_v34  ;;  %v3753_v8 = vmul.f32 %v3505_v49, %v4756_v14  ;;  %v4758_v63 = vld [vmem:[#allocation71_spill] sm:$0xff]  ;;  %v4760_v15 = vld [vmem:[#allocation72_spill] sm:$0xff]  ;;  %v3767_v17 = vpop.permute.xlu1 %1252 }
 0x214   : > { %4751 = vst [vmem:[#allocation45_spill] sm:$0xff] %v3740_v22  ;;  %4753 = vst [vmem:[#allocation46_spill] sm:$0xff] %v3744_v23  ;;  %v3757_v62 = vmul.f32 %v3505_v49, %v4758_v63  ;;  %v3761_v22 = vmul.f32 %v3505_v49, %v4760_v15  ;;  %v4762_v56 = vld [vmem:[#allocation73_spill] sm:$0xff]  ;;  %v4766_v34 = vld [vmem:[#allocation74_spill] sm:$0xff] }
 0x215   : > { %4755 = vst [vmem:[#allocation47_spill] sm:$0xff] %v3748_v21  ;;  %4757 = vst [vmem:[#allocation48_spill] sm:$0xff] %v3753_v8  ;;  %v3765_v23 = vmul.f32 %v3505_v49, %v4762_v56  ;;  %v3769_v21 = vpop.permute.xlu0 %1264  ;;  %v3773_v14 = vmul.f32 %v3505_v49, %v4766_v34  ;;  %v4768_v8 = vld [vmem:[#allocation75_spill] sm:$0xff]  ;;  %v4771_v56 = vld [vmem:[#allocation76_spill] sm:$0xff]  ;;  %v889_v34 = vmul.f32 %v3527_v43, %v4774_v19  ;;  %1636 = vperm.xlu1 %2652, %v4543_v53  }
 0x216   : > { %4759 = vst [vmem:[#allocation49_spill] sm:$0xff] %v3757_v62  ;;  %4761 = vst [vmem:[#allocation50_spill] sm:$0xff] %v3761_v22  ;;  %v3777_v63 = vmul.f32 %v3505_v49, %v4768_v8  ;;  %v4770_v62 = vld [vmem:[#allocation16_spill] sm:$0xff]  ;;  %v3782_v22 = vrot.slane %v3496_v44, %v1273_v12  ;;  %v4775_v8 = vld [vmem:[#allocation13_spill] sm:$0xff] }
 0x217   : > { %4763 = vst [vmem:[#allocation51_spill] sm:$0xff] %v3765_v23  ;;  %4764 = vst [vmem:[#allocation52_spill] sm:$0xff] %v3767_v17  ;;  %v888_v15 = vmul.f32 %v3527_v43, %v4770_v62  ;;  %v3786_v23 = vmul.f32 %v3505_v49, %v4771_v56  ;;  %v4773_v17 = vld [vmem:[#allocation79_spill] sm:$0xff]  ;;  %v3796_v62 = vmul.f32 %v3505_v49, %v4775_v8  ;;  %v4777_v12 = vld [vmem:[#allocation81_spill] sm:$0xff]  ;;  %v3817_v6 = vpop.permute.xlu1 %1260 }
 0x218   : > { %4765 = vst [vmem:[#allocation9_spill] sm:$0xff] %v3769_v21  ;;  %4767 = vst [vmem:[#allocation53_spill] sm:$0xff] %v3773_v14  ;;  %v887_v21 = vmul.f32 %v3527_v43, %v4773_v17  ;;  %v4778_v14 = vld [vmem:[#allocation82_spill] sm:$0xff]  ;;  %v4779_v17 = vld [vmem:[#allocation77_spill] sm:$0xff]  ;;  %v892_v8 = vmul.f32 %v3527_v43, %v4783_v13  ;;  %v953_v13 = vadd.f32 %v889_v34, %v3516_v51 }
 0x219   : > { %4769 = vst [vmem:[#allocation54_spill] sm:$0xff] %v3777_v63  ;;  %4772 = vst [vmem:[#allocation55_spill] sm:$0xff] %v3786_v23  ;;  %v890_v63 = vmul.f32 %v3527_v43, %v4777_v12  ;;  %v891_v56 = vmul.f32 %v3527_v43, %v4778_v14  ;;  %v3803_v23 = vrot.slane %v3496_v44, %v1661_v10  ;;  %v4781_v53 = vld [vmem:[#allocation14_spill] sm:$0xff]  ;;  %v4786_v44 = vld [vmem:[#allocation85_spill] sm:$0xff] }
 0x21a   : > { %4776 = vst [vmem:[#allocation56_spill] sm:$0xff] %v3796_v62  ;;  %v3807_v19 = vmul.f32 %v3505_v49, %v4779_v17  ;;  %v3811_v57 = vmul.f32 %v3505_v49, %v4781_v53  ;;  %v4784_v62 = vld [vmem:[#allocation84_spill] sm:$0xff]  ;;  %4785 = vst [vmem:[#allocation59_spill] sm:$0xff] %v3817_v6  ;;  %v952_v14 = vadd.f32 %v888_v15, %v3531_v42  ;;  %v1405_v49 = vpop.permute.xlu0 %1404  ;;  %v4790_v15 = vld [vmem:[#allocation15_spill] sm:$0xff] }
 0x21b   : > { %v893_v12 = vmul.f32 %v3527_v43, %v4784_v62  ;;  %v894_v10 = vmul.f32 %v3527_v43, %v4786_v44  ;;  %v895_v17 = vmul.f32 %v3527_v43, %v4787_v16  ;;  %v1275_v53 = vmul.f32 %v3782_v22, %v3342_v58  ;;  %v4789_v6 = vld [vmem:[#allocation88_spill] sm:$0xff]  ;;  %1644 = vperm.xlu1 %2652, %v4790_v15   ;;  %v4792_v34 = vld [vmem:[#allocation90_spill] sm:$0xff] }
 0x21c   : > { %4780 = vst [vmem:[#allocation57_spill] sm:$0xff] %v3807_v19  ;;  %4782 = vst [vmem:[#allocation58_spill] sm:$0xff] %v3811_v57  ;;  %v951_v57 = vadd.f32 %v887_v21, %v3520_v46  ;;  %v4788_v19 = vld [vmem:[#allocation87_spill] sm:$0xff]  ;;  %v897_v42 = vmul.f32 %v3527_v43, %v4789_v6  ;;  %v954_v44 = vadd.f32 %v890_v63, %v3524_v40  ;;  %v3848_v40 = vpop.permute.xlu1 %1268 }
 0x21d   : > { %v896_v62 = vmul.f32 %v3527_v43, %v4788_v19  ;;  %v3835_v16 = vadd.f32 %v891_v56, %v3539_v39  ;;  %v898_v58 = vmul.f32 %v3527_v43, %v4791_v11  ;;  %v1663_v46 = vmul.f32 %v3803_v23, %v1405_v49  ;;  %v4793_v19 = vld [vmem:[#allocation91_spill] sm:$0xff] }
 0x21e   : > { %v956_v51 = vadd.f32 %v892_v8, %v3535_v32  ;;  %v3842_v21 = vadd.f32 %v893_v12, %v3549_v52  ;;  %v899_v6 = vmul.f32 %v3527_v43, %v4792_v34  ;;  %v900_v15 = vmul.f32 %v3527_v43, %v4793_v19  ;;  %v1417_v52 = vpop.permute.xlu0 %1416  ;;  %v4794_v8 = vld [vmem:[#allocation92_spill] sm:$0xff] }
 0x21f   : > { %v3851_v39 = vadd.f32 %v894_v10, %v3545_v45  ;;  %v3854_v11 = vadd.f32 %v895_v17, %v3557_v47  ;;  %v1339_v49 = vadd.f32 %v1275_v53, %v951_v57  ;;  %v1278_v32 = vmul.f32 %v3782_v22, %v3354_v48  ;;  %1652 = vperm.xlu1 %2652, %v2954_v0   ;;  %v4795_v57 = vld [vmem:[#allocation93_spill] sm:$0xff]  ;;  %v4796_v53 = vld [vmem:[#allocation94_spill] sm:$0xff] }
 0x220   : > { %v3859_v63 = vadd.f32 %v896_v62, %v3553_v36  ;;  %v3862_v56 = vadd.f32 %v897_v42, %v3565_v38  ;;  %v901_v12 = vmul.f32 %v3527_v43, %v4794_v8  ;;  %v1276_v45 = vmul.f32 %v3782_v22, %v3344_v55  ;;  %v4797_v62 = vld [vmem:[#allocation95_spill] sm:$0xff]  ;;  %v4798_v42 = vld [vmem:[#allocation96_spill] sm:$0xff] }
 0x221   : > { %v3870_v47 = vadd.f32 %v898_v58, %v3561_v41  ;;  %v902_v48 = vmul.f32 %v3527_v43, %v4795_v57  ;;  %v1727_v10 = vadd.f32 %v1663_v46, %v1339_v49  ;;  %v1666_v36 = vmul.f32 %v3803_v23, %v1417_v52  ;;  %v3888_v41 = vld [vmem:[%s4437_s2] ss:$0 sm:$0xff]  ;;  %v4799_v46 = vld [vmem:[#allocation97_spill] sm:$0xff] }
 0x222   : > { %v3876_v38 = vadd.f32 %v899_v6, %v3573_v30  ;;  %v3879_v17 = vadd.f32 %v900_v15, %v3569_v37  ;;  %v903_v55 = vmul.f32 %v3527_v43, %v4796_v53  ;;  %v904_v0 = vmul.f32 %v3527_v43, %v4797_v62  ;;  %v1409_v6 = vpop.permute.xlu1 %1408  ;;  %v1425_v19 = vpop.permute.xlu0 %1424  ;;  %v4800_v53 = vld [vmem:[#allocation98_spill] sm:$0xff] }
 0x223   : > { %v905_v58 = vmul.f32 %v3527_v43, %v4798_v42  ;;  %v906_v30 = vmul.f32 %v3527_v43, %v4799_v46  ;;  %v1277_v37 = vmul.f32 %v3782_v22, %v3348_v50  ;;  %v1342_v34 = vadd.f32 %v1278_v32, %v954_v44 }
 0x224   : > { %v3897_v15 = vadd.f32 %v901_v12, %v3585_v54  ;;  %v1340_v49 = vadd.f32 %v1276_v45, %v952_v14  ;;  %v1280_v52 = vmul.f32 %v3782_v22, %v3360_v61  ;;  %v1664_v8 = vmul.f32 %v3803_v23, %v1409_v6 }
 0x225   : > { %v3903_v57 = vadd.f32 %v902_v48, %v3581_v28  ;;  %v907_v62 = vmul.f32 %v3527_v43, %v4800_v53  ;;  %v1798_v50 = vadd.f32 %v3888_v41, %v1727_v10  ;;  %v1730_v44 = vadd.f32 %v1666_v36, %v1342_v34 }
 0x226   : > { %v3909_v32 = vadd.f32 %v903_v55, %v3593_v26  ;;  %v3912_v54 = vadd.f32 %v904_v0, %v3589_v33  ;;  %v1728_v14 = vadd.f32 %v1664_v8, %v1340_v49  ;;  %v1668_v61 = vmul.f32 %v3803_v23, %v1425_v19  ;;  %v1413_v10 = vpop.permute.xlu1 %1412  ;;  %v1433_v36 = vpop.permute.xlu0 %1432 }
 0x227   : > { %v3916_v12 = vadd.f32 %v905_v58, %v3601_v31  ;;  %v3919_v28 = vadd.f32 %v906_v30, %v3597_v24  ;;  %v1341_v45 = vadd.f32 %v1277_v37, %v953_v13  ;;  %v1279_v48 = vmul.f32 %v3782_v22, %v3350_v60  ;;  %v4801_v24 = vld [vmem:[#allocation99_spill] sm:$0xff] }
 0x228   : > { %v1344_v26 = vadd.f32 %v1280_v52, %v956_v51  ;;  %v1282_v33 = vmul.f32 %v3782_v22, %v3366_v59  ;;  %v1799_v55 = vadd.f32 %v3888_v41, %v1728_v14  ;;  %v1665_v0 = vmul.f32 %v3803_v23, %v1413_v10  ;;  %v4802_v59 = vld [vmem:[#allocation100_spill] sm:$0xff] }
 0x229   : > { %v3929_v31 = vadd.f32 %v907_v62, %v3611_v27  ;;  %v908_v13 = vmul.f32 %v3527_v43, %v4801_v24  ;;  %v1862_v42 = vmax.f32 %v1798_v50, 0.0  ;;  %v1801_v60 = vadd.f32 %v3888_v41, %v1730_v44  ;;  %v4803_v62 = vld [vmem:[#allocation101_spill] sm:$0xff] }
 0x22a   : > { %v1863_v58 = vmax.f32 %v1799_v55, 0.0  ;;  %v1732_v46 = vadd.f32 %v1668_v61, %v1344_v26  ;;  %v1729_v51 = vadd.f32 %v1665_v0, %v1341_v45  ;;  %v1670_v30 = vmul.f32 %v3803_v23, %v1433_v36  ;;  %v1421_v19 = vpop.permute.xlu1 %1420  ;;  %v1441_v49 = vpop.permute.xlu0 %1440 }
 0x22b   : > { %v909_v37 = vmul.f32 %v3527_v43, %v4802_v59  ;;  %v1343_v34 = vadd.f32 %v1279_v48, %v3835_v16  ;;  %v1281_v27 = vmul.f32 %v3782_v22, %v3356_v2  ;;  %v1284_v6 = vmul.f32 %v3782_v22, %v3372_v5 }
 0x22c   : > { %v1346_v52 = vadd.f32 %v1282_v33, %v3851_v39  ;;  %v2445_v8 = vpack.c.bf16 %v1863_v58, %v1862_v42  ;;  %v1800_v53 = vadd.f32 %v3888_v41, %v1729_v51  ;;  %v1667_v16 = vmul.f32 %v3803_v23, %v1421_v19  ;;  %v4804_v42 = vld [vmem:[#allocation102_spill] sm:$0xff]  ;;  %v4805_v51 = vld [vmem:[#allocation103_spill] sm:$0xff] }
 0x22d   : > { %v3951_v2 = vadd.f32 %v908_v13, %v3605_v29  ;;  %v910_v5 = vmul.f32 %v3527_v43, %v4803_v62  ;;  %v1865_v50 = vmax.f32 %v1801_v60, 0.0  ;;  %v1672_v44 = vmul.f32 %v3803_v23, %v1441_v49 }
 0x22e   : > { %2446 = vst [vmem:[%s3945_s26] sm:$0xff] %v2445_v8   ;;  %v1803_v14 = vadd.f32 %v3888_v41, %v1732_v46  ;;  %v1864_v61 = vmax.f32 %v1800_v53, 0.0  ;;  %v1734_v45 = vadd.f32 %v1670_v30, %v1346_v52  ;;  %v1731_v39 = vadd.f32 %v1667_v16, %v1343_v34  ;;  %v1429_v26 = vpop.permute.xlu1 %1428  ;;  %v1449_v33 = vpop.permute.xlu0 %1448  ;;  %v4806_v53 = vld [vmem:[#allocation104_spill] sm:$0xff] }
 0x22f   : > { %v3959_v48 = vadd.f32 %v909_v37, %v3619_v35  ;;  %v1345_v10 = vadd.f32 %v1281_v27, %v3842_v21  ;;  %v1348_v29 = vadd.f32 %v1284_v6, %v3859_v63  ;;  %v1286_v36 = vmul.f32 %v3782_v22, %v3378_v7 }
 0x230   : > { %v1283_v55 = vmul.f32 %v3782_v22, %v3362_v3  ;;  %v2450_v0 = vpack.c.bf16 %v1865_v50, %v1864_v61  ;;  %v1802_v24 = vadd.f32 %v3888_v41, %v1731_v39  ;;  %v1669_v13 = vmul.f32 %v3803_v23, %v1429_v26  ;;  %v4807_v39 = vld [vmem:[#allocation139_spill] sm:$0xff] }
 0x231   : > { %v3970_v35 = vadd.f32 %v910_v5, %v3615_v20  ;;  %v911_v21 = vmul.f32 %v3527_v43, %v4804_v42  ;;  %v1736_v63 = vadd.f32 %v1672_v44, %v1348_v29  ;;  %v1674_v60 = vmul.f32 %v3803_v23, %v1449_v33  ;;  %v4808_v33 = vld [vmem:[#allocation20_spill] sm:$0xff] }
 0x232   : > { %v1867_v7 = vmax.f32 %v1803_v14, 0.0  ;;  %2602 = vst [vmem:[%s3945_s26 + $0x8] sm:$0xff] %v2450_v0   ;;  %v1805_v58 = vadd.f32 %v3888_v41, %v1734_v45  ;;  %v1866_v46 = vmax.f32 %v1802_v24, 0.0  ;;  %v1733_v3 = vadd.f32 %v1669_v13, %v1345_v10  ;;  %v1437_v34 = vpop.permute.xlu1 %1436  ;;  %v1457_v27 = vpop.permute.xlu0 %1456 }
 0x233   : > { %v912_v30 = vmul.f32 %v3527_v43, %v4805_v51  ;;  %v1285_v20 = vmul.f32 %v3782_v22, %v3368_v4  ;;  %v1350_v59 = vadd.f32 %v1286_v36, %v3870_v47  ;;  %v1288_v37 = vmul.f32 %v3782_v22, %v3384_v9 }
 0x234   : > { %v1347_v6 = vadd.f32 %v1283_v55, %v3854_v11  ;;  %v2455_v19 = vpack.c.bf16 %v1867_v7, %v1866_v46  ;;  %v1804_v49 = vadd.f32 %v3888_v41, %v1733_v3  ;;  %v1671_v52 = vmul.f32 %v3803_v23, %v1437_v34  ;;  %v4809_v55 = vld [vmem:[#allocation105_spill] sm:$0xff] }
 0x235   : > { %v3988_v8 = vadd.f32 %v911_v21, %v3627_v18  ;;  %v913_v4 = vmul.f32 %v3527_v43, %v4806_v53  ;;  %v1807_v47 = vadd.f32 %v3888_v41, %v1736_v63  ;;  %v1738_v16 = vadd.f32 %v1674_v60, %v1350_v59  ;;  %v4810_v21 = vld [vmem:[#allocation106_spill] sm:$0xff]  ;;  %v4811_v7 = vld [vmem:[#allocation137_spill] sm:$0xff] }
 0x236   : > { %v1869_v62 = vmax.f32 %v1805_v58, 0.0  ;;  %2603 = vst [vmem:[%s3945_s26 + $0x10] sm:$0xff] %v2455_v19   ;;  %v1868_v9 = vmax.f32 %v1804_v49, 0.0  ;;  %v1735_v5 = vadd.f32 %v1671_v52, %v1347_v6  ;;  %v1676_v11 = vmul.f32 %v3803_v23, %v1457_v27  ;;  %v1445_v61 = vpop.permute.xlu1 %1444  ;;  %v1465_v45 = vpop.permute.xlu0 %1464  ;;  %v4812_v46 = vld [vmem:[#allocation141_spill] sm:$0xff]  ;;  %v4813_v27 = vld [vmem:[#allocation19_spill] sm:$0xff] }
 0x237   : > { %v3996_v50 = vadd.f32 %v912_v30, %v3623_v25  ;;  %v1349_v44 = vadd.f32 %v1285_v20, %v3862_v56  ;;  %v1287_v18 = vmul.f32 %v3782_v22, %v3374_v1  ;;  %v1352_v14 = vadd.f32 %v1288_v37, %v3879_v17  ;;  %v4814_v19 = vld [vmem:[#allocation107_spill] sm:$0xff] }
 0x238   : > { %v1290_v10 = vmul.f32 %v3782_v22, %v4807_v39  ;;  %v2460_v29 = vpack.c.bf16 %v1869_v62, %v1868_v9  ;;  %v1806_v36 = vadd.f32 %v3888_v41, %v1735_v5  ;;  %v1673_v26 = vmul.f32 %v3803_v23, %v1445_v61  ;;  %v4817_v61 = vld [vmem:[#allocation138_spill] sm:$0xff] }
 0x239   : > { %v4007_v25 = vadd.f32 %v913_v4, %v4808_v33  ;;  %v914_v56 = vmul.f32 %v3527_v43, %v4809_v55  ;;  %v1871_v0 = vmax.f32 %v1807_v47, 0.0  ;;  %v1809_v1 = vadd.f32 %v3888_v41, %v1738_v16  ;;  %v4815_v16 = vld [vmem:[#allocation23_spill] sm:$0xff]  ;;  %v4819_v33 = vld [vmem:[#allocation108_spill] sm:$0xff] }
 0x23a   : > { %2604 = vst [vmem:[%s3945_s26 + $0x18] sm:$0xff] %v2460_v29   ;;  %v1870_v17 = vmax.f32 %v1806_v36, 0.0  ;;  %v1740_v24 = vadd.f32 %v1676_v11, %v1352_v14  ;;  %v1737_v13 = vadd.f32 %v1673_v26, %v1349_v44  ;;  %v1678_v42 = vmul.f32 %v3803_v23, %v1465_v45  ;;  %v1453_v51 = vpop.permute.xlu1 %1452  ;;  %v1473_v30 = vpop.permute.xlu0 %1472  ;;  %v4816_v11 = vld [vmem:[#allocation143_spill] sm:$0xff]  ;;  %v4818_v36 = vld [vmem:[#allocation21_spill] sm:$0xff] }
 0x23b   : > { %v915_v63 = vmul.f32 %v3527_v43, %v4810_v21  ;;  %v1351_v60 = vadd.f32 %v1287_v18, %v3876_v38  ;;  %v1289_v58 = vmul.f32 %v3782_v22, %v4811_v7  ;;  %v1292_v3 = vmul.f32 %v3782_v22, %v4812_v46 }
 0x23c   : > { %v1354_v20 = vadd.f32 %v1290_v10, %v3903_v57  ;;  %v2465_v59 = vpack.c.bf16 %v1871_v0, %v1870_v17  ;;  %v1808_v37 = vadd.f32 %v3888_v41, %v1737_v13  ;;  %v1675_v34 = vmul.f32 %v3803_v23, %v1453_v51 }
 0x23d   : > { %v4025_v6 = vadd.f32 %v914_v56, %v4813_v27  ;;  %v916_v38 = vmul.f32 %v3527_v43, %v4814_v19  ;;  %v1873_v49 = vmax.f32 %v1809_v1, 0.0  ;;  %v1680_v52 = vmul.f32 %v3803_v23, %v1473_v30 }
 0x23e   : > { %2605 = vst [vmem:[%s3945_s26 + $0x20] sm:$0xff] %v2465_v59   ;;  %v1811_v53 = vadd.f32 %v3888_v41, %v1740_v24  ;;  %v1872_v4 = vmax.f32 %v1808_v37, 0.0  ;;  %v1742_v47 = vadd.f32 %v1678_v42, %v1354_v20  ;;  %v1739_v57 = vadd.f32 %v1675_v34, %v1351_v60  ;;  %v1461_v18 = vpop.permute.xlu1 %1460  ;;  %v1481_v14 = vpop.permute.xlu0 %1480  ;;  %v4820_v24 = vld [vmem:[#allocation109_spill] sm:$0xff]  ;;  %v4821_v42 = vld [vmem:[#allocation140_spill] sm:$0xff]  ;;  %v4824_v34 = vld [vmem:[#allocation110_spill] sm:$0xff] }
 0x23f   : > { %v4033_v62 = vadd.f32 %v915_v63, %v4815_v16  ;;  %v1353_v9 = vadd.f32 %v1289_v58, %v3897_v15  ;;  %v1356_v5 = vadd.f32 %v1292_v3, %v3912_v54  ;;  %v1294_v44 = vmul.f32 %v3782_v22, %v4816_v11  ;;  %v4822_v60 = vld [vmem:[#allocation145_spill] sm:$0xff] }
 0x240   : > { %v1291_v45 = vmul.f32 %v3782_v22, %v4817_v61  ;;  %v2470_v39 = vpack.c.bf16 %v1873_v49, %v1872_v4  ;;  %v1810_v10 = vadd.f32 %v3888_v41, %v1739_v57  ;;  %v1677_v29 = vmul.f32 %v3803_v23, %v1461_v18  ;;  %v4823_v59 = vld [vmem:[#allocation25_spill] sm:$0xff]  ;;  %v4826_v57 = vld [vmem:[#allocation142_spill] sm:$0xff] }
 0x241   : > { %v4044_v26 = vadd.f32 %v916_v38, %v4818_v36  ;;  %v917_v15 = vmul.f32 %v3527_v43, %v4819_v33  ;;  %v1744_v54 = vadd.f32 %v1680_v52, %v1356_v5  ;;  %v1682_v55 = vmul.f32 %v3803_v23, %v1481_v14 }
 0x242   : > { %v1875_v56 = vmax.f32 %v1811_v53, 0.0  ;;  %2606 = vst [vmem:[%s3945_s26 + $0x28] sm:$0xff] %v2470_v39   ;;  %v1813_v0 = vadd.f32 %v3888_v41, %v1742_v47  ;;  %v1874_v1 = vmax.f32 %v1810_v10, 0.0  ;;  %v1741_v17 = vadd.f32 %v1677_v29, %v1353_v9  ;;  %v1469_v58 = vpop.permute.xlu1 %1468  ;;  %v1489_v46 = vpop.permute.xlu0 %1488  ;;  %v4825_v53 = vld [vmem:[#allocation24_spill] sm:$0xff]  ;;  %v4828_v39 = vld [vmem:[#allocation27_spill] sm:$0xff] }
 0x243   : > { %v918_v13 = vmul.f32 %v3527_v43, %v4820_v24  ;;  %v1293_v21 = vmul.f32 %v3782_v22, %v4821_v42  ;;  %v1358_v63 = vadd.f32 %v1294_v44, %v3919_v28  ;;  %v1296_v7 = vmul.f32 %v3782_v22, %v4822_v60  ;;  %v4827_v44 = vld [vmem:[#allocation147_spill] sm:$0xff] }
 0x244   : > { %v1355_v3 = vadd.f32 %v1291_v45, %v3909_v32  ;;  %v2475_v51 = vpack.c.bf16 %v1875_v56, %v1874_v1  ;;  %v1812_v30 = vadd.f32 %v3888_v41, %v1741_v17  ;;  %v1679_v20 = vmul.f32 %v3803_v23, %v1469_v58  ;;  %v4829_v29 = vld [vmem:[#allocation111_spill] sm:$0xff]  ;;  %v4830_v56 = vld [vmem:[#allocation112_spill] sm:$0xff] }
 0x245   : > { %v4062_v37 = vadd.f32 %v917_v15, %v4823_v59  ;;  %v919_v27 = vmul.f32 %v3527_v43, %v4824_v34  ;;  %v1815_v28 = vadd.f32 %v3888_v41, %v1744_v54  ;;  %v1746_v19 = vadd.f32 %v1682_v55, %v1358_v63  ;;  %v4831_v17 = vld [vmem:[#allocation144_spill] sm:$0xff] }
 0x246   : > { %v1877_v38 = vmax.f32 %v1813_v0, 0.0  ;;  %2607 = vst [vmem:[%s3945_s26 + $0x30] sm:$0xff] %v2475_v51   ;;  %v1876_v49 = vmax.f32 %v1812_v30, 0.0  ;;  %v1743_v52 = vadd.f32 %v1679_v20, %v1355_v3  ;;  %v1684_v32 = vmul.f32 %v3803_v23, %v1489_v46  ;;  %v1477_v5 = vpop.permute.xlu1 %1476  ;;  %v1497_v11 = vpop.permute.xlu0 %1496  ;;  %v4833_v3 = vld [vmem:[#allocation26_spill] sm:$0xff]  ;;  %v4834_v30 = vld [vmem:[#allocation113_spill] sm:$0xff] }
 0x247   : > { %v4070_v4 = vadd.f32 %v918_v13, %v4825_v53  ;;  %v1357_v47 = vadd.f32 %v1293_v21, %v3916_v12  ;;  %v1295_v16 = vmul.f32 %v3782_v22, %v4826_v57  ;;  %v1360_v9 = vadd.f32 %v1296_v7, %v3951_v2  ;;  %v4832_v13 = vld [vmem:[#allocation149_spill] sm:$0xff] }
 0x248   : > { %v1298_v18 = vmul.f32 %v3782_v22, %v4827_v44  ;;  %v2480_v14 = vpack.c.bf16 %v1877_v38, %v1876_v49  ;;  %v1814_v61 = vadd.f32 %v3888_v41, %v1743_v52  ;;  %v1681_v45 = vmul.f32 %v3803_v23, %v1477_v5 }
 0x249   : > { %v4081_v10 = vadd.f32 %v919_v27, %v4828_v39  ;;  %v920_v12 = vmul.f32 %v3527_v43, %v4829_v29  ;;  %v1879_v36 = vmax.f32 %v1815_v28, 0.0  ;;  %v1817_v33 = vadd.f32 %v3888_v41, %v1746_v19  ;;  %v4835_v19 = vld [vmem:[#allocation29_spill] sm:$0xff] }
 0x24a   : > { %2608 = vst [vmem:[%s3945_s26 + $0x38] sm:$0xff] %v2480_v14   ;;  %v1878_v2 = vmax.f32 %v1814_v61, 0.0  ;;  %v1748_v15 = vadd.f32 %v1684_v32, %v1360_v9  ;;  %v1745_v54 = vadd.f32 %v1681_v45, %v1357_v47  ;;  %v1686_v55 = vmul.f32 %v3803_v23, %v1497_v11  ;;  %v1485_v21 = vpop.permute.xlu1 %1484  ;;  %v1505_v63 = vpop.permute.xlu0 %1504  ;;  %v4836_v32 = vld [vmem:[#allocation151_spill] sm:$0xff]  ;;  %v4839_v61 = vld [vmem:[#allocation114_spill] sm:$0xff] }
 0x24b   : > { %v921_v0 = vmul.f32 %v3527_v43, %v4830_v56  ;;  %v1359_v1 = vadd.f32 %v1295_v16, %v3929_v31  ;;  %v1297_v24 = vmul.f32 %v3782_v22, %v4831_v17  ;;  %v1300_v42 = vmul.f32 %v3782_v22, %v4832_v13  ;;  %v4837_v16 = vld [vmem:[#allocation146_spill] sm:$0xff]  ;;  %v4842_v56 = vld [vmem:[#allocation153_spill] sm:$0xff] }
 0x24c   : > { %v1362_v60 = vadd.f32 %v1298_v18, %v3970_v35  ;;  %v2485_v7 = vpack.c.bf16 %v1879_v36, %v1878_v2  ;;  %v1816_v58 = vadd.f32 %v3888_v41, %v1745_v54  ;;  %v1683_v46 = vmul.f32 %v3803_v23, %v1485_v21  ;;  %v4838_v18 = vld [vmem:[#allocation28_spill] sm:$0xff] }
 0x24d   : > { %v4099_v51 = vadd.f32 %v920_v12, %v4833_v3  ;;  %v922_v31 = vmul.f32 %v3527_v43, %v4834_v30  ;;  %v1881_v20 = vmax.f32 %v1817_v33, 0.0  ;;  %v1688_v59 = vmul.f32 %v3803_v23, %v1505_v63  ;;  %v4840_v33 = vld [vmem:[#allocation115_spill] sm:$0xff] }
 0x24e   : > { %2609 = vst [vmem:[%s3945_s26 + $0x40] sm:$0xff] %v2485_v7   ;;  %v1819_v34 = vadd.f32 %v3888_v41, %v1748_v15  ;;  %v1880_v27 = vmax.f32 %v1816_v58, 0.0  ;;  %v1750_v28 = vadd.f32 %v1686_v55, %v1362_v60  ;;  %v1747_v35 = vadd.f32 %v1683_v46, %v1359_v1  ;;  %v1493_v47 = vpop.permute.xlu1 %1492  ;;  %v1513_v57 = vpop.permute.xlu0 %1512  ;;  %v4841_v15 = vld [vmem:[#allocation148_spill] sm:$0xff]  ;;  %v4843_v63 = vld [vmem:[#allocation31_spill] sm:$0xff] }
 0x24f   : > { %v4107_v38 = vadd.f32 %v921_v0, %v4835_v19  ;;  %v1361_v49 = vadd.f32 %v1297_v24, %v3959_v48  ;;  %v1364_v52 = vadd.f32 %v1300_v42, %v3996_v50  ;;  %v1302_v53 = vmul.f32 %v3782_v22, %v4836_v32  ;;  %v4844_v7 = vld [vmem:[#allocation116_spill] sm:$0xff] }
 0x250   : > { %v1299_v9 = vmul.f32 %v3782_v22, %v4837_v16  ;;  %v2490_v5 = vpack.c.bf16 %v1881_v20, %v1880_v27  ;;  %v1818_v11 = vadd.f32 %v3888_v41, %v1747_v35  ;;  %v1685_v44 = vmul.f32 %v3803_v23, %v1493_v47  ;;  %v4845_v20 = vld [vmem:[#allocation30_spill] sm:$0xff]  ;;  %v4848_v16 = vld [vmem:[#allocation33_spill] sm:$0xff] }
 0x251   : > { %v4118_v14 = vadd.f32 %v922_v31, %v4838_v18  ;;  %v923_v48 = vmul.f32 %v3527_v43, %v4839_v61  ;;  %v1752_v50 = vadd.f32 %v1688_v59, %v1364_v52  ;;  %v1690_v45 = vmul.f32 %v3803_v23, %v1513_v57  ;;  %v4846_v27 = vld [vmem:[#allocation150_spill] sm:$0xff]  ;;  %v4847_v52 = vld [vmem:[#allocation155_spill] sm:$0xff] }
 0x252   : > { %v1883_v39 = vmax.f32 %v1819_v34, 0.0  ;;  %2610 = vst [vmem:[%s3945_s26 + $0x48] sm:$0xff] %v2490_v5   ;;  %v1821_v29 = vadd.f32 %v3888_v41, %v1750_v28  ;;  %v1882_v12 = vmax.f32 %v1818_v11, 0.0  ;;  %v1749_v36 = vadd.f32 %v1685_v44, %v1361_v49  ;;  %v1501_v1 = vpop.permute.xlu1 %1500  ;;  %v1521_v17 = vpop.permute.xlu0 %1520  ;;  %v4849_v5 = vld [vmem:[#allocation117_spill] sm:$0xff] }
 0x253   : > { %v924_v2 = vmul.f32 %v3527_v43, %v4840_v33  ;;  %v1301_v54 = vmul.f32 %v3782_v22, %v4841_v15  ;;  %v1366_v55 = vadd.f32 %v1302_v53, %v4025_v6  ;;  %v1304_v0 = vmul.f32 %v3782_v22, %v4842_v56 }
 0x254   : > { %v1363_v24 = vadd.f32 %v1299_v9, %v3988_v8  ;;  %v2495_v13 = vpack.c.bf16 %v1883_v39, %v1882_v12  ;;  %v1820_v42 = vadd.f32 %v3888_v41, %v1749_v36  ;;  %v1687_v21 = vmul.f32 %v3803_v23, %v1501_v1  ;;  %v4852_v36 = vld [vmem:[#allocation157_spill] sm:$0xff]  ;;  %v4853_v1 = vld [vmem:[#allocation32_spill] sm:$0xff] }
 0x255   : > { %v4136_v60 = vadd.f32 %v923_v48, %v4843_v63  ;;  %v925_v58 = vmul.f32 %v3527_v43, %v4844_v7  ;;  %v1823_v6 = vadd.f32 %v3888_v41, %v1752_v50  ;;  %v1754_v46 = vadd.f32 %v1690_v45, %v1366_v55  ;;  %v4850_v50 = vld [vmem:[#allocation118_spill] sm:$0xff] }
 0x256   : > { %v1885_v3 = vmax.f32 %v1821_v29, 0.0  ;;  %2611 = vst [vmem:[%s3945_s26 + $0x50] sm:$0xff] %v2495_v13   ;;  %v1884_v30 = vmax.f32 %v1820_v42, 0.0  ;;  %v1751_v31 = vadd.f32 %v1687_v21, %v1363_v24  ;;  %v1692_v8 = vmul.f32 %v3803_v23, %v1521_v17  ;;  %v1509_v19 = vpop.permute.xlu1 %1508  ;;  %v1529_v49 = vpop.permute.xlu0 %1528  ;;  %v4851_v29 = vld [vmem:[#allocation152_spill] sm:$0xff]  ;;  %v4854_v24 = vld [vmem:[#allocation119_spill] sm:$0xff] }
 0x257   : > { %v4144_v59 = vadd.f32 %v924_v2, %v4845_v20  ;;  %v1365_v34 = vadd.f32 %v1301_v54, %v4007_v25  ;;  %v1303_v28 = vmul.f32 %v3782_v22, %v4846_v27  ;;  %v1368_v35 = vadd.f32 %v1304_v0, %v4044_v26 }
 0x258   : > { %v1306_v32 = vmul.f32 %v3782_v22, %v4847_v52  ;;  %v2500_v53 = vpack.c.bf16 %v1885_v3, %v1884_v30  ;;  %v1822_v47 = vadd.f32 %v3888_v41, %v1751_v31  ;;  %v1689_v57 = vmul.f32 %v3803_v23, %v1509_v19  ;;  %v4856_v30 = vld [vmem:[#allocation159_spill] sm:$0xff] }
 0x259   : > { %v4155_v9 = vadd.f32 %v925_v58, %v4848_v16  ;;  %v926_v25 = vmul.f32 %v3527_v43, %v4849_v5  ;;  %v1887_v11 = vmax.f32 %v1823_v6, 0.0  ;;  %v1825_v44 = vadd.f32 %v3888_v41, %v1754_v46  ;;  %v4855_v58 = vld [vmem:[#allocation35_spill] sm:$0xff] }
 0x25a   : > { %2612 = vst [vmem:[%s3945_s26 + $0x58] sm:$0xff] %v2500_v53   ;;  %v1886_v26 = vmax.f32 %v1822_v47, 0.0  ;;  %v1756_v18 = vadd.f32 %v1692_v8, %v1368_v35  ;;  %v1753_v61 = vadd.f32 %v1689_v57, %v1365_v34  ;;  %v1694_v48 = vmul.f32 %v3803_v23, %v1529_v49  ;;  %v1517_v2 = vpop.permute.xlu1 %1516  ;;  %v1537_v15 = vpop.permute.xlu0 %1536  ;;  %v4857_v34 = vld [vmem:[#allocation154_spill] sm:$0xff] }
 0x25b   : > { %v927_v45 = vmul.f32 %v3527_v43, %v4850_v50  ;;  %v1367_v39 = vadd.f32 %v1303_v28, %v4033_v62  ;;  %v1305_v12 = vmul.f32 %v3782_v22, %v4851_v29  ;;  %v1308_v33 = vmul.f32 %v3782_v22, %v4852_v36  ;;  %v4858_v49 = vld [vmem:[#allocation34_spill] sm:$0xff] }
 0x25c   : > { %v1370_v54 = vadd.f32 %v1306_v32, %v4070_v4  ;;  %v2505_v55 = vpack.c.bf16 %v1887_v11, %v1886_v26  ;;  %v1824_v56 = vadd.f32 %v3888_v41, %v1753_v61  ;;  %v1691_v0 = vmul.f32 %v3803_v23, %v1517_v2  ;;  %v4859_v32 = vld [vmem:[#allocation120_spill] sm:$0xff]  ;;  %v4862_v61 = vld [vmem:[#allocation161_spill] sm:$0xff] }
 0x25d   : > { %v4173_v17 = vadd.f32 %v926_v25, %v4853_v1  ;;  %v928_v62 = vmul.f32 %v3527_v43, %v4854_v24  ;;  %v1889_v13 = vmax.f32 %v1825_v44, 0.0  ;;  %v1696_v42 = vmul.f32 %v3803_v23, %v1537_v15  ;;  %v4860_v25 = vld [vmem:[#allocation121_spill] sm:$0xff]  ;;  %v4861_v44 = vld [vmem:[#allocation156_spill] sm:$0xff]  ;;  %v4864_v15 = vld [vmem:[#allocation122_spill] sm:$0xff] }
 0x25e   : > { %2613 = vst [vmem:[%s3945_s26 + $0x60] sm:$0xff] %v2505_v55   ;;  %v1827_v21 = vadd.f32 %v3888_v41, %v1756_v18  ;;  %v1888_v63 = vmax.f32 %v1824_v56, 0.0  ;;  %v1758_v7 = vadd.f32 %v1694_v48, %v1370_v54  ;;  %v1755_v4 = vadd.f32 %v1691_v0, %v1367_v39  ;;  %v1525_v8 = vpop.permute.xlu1 %1524  ;;  %v1545_v20 = vpop.permute.xlu0 %1544  ;;  %v4865_v24 = vld [vmem:[#allocation36_spill] sm:$0xff] }
 0x25f   : > { %v4181_v6 = vadd.f32 %v927_v45, %v4855_v58  ;;  %v1369_v46 = vadd.f32 %v1305_v12, %v4062_v37  ;;  %v1372_v3 = vadd.f32 %v1308_v33, %v4099_v51  ;;  %v1310_v31 = vmul.f32 %v3782_v22, %v4856_v30  ;;  %v4863_v33 = vld [vmem:[#allocation37_spill] sm:$0xff]  ;;  %v4867_v58 = vld [vmem:[#allocation163_spill] sm:$0xff] }
 0x260   : > { %v1307_v27 = vmul.f32 %v3782_v22, %v4857_v34  ;;  %v2510_v28 = vpack.c.bf16 %v1889_v13, %v1888_v63  ;;  %v1826_v35 = vadd.f32 %v3888_v41, %v1755_v4  ;;  %v1693_v19 = vmul.f32 %v3803_v23, %v1525_v8  ;;  %v4868_v8 = vld [vmem:[#allocation40_spill] sm:$0xff]  ;;  %v4869_v34 = vld [vmem:[#allocation123_spill] sm:$0xff] }
 0x261   : > { %v4192_v52 = vadd.f32 %v928_v62, %v4858_v49  ;;  %v929_v37 = vmul.f32 %v3527_v43, %v4859_v32  ;;  %v1760_v51 = vadd.f32 %v1696_v42, %v1372_v3  ;;  %v1698_v53 = vmul.f32 %v3803_v23, %v1545_v20  ;;  %v4866_v42 = vld [vmem:[#allocation158_spill] sm:$0xff]  ;;  %v4870_v32 = vld [vmem:[#allocation124_spill] sm:$0xff] }
 0x262   : > { %v1891_v47 = vmax.f32 %v1827_v21, 0.0  ;;  %2614 = vst [vmem:[%s3945_s26 + $0x68] sm:$0xff] %v2510_v28   ;;  %v1829_v57 = vadd.f32 %v3888_v41, %v1758_v7  ;;  %v1890_v16 = vmax.f32 %v1826_v35, 0.0  ;;  %v1757_v5 = vadd.f32 %v1693_v19, %v1369_v46  ;;  %v1533_v50 = vpop.permute.xlu1 %1532  ;;  %v1553_v45 = vpop.permute.xlu0 %1552 }
 0x263   : > { %v930_v11 = vmul.f32 %v3527_v43, %v4860_v25  ;;  %v1309_v26 = vmul.f32 %v3782_v22, %v4861_v44  ;;  %v1374_v18 = vadd.f32 %v1310_v31, %v4118_v14  ;;  %v1312_v48 = vmul.f32 %v3782_v22, %v4862_v61  ;;  %v4873_v61 = vld [vmem:[#allocation39_spill] sm:$0xff] }
 0x264   : > { %v1371_v39 = vadd.f32 %v1307_v27, %v4081_v10  ;;  %v2515_v29 = vpack.c.bf16 %v1891_v47, %v1890_v16  ;;  %v1828_v12 = vadd.f32 %v3888_v41, %v1757_v5  ;;  %v1695_v36 = vmul.f32 %v3803_v23, %v1533_v50  ;;  %v4874_v50 = vld [vmem:[#allocation125_spill] sm:$0xff] }
 0x265   : > { %v4210_v2 = vadd.f32 %v929_v37, %v4863_v33  ;;  %v931_v54 = vmul.f32 %v3527_v43, %v4864_v15  ;;  %v1831_v14 = vadd.f32 %v3888_v41, %v1760_v51  ;;  %v1762_v55 = vadd.f32 %v1698_v53, %v1374_v18  ;;  %v4871_v53 = vld [vmem:[#allocation160_spill] sm:$0xff] }
 0x266   : > { %v1893_v56 = vmax.f32 %v1829_v57, 0.0  ;;  %2615 = vst [vmem:[%s3945_s26 + $0x70] sm:$0xff] %v2515_v29   ;;  %v1892_v0 = vmax.f32 %v1828_v12, 0.0  ;;  %v1759_v1 = vadd.f32 %v1695_v36, %v1371_v39  ;;  %v1700_v10 = vmul.f32 %v3803_v23, %v1553_v45  ;;  %v1541_v7 = vpop.permute.xlu1 %1540  ;;  %v1561_v4 = vpop.permute.xlu0 %1560  ;;  %v4872_v57 = vld [vmem:[#allocation165_spill] sm:$0xff] }
 0x267   : > { %v994_v62 = vadd.f32 %v930_v11, %v4865_v24  ;;  %v1373_v13 = vadd.f32 %v1309_v26, %v4107_v38  ;;  %v1311_v21 = vmul.f32 %v3782_v22, %v4866_v42  ;;  %v1376_v63 = vadd.f32 %v1312_v48, %v4144_v59 }
 0x268   : > { %v1314_v46 = vmul.f32 %v3782_v22, %v4867_v58  ;;  %v2520_v3 = vpack.c.bf16 %v1893_v56, %v1892_v0  ;;  %v1830_v30 = vadd.f32 %v3888_v41, %v1759_v1  ;;  %v1697_v31 = vmul.f32 %v3803_v23, %v1541_v7 }
 0x269   : > { %v4227_v20 = vadd.f32 %v931_v54, %v4868_v8  ;;  %v932_v38 = vmul.f32 %v3527_v43, %v4869_v34  ;;  %v1895_v27 = vmax.f32 %v1831_v14, 0.0  ;;  %v1833_v28 = vadd.f32 %v3888_v41, %v1762_v55  ;;  %v4876_v55 = vld [vmem:[#allocation167_spill] sm:$0xff] }
 0x26a   : > { %2616 = vst [vmem:[%s3945_s26 + $0x78] sm:$0xff] %v2520_v3   ;;  %v1894_v59 = vmax.f32 %v1830_v30, 0.0  ;;  %v1764_v35 = vadd.f32 %v1700_v10, %v1376_v63  ;;  %v1761_v19 = vadd.f32 %v1697_v31, %v1373_v13  ;;  %v1702_v49 = vmul.f32 %v3803_v23, %v1561_v4  ;;  %v1549_v5 = vpop.permute.xlu1 %1548  ;;  %v1569_v25 = vpop.permute.xlu0 %1568  ;;  %v4877_v10 = vld [vmem:[#allocation162_spill] sm:$0xff]  ;;  %v4878_v63 = vld [vmem:[#allocation41_spill] sm:$0xff]  ;;  %v4880_v8 = vld [vmem:[#allocation127_spill] sm:$0xff] }
 0x26b   : > { %v933_v37 = vmul.f32 %v3527_v43, %v4870_v32  ;;  %v1375_v51 = vadd.f32 %v1311_v21, %v4136_v60  ;;  %v1313_v47 = vmul.f32 %v3782_v22, %v4871_v53  ;;  %v1316_v16 = vmul.f32 %v3782_v22, %v4872_v57  ;;  %v4879_v4 = vld [vmem:[#allocation126_spill] sm:$0xff] }
 0x26c   : > { %v1378_v11 = vadd.f32 %v1314_v46, %v4173_v17  ;;  %v2525_v44 = vpack.c.bf16 %v1895_v27, %v1894_v59  ;;  %v1832_v26 = vadd.f32 %v3888_v41, %v1761_v19  ;;  %v1699_v18 = vmul.f32 %v3803_v23, %v1549_v5  ;;  %v4875_v17 = vld [vmem:[#allocation42_spill] sm:$0xff]  ;;  %v4882_v59 = vld [vmem:[#allocation169_spill] sm:$0xff] }
 0x26d   : > { %v996_v48 = vadd.f32 %v932_v38, %v4873_v61  ;;  %v934_v60 = vmul.f32 %v3527_v43, %v4874_v50  ;;  %v1897_v45 = vmax.f32 %v1833_v28, 0.0  ;;  %v1704_v39 = vmul.f32 %v3803_v23, %v1569_v25  ;;  %v4881_v38 = vld [vmem:[#allocation164_spill] sm:$0xff] }
 0x26e   : > { %2617 = vst [vmem:[%s3945_s26 + $0x80] sm:$0xff] %v2525_v44   ;;  %v1835_v29 = vadd.f32 %v3888_v41, %v1764_v35  ;;  %v1896_v12 = vmax.f32 %v1832_v26, 0.0  ;;  %v1766_v36 = vadd.f32 %v1702_v49, %v1378_v11  ;;  %v1763_v33 = vadd.f32 %v1699_v18, %v1375_v51  ;;  %v1557_v0 = vpop.permute.xlu1 %1556  ;;  %v1577_v1 = vpop.permute.xlu0 %1576  ;;  %v4885_v18 = vld [vmem:[#allocation43_spill] sm:$0xff] }
 0x26f   : > { %v4251_v15 = vadd.f32 %v933_v37, %v4875_v17  ;;  %v1377_v54 = vadd.f32 %v1313_v47, %v4155_v9  ;;  %v1380_v14 = vadd.f32 %v1316_v16, %v4192_v52  ;;  %v1318_v56 = vmul.f32 %v3782_v22, %v4876_v55  ;;  %v4883_v47 = vld [vmem:[#allocation44_spill] sm:$0xff]  ;;  %v4888_v55 = vld [vmem:[#allocation46_spill] sm:$0xff] }
 0x270   : > { %v1315_v24 = vmul.f32 %v3782_v22, %v4877_v10  ;;  %v2530_v13 = vpack.c.bf16 %v1897_v45, %v1896_v12  ;;  %v1834_v42 = vadd.f32 %v3888_v41, %v1763_v33  ;;  %v1701_v21 = vmul.f32 %v3803_v23, %v1557_v0  ;;  %v4884_v16 = vld [vmem:[#allocation128_spill] sm:$0xff]  ;;  %v4889_v0 = vld [vmem:[#allocation129_spill] sm:$0xff] }
 0x271   : > { %v998_v7 = vadd.f32 %v934_v60, %v4878_v63  ;;  %v935_v9 = vmul.f32 %v3527_v43, %v4879_v4  ;;  %v1768_v58 = vadd.f32 %v1704_v39, %v1380_v14  ;;  %v1706_v52 = vmul.f32 %v3803_v23, %v1577_v1  ;;  %v4886_v60 = vld [vmem:[#allocation166_spill] sm:$0xff] }
 0x272   : > { %v1899_v46 = vmax.f32 %v1835_v29, 0.0  ;;  %2618 = vst [vmem:[%s3945_s26 + $0x88] sm:$0xff] %v2530_v13   ;;  %v1837_v3 = vadd.f32 %v3888_v41, %v1766_v36  ;;  %v1898_v30 = vmax.f32 %v1834_v42, 0.0  ;;  %v1765_v31 = vadd.f32 %v1701_v21, %v1377_v54  ;;  %v1565_v19 = vpop.permute.xlu1 %1564  ;;  %v1585_v49 = vpop.permute.xlu0 %1584  ;;  %v4887_v36 = vld [vmem:[#allocation171_spill] sm:$0xff]  ;;  %v4890_v21 = vld [vmem:[#allocation130_spill] sm:$0xff] }
 0x273   : > { %v936_v34 = vmul.f32 %v3527_v43, %v4880_v8  ;;  %v1317_v27 = vmul.f32 %v3782_v22, %v4881_v38  ;;  %v1382_v28 = vadd.f32 %v1318_v56, %v994_v62  ;;  %v1320_v35 = vmul.f32 %v3782_v22, %v4882_v59  ;;  %v4894_v59 = vld [vmem:[#allocation131_spill] sm:$0xff] }
 0x274   : > { %v1379_v32 = vadd.f32 %v1315_v24, %v4181_v6  ;;  %v2535_v37 = vpack.c.bf16 %v1899_v46, %v1898_v30  ;;  %v1836_v51 = vadd.f32 %v3888_v41, %v1765_v31  ;;  %v1703_v53 = vmul.f32 %v3803_v23, %v1565_v19 }
 0x275   : > { %v4277_v57 = vadd.f32 %v935_v9, %v4883_v47  ;;  %v937_v5 = vmul.f32 %v3527_v43, %v4884_v16  ;;  %v1839_v62 = vadd.f32 %v3888_v41, %v1768_v58  ;;  %v1770_v25 = vadd.f32 %v1706_v52, %v1382_v28  ;;  %v4891_v9 = vld [vmem:[#allocation168_spill] sm:$0xff]  ;;  %v4892_v52 = vld [vmem:[#allocation2_spill] sm:$0xff] }
 0x276   : > { %v1901_v11 = vmax.f32 %v1837_v3, 0.0  ;;  %2619 = vst [vmem:[%s3945_s26 + $0x90] sm:$0xff] %v2535_v37   ;;  %v1900_v44 = vmax.f32 %v1836_v51, 0.0  ;;  %v1767_v26 = vadd.f32 %v1703_v53, %v1379_v32  ;;  %v1708_v6 = vmul.f32 %v3803_v23, %v1585_v49  ;;  %v1573_v29 = vpop.permute.xlu1 %1572  ;;  %v1593_v12 = vpop.permute.xlu0 %1592 }
 0x277   : > { %v1000_v61 = vadd.f32 %v936_v34, %v4885_v18  ;;  %v1381_v50 = vadd.f32 %v1317_v27, %v4210_v2  ;;  %v1319_v45 = vmul.f32 %v3782_v22, %v4886_v60  ;;  %v1384_v39 = vadd.f32 %v1320_v35, %v996_v48  ;;  %v4893_v27 = vld [vmem:[#allocation45_spill] sm:$0xff]  ;;  %v4898_v60 = vld [vmem:[#allocation47_spill] sm:$0xff] }
 0x278   : > { %v1322_v33 = vmul.f32 %v3782_v22, %v4887_v36  ;;  %v2540_v17 = vpack.c.bf16 %v1901_v11, %v1900_v44  ;;  %v1838_v54 = vadd.f32 %v3888_v41, %v1767_v26  ;;  %v1705_v14 = vmul.f32 %v3803_v23, %v1573_v29  ;;  %v4897_v44 = vld [vmem:[#allocation170_spill] sm:$0xff] }
 0x279   : > { %v4293_v56 = vadd.f32 %v937_v5, %v4888_v55  ;;  %v938_v2 = vmul.f32 %v3527_v43, %v4889_v0  ;;  %v1903_v1 = vmax.f32 %v1839_v62, 0.0  ;;  %v1841_v10 = vadd.f32 %v3888_v41, %v1770_v25  ;;  %v4896_v5 = vld [vmem:[#allocation3_spill] sm:$0xff]  ;;  %v4901_v55 = vld [vmem:[#allocation172_spill] sm:$0xff] }
 0x27a   : > { %2620 = vst [vmem:[%s3945_s26 + $0x98] sm:$0xff] %v2540_v17   ;;  %v1902_v48 = vmax.f32 %v1838_v54, 0.0  ;;  %v1772_v24 = vadd.f32 %v1708_v6, %v1384_v39  ;;  %v1769_v13 = vadd.f32 %v1705_v14, %v1381_v50  ;;  %v1710_v42 = vmul.f32 %v3803_v23, %v1593_v12  ;;  %v1581_v3 = vpop.permute.xlu1 %1580  ;;  %v1601_v30 = vpop.permute.xlu0 %1600  ;;  %v4899_v39 = vld [vmem:[#allocation4_spill] sm:$0xff] }
 0x27b   : > { %v939_v63 = vmul.f32 %v3527_v43, %v4890_v21  ;;  %v1383_v4 = vadd.f32 %v1319_v45, %v4227_v20  ;;  %v1321_v58 = vmul.f32 %v3782_v22, %v4891_v9  ;;  %v1324_v46 = vmul.f32 %v3782_v22, %v4892_v52  ;;  %v4900_v54 = vld [vmem:[#allocation132_spill] sm:$0xff] }
 0x27c   : > { %v1386_v31 = vadd.f32 %v1322_v33, %v998_v7  ;;  %v2545_v8 = vpack.c.bf16 %v1903_v1, %v1902_v48  ;;  %v1840_v34 = vadd.f32 %v3888_v41, %v1769_v13  ;;  %v1707_v38 = vmul.f32 %v3803_v23, %v1581_v3  ;;  %v4895_v7 = vld [vmem:[#allocation48_spill] sm:$0xff]  ;;  %v4902_v1 = vld [vmem:[#allocation17_spill] sm:$0xff] }
 0x27d   : > { %v1002_v28 = vadd.f32 %v938_v2, %v4893_v27  ;;  %v940_v35 = vmul.f32 %v3527_v43, %v4894_v59  ;;  %v1905_v20 = vmax.f32 %v1841_v10, 0.0  ;;  %v1712_v19 = vmul.f32 %v3803_v23, %v1601_v30 }
 0x27e   : > { %2621 = vst [vmem:[%s3945_s26 + $0xa0] sm:$0xff] %v2545_v8   ;;  %v1843_v49 = vadd.f32 %v3888_v41, %v1772_v24  ;;  %v1904_v32 = vmax.f32 %v1840_v34, 0.0  ;;  %v1774_v37 = vadd.f32 %v1710_v42, %v1386_v31  ;;  %v1771_v51 = vadd.f32 %v1707_v38, %v1383_v4  ;;  %v1589_v25 = vpop.permute.xlu1 %1588  ;;  %v1609_v11 = vpop.permute.xlu0 %1608  ;;  %v4903_v4 = vld [vmem:[#allocation50_spill] sm:$0xff]  ;;  %v4905_v34 = vld [vmem:[#allocation49_spill] sm:$0xff] }
 0x27f   : > { %v1003_v53 = vadd.f32 %v939_v63, %v4895_v7  ;;  %v1385_v47 = vadd.f32 %v1321_v58, %v4251_v15  ;;  %v1388_v16 = vadd.f32 %v1324_v46, %v1000_v61  ;;  %v1326_v62 = vmul.f32 %v3782_v22, %v4896_v5  ;;  %v4904_v58 = vld [vmem:[#allocation6_spill] sm:$0xff]  ;;  %v4909_v5 = vld [vmem:[#allocation133_spill] sm:$0xff] }
 0x280   : > { %v1323_v26 = vmul.f32 %v3782_v22, %v4897_v44  ;;  %v2550_v6 = vpack.c.bf16 %v1905_v20, %v1904_v32  ;;  %v1842_v18 = vadd.f32 %v3888_v41, %v1771_v51  ;;  %v1709_v50 = vmul.f32 %v3803_v23, %v1589_v25 }
 0x281   : > { %v1004_v45 = vadd.f32 %v940_v35, %v4898_v60  ;;  %v941_v29 = vmul.f32 %v3527_v43, %v4899_v39  ;;  %v1776_v15 = vadd.f32 %v1712_v19, %v1388_v16  ;;  %v1714_v61 = vmul.f32 %v3803_v23, %v1609_v11 }
 0x282   : > { %v1907_v12 = vmax.f32 %v1843_v49, 0.0  ;;  %2622 = vst [vmem:[%s3945_s26 + $0xa8] sm:$0xff] %v2550_v6   ;;  %v1845_v36 = vadd.f32 %v3888_v41, %v1774_v37  ;;  %v1906_v33 = vmax.f32 %v1842_v18, 0.0  ;;  %v1773_v17 = vadd.f32 %v1709_v50, %v1385_v47  ;;  %v1597_v48 = vpop.permute.xlu1 %1596  ;;  %v1617_v24 = vpop.permute.xlu0 %1616  ;;  %v4907_v49 = vld [vmem:[#allocation22_spill] sm:$0xff]  ;;  %v4908_v47 = vld [vmem:[#allocation53_spill] sm:$0xff]  ;;  %v4910_v18 = vld [vmem:[#allocation8_spill] sm:$0xff] }
 0x283   : > { %v942_v14 = vmul.f32 %v3527_v43, %v4900_v54  ;;  %v1325_v0 = vmul.f32 %v3782_v22, %v4901_v55  ;;  %v1390_v2 = vadd.f32 %v1326_v62, %v1002_v28  ;;  %v1328_v10 = vmul.f32 %v3782_v22, %v4902_v1  ;;  %v4906_v28 = vld [vmem:[#allocation173_spill] sm:$0xff] }
 0x284   : > { %v1387_v13 = vadd.f32 %v1323_v26, %v4277_v57  ;;  %v2555_v42 = vpack.c.bf16 %v1907_v12, %v1906_v33  ;;  %v1844_v21 = vadd.f32 %v3888_v41, %v1773_v17  ;;  %v1711_v63 = vmul.f32 %v3803_v23, %v1597_v48 }
 0x285   : > { %v1005_v9 = vadd.f32 %v941_v29, %v4903_v4  ;;  %v943_v52 = vmul.f32 %v3527_v43, %v4904_v58  ;;  %v1847_v46 = vadd.f32 %v3888_v41, %v1776_v15  ;;  %v1778_v3 = vadd.f32 %v1714_v61, %v1390_v2  ;;  %v4912_v29 = vld [vmem:[#allocation7_spill] sm:$0xff]  ;;  %v4916_v58 = vld [vmem:[#allocation52_spill] sm:$0xff] }
 0x286   : > { %v1909_v30 = vmax.f32 %v1845_v36, 0.0  ;;  %2623 = vst [vmem:[%s3945_s26 + $0xb0] sm:$0xff] %v2555_v42   ;;  %v1908_v31 = vmax.f32 %v1844_v21, 0.0  ;;  %v1775_v8 = vadd.f32 %v1711_v63, %v1387_v13  ;;  %v1716_v57 = vmul.f32 %v3803_v23, %v1617_v24  ;;  %v1605_v20 = vpop.permute.xlu1 %1604  ;;  %v1625_v19 = vpop.permute.xlu0 %1624  ;;  %v4915_v42 = vld [vmem:[#allocation55_spill] sm:$0xff] }
 0x287   : > { %v1006_v38 = vadd.f32 %v942_v14, %v4905_v34  ;;  %v1389_v27 = vadd.f32 %v1325_v0, %v4293_v56  ;;  %v1327_v59 = vmul.f32 %v3782_v22, %v4906_v28  ;;  %v1392_v35 = vadd.f32 %v1328_v10, %v1004_v45  ;;  %v4911_v45 = vld [vmem:[#allocation175_spill] sm:$0xff]  ;;  %v4914_v0 = vld [vmem:[#allocation134_spill] sm:$0xff] }
 0x288   : > { %v1330_v32 = vmul.f32 %v3782_v22, %v4907_v49  ;;  %v2560_v37 = vpack.c.bf16 %v1909_v30, %v1908_v31  ;;  %v1846_v51 = vadd.f32 %v3888_v41, %v1775_v8  ;;  %v1713_v7 = vmul.f32 %v3803_v23, %v1605_v20  ;;  %v4913_v14 = vld [vmem:[#allocation51_spill] sm:$0xff]  ;;  %v4917_v30 = vld [vmem:[#allocation18_spill] sm:$0xff] }
 0x289   : > { %v1007_v16 = vadd.f32 %v943_v52, %v4908_v47  ;;  %v944_v62 = vmul.f32 %v3527_v43, %v4909_v5  ;;  %v1911_v56 = vmax.f32 %v1847_v46, 0.0  ;;  %v1849_v25 = vadd.f32 %v3888_v41, %v1778_v3 }
 0x28a   : > { %2624 = vst [vmem:[%s3945_s26 + $0xb8] sm:$0xff] %v2560_v37   ;;  %v1910_v11 = vmax.f32 %v1846_v51, 0.0  ;;  %v1780_v44 = vadd.f32 %v1716_v57, %v1392_v35  ;;  %v1777_v26 = vadd.f32 %v1713_v7, %v1389_v27  ;;  %v1718_v6 = vmul.f32 %v3803_v23, %v1625_v19  ;;  %v1613_v61 = vpop.permute.xlu1 %1612  ;;  %v1633_v12 = vpop.permute.xlu0 %1632  ;;  %v4919_v27 = vld [vmem:[#allocation135_spill] sm:$0xff]  ;;  %v4920_v37 = vld [vmem:[#allocation10_spill] sm:$0xff]  ;;  %v4921_v7 = vld [vmem:[#allocation5_spill] sm:$0xff] }
 0x28b   : > { %v945_v50 = vmul.f32 %v3527_v43, %v4910_v18  ;;  %v1391_v60 = vadd.f32 %v1327_v59, %v1003_v53  ;;  %v1329_v39 = vmul.f32 %v3782_v22, %v4911_v45  ;;  %v1332_v15 = vmul.f32 %v3782_v22, %v4912_v29  ;;  %v4924_v45 = vld [vmem:[#allocation136_spill] sm:$0xff] }
 0x28c   : > { %v1394_v36 = vadd.f32 %v1330_v32, %v1006_v38  ;;  %v2565_v33 = vpack.c.bf16 %v1911_v56, %v1910_v11  ;;  %v1848_v17 = vadd.f32 %v3888_v41, %v1777_v26  ;;  %v1715_v54 = vmul.f32 %v3803_v23, %v1613_v61 }
 0x28d   : > { %v1008_v55 = vadd.f32 %v944_v62, %v4913_v14  ;;  %v946_v2 = vmul.f32 %v3527_v43, %v4914_v0  ;;  %v1913_v53 = vmax.f32 %v1849_v25, 0.0  ;;  %v1720_v1 = vmul.f32 %v3803_v23, %v1633_v12  ;;  %v4922_v62 = vld [vmem:[#allocation59_spill] sm:$0xff]  ;;  %v4926_v14 = vld [vmem:[#allocation38_spill] sm:$0xff] }
 0x28e   : > { %2625 = vst [vmem:[%s3945_s26 + $0xc0] sm:$0xff] %v2565_v33   ;;  %v1851_v10 = vadd.f32 %v3888_v41, %v1780_v44  ;;  %v1912_v48 = vmax.f32 %v1848_v17, 0.0  ;;  %v1782_v24 = vadd.f32 %v1718_v6, %v1394_v36  ;;  %v1779_v13 = vadd.f32 %v1715_v54, %v1391_v60  ;;  %v1621_v46 = vpop.permute.xlu1 %1620  ;;  %v1641_v3 = vpop.permute.xlu0 %1640  ;;  %v4380_v41 = vld [vmem:[%s4437_s2] ss:$0 sm:$0xff]  ;;  %v4925_v33 = vld [vmem:[#allocation57_spill] sm:$0xff] }
 0x28f   : > { %v1009_v21 = vadd.f32 %v945_v50, %v4915_v42  ;;  %v1393_v63 = vadd.f32 %v1329_v39, %v1005_v9  ;;  %v1396_v4 = vadd.f32 %v1332_v15, %v1008_v55  ;;  %v1334_v52 = vmul.f32 %v3782_v22, %v4916_v58  ;;  %v4918_v9 = vld [vmem:[#allocation54_spill] sm:$0xff]  ;;  %v4923_v50 = vld [vmem:[#allocation56_spill] sm:$0xff] }
 0x290   : > { %v1331_v31 = vmul.f32 %v3782_v22, %v4917_v30  ;;  %v2570_v8 = vpack.c.bf16 %v1913_v53, %v1912_v48  ;;  %v1850_v57 = vadd.f32 %v4380_v41, %v1779_v13  ;;  %v1717_v34 = vmul.f32 %v3803_v23, %v1621_v46  ;;  %v4927_v13 = vld [vmem:[#allocation12_spill] sm:$0xff]  ;;  %v4929_v30 = vld [vmem:[#allocation78_spill] sm:$0xff] }
 0x291   : > { %v1010_v38 = vadd.f32 %v946_v2, %v4918_v9  ;;  %v948_v28 = vmul.f32 %v3527_v43, %v4919_v27  ;;  %v1784_v59 = vadd.f32 %v1720_v1, %v1396_v4  ;;  %v1722_v35 = vmul.f32 %v3803_v23, %v1641_v3 }
 0x292   : > { %v1915_v20 = vmax.f32 %v1851_v10, 0.0  ;;  %2626 = vst [vmem:[%s3945_s26 + $0xc8] sm:$0xff] %v2570_v8   ;;  %v1853_v19 = vadd.f32 %v4380_v41, %v1782_v24  ;;  %v1914_v49 = vmax.f32 %v1850_v57, 0.0  ;;  %v1781_v32 = vadd.f32 %v1717_v34, %v1393_v63  ;;  %v1629_v25 = vpop.permute.xlu1 %1628  ;;  %v1649_v11 = vpop.permute.xlu0 %1648  ;;  %v4928_v63 = vld [vmem:[#allocation58_spill] sm:$0xff]  ;;  %v4931_v34 = vld [vmem:[#allocation9_spill] sm:$0xff] }
 0x293   : > { %v947_v51 = vmul.f32 %v3527_v43, %v4920_v37  ;;  %v1333_v47 = vmul.f32 %v3782_v22, %v4921_v7  ;;  %v1398_v5 = vadd.f32 %v1334_v52, %v1010_v38  ;;  %v1336_v56 = vmul.f32 %v3782_v22, %v4922_v62 }
 0x294   : > { %v1395_v44 = vadd.f32 %v1331_v31, %v1007_v16  ;;  %v2575_v26 = vpack.c.bf16 %v1915_v20, %v1914_v49  ;;  %v1852_v6 = vadd.f32 %v4380_v41, %v1781_v32  ;;  %v1719_v18 = vmul.f32 %v3803_v23, %v1629_v25  ;;  %v4930_v31 = vld [vmem:[#allocation174_spill] sm:$0xff] }
 0x295   : > { %v1012_v60 = vadd.f32 %v948_v28, %v4923_v50  ;;  %v950_v39 = vmul.f32 %v3527_v43, %v4924_v45  ;;  %v1855_v29 = vadd.f32 %v4380_v41, %v1784_v59  ;;  %v1786_v15 = vadd.f32 %v1722_v35, %v1398_v5 }
 0x296   : > { %v1917_v61 = vmax.f32 %v1853_v19, 0.0  ;;  %2627 = vst [vmem:[%s3945_s26 + $0xd0] sm:$0xff] %v2575_v26   ;;  %v1916_v12 = vmax.f32 %v1852_v6, 0.0  ;;  %v1783_v36 = vadd.f32 %v1719_v18, %v1395_v44  ;;  %v1724_v16 = vmul.f32 %v3803_v23, %v1649_v11  ;;  %v1637_v2 = vpop.permute.xlu1 %1636  ;;  %v1657_v53 = vpop.permute.xlu0 %1656 }
 0x297   : > { %v1011_v17 = vadd.f32 %v947_v51, %v4925_v33  ;;  %v1397_v54 = vadd.f32 %v1333_v47, %v1009_v21  ;;  %v1335_v55 = vmul.f32 %v3782_v22, %v4926_v14  ;;  %v1400_v0 = vadd.f32 %v1336_v56, %v1012_v60 }
 0x298   : > { %v1338_v1 = vmul.f32 %v3782_v22, %v3848_v40  ;;  %v2580_v10 = vpack.c.bf16 %v1917_v61, %v1916_v12  ;;  %v1854_v48 = vadd.f32 %v4380_v41, %v1783_v36  ;;  %v1721_v24 = vmul.f32 %v3803_v23, %v1637_v2 }
 0x299   : > { %v949_v42 = vmul.f32 %v3527_v43, %v4927_v13  ;;  %v1014_v4 = vadd.f32 %v950_v39, %v4928_v63  ;;  %v1919_v21 = vmax.f32 %v1855_v29, 0.0  ;;  %v1857_v58 = vadd.f32 %v4380_v41, %v1786_v15 }
 0x29a   : > { %2628 = vst [vmem:[%s3945_s26 + $0xd8] sm:$0xff] %v2580_v10   ;;  %v1918_v52 = vmax.f32 %v1854_v48, 0.0  ;;  %v1788_v46 = vadd.f32 %v1724_v16, %v1400_v0  ;;  %v1785_v3 = vadd.f32 %v1721_v24, %v1397_v54  ;;  %v1726_v40 = vmul.f32 %v3803_v23, %v1657_v53  ;;  %v1645_v43 = vpop.permute.xlu1 %1644 }
 0x29b   : > { %v625_v8 = vmul.f32 %v4930_v31, %v4929_v30  ;;  %v1399_v57 = vadd.f32 %v1335_v55, %v1011_v17  ;;  %v1337_v9 = vmul.f32 %v3782_v22, %v4931_v34  ;;  %v1402_v38 = vadd.f32 %v1338_v1, %v1014_v4 }
 0x29c   : > { %v2585_v27 = vpack.c.bf16 %v1919_v21, %v1918_v52  ;;  %v1856_v28 = vadd.f32 %v4380_v41, %v1785_v3  ;;  %v1723_v59 = vmul.f32 %v3803_v23, %v1645_v43  ;;  %v1921_v20 = vmax.f32 %v1857_v58, 0.0 }
 0x29d   : > { %v1013_v35 = vadd.f32 %v949_v42, %v625_v8  ;;  %v1859_v19 = vadd.f32 %v4380_v41, %v1788_v46  ;;  %v1790_v32 = vadd.f32 %v1726_v40, %v1402_v38 }
 0x29e   : > { %2629 = vst [vmem:[%s3945_s26 + $0xe0] sm:$0xff] %v2585_v27   ;;  %v1920_v49 = vmax.f32 %v1856_v28, 0.0  ;;  %v1787_v37 = vadd.f32 %v1723_v59, %v1399_v57  ;;  %v1653_v51 = vpop.permute.xlu1 %1652 }
 0x29f   : > { %v1401_v22 = vadd.f32 %v1337_v9, %v1013_v35  ;;  %v1725_v5 = vmul.f32 %v3803_v23, %v1653_v51  ;;  %v1923_v62 = vmax.f32 %v1859_v19, 0.0  ;;  %v1861_v56 = vadd.f32 %v4380_v41, %v1790_v32 }
 0x2a0   : > { %v2590_v7 = vpack.c.bf16 %v1921_v20, %v1920_v49  ;;  %v1858_v47 = vadd.f32 %v4380_v41, %v1787_v37 }
 0x2a1   : > { %v1789_v11 = vadd.f32 %v1725_v5, %v1401_v22  ;;  %v1925_v6 = vmax.f32 %v1861_v56, 0.0 }
 0x2a2   : > { %2630 = vst [vmem:[%s3945_s26 + $0xe8] sm:$0xff] %v2590_v7   ;;  %v1922_v25 = vmax.f32 %v1858_v47, 0.0 }
 0x2a3   : > { %v1860_v26 = vadd.f32 %v4380_v41, %v1789_v11 }
 0x2a4   : > { %v2595_v44 = vpack.c.bf16 %v1923_v62, %v1922_v25 }
 0x2a5   : > { %v1924_v18 = vmax.f32 %v1860_v26, 0.0 }
 0x2a6   : > { %2631 = vst [vmem:[%s3945_s26 + $0xf0] sm:$0xff] %v2595_v44  }
 0x2a7   : > { %v2600_v50 = vpack.c.bf16 %v1925_v6, %v1924_v18 }
 0x2a9   : > { %2632 = vst [vmem:[%s3945_s26 + $0xf8] sm:$0xff] %v2600_v50  }
 0x2aa PF: > { %s13_s12 = sadd.s32 1, %s2660_s12  }
 0x2ab   : > { %p10_p4 = scmp.ge.s32.totalorder %s13_s12, 22  }
 0x2ad   :  { %12 = sbr.rel (!%p10_p4) target bundleno = 1 (0x1), region = 62 }

// kernel: _lambda_.17
= control target key start
LH: loop header
LB: loop body
LE: loop exit
PB: predicated region body
PF: predicated region fallthrough
CT: control target
= control target key end

     0   :  { %s1814_s12 = smov 0   ;;  %s1999_s0 = inlined_call_operand.vmem [shape: bf16[4608,128], index: 0, kind: input, shape index: {}]   ;;  %s2000_s1 = inlined_call_operand.vmem [shape: bf16[128,128], index: 1, kind: input, shape index: {}]   ;;  %s2001_s2 = inlined_call_operand.vmem [shape: f32[1,128], index: 2, kind: input, shape index: {}]   ;;  %s2002_s3 = inlined_call_operand.vmem [shape: bf16[4608,128], index: 3, kind: output, shape index: {}]  }
   0x1 LB: > { %s1231_s13 = sadd.s32 4294967295, %s1792_s12   ;;  %p1235_p0 = scmp.ge.s32.totalorder %s1792_s12, 1  ;;  %s1792_s12 = sphi %s1814_s12, %s13_s12  }
   0x2   : > { %p138_p1 = scmp.lt.s32.totalorder %s1792_s12, 10 }
   0x4   : > { %p139_p2 = pnand %p1235_p0, %p138_p1 }
   0x5   : > { %v1746_v0 = vld [vmem:[%s2000_s1] sm:$0xff] (!%p139_p2)   ;;  %s1236_s16 = sshll.u32 (!%p139_p2), %s1231_s13, 6  ;;  %v1747_v1 = vld [vmem:[%s2000_s1 + $0x8] sm:$0xff] (!%p139_p2)   ;;  %v1748_v2 = vld [vmem:[%s2000_s1 + $0x10] sm:$0xff] (!%p139_p2)  }
   0x6   : > { %142 = sbr.rel (%p139_p2) target bundleno = 316 (0x13c), region = 32  ;;  %p163_p3 = scmp.lt.s32.totalorder (!%p139_p2), %s1236_s16, 575  ;;  %1642 = vmatprep.subr.bf16.mxu0 (!%p139_p2), %v1746_v0  ;;  %1722 = vmatprep.subr.bf16.mxu1 (!%p139_p2), %v1746_v0  ;;  %v1749_v3 = vld [vmem:[%s2000_s1 + $0x18] sm:$0xff] (!%p139_p2)   ;;  %v1750_v6 = vld [vmem:[%s2000_s1 + $0x20] sm:$0xff] (!%p139_p2)   ;;  %v1751_v7 = vld [vmem:[%s2000_s1 + $0x28] sm:$0xff] (!%p139_p2)  }
   0x7   : > { %1643 = vmatpush3.bf16.msra.mxu0 (!%p139_p2), %v1746_v0  ;;  %1730 = vmatpush3.bf16.msra.mxu1 (!%p139_p2), %v1746_v0  ;;  %v1752_v8 = vld [vmem:[%s2000_s1 + $0x30] sm:$0xff] (!%p139_p2)   ;;  %v1753_v9 = vld [vmem:[%s2000_s1 + $0x38] sm:$0xff] (!%p139_p2)   ;;  %v1891_v40 = vld [vmem:[%s2001_s2] ss:$0 sm:$0xff] (!%p139_p2) }
   0x8   : > { %1644 = vmatprep.subr.bf16.mxu0 (!%p139_p2), %v1747_v1  ;;  %1723 = vmatprep.subr.bf16.mxu1 (!%p139_p2), %v1747_v1 }
   0xb   : > { %1645 = vmatpush3.bf16.msra.mxu0 (!%p139_p2), %v1747_v1  ;;  %1731 = vmatpush3.bf16.msra.mxu1 (!%p139_p2), %v1747_v1 }
   0xc   : > { %1646 = vmatprep.subr.bf16.mxu0 (!%p139_p2), %v1748_v2  ;;  %1724 = vmatprep.subr.bf16.mxu1 (!%p139_p2), %v1748_v2 }
   0xd   : > { %s2004_s16 = smov (!%p163_p3, %s1236_s16), 575 }
   0xe   : > { %s1237_s21 = sshll.u32 %s2004_s16, 2 }
   0xf   : > { %s1839_s24 = scalar_lea.vmem %s1999_s0, %s1237_s21  ;;  %1647 = vmatpush3.bf16.msra.mxu0 %v1748_v2  ;;  %1732 = vmatpush3.bf16.msra.mxu1 %v1748_v2  ;;  %s1906_s13 = scalar_lea.vmem %s2002_s3, %s1237_s21 }
  0x10   : > { %v1754_v4 = vld [vmem:[%s1839_s24] sm:$0xff]   ;;  %1648 = vmatprep.subr.bf16.mxu0 %v1749_v3  ;;  %1725 = vmatprep.subr.bf16.mxu1 %v1749_v3  ;;  %v1756_v10 = vld [vmem:[%s1839_s24 + $0x8] sm:$0xff]   ;;  %v1758_v12 = vld [vmem:[%s1839_s24 + $0x10] sm:$0xff]  }
  0x11   : > { %v1755_v5 = vld [vmem:[%s1839_s24 + $0x80] sm:$0xff]   ;;  %1658 = vmatprep.mubr.bf16.mxu0 %v1754_v4  ;;  %v1757_v11 = vld [vmem:[%s1839_s24 + $0x88] sm:$0xff]   ;;  %v1759_v13 = vld [vmem:[%s1839_s24 + $0x90] sm:$0xff]  }
  0x12   : > { %1690 = vmatprep.mubr.bf16.mxu1 %v1755_v5  ;;  %v1760_v14 = vld [vmem:[%s1839_s24 + $0x18] sm:$0xff]   ;;  %v1762_v16 = vld [vmem:[%s1839_s24 + $0x20] sm:$0xff]   ;;  %v1764_v18 = vld [vmem:[%s1839_s24 + $0x28] sm:$0xff]  }
  0x13   : > { %1649 = vmatpush3.bf16.msra.mxu0 %v1749_v3  ;;  %1733 = vmatpush3.bf16.msra.mxu1 %v1749_v3  ;;  %v1761_v15 = vld [vmem:[%s1839_s24 + $0x98] sm:$0xff]   ;;  %v1763_v17 = vld [vmem:[%s1839_s24 + $0xa0] sm:$0xff]   ;;  %v1765_v19 = vld [vmem:[%s1839_s24 + $0xa8] sm:$0xff]  }
  0x14   : > { %1650 = vmatprep.subr.bf16.mxu0 %v1750_v6  ;;  %1726 = vmatprep.subr.bf16.mxu1 %v1750_v6  ;;  %v1766_v20 = vld [vmem:[%s1839_s24 + $0x30] sm:$0xff]   ;;  %v1768_v22 = vld [vmem:[%s1839_s24 + $0x38] sm:$0xff]   ;;  %v1770_v24 = vld [vmem:[%s1839_s24 + $0x40] sm:$0xff]  }
  0x15   : > { %v1767_v21 = vld [vmem:[%s1839_s24 + $0xb0] sm:$0xff]   ;;  %v1769_v23 = vld [vmem:[%s1839_s24 + $0xb8] sm:$0xff]   ;;  %v1771_v25 = vld [vmem:[%s1839_s24 + $0xc0] sm:$0xff]  }
  0x16   : > { %v1772_v26 = vld [vmem:[%s1839_s24 + $0x48] sm:$0xff]   ;;  %v1774_v28 = vld [vmem:[%s1839_s24 + $0x50] sm:$0xff]   ;;  %v1776_v30 = vld [vmem:[%s1839_s24 + $0x58] sm:$0xff]  }
  0x17   : > { %1651 = vmatpush3.bf16.msra.mxu0 %v1750_v6  ;;  %1734 = vmatpush3.bf16.msra.mxu1 %v1750_v6  ;;  %v1773_v27 = vld [vmem:[%s1839_s24 + $0xc8] sm:$0xff]   ;;  %v1775_v29 = vld [vmem:[%s1839_s24 + $0xd0] sm:$0xff]   ;;  %v1777_v31 = vld [vmem:[%s1839_s24 + $0xd8] sm:$0xff]  }
  0x18   : > { %1652 = vmatprep.subr.bf16.mxu0 %v1751_v7  ;;  %1727 = vmatprep.subr.bf16.mxu1 %v1751_v7  ;;  %v1778_v32 = vld [vmem:[%s1839_s24 + $0x60] sm:$0xff]   ;;  %v1780_v34 = vld [vmem:[%s1839_s24 + $0x68] sm:$0xff]   ;;  %v1782_v36 = vld [vmem:[%s1839_s24 + $0x70] sm:$0xff]  }
  0x19   : > { %v1779_v33 = vld [vmem:[%s1839_s24 + $0xe0] sm:$0xff]   ;;  %v1781_v35 = vld [vmem:[%s1839_s24 + $0xe8] sm:$0xff]   ;;  %v1783_v37 = vld [vmem:[%s1839_s24 + $0xf0] sm:$0xff]  }
  0x1a   : > { %v1784_v38 = vld [vmem:[%s1839_s24 + $0x78] sm:$0xff]  }
  0x1b   : > { %1653 = vmatpush3.bf16.msra.mxu0 %v1751_v7  ;;  %1735 = vmatpush3.bf16.msra.mxu1 %v1751_v7  ;;  %v1785_v39 = vld [vmem:[%s1839_s24 + $0xf8] sm:$0xff]  }
  0x1c   : > { %1654 = vmatprep.subr.bf16.mxu0 %v1752_v8  ;;  %1728 = vmatprep.subr.bf16.mxu1 %v1752_v8 }
  0x1f   : > { %1655 = vmatpush3.bf16.msra.mxu0 %v1752_v8  ;;  %1736 = vmatpush3.bf16.msra.mxu1 %v1752_v8 }
  0x20   : > { %1656 = vmatprep.subr.bf16.mxu0 %v1753_v9  ;;  %1729 = vmatprep.subr.bf16.mxu1 %v1753_v9 }
  0x23   : > { %1657 = vmatpush3.bf16.msra.mxu0 %v1753_v9  ;;  %1737 = vmatpush3.bf16.msra.mxu1 %v1753_v9 }
  0x26   : > { %1659 = vmatmul.mubr.bf16.vlgmr.msra.gmra.mrb[0].mxu0 %v1756_v10  ;;  %1691 = vmatmul.mubr.bf16.vlgmr.msra.gmra.mrb[0].mxu1 %v1757_v11 }
  0x27   : > { %1662 = vmatprep.mubr.bf16.mxu0 %v1758_v12  ;;  %1694 = vmatprep.mubr.bf16.mxu1 %v1759_v13 }
  0x2e   : > { %1663 = vmatmul.mubr.bf16.gmra.mrb[4].mxu0 %v1760_v14  ;;  %1695 = vmatmul.mubr.bf16.gmra.mrb[4].mxu1 %v1761_v15 }
  0x2f   : > { %1666 = vmatprep.mubr.bf16.mxu0 %v1762_v16  ;;  %1698 = vmatprep.mubr.bf16.mxu1 %v1763_v17 }
  0x36   : > { %1667 = vmatmul.mubr.bf16.gmra.mrb[8].mxu0 %v1764_v18  ;;  %1699 = vmatmul.mubr.bf16.gmra.mrb[8].mxu1 %v1765_v19 }
  0x37   : > { %1670 = vmatprep.mubr.bf16.mxu0 %v1766_v20  ;;  %1702 = vmatprep.mubr.bf16.mxu1 %v1767_v21 }
  0x3e   : > { %1671 = vmatmul.mubr.bf16.gmra.mrb[12].mxu0 %v1768_v22  ;;  %1703 = vmatmul.mubr.bf16.gmra.mrb[12].mxu1 %v1769_v23 }
  0x3f   : > { %1674 = vmatprep.mubr.bf16.mxu0 %v1770_v24  ;;  %1706 = vmatprep.mubr.bf16.mxu1 %v1771_v25 }
  0x46   : > { %1675 = vmatmul.mubr.bf16.gmra.mrb[16].mxu0 %v1772_v26  ;;  %1707 = vmatmul.mubr.bf16.gmra.mrb[16].mxu1 %v1773_v27 }
  0x47   : > { %1678 = vmatprep.mubr.bf16.mxu0 %v1774_v28  ;;  %1710 = vmatprep.mubr.bf16.mxu1 %v1775_v29 }
  0x4e   : > { %1679 = vmatmul.mubr.bf16.gmra.mrb[20].mxu0 %v1776_v30  ;;  %1711 = vmatmul.mubr.bf16.gmra.mrb[20].mxu1 %v1777_v31 }
  0x4f   : > { %1682 = vmatprep.mubr.bf16.mxu0 %v1778_v32  ;;  %1714 = vmatprep.mubr.bf16.mxu1 %v1779_v33 }
  0x56   : > { %1683 = vmatmul.mubr.bf16.gmra.mrb[24].mxu0 %v1780_v34  ;;  %1715 = vmatmul.mubr.bf16.gmra.mrb[24].mxu1 %v1781_v35 }
  0x57   : > { %1686 = vmatprep.mubr.bf16.mxu0 %v1782_v36  ;;  %1718 = vmatprep.mubr.bf16.mxu1 %v1783_v37 }
  0x5e   : > { %1687 = vmatmul.mubr.bf16.gmra.mrb[28].mxu0 %v1784_v38  ;;  %1719 = vmatmul.mubr.bf16.gmra.mrb[28].mxu1 %v1785_v39 }
  0xf9   : > { %v1660_v41 = vpop.f32.mrb[0].mxu0  ;;  %v1692_v42 = vpop.f32.mrb[0].mxu1 }
  0xfa   : > { %v545_v43 = vadd.f32 %v1660_v41, %v1891_v40  ;;  %v673_v44 = vadd.f32 %v1692_v42, %v1891_v40  ;;  %v536_v45 = vpop.f32.mrb[1].mxu0  ;;  %v664_v46 = vpop.f32.mrb[1].mxu1 }
  0xfb   : > { %v537_v47 = vadd.f32 %v1891_v40, %v536_v45  ;;  %v665_v48 = vadd.f32 %v1891_v40, %v664_v46  ;;  %v1661_v49 = vpop.f32.mrb[2].mxu0  ;;  %v1693_v50 = vpop.f32.mrb[2].mxu1 }
  0xfc   : > { %v548_v51 = vadd.f32 %v1661_v49, %v1891_v40  ;;  %v676_v52 = vadd.f32 %v1693_v50, %v1891_v40  ;;  %v539_v53 = vpop.f32.mrb[3].mxu0  ;;  %v667_v54 = vpop.f32.mrb[3].mxu1  ;;  %v793_v57 = vmax.f32 %v545_v43, 0.0  ;;  %v825_v58 = vmax.f32 %v673_v44, 0.0 }
  0xfd   : > { %v540_v55 = vadd.f32 %v1891_v40, %v539_v53  ;;  %v668_v56 = vadd.f32 %v1891_v40, %v667_v54  ;;  %v791_v61 = vmax.f32 %v537_v47, 0.0  ;;  %v823_v62 = vmax.f32 %v665_v48, 0.0 }
  0xfe   : > { %v794_v59 = vmax.f32 %v548_v51, 0.0  ;;  %v826_v60 = vmax.f32 %v676_v52, 0.0 }
  0xff   : > { %v792_v63 = vmax.f32 %v540_v55, 0.0  ;;  %v824_v0 = vmax.f32 %v668_v56, 0.0 }
 0x100   : > { %v1419_v1 = vpack.c.bf16 %v794_v59, %v793_v57  ;;  %v1499_v2 = vpack.c.bf16 %v826_v60, %v825_v58 }
 0x101   : > { %v1414_v3 = vpack.c.bf16 %v792_v63, %v791_v61  ;;  %v1494_v4 = vpack.c.bf16 %v824_v0, %v823_v62  ;;  %v1664_v5 = vpop.f32.mrb[4].mxu0  ;;  %v1696_v6 = vpop.f32.mrb[4].mxu1 }
 0x102   : > { %1571 = vst [vmem:[%s1906_s13 + $0x8] sm:$0xff] %v1419_v1   ;;  %1587 = vst [vmem:[%s1906_s13 + $0x88] sm:$0xff] %v1499_v2   ;;  %v561_v7 = vadd.f32 %v1664_v5, %v1891_v40  ;;  %v689_v8 = vadd.f32 %v1696_v6, %v1891_v40  ;;  %v552_v9 = vpop.f32.mrb[5].mxu0  ;;  %v680_v10 = vpop.f32.mrb[5].mxu1 }
 0x103   : > { %1415 = vst [vmem:[%s1906_s13] sm:$0xff] %v1414_v3   ;;  %1586 = vst [vmem:[%s1906_s13 + $0x80] sm:$0xff] %v1494_v4   ;;  %v553_v11 = vadd.f32 %v1891_v40, %v552_v9  ;;  %v681_v12 = vadd.f32 %v1891_v40, %v680_v10  ;;  %v1665_v13 = vpop.f32.mrb[6].mxu0  ;;  %v1697_v14 = vpop.f32.mrb[6].mxu1 }
 0x104   : > { %v564_v15 = vadd.f32 %v1665_v13, %v1891_v40  ;;  %v692_v16 = vadd.f32 %v1697_v14, %v1891_v40  ;;  %v555_v17 = vpop.f32.mrb[7].mxu0  ;;  %v683_v18 = vpop.f32.mrb[7].mxu1  ;;  %v797_v21 = vmax.f32 %v561_v7, 0.0  ;;  %v829_v22 = vmax.f32 %v689_v8, 0.0 }
 0x105   : > { %v556_v19 = vadd.f32 %v1891_v40, %v555_v17  ;;  %v684_v20 = vadd.f32 %v1891_v40, %v683_v18  ;;  %v795_v25 = vmax.f32 %v553_v11, 0.0  ;;  %v827_v26 = vmax.f32 %v681_v12, 0.0 }
 0x106   : > { %v798_v23 = vmax.f32 %v564_v15, 0.0  ;;  %v830_v24 = vmax.f32 %v692_v16, 0.0 }
 0x107   : > { %v796_v27 = vmax.f32 %v556_v19, 0.0  ;;  %v828_v28 = vmax.f32 %v684_v20, 0.0 }
 0x108   : > { %v1429_v29 = vpack.c.bf16 %v798_v23, %v797_v21  ;;  %v1509_v30 = vpack.c.bf16 %v830_v24, %v829_v22 }
 0x109   : > { %v1424_v31 = vpack.c.bf16 %v796_v27, %v795_v25  ;;  %v1504_v32 = vpack.c.bf16 %v828_v28, %v827_v26  ;;  %v1668_v33 = vpop.f32.mrb[8].mxu0  ;;  %v1700_v34 = vpop.f32.mrb[8].mxu1 }
 0x10a   : > { %1573 = vst [vmem:[%s1906_s13 + $0x18] sm:$0xff] %v1429_v29   ;;  %1589 = vst [vmem:[%s1906_s13 + $0x98] sm:$0xff] %v1509_v30   ;;  %v577_v35 = vadd.f32 %v1668_v33, %v1891_v40  ;;  %v705_v36 = vadd.f32 %v1700_v34, %v1891_v40  ;;  %v568_v37 = vpop.f32.mrb[9].mxu0  ;;  %v696_v38 = vpop.f32.mrb[9].mxu1 }
 0x10b   : > { %1572 = vst [vmem:[%s1906_s13 + $0x10] sm:$0xff] %v1424_v31   ;;  %1588 = vst [vmem:[%s1906_s13 + $0x90] sm:$0xff] %v1504_v32   ;;  %v569_v39 = vadd.f32 %v1891_v40, %v568_v37  ;;  %v697_v41 = vadd.f32 %v1891_v40, %v696_v38  ;;  %v1669_v42 = vpop.f32.mrb[10].mxu0  ;;  %v1701_v43 = vpop.f32.mrb[10].mxu1 }
 0x10c   : > { %v580_v44 = vadd.f32 %v1669_v42, %v1891_v40  ;;  %v708_v45 = vadd.f32 %v1701_v43, %v1891_v40  ;;  %v571_v46 = vpop.f32.mrb[11].mxu0  ;;  %v699_v47 = vpop.f32.mrb[11].mxu1  ;;  %v801_v50 = vmax.f32 %v577_v35, 0.0  ;;  %v833_v51 = vmax.f32 %v705_v36, 0.0 }
 0x10d   : > { %v572_v48 = vadd.f32 %v1891_v40, %v571_v46  ;;  %v700_v49 = vadd.f32 %v1891_v40, %v699_v47  ;;  %v799_v54 = vmax.f32 %v569_v39, 0.0  ;;  %v831_v55 = vmax.f32 %v697_v41, 0.0 }
 0x10e   : > { %v802_v52 = vmax.f32 %v580_v44, 0.0  ;;  %v834_v53 = vmax.f32 %v708_v45, 0.0 }
 0x10f   : > { %v800_v56 = vmax.f32 %v572_v48, 0.0  ;;  %v832_v57 = vmax.f32 %v700_v49, 0.0 }
 0x110   : > { %v1439_v58 = vpack.c.bf16 %v802_v52, %v801_v50  ;;  %v1519_v59 = vpack.c.bf16 %v834_v53, %v833_v51 }
 0x111   : > { %v1434_v60 = vpack.c.bf16 %v800_v56, %v799_v54  ;;  %v1514_v61 = vpack.c.bf16 %v832_v57, %v831_v55  ;;  %v1672_v62 = vpop.f32.mrb[12].mxu0  ;;  %v1704_v63 = vpop.f32.mrb[12].mxu1 }
 0x112   : > { %1575 = vst [vmem:[%s1906_s13 + $0x28] sm:$0xff] %v1439_v58   ;;  %1591 = vst [vmem:[%s1906_s13 + $0xa8] sm:$0xff] %v1519_v59   ;;  %v593_v0 = vadd.f32 %v1672_v62, %v1891_v40  ;;  %v721_v1 = vadd.f32 %v1704_v63, %v1891_v40  ;;  %v584_v2 = vpop.f32.mrb[13].mxu0  ;;  %v712_v3 = vpop.f32.mrb[13].mxu1 }
 0x113   : > { %1574 = vst [vmem:[%s1906_s13 + $0x20] sm:$0xff] %v1434_v60   ;;  %1590 = vst [vmem:[%s1906_s13 + $0xa0] sm:$0xff] %v1514_v61   ;;  %v585_v4 = vadd.f32 %v1891_v40, %v584_v2  ;;  %v713_v5 = vadd.f32 %v1891_v40, %v712_v3  ;;  %v1673_v6 = vpop.f32.mrb[14].mxu0  ;;  %v1705_v7 = vpop.f32.mrb[14].mxu1 }
 0x114   : > { %v596_v8 = vadd.f32 %v1673_v6, %v1891_v40  ;;  %v724_v9 = vadd.f32 %v1705_v7, %v1891_v40  ;;  %v587_v10 = vpop.f32.mrb[15].mxu0  ;;  %v715_v11 = vpop.f32.mrb[15].mxu1  ;;  %v805_v14 = vmax.f32 %v593_v0, 0.0  ;;  %v837_v15 = vmax.f32 %v721_v1, 0.0 }
 0x115   : > { %v588_v12 = vadd.f32 %v1891_v40, %v587_v10  ;;  %v716_v13 = vadd.f32 %v1891_v40, %v715_v11  ;;  %v803_v18 = vmax.f32 %v585_v4, 0.0  ;;  %v835_v19 = vmax.f32 %v713_v5, 0.0 }
 0x116   : > { %v806_v16 = vmax.f32 %v596_v8, 0.0  ;;  %v838_v17 = vmax.f32 %v724_v9, 0.0 }
 0x117   : > { %v804_v20 = vmax.f32 %v588_v12, 0.0  ;;  %v836_v21 = vmax.f32 %v716_v13, 0.0 }
 0x118   : > { %v1449_v22 = vpack.c.bf16 %v806_v16, %v805_v14  ;;  %v1529_v23 = vpack.c.bf16 %v838_v17, %v837_v15 }
 0x119   : > { %v1444_v24 = vpack.c.bf16 %v804_v20, %v803_v18  ;;  %v1524_v25 = vpack.c.bf16 %v836_v21, %v835_v19  ;;  %v1676_v26 = vpop.f32.mrb[16].mxu0  ;;  %v1708_v27 = vpop.f32.mrb[16].mxu1 }
 0x11a   : > { %1577 = vst [vmem:[%s1906_s13 + $0x38] sm:$0xff] %v1449_v22   ;;  %1593 = vst [vmem:[%s1906_s13 + $0xb8] sm:$0xff] %v1529_v23   ;;  %v609_v28 = vadd.f32 %v1676_v26, %v1891_v40  ;;  %v737_v29 = vadd.f32 %v1708_v27, %v1891_v40  ;;  %v600_v30 = vpop.f32.mrb[17].mxu0  ;;  %v728_v31 = vpop.f32.mrb[17].mxu1 }
 0x11b   : > { %1576 = vst [vmem:[%s1906_s13 + $0x30] sm:$0xff] %v1444_v24   ;;  %1592 = vst [vmem:[%s1906_s13 + $0xb0] sm:$0xff] %v1524_v25   ;;  %v601_v32 = vadd.f32 %v1891_v40, %v600_v30  ;;  %v729_v33 = vadd.f32 %v1891_v40, %v728_v31  ;;  %v1677_v34 = vpop.f32.mrb[18].mxu0  ;;  %v1709_v35 = vpop.f32.mrb[18].mxu1 }
 0x11c   : > { %v612_v36 = vadd.f32 %v1677_v34, %v1891_v40  ;;  %v740_v37 = vadd.f32 %v1709_v35, %v1891_v40  ;;  %v603_v38 = vpop.f32.mrb[19].mxu0  ;;  %v731_v39 = vpop.f32.mrb[19].mxu1  ;;  %v809_v43 = vmax.f32 %v609_v28, 0.0  ;;  %v841_v44 = vmax.f32 %v737_v29, 0.0 }
 0x11d   : > { %v604_v41 = vadd.f32 %v1891_v40, %v603_v38  ;;  %v732_v42 = vadd.f32 %v1891_v40, %v731_v39  ;;  %v807_v47 = vmax.f32 %v601_v32, 0.0  ;;  %v839_v48 = vmax.f32 %v729_v33, 0.0 }
 0x11e   : > { %v810_v45 = vmax.f32 %v612_v36, 0.0  ;;  %v842_v46 = vmax.f32 %v740_v37, 0.0 }
 0x11f   : > { %v808_v49 = vmax.f32 %v604_v41, 0.0  ;;  %v840_v50 = vmax.f32 %v732_v42, 0.0 }
 0x120   : > { %v1459_v51 = vpack.c.bf16 %v810_v45, %v809_v43  ;;  %v1539_v52 = vpack.c.bf16 %v842_v46, %v841_v44 }
 0x121   : > { %v1454_v53 = vpack.c.bf16 %v808_v49, %v807_v47  ;;  %v1534_v54 = vpack.c.bf16 %v840_v50, %v839_v48  ;;  %v1680_v55 = vpop.f32.mrb[20].mxu0  ;;  %v1712_v56 = vpop.f32.mrb[20].mxu1 }
 0x122   : > { %1579 = vst [vmem:[%s1906_s13 + $0x48] sm:$0xff] %v1459_v51   ;;  %1595 = vst [vmem:[%s1906_s13 + $0xc8] sm:$0xff] %v1539_v52   ;;  %v625_v57 = vadd.f32 %v1680_v55, %v1891_v40  ;;  %v753_v58 = vadd.f32 %v1712_v56, %v1891_v40  ;;  %v616_v59 = vpop.f32.mrb[21].mxu0  ;;  %v744_v60 = vpop.f32.mrb[21].mxu1 }
 0x123   : > { %1578 = vst [vmem:[%s1906_s13 + $0x40] sm:$0xff] %v1454_v53   ;;  %1594 = vst [vmem:[%s1906_s13 + $0xc0] sm:$0xff] %v1534_v54   ;;  %v617_v61 = vadd.f32 %v1891_v40, %v616_v59  ;;  %v745_v62 = vadd.f32 %v1891_v40, %v744_v60  ;;  %v1681_v63 = vpop.f32.mrb[22].mxu0  ;;  %v1713_v0 = vpop.f32.mrb[22].mxu1 }
 0x124   : > { %v628_v1 = vadd.f32 %v1681_v63, %v1891_v40  ;;  %v756_v2 = vadd.f32 %v1713_v0, %v1891_v40  ;;  %v619_v3 = vpop.f32.mrb[23].mxu0  ;;  %v747_v4 = vpop.f32.mrb[23].mxu1  ;;  %v813_v7 = vmax.f32 %v625_v57, 0.0  ;;  %v845_v8 = vmax.f32 %v753_v58, 0.0 }
 0x125   : > { %v620_v5 = vadd.f32 %v1891_v40, %v619_v3  ;;  %v748_v6 = vadd.f32 %v1891_v40, %v747_v4  ;;  %v811_v11 = vmax.f32 %v617_v61, 0.0  ;;  %v843_v12 = vmax.f32 %v745_v62, 0.0 }
 0x126   : > { %v814_v9 = vmax.f32 %v628_v1, 0.0  ;;  %v846_v10 = vmax.f32 %v756_v2, 0.0 }
 0x127   : > { %v812_v13 = vmax.f32 %v620_v5, 0.0  ;;  %v844_v14 = vmax.f32 %v748_v6, 0.0 }
 0x128   : > { %v1469_v15 = vpack.c.bf16 %v814_v9, %v813_v7  ;;  %v1549_v16 = vpack.c.bf16 %v846_v10, %v845_v8 }
 0x129   : > { %v1464_v17 = vpack.c.bf16 %v812_v13, %v811_v11  ;;  %v1544_v18 = vpack.c.bf16 %v844_v14, %v843_v12  ;;  %v1684_v19 = vpop.f32.mrb[24].mxu0  ;;  %v1716_v20 = vpop.f32.mrb[24].mxu1 }
 0x12a   : > { %1581 = vst [vmem:[%s1906_s13 + $0x58] sm:$0xff] %v1469_v15   ;;  %1597 = vst [vmem:[%s1906_s13 + $0xd8] sm:$0xff] %v1549_v16   ;;  %v641_v21 = vadd.f32 %v1684_v19, %v1891_v40  ;;  %v769_v22 = vadd.f32 %v1716_v20, %v1891_v40  ;;  %v632_v23 = vpop.f32.mrb[25].mxu0  ;;  %v760_v24 = vpop.f32.mrb[25].mxu1 }
 0x12b   : > { %1580 = vst [vmem:[%s1906_s13 + $0x50] sm:$0xff] %v1464_v17   ;;  %1596 = vst [vmem:[%s1906_s13 + $0xd0] sm:$0xff] %v1544_v18   ;;  %v633_v25 = vadd.f32 %v1891_v40, %v632_v23  ;;  %v761_v26 = vadd.f32 %v1891_v40, %v760_v24  ;;  %v1685_v27 = vpop.f32.mrb[26].mxu0  ;;  %v1717_v28 = vpop.f32.mrb[26].mxu1 }
 0x12c   : > { %v644_v29 = vadd.f32 %v1685_v27, %v1891_v40  ;;  %v772_v30 = vadd.f32 %v1717_v28, %v1891_v40  ;;  %v635_v31 = vpop.f32.mrb[27].mxu0  ;;  %v763_v32 = vpop.f32.mrb[27].mxu1  ;;  %v817_v35 = vmax.f32 %v641_v21, 0.0  ;;  %v849_v36 = vmax.f32 %v769_v22, 0.0 }
 0x12d   : > { %v636_v33 = vadd.f32 %v1891_v40, %v635_v31  ;;  %v764_v34 = vadd.f32 %v1891_v40, %v763_v32  ;;  %v815_v39 = vmax.f32 %v633_v25, 0.0  ;;  %v847_v41 = vmax.f32 %v761_v26, 0.0 }
 0x12e   : > { %v818_v37 = vmax.f32 %v644_v29, 0.0  ;;  %v850_v38 = vmax.f32 %v772_v30, 0.0 }
 0x12f   : > { %v816_v42 = vmax.f32 %v636_v33, 0.0  ;;  %v848_v43 = vmax.f32 %v764_v34, 0.0 }
 0x130   : > { %v1479_v44 = vpack.c.bf16 %v818_v37, %v817_v35  ;;  %v1559_v45 = vpack.c.bf16 %v850_v38, %v849_v36 }
 0x131   : > { %v1474_v46 = vpack.c.bf16 %v816_v42, %v815_v39  ;;  %v1554_v47 = vpack.c.bf16 %v848_v43, %v847_v41  ;;  %v1688_v48 = vpop.f32.mrb[28].mxu0  ;;  %v1720_v49 = vpop.f32.mrb[28].mxu1 }
 0x132   : > { %1583 = vst [vmem:[%s1906_s13 + $0x68] sm:$0xff] %v1479_v44   ;;  %1599 = vst [vmem:[%s1906_s13 + $0xe8] sm:$0xff] %v1559_v45   ;;  %v657_v50 = vadd.f32 %v1688_v48, %v1891_v40  ;;  %v785_v51 = vadd.f32 %v1720_v49, %v1891_v40  ;;  %v648_v52 = vpop.f32.mrb[29].mxu0  ;;  %v776_v53 = vpop.f32.mrb[29].mxu1 }
 0x133   : > { %1582 = vst [vmem:[%s1906_s13 + $0x60] sm:$0xff] %v1474_v46   ;;  %1598 = vst [vmem:[%s1906_s13 + $0xe0] sm:$0xff] %v1554_v47   ;;  %v649_v54 = vadd.f32 %v1891_v40, %v648_v52  ;;  %v777_v55 = vadd.f32 %v1891_v40, %v776_v53  ;;  %v1689_v56 = vpop.f32.mrb[30].mxu0  ;;  %v1721_v57 = vpop.f32.mrb[30].mxu1 }
 0x134   : > { %v660_v58 = vadd.f32 %v1689_v56, %v1891_v40  ;;  %v788_v59 = vadd.f32 %v1721_v57, %v1891_v40  ;;  %v651_v60 = vpop.f32.mrb[31].mxu0  ;;  %v779_v61 = vpop.f32.mrb[31].mxu1  ;;  %v821_v0 = vmax.f32 %v657_v50, 0.0  ;;  %v853_v1 = vmax.f32 %v785_v51, 0.0 }
 0x135   : > { %v652_v62 = vadd.f32 %v1891_v40, %v651_v60  ;;  %v780_v63 = vadd.f32 %v1891_v40, %v779_v61  ;;  %v819_v4 = vmax.f32 %v649_v54, 0.0  ;;  %v851_v5 = vmax.f32 %v777_v55, 0.0 }
 0x136   : > { %v822_v2 = vmax.f32 %v660_v58, 0.0  ;;  %v854_v3 = vmax.f32 %v788_v59, 0.0 }
 0x137   : > { %v820_v6 = vmax.f32 %v652_v62, 0.0  ;;  %v852_v7 = vmax.f32 %v780_v63, 0.0 }
 0x138   : > { %v1489_v8 = vpack.c.bf16 %v822_v2, %v821_v0  ;;  %v1569_v9 = vpack.c.bf16 %v854_v3, %v853_v1 }
 0x139   : > { %v1484_v10 = vpack.c.bf16 %v820_v6, %v819_v4  ;;  %v1564_v11 = vpack.c.bf16 %v852_v7, %v851_v5 }
 0x13a   : > { %1585 = vst [vmem:[%s1906_s13 + $0x78] sm:$0xff] %v1489_v8   ;;  %1601 = vst [vmem:[%s1906_s13 + $0xf8] sm:$0xff] %v1569_v9  }
 0x13b   : > { %1584 = vst [vmem:[%s1906_s13 + $0x70] sm:$0xff] %v1484_v10   ;;  %1600 = vst [vmem:[%s1906_s13 + $0xf0] sm:$0xff] %v1564_v11  }
 0x13c PF: > { %s13_s12 = sadd.s32 1, %s1792_s12  }
 0x13d   : > { %p10_p4 = scmp.ge.s32.totalorder %s13_s12, 11  }
 0x13f   :  { %12 = sbr.rel (!%p10_p4) target bundleno = 1 (0x1), region = 62 }

// kernel: _lambda_.18
= control target key start
LH: loop header
LB: loop body
LE: loop exit
PB: predicated region body
PF: predicated region fallthrough
CT: control target
= control target key end

     0   :  { %s1363_s12 = smov 0   ;;  %s1521_s0 = inlined_call_operand.vmem [shape: bf16[1792,256], index: 0, kind: input, shape index: {}]   ;;  %s1522_s1 = inlined_call_operand.vmem [shape: bf16[256,128], index: 1, kind: input, shape index: {}]   ;;  %s1523_s2 = inlined_call_operand.vmem [shape: f32[1,128], index: 2, kind: input, shape index: {}]   ;;  %s1524_s3 = inlined_call_operand.vmem [shape: bf16[1792,128], index: 3, kind: output, shape index: {}]  }
   0x1 LB: > { %s914_s13 = sadd.s32 4294967295, %s1341_s12   ;;  %p918_p0 = scmp.ge.s32.totalorder %s1341_s12, 1  ;;  %s1341_s12 = sphi %s1363_s12, %s13_s12  }
   0x2   : > { %p139_p1 = scmp.lt.s32.totalorder %s1341_s12, 8 }
   0x4   : > { %p140_p2 = pnand %p918_p0, %p139_p1 }
   0x5   : > { %v1271_v0 = vld [vmem:[%s1522_s1 + $0x40] sm:$0xff] (!%p140_p2)   ;;  %s919_s16 = sshll.u32 (!%p140_p2), %s914_s13, 5  ;;  %v1273_v2 = vld [vmem:[%s1522_s1 + $0x48] sm:$0xff] (!%p140_p2)   ;;  %v1275_v4 = vld [vmem:[%s1522_s1 + $0x50] sm:$0xff] (!%p140_p2)  }
   0x6   : > { %143 = sbr.rel (%p140_p2) target bundleno = 319 (0x13f), region = 32  ;;  %v1272_v1 = vld [vmem:[%s1522_s1] sm:$0xff] (!%p140_p2)   ;;  %1135 = vmatprep.subr.bf16.mxu0 (!%p140_p2), %v1271_v0  ;;  %1247 = vmatprep.subr.bf16.mxu1 (!%p140_p2), %v1271_v0  ;;  %v1274_v3 = vld [vmem:[%s1522_s1 + $0x8] sm:$0xff] (!%p140_p2)   ;;  %p165_p3 = scmp.lt.s32.totalorder (!%p140_p2), %s919_s16, 223  ;;  %v1276_v5 = vld [vmem:[%s1522_s1 + $0x10] sm:$0xff] (!%p140_p2)  }
   0x7   : > { %1136 = vmatpush3.bf16.msra.mxu0 (!%p140_p2), %v1272_v1  ;;  %1255 = vmatpush3.bf16.msra.mxu1 (!%p140_p2), %v1272_v1  ;;  %v1277_v6 = vld [vmem:[%s1522_s1 + $0x58] sm:$0xff] (!%p140_p2)   ;;  %v1279_v8 = vld [vmem:[%s1522_s1 + $0x60] sm:$0xff] (!%p140_p2)   ;;  %v1281_v10 = vld [vmem:[%s1522_s1 + $0x68] sm:$0xff] (!%p140_p2)  }
   0x8   : > { %1137 = vmatprep.subr.bf16.mxu0 (!%p140_p2), %v1273_v2  ;;  %1248 = vmatprep.subr.bf16.mxu1 (!%p140_p2), %v1273_v2  ;;  %v1278_v7 = vld [vmem:[%s1522_s1 + $0x18] sm:$0xff] (!%p140_p2)   ;;  %v1280_v9 = vld [vmem:[%s1522_s1 + $0x20] sm:$0xff] (!%p140_p2)   ;;  %v1282_v13 = vld [vmem:[%s1522_s1 + $0x28] sm:$0xff] (!%p140_p2)  }
   0x9   : > { %v1283_v14 = vld [vmem:[%s1522_s1 + $0x70] sm:$0xff] (!%p140_p2)   ;;  %v1285_v16 = vld [vmem:[%s1522_s1 + $0x78] sm:$0xff] (!%p140_p2)   ;;  %v1462_v50 = vld [vmem:[%s1523_s2] ss:$0 sm:$0xff] (!%p140_p2) }
   0xa   : > { %v1284_v15 = vld [vmem:[%s1522_s1 + $0x30] sm:$0xff] (!%p140_p2)   ;;  %v1286_v17 = vld [vmem:[%s1522_s1 + $0x38] sm:$0xff] (!%p140_p2)  }
   0xb   : > { %1138 = vmatpush3.bf16.msra.mxu0 (!%p140_p2), %v1274_v3  ;;  %1256 = vmatpush3.bf16.msra.mxu1 (!%p140_p2), %v1274_v3 }
   0xc   : > { %1139 = vmatprep.subr.bf16.mxu0 (!%p140_p2), %v1275_v4  ;;  %1249 = vmatprep.subr.bf16.mxu1 (!%p140_p2), %v1275_v4 }
   0xd   : > { %s1526_s16 = smov (!%p165_p3, %s919_s16), 223 }
   0xe   : > { %s1007_s4 = sshll.u32 %s1526_s16, 3  ;;  %s923_s28 = sshll.u32 %s1526_s16, 2 }
   0xf   : > { %1140 = vmatpush3.bf16.msra.mxu0 %v1276_v5  ;;  %1257 = vmatpush3.bf16.msra.mxu1 %v1276_v5  ;;  %s1404_s9 = scalar_lea.vmem %s1521_s0, %s1007_s4  ;;  %s1472_s4 = scalar_lea.vmem %s1524_s3, %s923_s28 }
  0x10   : > { %1141 = vmatprep.subr.bf16.mxu0 %v1277_v6  ;;  %1250 = vmatprep.subr.bf16.mxu1 %v1277_v6  ;;  %v1289_v11 = vld [vmem:[%s1404_s9 + $0x4] ss:$8 sps:$4 sm:$0xff]   ;;  %v1287_v18 = vld [vmem:[%s1404_s9] ss:$8 sps:$4 sm:$0xff]   ;;  %v1293_v20 = vld [vmem:[%s1404_s9 + $0x14] ss:$8 sps:$4 sm:$0xff]  }
  0x11   : > { %v1292_v12 = vld [vmem:[%s1404_s9 + $0x84] ss:$8 sps:$4 sm:$0xff]   ;;  %537 = vmatprep.mubr.bf16.mxu0 %v1289_v11  ;;  %v1290_v19 = vld [vmem:[%s1404_s9 + $0x80] ss:$8 sps:$4 sm:$0xff]   ;;  %v1295_v21 = vld [vmem:[%s1404_s9 + $0x94] ss:$8 sps:$4 sm:$0xff]  }
  0x12   : > { %601 = vmatprep.mubr.bf16.mxu1 %v1292_v12  ;;  %v1297_v22 = vld [vmem:[%s1404_s9 + $0x10] ss:$8 sps:$4 sm:$0xff]   ;;  %v1299_v24 = vld [vmem:[%s1404_s9 + $0x24] ss:$8 sps:$4 sm:$0xff]   ;;  %v1303_v26 = vld [vmem:[%s1404_s9 + $0x20] ss:$8 sps:$4 sm:$0xff]  }
  0x13   : > { %1142 = vmatpush3.bf16.msra.mxu0 %v1278_v7  ;;  %1258 = vmatpush3.bf16.msra.mxu1 %v1278_v7  ;;  %v1298_v23 = vld [vmem:[%s1404_s9 + $0x90] ss:$8 sps:$4 sm:$0xff]   ;;  %v1301_v25 = vld [vmem:[%s1404_s9 + $0xa4] ss:$8 sps:$4 sm:$0xff]   ;;  %v1304_v27 = vld [vmem:[%s1404_s9 + $0xa0] ss:$8 sps:$4 sm:$0xff]  }
  0x14   : > { %1143 = vmatprep.subr.bf16.mxu0 %v1279_v8  ;;  %1251 = vmatprep.subr.bf16.mxu1 %v1279_v8  ;;  %v1305_v28 = vld [vmem:[%s1404_s9 + $0x34] ss:$8 sps:$4 sm:$0xff]   ;;  %v1309_v30 = vld [vmem:[%s1404_s9 + $0x30] ss:$8 sps:$4 sm:$0xff]   ;;  %v1311_v32 = vld [vmem:[%s1404_s9 + $0x44] ss:$8 sps:$4 sm:$0xff]  }
  0x15   : > { %v1307_v29 = vld [vmem:[%s1404_s9 + $0xb4] ss:$8 sps:$4 sm:$0xff]   ;;  %v1310_v31 = vld [vmem:[%s1404_s9 + $0xb0] ss:$8 sps:$4 sm:$0xff]   ;;  %v1313_v33 = vld [vmem:[%s1404_s9 + $0xc4] ss:$8 sps:$4 sm:$0xff]  }
  0x16   : > { %v1315_v34 = vld [vmem:[%s1404_s9 + $0x40] ss:$8 sps:$4 sm:$0xff]   ;;  %v1317_v36 = vld [vmem:[%s1404_s9 + $0x54] ss:$8 sps:$4 sm:$0xff]   ;;  %v1321_v38 = vld [vmem:[%s1404_s9 + $0x50] ss:$8 sps:$4 sm:$0xff]  }
  0x17   : > { %1144 = vmatpush3.bf16.msra.mxu0 %v1280_v9  ;;  %1259 = vmatpush3.bf16.msra.mxu1 %v1280_v9  ;;  %v1316_v35 = vld [vmem:[%s1404_s9 + $0xc0] ss:$8 sps:$4 sm:$0xff]   ;;  %v1319_v37 = vld [vmem:[%s1404_s9 + $0xd4] ss:$8 sps:$4 sm:$0xff]   ;;  %v1322_v39 = vld [vmem:[%s1404_s9 + $0xd0] ss:$8 sps:$4 sm:$0xff]  }
  0x18   : > { %1145 = vmatprep.subr.bf16.mxu0 %v1281_v10  ;;  %1252 = vmatprep.subr.bf16.mxu1 %v1281_v10  ;;  %v1323_v40 = vld [vmem:[%s1404_s9 + $0x64] ss:$8 sps:$4 sm:$0xff]   ;;  %v1327_v42 = vld [vmem:[%s1404_s9 + $0x60] ss:$8 sps:$4 sm:$0xff]   ;;  %v1329_v44 = vld [vmem:[%s1404_s9 + $0x74] ss:$8 sps:$4 sm:$0xff]  }
  0x19   : > { %v1325_v41 = vld [vmem:[%s1404_s9 + $0xe4] ss:$8 sps:$4 sm:$0xff]   ;;  %v1328_v43 = vld [vmem:[%s1404_s9 + $0xe0] ss:$8 sps:$4 sm:$0xff]   ;;  %v1331_v45 = vld [vmem:[%s1404_s9 + $0xf4] ss:$8 sps:$4 sm:$0xff]  }
  0x1a   : > { %v1333_v46 = vld [vmem:[%s1404_s9 + $0x70] ss:$8 sps:$4 sm:$0xff]  }
  0x1b   : > { %1146 = vmatpush3.bf16.msra.mxu0 %v1282_v13  ;;  %1260 = vmatpush3.bf16.msra.mxu1 %v1282_v13  ;;  %v1334_v47 = vld [vmem:[%s1404_s9 + $0xf0] ss:$8 sps:$4 sm:$0xff]  }
  0x1c   : > { %1147 = vmatprep.subr.bf16.mxu0 %v1283_v14  ;;  %1253 = vmatprep.subr.bf16.mxu1 %v1283_v14 }
  0x1f   : > { %1148 = vmatpush3.bf16.msra.mxu0 %v1284_v15  ;;  %1261 = vmatpush3.bf16.msra.mxu1 %v1284_v15 }
  0x20   : > { %1149 = vmatprep.subr.bf16.mxu0 %v1285_v16  ;;  %1254 = vmatprep.subr.bf16.mxu1 %v1285_v16 }
  0x23   : > { %1150 = vmatpush3.bf16.msra.mxu0 %v1286_v17  ;;  %1262 = vmatpush3.bf16.msra.mxu1 %v1286_v17 }
  0x26   : > { %538 = vmatmul.mubr.bf16.vlgmr.msra.gmra.mrb[0].mxu0 %v1287_v18  ;;  %602 = vmatmul.mubr.bf16.vlgmr.msra.gmra.mrb[0].mxu1 %v1290_v19 }
  0x27   : > { %545 = vmatprep.mubr.bf16.mxu0 %v1293_v20  ;;  %609 = vmatprep.mubr.bf16.mxu1 %v1295_v21 }
  0x2e   : > { %546 = vmatmul.mubr.bf16.gmra.mrb[4].mxu0 %v1297_v22  ;;  %610 = vmatmul.mubr.bf16.gmra.mrb[4].mxu1 %v1298_v23 }
  0x2f   : > { %553 = vmatprep.mubr.bf16.mxu0 %v1299_v24  ;;  %617 = vmatprep.mubr.bf16.mxu1 %v1301_v25 }
  0x36   : > { %554 = vmatmul.mubr.bf16.gmra.mrb[8].mxu0 %v1303_v26  ;;  %618 = vmatmul.mubr.bf16.gmra.mrb[8].mxu1 %v1304_v27 }
  0x37   : > { %561 = vmatprep.mubr.bf16.mxu0 %v1305_v28  ;;  %625 = vmatprep.mubr.bf16.mxu1 %v1307_v29 }
  0x3e   : > { %562 = vmatmul.mubr.bf16.gmra.mrb[12].mxu0 %v1309_v30  ;;  %626 = vmatmul.mubr.bf16.gmra.mrb[12].mxu1 %v1310_v31 }
  0x3f   : > { %569 = vmatprep.mubr.bf16.mxu0 %v1311_v32  ;;  %633 = vmatprep.mubr.bf16.mxu1 %v1313_v33 }
  0x46   : > { %570 = vmatmul.mubr.bf16.gmra.mrb[16].mxu0 %v1315_v34  ;;  %634 = vmatmul.mubr.bf16.gmra.mrb[16].mxu1 %v1316_v35 }
  0x47   : > { %577 = vmatprep.mubr.bf16.mxu0 %v1317_v36  ;;  %641 = vmatprep.mubr.bf16.mxu1 %v1319_v37 }
  0x4e   : > { %578 = vmatmul.mubr.bf16.gmra.mrb[20].mxu0 %v1321_v38  ;;  %642 = vmatmul.mubr.bf16.gmra.mrb[20].mxu1 %v1322_v39 }
  0x4f   : > { %585 = vmatprep.mubr.bf16.mxu0 %v1323_v40  ;;  %649 = vmatprep.mubr.bf16.mxu1 %v1325_v41 }
  0x56   : > { %586 = vmatmul.mubr.bf16.gmra.mrb[24].mxu0 %v1327_v42  ;;  %650 = vmatmul.mubr.bf16.gmra.mrb[24].mxu1 %v1328_v43 }
  0x57   : > { %593 = vmatprep.mubr.bf16.mxu0 %v1329_v44  ;;  %657 = vmatprep.mubr.bf16.mxu1 %v1331_v45 }
  0x5e   : > { %594 = vmatmul.mubr.bf16.gmra.mrb[28].mxu0 %v1333_v46  ;;  %658 = vmatmul.mubr.bf16.gmra.mrb[28].mxu1 %v1334_v47 }
  0xf9   : > { %v1151_v48 = vpop.f32.mrb[0].mxu0  ;;  %v1199_v49 = vpop.f32.mrb[0].mxu1 }
  0xfa   : > { %v1152_v51 = vpop.f32.mrb[1].mxu0  ;;  %v1200_v52 = vpop.f32.mrb[1].mxu1 }
  0xfb   : > { %v1153_v53 = vadd.f32 %v1152_v51, %v1151_v48  ;;  %v1201_v54 = vadd.f32 %v1200_v52, %v1199_v49  ;;  %v1154_v55 = vpop.f32.mrb[2].mxu0  ;;  %v1202_v56 = vpop.f32.mrb[2].mxu1 }
  0xfc   : > { %v1155_v57 = vpop.f32.mrb[3].mxu0  ;;  %v1203_v58 = vpop.f32.mrb[3].mxu1 }
  0xfd   : > { %v540_v59 = vadd.f32 %v1153_v53, %v1462_v50  ;;  %v604_v60 = vadd.f32 %v1201_v54, %v1462_v50  ;;  %v1156_v61 = vadd.f32 %v1155_v57, %v1154_v55  ;;  %v1204_v62 = vadd.f32 %v1203_v58, %v1202_v56 }
  0xff   : > { %v543_v63 = vadd.f32 %v1156_v61, %v1462_v50  ;;  %v607_v0 = vadd.f32 %v1204_v62, %v1462_v50  ;;  %v666_v1 = vmax.f32 %v540_v59, 0.0  ;;  %v682_v2 = vmax.f32 %v604_v60, 0.0 }
 0x101   : > { %v667_v3 = vmax.f32 %v543_v63, 0.0  ;;  %v683_v4 = vmax.f32 %v607_v0, 0.0  ;;  %v1157_v5 = vpop.f32.mrb[4].mxu0  ;;  %v1205_v6 = vpop.f32.mrb[4].mxu1 }
 0x102   : > { %v1158_v7 = vpop.f32.mrb[5].mxu0  ;;  %v1206_v8 = vpop.f32.mrb[5].mxu1 }
 0x103   : > { %v1043_v9 = vpack.c.bf16 %v667_v3, %v666_v1  ;;  %v1083_v10 = vpack.c.bf16 %v683_v4, %v682_v2  ;;  %v1159_v11 = vadd.f32 %v1158_v7, %v1157_v5  ;;  %v1207_v12 = vadd.f32 %v1206_v8, %v1205_v6  ;;  %v1160_v13 = vpop.f32.mrb[6].mxu0  ;;  %v1208_v14 = vpop.f32.mrb[6].mxu1 }
 0x104   : > { %v1161_v15 = vpop.f32.mrb[7].mxu0  ;;  %v1209_v16 = vpop.f32.mrb[7].mxu1 }
 0x105   : > { %1044 = vst [vmem:[%s1472_s4] sm:$0xff] %v1043_v9   ;;  %1127 = vst [vmem:[%s1472_s4 + $0x40] sm:$0xff] %v1083_v10   ;;  %v548_v17 = vadd.f32 %v1159_v11, %v1462_v50  ;;  %v612_v18 = vadd.f32 %v1207_v12, %v1462_v50  ;;  %v1162_v19 = vadd.f32 %v1161_v15, %v1160_v13 }
 0x106   : > { %v1210_v20 = vadd.f32 %v1209_v16, %v1208_v14 }
 0x107   : > { %v551_v21 = vadd.f32 %v1162_v19, %v1462_v50  ;;  %v668_v23 = vmax.f32 %v548_v17, 0.0  ;;  %v684_v24 = vmax.f32 %v612_v18, 0.0 }
 0x108   : > { %v615_v22 = vadd.f32 %v1210_v20, %v1462_v50 }
 0x109   : > { %v669_v25 = vmax.f32 %v551_v21, 0.0  ;;  %v1163_v27 = vpop.f32.mrb[8].mxu0  ;;  %v1211_v28 = vpop.f32.mrb[8].mxu1 }
 0x10a   : > { %v685_v26 = vmax.f32 %v615_v22, 0.0  ;;  %v1164_v29 = vpop.f32.mrb[9].mxu0  ;;  %v1212_v30 = vpop.f32.mrb[9].mxu1 }
 0x10b   : > { %v1048_v31 = vpack.c.bf16 %v669_v25, %v668_v23  ;;  %v1165_v33 = vadd.f32 %v1164_v29, %v1163_v27  ;;  %v1213_v34 = vadd.f32 %v1212_v30, %v1211_v28  ;;  %v1166_v35 = vpop.f32.mrb[10].mxu0  ;;  %v1214_v36 = vpop.f32.mrb[10].mxu1 }
 0x10c   : > { %v1088_v32 = vpack.c.bf16 %v685_v26, %v684_v24  ;;  %v1167_v37 = vpop.f32.mrb[11].mxu0  ;;  %v1215_v38 = vpop.f32.mrb[11].mxu1 }
 0x10d   : > { %1120 = vst [vmem:[%s1472_s4 + $0x8] sm:$0xff] %v1048_v31   ;;  %v556_v39 = vadd.f32 %v1165_v33, %v1462_v50  ;;  %v620_v40 = vadd.f32 %v1213_v34, %v1462_v50  ;;  %v1168_v41 = vadd.f32 %v1167_v37, %v1166_v35  ;;  %v1216_v42 = vadd.f32 %v1215_v38, %v1214_v36 }
 0x10e   : > { %1128 = vst [vmem:[%s1472_s4 + $0x48] sm:$0xff] %v1088_v32  }
 0x10f   : > { %v559_v43 = vadd.f32 %v1168_v41, %v1462_v50  ;;  %v623_v44 = vadd.f32 %v1216_v42, %v1462_v50  ;;  %v670_v45 = vmax.f32 %v556_v39, 0.0  ;;  %v686_v46 = vmax.f32 %v620_v40, 0.0 }
 0x111   : > { %v671_v47 = vmax.f32 %v559_v43, 0.0  ;;  %v687_v48 = vmax.f32 %v623_v44, 0.0  ;;  %v1169_v49 = vpop.f32.mrb[12].mxu0  ;;  %v1217_v51 = vpop.f32.mrb[12].mxu1 }
 0x112   : > { %v1170_v52 = vpop.f32.mrb[13].mxu0  ;;  %v1218_v53 = vpop.f32.mrb[13].mxu1 }
 0x113   : > { %v1053_v54 = vpack.c.bf16 %v671_v47, %v670_v45  ;;  %v1093_v55 = vpack.c.bf16 %v687_v48, %v686_v46  ;;  %v1171_v56 = vadd.f32 %v1170_v52, %v1169_v49  ;;  %v1219_v57 = vadd.f32 %v1218_v53, %v1217_v51  ;;  %v1172_v58 = vpop.f32.mrb[14].mxu0  ;;  %v1220_v59 = vpop.f32.mrb[14].mxu1 }
 0x114   : > { %v1173_v60 = vpop.f32.mrb[15].mxu0  ;;  %v1221_v61 = vpop.f32.mrb[15].mxu1 }
 0x115   : > { %1121 = vst [vmem:[%s1472_s4 + $0x10] sm:$0xff] %v1053_v54   ;;  %1129 = vst [vmem:[%s1472_s4 + $0x50] sm:$0xff] %v1093_v55   ;;  %v564_v62 = vadd.f32 %v1171_v56, %v1462_v50  ;;  %v628_v63 = vadd.f32 %v1219_v57, %v1462_v50  ;;  %v1174_v0 = vadd.f32 %v1173_v60, %v1172_v58 }
 0x116   : > { %v1222_v1 = vadd.f32 %v1221_v61, %v1220_v59 }
 0x117   : > { %v567_v2 = vadd.f32 %v1174_v0, %v1462_v50  ;;  %v672_v4 = vmax.f32 %v564_v62, 0.0  ;;  %v688_v5 = vmax.f32 %v628_v63, 0.0 }
 0x118   : > { %v631_v3 = vadd.f32 %v1222_v1, %v1462_v50 }
 0x119   : > { %v673_v6 = vmax.f32 %v567_v2, 0.0  ;;  %v1175_v8 = vpop.f32.mrb[16].mxu0  ;;  %v1223_v9 = vpop.f32.mrb[16].mxu1 }
 0x11a   : > { %v689_v7 = vmax.f32 %v631_v3, 0.0  ;;  %v1176_v10 = vpop.f32.mrb[17].mxu0  ;;  %v1224_v11 = vpop.f32.mrb[17].mxu1 }
 0x11b   : > { %v1058_v12 = vpack.c.bf16 %v673_v6, %v672_v4  ;;  %v1177_v14 = vadd.f32 %v1176_v10, %v1175_v8  ;;  %v1225_v15 = vadd.f32 %v1224_v11, %v1223_v9  ;;  %v1178_v16 = vpop.f32.mrb[18].mxu0  ;;  %v1226_v17 = vpop.f32.mrb[18].mxu1 }
 0x11c   : > { %v1098_v13 = vpack.c.bf16 %v689_v7, %v688_v5  ;;  %v1179_v18 = vpop.f32.mrb[19].mxu0  ;;  %v1227_v19 = vpop.f32.mrb[19].mxu1 }
 0x11d   : > { %1122 = vst [vmem:[%s1472_s4 + $0x18] sm:$0xff] %v1058_v12   ;;  %v572_v20 = vadd.f32 %v1177_v14, %v1462_v50  ;;  %v636_v21 = vadd.f32 %v1225_v15, %v1462_v50  ;;  %v1180_v22 = vadd.f32 %v1179_v18, %v1178_v16  ;;  %v1228_v23 = vadd.f32 %v1227_v19, %v1226_v17 }
 0x11e   : > { %1130 = vst [vmem:[%s1472_s4 + $0x58] sm:$0xff] %v1098_v13  }
 0x11f   : > { %v575_v24 = vadd.f32 %v1180_v22, %v1462_v50  ;;  %v639_v25 = vadd.f32 %v1228_v23, %v1462_v50  ;;  %v674_v26 = vmax.f32 %v572_v20, 0.0  ;;  %v690_v27 = vmax.f32 %v636_v21, 0.0 }
 0x121   : > { %v675_v28 = vmax.f32 %v575_v24, 0.0  ;;  %v691_v29 = vmax.f32 %v639_v25, 0.0  ;;  %v1181_v30 = vpop.f32.mrb[20].mxu0  ;;  %v1229_v31 = vpop.f32.mrb[20].mxu1 }
 0x122   : > { %v1182_v32 = vpop.f32.mrb[21].mxu0  ;;  %v1230_v33 = vpop.f32.mrb[21].mxu1 }
 0x123   : > { %v1063_v34 = vpack.c.bf16 %v675_v28, %v674_v26  ;;  %v1103_v35 = vpack.c.bf16 %v691_v29, %v690_v27  ;;  %v1183_v36 = vadd.f32 %v1182_v32, %v1181_v30  ;;  %v1231_v37 = vadd.f32 %v1230_v33, %v1229_v31  ;;  %v1184_v38 = vpop.f32.mrb[22].mxu0  ;;  %v1232_v39 = vpop.f32.mrb[22].mxu1 }
 0x124   : > { %v1185_v40 = vpop.f32.mrb[23].mxu0  ;;  %v1233_v41 = vpop.f32.mrb[23].mxu1 }
 0x125   : > { %1123 = vst [vmem:[%s1472_s4 + $0x20] sm:$0xff] %v1063_v34   ;;  %1131 = vst [vmem:[%s1472_s4 + $0x60] sm:$0xff] %v1103_v35   ;;  %v580_v42 = vadd.f32 %v1183_v36, %v1462_v50  ;;  %v644_v43 = vadd.f32 %v1231_v37, %v1462_v50  ;;  %v1186_v44 = vadd.f32 %v1185_v40, %v1184_v38 }
 0x126   : > { %v1234_v45 = vadd.f32 %v1233_v41, %v1232_v39 }
 0x127   : > { %v583_v46 = vadd.f32 %v1186_v44, %v1462_v50  ;;  %v676_v48 = vmax.f32 %v580_v42, 0.0  ;;  %v692_v49 = vmax.f32 %v644_v43, 0.0 }
 0x128   : > { %v647_v47 = vadd.f32 %v1234_v45, %v1462_v50 }
 0x129   : > { %v677_v51 = vmax.f32 %v583_v46, 0.0  ;;  %v1187_v53 = vpop.f32.mrb[24].mxu0  ;;  %v1235_v54 = vpop.f32.mrb[24].mxu1 }
 0x12a   : > { %v693_v52 = vmax.f32 %v647_v47, 0.0  ;;  %v1188_v55 = vpop.f32.mrb[25].mxu0  ;;  %v1236_v56 = vpop.f32.mrb[25].mxu1 }
 0x12b   : > { %v1068_v57 = vpack.c.bf16 %v677_v51, %v676_v48  ;;  %v1189_v59 = vadd.f32 %v1188_v55, %v1187_v53  ;;  %v1237_v60 = vadd.f32 %v1236_v56, %v1235_v54  ;;  %v1190_v61 = vpop.f32.mrb[26].mxu0  ;;  %v1238_v62 = vpop.f32.mrb[26].mxu1 }
 0x12c   : > { %v1108_v58 = vpack.c.bf16 %v693_v52, %v692_v49  ;;  %v1191_v63 = vpop.f32.mrb[27].mxu0  ;;  %v1239_v0 = vpop.f32.mrb[27].mxu1 }
 0x12d   : > { %1124 = vst [vmem:[%s1472_s4 + $0x28] sm:$0xff] %v1068_v57   ;;  %v588_v1 = vadd.f32 %v1189_v59, %v1462_v50  ;;  %v652_v2 = vadd.f32 %v1237_v60, %v1462_v50  ;;  %v1192_v3 = vadd.f32 %v1191_v63, %v1190_v61  ;;  %v1240_v4 = vadd.f32 %v1239_v0, %v1238_v62 }
 0x12e   : > { %1132 = vst [vmem:[%s1472_s4 + $0x68] sm:$0xff] %v1108_v58  }
 0x12f   : > { %v591_v5 = vadd.f32 %v1192_v3, %v1462_v50  ;;  %v655_v6 = vadd.f32 %v1240_v4, %v1462_v50  ;;  %v678_v7 = vmax.f32 %v588_v1, 0.0  ;;  %v694_v8 = vmax.f32 %v652_v2, 0.0 }
 0x131   : > { %v679_v9 = vmax.f32 %v591_v5, 0.0  ;;  %v695_v10 = vmax.f32 %v655_v6, 0.0  ;;  %v1193_v11 = vpop.f32.mrb[28].mxu0  ;;  %v1241_v12 = vpop.f32.mrb[28].mxu1 }
 0x132   : > { %v1194_v13 = vpop.f32.mrb[29].mxu0  ;;  %v1242_v14 = vpop.f32.mrb[29].mxu1 }
 0x133   : > { %v1073_v15 = vpack.c.bf16 %v679_v9, %v678_v7  ;;  %v1113_v16 = vpack.c.bf16 %v695_v10, %v694_v8  ;;  %v1195_v17 = vadd.f32 %v1194_v13, %v1193_v11  ;;  %v1243_v18 = vadd.f32 %v1242_v14, %v1241_v12  ;;  %v1196_v19 = vpop.f32.mrb[30].mxu0  ;;  %v1244_v20 = vpop.f32.mrb[30].mxu1 }
 0x134   : > { %v1197_v21 = vpop.f32.mrb[31].mxu0  ;;  %v1245_v22 = vpop.f32.mrb[31].mxu1 }
 0x135   : > { %1125 = vst [vmem:[%s1472_s4 + $0x30] sm:$0xff] %v1073_v15   ;;  %1133 = vst [vmem:[%s1472_s4 + $0x70] sm:$0xff] %v1113_v16   ;;  %v596_v23 = vadd.f32 %v1195_v17, %v1462_v50  ;;  %v660_v24 = vadd.f32 %v1243_v18, %v1462_v50  ;;  %v1198_v25 = vadd.f32 %v1197_v21, %v1196_v19 }
 0x136   : > { %v1246_v26 = vadd.f32 %v1245_v22, %v1244_v20 }
 0x137   : > { %v599_v27 = vadd.f32 %v1198_v25, %v1462_v50  ;;  %v680_v29 = vmax.f32 %v596_v23, 0.0  ;;  %v696_v30 = vmax.f32 %v660_v24, 0.0 }
 0x138   : > { %v663_v28 = vadd.f32 %v1246_v26, %v1462_v50 }
 0x139   : > { %v681_v31 = vmax.f32 %v599_v27, 0.0 }
 0x13a   : > { %v697_v32 = vmax.f32 %v663_v28, 0.0 }
 0x13b   : > { %v1078_v33 = vpack.c.bf16 %v681_v31, %v680_v29 }
 0x13c   : > { %v1118_v34 = vpack.c.bf16 %v697_v32, %v696_v30 }
 0x13d   : > { %1126 = vst [vmem:[%s1472_s4 + $0x38] sm:$0xff] %v1078_v33  }
 0x13e   : > { %1134 = vst [vmem:[%s1472_s4 + $0x78] sm:$0xff] %v1118_v34  }
 0x13f PF: > { %s13_s12 = sadd.s32 1, %s1341_s12  }
 0x140   : > { %p10_p4 = scmp.ge.s32.totalorder %s13_s12, 9  }
 0x142   :  { %12 = sbr.rel (!%p10_p4) target bundleno = 1 (0x1), region = 62 }

// kernel: _lambda_.19
= control target key start
LH: loop header
LB: loop body
LE: loop exit
PB: predicated region body
PF: predicated region fallthrough
CT: control target
= control target key end

     0   :  { %s1363_s12 = smov 0   ;;  %s1521_s0 = inlined_call_operand.vmem [shape: bf16[512,256], index: 0, kind: input, shape index: {}]   ;;  %s1522_s1 = inlined_call_operand.vmem [shape: bf16[256,128], index: 1, kind: input, shape index: {}]   ;;  %s1523_s2 = inlined_call_operand.vmem [shape: f32[1,128], index: 2, kind: input, shape index: {}]   ;;  %s1524_s3 = inlined_call_operand.vmem [shape: bf16[512,128], index: 3, kind: output, shape index: {}]  }
   0x1 LB: > { %s914_s13 = sadd.s32 4294967295, %s1341_s12   ;;  %p918_p0 = scmp.ge.s32.totalorder %s1341_s12, 1  ;;  %s1341_s12 = sphi %s1363_s12, %s13_s12  }
   0x2   : > { %p139_p1 = scmp.lt.s32.totalorder %s1341_s12, 3 }
   0x4   : > { %p140_p2 = pnand %p918_p0, %p139_p1 }
   0x5   : > { %v1271_v0 = vld [vmem:[%s1522_s1 + $0x40] sm:$0xff] (!%p140_p2)   ;;  %s919_s16 = sshll.u32 (!%p140_p2), %s914_s13, 5  ;;  %v1273_v2 = vld [vmem:[%s1522_s1 + $0x48] sm:$0xff] (!%p140_p2)   ;;  %v1275_v4 = vld [vmem:[%s1522_s1 + $0x50] sm:$0xff] (!%p140_p2)  }
   0x6   : > { %143 = sbr.rel (%p140_p2) target bundleno = 319 (0x13f), region = 32  ;;  %v1272_v1 = vld [vmem:[%s1522_s1] sm:$0xff] (!%p140_p2)   ;;  %1135 = vmatprep.subr.bf16.mxu0 (!%p140_p2), %v1271_v0  ;;  %1247 = vmatprep.subr.bf16.mxu1 (!%p140_p2), %v1271_v0  ;;  %v1274_v3 = vld [vmem:[%s1522_s1 + $0x8] sm:$0xff] (!%p140_p2)   ;;  %p165_p3 = scmp.lt.s32.totalorder (!%p140_p2), %s919_s16, 63  ;;  %v1276_v5 = vld [vmem:[%s1522_s1 + $0x10] sm:$0xff] (!%p140_p2)  }
   0x7   : > { %1136 = vmatpush3.bf16.msra.mxu0 (!%p140_p2), %v1272_v1  ;;  %1255 = vmatpush3.bf16.msra.mxu1 (!%p140_p2), %v1272_v1  ;;  %v1277_v6 = vld [vmem:[%s1522_s1 + $0x58] sm:$0xff] (!%p140_p2)   ;;  %v1279_v8 = vld [vmem:[%s1522_s1 + $0x60] sm:$0xff] (!%p140_p2)   ;;  %v1281_v10 = vld [vmem:[%s1522_s1 + $0x68] sm:$0xff] (!%p140_p2)  }
   0x8   : > { %1137 = vmatprep.subr.bf16.mxu0 (!%p140_p2), %v1273_v2  ;;  %1248 = vmatprep.subr.bf16.mxu1 (!%p140_p2), %v1273_v2  ;;  %v1278_v7 = vld [vmem:[%s1522_s1 + $0x18] sm:$0xff] (!%p140_p2)   ;;  %v1280_v9 = vld [vmem:[%s1522_s1 + $0x20] sm:$0xff] (!%p140_p2)   ;;  %v1282_v13 = vld [vmem:[%s1522_s1 + $0x28] sm:$0xff] (!%p140_p2)  }
   0x9   : > { %v1283_v14 = vld [vmem:[%s1522_s1 + $0x70] sm:$0xff] (!%p140_p2)   ;;  %v1285_v16 = vld [vmem:[%s1522_s1 + $0x78] sm:$0xff] (!%p140_p2)   ;;  %v1462_v50 = vld [vmem:[%s1523_s2] ss:$0 sm:$0xff] (!%p140_p2) }
   0xa   : > { %v1284_v15 = vld [vmem:[%s1522_s1 + $0x30] sm:$0xff] (!%p140_p2)   ;;  %v1286_v17 = vld [vmem:[%s1522_s1 + $0x38] sm:$0xff] (!%p140_p2)  }
   0xb   : > { %1138 = vmatpush3.bf16.msra.mxu0 (!%p140_p2), %v1274_v3  ;;  %1256 = vmatpush3.bf16.msra.mxu1 (!%p140_p2), %v1274_v3 }
   0xc   : > { %1139 = vmatprep.subr.bf16.mxu0 (!%p140_p2), %v1275_v4  ;;  %1249 = vmatprep.subr.bf16.mxu1 (!%p140_p2), %v1275_v4 }
   0xd   : > { %s1526_s16 = smov (!%p165_p3, %s919_s16), 63 }
   0xe   : > { %s1007_s4 = sshll.u32 %s1526_s16, 3  ;;  %s923_s28 = sshll.u32 %s1526_s16, 2 }
   0xf   : > { %1140 = vmatpush3.bf16.msra.mxu0 %v1276_v5  ;;  %1257 = vmatpush3.bf16.msra.mxu1 %v1276_v5  ;;  %s1404_s9 = scalar_lea.vmem %s1521_s0, %s1007_s4  ;;  %s1472_s4 = scalar_lea.vmem %s1524_s3, %s923_s28 }
  0x10   : > { %1141 = vmatprep.subr.bf16.mxu0 %v1277_v6  ;;  %1250 = vmatprep.subr.bf16.mxu1 %v1277_v6  ;;  %v1289_v11 = vld [vmem:[%s1404_s9 + $0x4] ss:$8 sps:$4 sm:$0xff]   ;;  %v1287_v18 = vld [vmem:[%s1404_s9] ss:$8 sps:$4 sm:$0xff]   ;;  %v1293_v20 = vld [vmem:[%s1404_s9 + $0x14] ss:$8 sps:$4 sm:$0xff]  }
  0x11   : > { %v1292_v12 = vld [vmem:[%s1404_s9 + $0x84] ss:$8 sps:$4 sm:$0xff]   ;;  %537 = vmatprep.mubr.bf16.mxu0 %v1289_v11  ;;  %v1290_v19 = vld [vmem:[%s1404_s9 + $0x80] ss:$8 sps:$4 sm:$0xff]   ;;  %v1295_v21 = vld [vmem:[%s1404_s9 + $0x94] ss:$8 sps:$4 sm:$0xff]  }
  0x12   : > { %601 = vmatprep.mubr.bf16.mxu1 %v1292_v12  ;;  %v1297_v22 = vld [vmem:[%s1404_s9 + $0x10] ss:$8 sps:$4 sm:$0xff]   ;;  %v1299_v24 = vld [vmem:[%s1404_s9 + $0x24] ss:$8 sps:$4 sm:$0xff]   ;;  %v1303_v26 = vld [vmem:[%s1404_s9 + $0x20] ss:$8 sps:$4 sm:$0xff]  }
  0x13   : > { %1142 = vmatpush3.bf16.msra.mxu0 %v1278_v7  ;;  %1258 = vmatpush3.bf16.msra.mxu1 %v1278_v7  ;;  %v1298_v23 = vld [vmem:[%s1404_s9 + $0x90] ss:$8 sps:$4 sm:$0xff]   ;;  %v1301_v25 = vld [vmem:[%s1404_s9 + $0xa4] ss:$8 sps:$4 sm:$0xff]   ;;  %v1304_v27 = vld [vmem:[%s1404_s9 + $0xa0] ss:$8 sps:$4 sm:$0xff]  }
  0x14   : > { %1143 = vmatprep.subr.bf16.mxu0 %v1279_v8  ;;  %1251 = vmatprep.subr.bf16.mxu1 %v1279_v8  ;;  %v1305_v28 = vld [vmem:[%s1404_s9 + $0x34] ss:$8 sps:$4 sm:$0xff]   ;;  %v1309_v30 = vld [vmem:[%s1404_s9 + $0x30] ss:$8 sps:$4 sm:$0xff]   ;;  %v1311_v32 = vld [vmem:[%s1404_s9 + $0x44] ss:$8 sps:$4 sm:$0xff]  }
  0x15   : > { %v1307_v29 = vld [vmem:[%s1404_s9 + $0xb4] ss:$8 sps:$4 sm:$0xff]   ;;  %v1310_v31 = vld [vmem:[%s1404_s9 + $0xb0] ss:$8 sps:$4 sm:$0xff]   ;;  %v1313_v33 = vld [vmem:[%s1404_s9 + $0xc4] ss:$8 sps:$4 sm:$0xff]  }
  0x16   : > { %v1315_v34 = vld [vmem:[%s1404_s9 + $0x40] ss:$8 sps:$4 sm:$0xff]   ;;  %v1317_v36 = vld [vmem:[%s1404_s9 + $0x54] ss:$8 sps:$4 sm:$0xff]   ;;  %v1321_v38 = vld [vmem:[%s1404_s9 + $0x50] ss:$8 sps:$4 sm:$0xff]  }
  0x17   : > { %1144 = vmatpush3.bf16.msra.mxu0 %v1280_v9  ;;  %1259 = vmatpush3.bf16.msra.mxu1 %v1280_v9  ;;  %v1316_v35 = vld [vmem:[%s1404_s9 + $0xc0] ss:$8 sps:$4 sm:$0xff]   ;;  %v1319_v37 = vld [vmem:[%s1404_s9 + $0xd4] ss:$8 sps:$4 sm:$0xff]   ;;  %v1322_v39 = vld [vmem:[%s1404_s9 + $0xd0] ss:$8 sps:$4 sm:$0xff]  }
  0x18   : > { %1145 = vmatprep.subr.bf16.mxu0 %v1281_v10  ;;  %1252 = vmatprep.subr.bf16.mxu1 %v1281_v10  ;;  %v1323_v40 = vld [vmem:[%s1404_s9 + $0x64] ss:$8 sps:$4 sm:$0xff]   ;;  %v1327_v42 = vld [vmem:[%s1404_s9 + $0x60] ss:$8 sps:$4 sm:$0xff]   ;;  %v1329_v44 = vld [vmem:[%s1404_s9 + $0x74] ss:$8 sps:$4 sm:$0xff]  }
  0x19   : > { %v1325_v41 = vld [vmem:[%s1404_s9 + $0xe4] ss:$8 sps:$4 sm:$0xff]   ;;  %v1328_v43 = vld [vmem:[%s1404_s9 + $0xe0] ss:$8 sps:$4 sm:$0xff]   ;;  %v1331_v45 = vld [vmem:[%s1404_s9 + $0xf4] ss:$8 sps:$4 sm:$0xff]  }
  0x1a   : > { %v1333_v46 = vld [vmem:[%s1404_s9 + $0x70] ss:$8 sps:$4 sm:$0xff]  }
  0x1b   : > { %1146 = vmatpush3.bf16.msra.mxu0 %v1282_v13  ;;  %1260 = vmatpush3.bf16.msra.mxu1 %v1282_v13  ;;  %v1334_v47 = vld [vmem:[%s1404_s9 + $0xf0] ss:$8 sps:$4 sm:$0xff]  }
  0x1c   : > { %1147 = vmatprep.subr.bf16.mxu0 %v1283_v14  ;;  %1253 = vmatprep.subr.bf16.mxu1 %v1283_v14 }
  0x1f   : > { %1148 = vmatpush3.bf16.msra.mxu0 %v1284_v15  ;;  %1261 = vmatpush3.bf16.msra.mxu1 %v1284_v15 }
  0x20   : > { %1149 = vmatprep.subr.bf16.mxu0 %v1285_v16  ;;  %1254 = vmatprep.subr.bf16.mxu1 %v1285_v16 }
  0x23   : > { %1150 = vmatpush3.bf16.msra.mxu0 %v1286_v17  ;;  %1262 = vmatpush3.bf16.msra.mxu1 %v1286_v17 }
  0x26   : > { %538 = vmatmul.mubr.bf16.vlgmr.msra.gmra.mrb[0].mxu0 %v1287_v18  ;;  %602 = vmatmul.mubr.bf16.vlgmr.msra.gmra.mrb[0].mxu1 %v1290_v19 }
  0x27   : > { %545 = vmatprep.mubr.bf16.mxu0 %v1293_v20  ;;  %609 = vmatprep.mubr.bf16.mxu1 %v1295_v21 }
  0x2e   : > { %546 = vmatmul.mubr.bf16.gmra.mrb[4].mxu0 %v1297_v22  ;;  %610 = vmatmul.mubr.bf16.gmra.mrb[4].mxu1 %v1298_v23 }
  0x2f   : > { %553 = vmatprep.mubr.bf16.mxu0 %v1299_v24  ;;  %617 = vmatprep.mubr.bf16.mxu1 %v1301_v25 }
  0x36   : > { %554 = vmatmul.mubr.bf16.gmra.mrb[8].mxu0 %v1303_v26  ;;  %618 = vmatmul.mubr.bf16.gmra.mrb[8].mxu1 %v1304_v27 }
  0x37   : > { %561 = vmatprep.mubr.bf16.mxu0 %v1305_v28  ;;  %625 = vmatprep.mubr.bf16.mxu1 %v1307_v29 }
  0x3e   : > { %562 = vmatmul.mubr.bf16.gmra.mrb[12].mxu0 %v1309_v30  ;;  %626 = vmatmul.mubr.bf16.gmra.mrb[12].mxu1 %v1310_v31 }
  0x3f   : > { %569 = vmatprep.mubr.bf16.mxu0 %v1311_v32  ;;  %633 = vmatprep.mubr.bf16.mxu1 %v1313_v33 }
  0x46   : > { %570 = vmatmul.mubr.bf16.gmra.mrb[16].mxu0 %v1315_v34  ;;  %634 = vmatmul.mubr.bf16.gmra.mrb[16].mxu1 %v1316_v35 }
  0x47   : > { %577 = vmatprep.mubr.bf16.mxu0 %v1317_v36  ;;  %641 = vmatprep.mubr.bf16.mxu1 %v1319_v37 }
  0x4e   : > { %578 = vmatmul.mubr.bf16.gmra.mrb[20].mxu0 %v1321_v38  ;;  %642 = vmatmul.mubr.bf16.gmra.mrb[20].mxu1 %v1322_v39 }
  0x4f   : > { %585 = vmatprep.mubr.bf16.mxu0 %v1323_v40  ;;  %649 = vmatprep.mubr.bf16.mxu1 %v1325_v41 }
  0x56   : > { %586 = vmatmul.mubr.bf16.gmra.mrb[24].mxu0 %v1327_v42  ;;  %650 = vmatmul.mubr.bf16.gmra.mrb[24].mxu1 %v1328_v43 }
  0x57   : > { %593 = vmatprep.mubr.bf16.mxu0 %v1329_v44  ;;  %657 = vmatprep.mubr.bf16.mxu1 %v1331_v45 }
  0x5e   : > { %594 = vmatmul.mubr.bf16.gmra.mrb[28].mxu0 %v1333_v46  ;;  %658 = vmatmul.mubr.bf16.gmra.mrb[28].mxu1 %v1334_v47 }
  0xf9   : > { %v1151_v48 = vpop.f32.mrb[0].mxu0  ;;  %v1199_v49 = vpop.f32.mrb[0].mxu1 }
  0xfa   : > { %v1152_v51 = vpop.f32.mrb[1].mxu0  ;;  %v1200_v52 = vpop.f32.mrb[1].mxu1 }
  0xfb   : > { %v1153_v53 = vadd.f32 %v1152_v51, %v1151_v48  ;;  %v1201_v54 = vadd.f32 %v1200_v52, %v1199_v49  ;;  %v1154_v55 = vpop.f32.mrb[2].mxu0  ;;  %v1202_v56 = vpop.f32.mrb[2].mxu1 }
  0xfc   : > { %v1155_v57 = vpop.f32.mrb[3].mxu0  ;;  %v1203_v58 = vpop.f32.mrb[3].mxu1 }
  0xfd   : > { %v540_v59 = vadd.f32 %v1153_v53, %v1462_v50  ;;  %v604_v60 = vadd.f32 %v1201_v54, %v1462_v50  ;;  %v1156_v61 = vadd.f32 %v1155_v57, %v1154_v55  ;;  %v1204_v62 = vadd.f32 %v1203_v58, %v1202_v56 }
  0xff   : > { %v543_v63 = vadd.f32 %v1156_v61, %v1462_v50  ;;  %v607_v0 = vadd.f32 %v1204_v62, %v1462_v50  ;;  %v666_v1 = vmax.f32 %v540_v59, 0.0  ;;  %v682_v2 = vmax.f32 %v604_v60, 0.0 }
 0x101   : > { %v667_v3 = vmax.f32 %v543_v63, 0.0  ;;  %v683_v4 = vmax.f32 %v607_v0, 0.0  ;;  %v1157_v5 = vpop.f32.mrb[4].mxu0  ;;  %v1205_v6 = vpop.f32.mrb[4].mxu1 }
 0x102   : > { %v1158_v7 = vpop.f32.mrb[5].mxu0  ;;  %v1206_v8 = vpop.f32.mrb[5].mxu1 }
 0x103   : > { %v1043_v9 = vpack.c.bf16 %v667_v3, %v666_v1  ;;  %v1083_v10 = vpack.c.bf16 %v683_v4, %v682_v2  ;;  %v1159_v11 = vadd.f32 %v1158_v7, %v1157_v5  ;;  %v1207_v12 = vadd.f32 %v1206_v8, %v1205_v6  ;;  %v1160_v13 = vpop.f32.mrb[6].mxu0  ;;  %v1208_v14 = vpop.f32.mrb[6].mxu1 }
 0x104   : > { %v1161_v15 = vpop.f32.mrb[7].mxu0  ;;  %v1209_v16 = vpop.f32.mrb[7].mxu1 }
 0x105   : > { %1044 = vst [vmem:[%s1472_s4] sm:$0xff] %v1043_v9   ;;  %1127 = vst [vmem:[%s1472_s4 + $0x40] sm:$0xff] %v1083_v10   ;;  %v548_v17 = vadd.f32 %v1159_v11, %v1462_v50  ;;  %v612_v18 = vadd.f32 %v1207_v12, %v1462_v50  ;;  %v1162_v19 = vadd.f32 %v1161_v15, %v1160_v13 }
 0x106   : > { %v1210_v20 = vadd.f32 %v1209_v16, %v1208_v14 }
 0x107   : > { %v551_v21 = vadd.f32 %v1162_v19, %v1462_v50  ;;  %v668_v23 = vmax.f32 %v548_v17, 0.0  ;;  %v684_v24 = vmax.f32 %v612_v18, 0.0 }
 0x108   : > { %v615_v22 = vadd.f32 %v1210_v20, %v1462_v50 }
 0x109   : > { %v669_v25 = vmax.f32 %v551_v21, 0.0  ;;  %v1163_v27 = vpop.f32.mrb[8].mxu0  ;;  %v1211_v28 = vpop.f32.mrb[8].mxu1 }
 0x10a   : > { %v685_v26 = vmax.f32 %v615_v22, 0.0  ;;  %v1164_v29 = vpop.f32.mrb[9].mxu0  ;;  %v1212_v30 = vpop.f32.mrb[9].mxu1 }
 0x10b   : > { %v1048_v31 = vpack.c.bf16 %v669_v25, %v668_v23  ;;  %v1165_v33 = vadd.f32 %v1164_v29, %v1163_v27  ;;  %v1213_v34 = vadd.f32 %v1212_v30, %v1211_v28  ;;  %v1166_v35 = vpop.f32.mrb[10].mxu0  ;;  %v1214_v36 = vpop.f32.mrb[10].mxu1 }
 0x10c   : > { %v1088_v32 = vpack.c.bf16 %v685_v26, %v684_v24  ;;  %v1167_v37 = vpop.f32.mrb[11].mxu0  ;;  %v1215_v38 = vpop.f32.mrb[11].mxu1 }
 0x10d   : > { %1120 = vst [vmem:[%s1472_s4 + $0x8] sm:$0xff] %v1048_v31   ;;  %v556_v39 = vadd.f32 %v1165_v33, %v1462_v50  ;;  %v620_v40 = vadd.f32 %v1213_v34, %v1462_v50  ;;  %v1168_v41 = vadd.f32 %v1167_v37, %v1166_v35  ;;  %v1216_v42 = vadd.f32 %v1215_v38, %v1214_v36 }
 0x10e   : > { %1128 = vst [vmem:[%s1472_s4 + $0x48] sm:$0xff] %v1088_v32  }
 0x10f   : > { %v559_v43 = vadd.f32 %v1168_v41, %v1462_v50  ;;  %v623_v44 = vadd.f32 %v1216_v42, %v1462_v50  ;;  %v670_v45 = vmax.f32 %v556_v39, 0.0  ;;  %v686_v46 = vmax.f32 %v620_v40, 0.0 }
 0x111   : > { %v671_v47 = vmax.f32 %v559_v43, 0.0  ;;  %v687_v48 = vmax.f32 %v623_v44, 0.0  ;;  %v1169_v49 = vpop.f32.mrb[12].mxu0  ;;  %v1217_v51 = vpop.f32.mrb[12].mxu1 }
 0x112   : > { %v1170_v52 = vpop.f32.mrb[13].mxu0  ;;  %v1218_v53 = vpop.f32.mrb[13].mxu1 }
 0x113   : > { %v1053_v54 = vpack.c.bf16 %v671_v47, %v670_v45  ;;  %v1093_v55 = vpack.c.bf16 %v687_v48, %v686_v46  ;;  %v1171_v56 = vadd.f32 %v1170_v52, %v1169_v49  ;;  %v1219_v57 = vadd.f32 %v1218_v53, %v1217_v51  ;;  %v1172_v58 = vpop.f32.mrb[14].mxu0  ;;  %v1220_v59 = vpop.f32.mrb[14].mxu1 }
 0x114   : > { %v1173_v60 = vpop.f32.mrb[15].mxu0  ;;  %v1221_v61 = vpop.f32.mrb[15].mxu1 }
 0x115   : > { %1121 = vst [vmem:[%s1472_s4 + $0x10] sm:$0xff] %v1053_v54   ;;  %1129 = vst [vmem:[%s1472_s4 + $0x50] sm:$0xff] %v1093_v55   ;;  %v564_v62 = vadd.f32 %v1171_v56, %v1462_v50  ;;  %v628_v63 = vadd.f32 %v1219_v57, %v1462_v50  ;;  %v1174_v0 = vadd.f32 %v1173_v60, %v1172_v58 }
 0x116   : > { %v1222_v1 = vadd.f32 %v1221_v61, %v1220_v59 }
 0x117   : > { %v567_v2 = vadd.f32 %v1174_v0, %v1462_v50  ;;  %v672_v4 = vmax.f32 %v564_v62, 0.0  ;;  %v688_v5 = vmax.f32 %v628_v63, 0.0 }
 0x118   : > { %v631_v3 = vadd.f32 %v1222_v1, %v1462_v50 }
 0x119   : > { %v673_v6 = vmax.f32 %v567_v2, 0.0  ;;  %v1175_v8 = vpop.f32.mrb[16].mxu0  ;;  %v1223_v9 = vpop.f32.mrb[16].mxu1 }
 0x11a   : > { %v689_v7 = vmax.f32 %v631_v3, 0.0  ;;  %v1176_v10 = vpop.f32.mrb[17].mxu0  ;;  %v1224_v11 = vpop.f32.mrb[17].mxu1 }
 0x11b   : > { %v1058_v12 = vpack.c.bf16 %v673_v6, %v672_v4  ;;  %v1177_v14 = vadd.f32 %v1176_v10, %v1175_v8  ;;  %v1225_v15 = vadd.f32 %v1224_v11, %v1223_v9  ;;  %v1178_v16 = vpop.f32.mrb[18].mxu0  ;;  %v1226_v17 = vpop.f32.mrb[18].mxu1 }
 0x11c   : > { %v1098_v13 = vpack.c.bf16 %v689_v7, %v688_v5  ;;  %v1179_v18 = vpop.f32.mrb[19].mxu0  ;;  %v1227_v19 = vpop.f32.mrb[19].mxu1 }
 0x11d   : > { %1122 = vst [vmem:[%s1472_s4 + $0x18] sm:$0xff] %v1058_v12   ;;  %v572_v20 = vadd.f32 %v1177_v14, %v1462_v50  ;;  %v636_v21 = vadd.f32 %v1225_v15, %v1462_v50  ;;  %v1180_v22 = vadd.f32 %v1179_v18, %v1178_v16  ;;  %v1228_v23 = vadd.f32 %v1227_v19, %v1226_v17 }
 0x11e   : > { %1130 = vst [vmem:[%s1472_s4 + $0x58] sm:$0xff] %v1098_v13  }
 0x11f   : > { %v575_v24 = vadd.f32 %v1180_v22, %v1462_v50  ;;  %v639_v25 = vadd.f32 %v1228_v23, %v1462_v50  ;;  %v674_v26 = vmax.f32 %v572_v20, 0.0  ;;  %v690_v27 = vmax.f32 %v636_v21, 0.0 }
 0x121   : > { %v675_v28 = vmax.f32 %v575_v24, 0.0  ;;  %v691_v29 = vmax.f32 %v639_v25, 0.0  ;;  %v1181_v30 = vpop.f32.mrb[20].mxu0  ;;  %v1229_v31 = vpop.f32.mrb[20].mxu1 }
 0x122   : > { %v1182_v32 = vpop.f32.mrb[21].mxu0  ;;  %v1230_v33 = vpop.f32.mrb[21].mxu1 }
 0x123   : > { %v1063_v34 = vpack.c.bf16 %v675_v28, %v674_v26  ;;  %v1103_v35 = vpack.c.bf16 %v691_v29, %v690_v27  ;;  %v1183_v36 = vadd.f32 %v1182_v32, %v1181_v30  ;;  %v1231_v37 = vadd.f32 %v1230_v33, %v1229_v31  ;;  %v1184_v38 = vpop.f32.mrb[22].mxu0  ;;  %v1232_v39 = vpop.f32.mrb[22].mxu1 }
 0x124   : > { %v1185_v40 = vpop.f32.mrb[23].mxu0  ;;  %v1233_v41 = vpop.f32.mrb[23].mxu1 }
 0x125   : > { %1123 = vst [vmem:[%s1472_s4 + $0x20] sm:$0xff] %v1063_v34   ;;  %1131 = vst [vmem:[%s1472_s4 + $0x60] sm:$0xff] %v1103_v35   ;;  %v580_v42 = vadd.f32 %v1183_v36, %v1462_v50  ;;  %v644_v43 = vadd.f32 %v1231_v37, %v1462_v50  ;;  %v1186_v44 = vadd.f32 %v1185_v40, %v1184_v38 }
 0x126   : > { %v1234_v45 = vadd.f32 %v1233_v41, %v1232_v39 }
 0x127   : > { %v583_v46 = vadd.f32 %v1186_v44, %v1462_v50  ;;  %v676_v48 = vmax.f32 %v580_v42, 0.0  ;;  %v692_v49 = vmax.f32 %v644_v43, 0.0 }
 0x128   : > { %v647_v47 = vadd.f32 %v1234_v45, %v1462_v50 }
 0x129   : > { %v677_v51 = vmax.f32 %v583_v46, 0.0  ;;  %v1187_v53 = vpop.f32.mrb[24].mxu0  ;;  %v1235_v54 = vpop.f32.mrb[24].mxu1 }
 0x12a   : > { %v693_v52 = vmax.f32 %v647_v47, 0.0  ;;  %v1188_v55 = vpop.f32.mrb[25].mxu0  ;;  %v1236_v56 = vpop.f32.mrb[25].mxu1 }
 0x12b   : > { %v1068_v57 = vpack.c.bf16 %v677_v51, %v676_v48  ;;  %v1189_v59 = vadd.f32 %v1188_v55, %v1187_v53  ;;  %v1237_v60 = vadd.f32 %v1236_v56, %v1235_v54  ;;  %v1190_v61 = vpop.f32.mrb[26].mxu0  ;;  %v1238_v62 = vpop.f32.mrb[26].mxu1 }
 0x12c   : > { %v1108_v58 = vpack.c.bf16 %v693_v52, %v692_v49  ;;  %v1191_v63 = vpop.f32.mrb[27].mxu0  ;;  %v1239_v0 = vpop.f32.mrb[27].mxu1 }
 0x12d   : > { %1124 = vst [vmem:[%s1472_s4 + $0x28] sm:$0xff] %v1068_v57   ;;  %v588_v1 = vadd.f32 %v1189_v59, %v1462_v50  ;;  %v652_v2 = vadd.f32 %v1237_v60, %v1462_v50  ;;  %v1192_v3 = vadd.f32 %v1191_v63, %v1190_v61  ;;  %v1240_v4 = vadd.f32 %v1239_v0, %v1238_v62 }
 0x12e   : > { %1132 = vst [vmem:[%s1472_s4 + $0x68] sm:$0xff] %v1108_v58  }
 0x12f   : > { %v591_v5 = vadd.f32 %v1192_v3, %v1462_v50  ;;  %v655_v6 = vadd.f32 %v1240_v4, %v1462_v50  ;;  %v678_v7 = vmax.f32 %v588_v1, 0.0  ;;  %v694_v8 = vmax.f32 %v652_v2, 0.0 }
 0x131   : > { %v679_v9 = vmax.f32 %v591_v5, 0.0  ;;  %v695_v10 = vmax.f32 %v655_v6, 0.0  ;;  %v1193_v11 = vpop.f32.mrb[28].mxu0  ;;  %v1241_v12 = vpop.f32.mrb[28].mxu1 }
 0x132   : > { %v1194_v13 = vpop.f32.mrb[29].mxu0  ;;  %v1242_v14 = vpop.f32.mrb[29].mxu1 }
 0x133   : > { %v1073_v15 = vpack.c.bf16 %v679_v9, %v678_v7  ;;  %v1113_v16 = vpack.c.bf16 %v695_v10, %v694_v8  ;;  %v1195_v17 = vadd.f32 %v1194_v13, %v1193_v11  ;;  %v1243_v18 = vadd.f32 %v1242_v14, %v1241_v12  ;;  %v1196_v19 = vpop.f32.mrb[30].mxu0  ;;  %v1244_v20 = vpop.f32.mrb[30].mxu1 }
 0x134   : > { %v1197_v21 = vpop.f32.mrb[31].mxu0  ;;  %v1245_v22 = vpop.f32.mrb[31].mxu1 }
 0x135   : > { %1125 = vst [vmem:[%s1472_s4 + $0x30] sm:$0xff] %v1073_v15   ;;  %1133 = vst [vmem:[%s1472_s4 + $0x70] sm:$0xff] %v1113_v16   ;;  %v596_v23 = vadd.f32 %v1195_v17, %v1462_v50  ;;  %v660_v24 = vadd.f32 %v1243_v18, %v1462_v50  ;;  %v1198_v25 = vadd.f32 %v1197_v21, %v1196_v19 }
 0x136   : > { %v1246_v26 = vadd.f32 %v1245_v22, %v1244_v20 }
 0x137   : > { %v599_v27 = vadd.f32 %v1198_v25, %v1462_v50  ;;  %v680_v29 = vmax.f32 %v596_v23, 0.0  ;;  %v696_v30 = vmax.f32 %v660_v24, 0.0 }
 0x138   : > { %v663_v28 = vadd.f32 %v1246_v26, %v1462_v50 }
 0x139   : > { %v681_v31 = vmax.f32 %v599_v27, 0.0 }
 0x13a   : > { %v697_v32 = vmax.f32 %v663_v28, 0.0 }
 0x13b   : > { %v1078_v33 = vpack.c.bf16 %v681_v31, %v680_v29 }
 0x13c   : > { %v1118_v34 = vpack.c.bf16 %v697_v32, %v696_v30 }
 0x13d   : > { %1126 = vst [vmem:[%s1472_s4 + $0x38] sm:$0xff] %v1078_v33  }
 0x13e   : > { %1134 = vst [vmem:[%s1472_s4 + $0x78] sm:$0xff] %v1118_v34  }
 0x13f PF: > { %s13_s12 = sadd.s32 1, %s1341_s12  }
 0x140   : > { %p10_p4 = scmp.ge.s32.totalorder %s13_s12, 4  }
 0x142   :  { %12 = sbr.rel (!%p10_p4) target bundleno = 1 (0x1), region = 62 }

// kernel: _lambda_.21
= control target key start
LH: loop header
LB: loop body
LE: loop exit
PB: predicated region body
PF: predicated region fallthrough
CT: control target
= control target key end

     0   :  { %s431_s12 = smov 0   ;;  %s461_s0 = inlined_call_operand.vmem [shape: bf16[128,128], index: 0, kind: input, shape index: {}]   ;;  %s462_s1 = inlined_call_operand.vmem [shape: f32[1,128], index: 1, kind: input, shape index: {}]   ;;  %s463_s2 = inlined_call_operand.vmem [shape: f32[1,128], index: 2, kind: input, shape index: {}]   ;;  %s464_s3 = inlined_call_operand.vmem [shape: bf16[128,128], index: 3, kind: output, shape index: {}]  }
   0x1 LB: > { %s324_s13 = sadd.s32 4294967295, %s409_s12   ;;  %p328_p0 = scmp.ge.s32.totalorder %s409_s12, 1  ;;  %s409_s12 = sphi %s431_s12, %s13_s12  }
   0x2   : > { %p138_p1 = scmp.lt.s32.totalorder %s409_s12, 3 }
   0x4   : > { %p139_p2 = pnand %p328_p0, %p138_p1 }
   0x5   : > { %s329_s14 = sshll.u32 (!%p139_p2), %s324_s13, 3  ;;  %v333_v0 = vld [vmem:[%s462_s1] ss:$0 sm:$0xff] (!%p139_p2) }
   0x6   : > { %142 = sbr.rel (%p139_p2) target bundleno = 29 (0x1d), region = 32  ;;  %p163_p3 = scmp.lt.s32.totalorder (!%p139_p2), %s329_s14, 15  ;;  %v334_v9 = vld [vmem:[%s463_s2] ss:$0 sm:$0xff] (!%p139_p2) }
   0xd   : > { %s466_s14 = smov (!%p163_p3, %s329_s14), 15 }
   0xe   : > { %s330_s15 = sshll.u32 %s466_s14, 2 }
   0xf   : > { %s166_s18 = scalar_lea.vmem %s461_s0, %s330_s15  ;;  %s172_s25 = scalar_lea.vmem %s464_s3, %s330_s15 }
  0x10   : > { %v354_v1 = vld [vmem:[%s166_s18] sm:$0xff]   ;;  %v389_v2 = vld [vmem:[%s166_s18 + $0x8] sm:$0xff]   ;;  %v390_v3 = vld [vmem:[%s166_s18 + $0x10] sm:$0xff]  }
  0x11   : > { %v355_v4 = vunpack.c.l.bf16 %v354_v1  ;;  %v356_v5 = vunpack.c.h.bf16 %v354_v1  ;;  %v359_v6 = vunpack.c.l.bf16 %v389_v2  ;;  %v360_v7 = vunpack.c.h.bf16 %v389_v2  ;;  %v391_v8 = vld [vmem:[%s166_s18 + $0x18] sm:$0xff]  }
  0x12   : > { %v363_v10 = vunpack.c.l.bf16 %v390_v3  ;;  %v364_v11 = vunpack.c.h.bf16 %v390_v3  ;;  %v367_v12 = vunpack.c.l.bf16 %v391_v8  ;;  %v368_v13 = vunpack.c.h.bf16 %v391_v8 }
  0x13   : > { %v197_v14 = vmul.f32 %v355_v4, %v333_v0  ;;  %v198_v15 = vmul.f32 %v356_v5, %v333_v0  ;;  %v199_v16 = vmul.f32 %v359_v6, %v333_v0  ;;  %v200_v17 = vmul.f32 %v360_v7, %v333_v0 }
  0x14   : > { %v201_v18 = vmul.f32 %v363_v10, %v333_v0  ;;  %v202_v19 = vmul.f32 %v364_v11, %v333_v0  ;;  %v203_v20 = vmul.f32 %v367_v12, %v333_v0  ;;  %v204_v21 = vmul.f32 %v368_v13, %v333_v0 }
  0x15   : > { %v212_v22 = vadd.f32 %v334_v9, %v197_v14  ;;  %v213_v23 = vadd.f32 %v334_v9, %v198_v15  ;;  %v214_v24 = vadd.f32 %v334_v9, %v199_v16  ;;  %v215_v25 = vadd.f32 %v334_v9, %v200_v17 }
  0x16   : > { %v216_v26 = vadd.f32 %v334_v9, %v201_v18  ;;  %v217_v27 = vadd.f32 %v334_v9, %v202_v19  ;;  %v218_v28 = vadd.f32 %v334_v9, %v203_v20  ;;  %v219_v29 = vadd.f32 %v334_v9, %v204_v21 }
  0x17   : > { %v220_v30 = vmax.f32 %v212_v22, 0.0  ;;  %v221_v31 = vmax.f32 %v213_v23, 0.0  ;;  %v222_v32 = vmax.f32 %v214_v24, 0.0  ;;  %v223_v33 = vmax.f32 %v215_v25, 0.0 }
  0x18   : > { %v224_v34 = vmax.f32 %v216_v26, 0.0  ;;  %v225_v35 = vmax.f32 %v217_v27, 0.0  ;;  %v226_v36 = vmax.f32 %v218_v28, 0.0  ;;  %v227_v37 = vmax.f32 %v219_v29, 0.0 }
  0x19   : > { %v372_v38 = vpack.c.bf16 %v221_v31, %v220_v30  ;;  %v377_v39 = vpack.c.bf16 %v223_v33, %v222_v32 }
  0x1a   : > { %v382_v40 = vpack.c.bf16 %v225_v35, %v224_v34  ;;  %v387_v41 = vpack.c.bf16 %v227_v37, %v226_v36 }
  0x1b   : > { %373 = vst [vmem:[%s172_s25] sm:$0xff] %v372_v38   ;;  %392 = vst [vmem:[%s172_s25 + $0x8] sm:$0xff] %v377_v39  }
  0x1c   : > { %393 = vst [vmem:[%s172_s25 + $0x10] sm:$0xff] %v382_v40   ;;  %394 = vst [vmem:[%s172_s25 + $0x18] sm:$0xff] %v387_v41  }
  0x1d PF: > { %s13_s12 = sadd.s32 1, %s409_s12  }
  0x1e   : > { %p10_p4 = scmp.ge.s32.totalorder %s13_s12, 4  }
  0x20   :  { %12 = sbr.rel (!%p10_p4) target bundleno = 1 (0x1), region = 62 }

// kernel: _lambda_.20
= control target key start
LH: loop header
LB: loop body
LE: loop exit
PB: predicated region body
PF: predicated region fallthrough
CT: control target
= control target key end

     0   :  { %s1399_s15 = smov 0   ;;  %s1573_s0 = inlined_call_operand.vmem [shape: bf16[128,640], index: 0, kind: input, shape index: {}]   ;;  %s1574_s1 = inlined_call_operand.vmem [shape: bf16[640,128], index: 1, kind: input, shape index: {}]   ;;  %s1575_s2 = inlined_call_operand.vmem [shape: bf16[128,128], index: 2, kind: output, shape index: {0}]   ;;  %s1576_s3 = inlined_call_operand.vmem [shape: f32[2,1,128], index: 3, kind: output, shape index: {1}]   ;;  %s1577_s4 = inlined_call_operand.vmem [shape: f32[2,1,128], index: 4, kind: output, shape index: {2}]  }
   0x1 LB: > { %s1405_s16 = sadd.s32 4294967295, %s1372_s15   ;;  %p1051_p0 = scmp.ge.s32.totalorder %s1372_s15, 1  ;;  %s1372_s15 = sphi %s1399_s15, %s15_s15  }
   0x2   : > { %p169_p1 = scmp.lt.s32.totalorder %s1372_s15, 3 }
   0x4   : > { %p170_p2 = pnand %p1051_p0, %p169_p1 }
   0x5   : > { %v1298_v0 = vld [vmem:[%s1574_s1 + $0x40] sm:$0xff] (!%p170_p2)   ;;  %v1302_v4 = vld [vmem:[%s1574_s1 + $0x48] sm:$0xff] (!%p170_p2)   ;;  %v1306_v8 = vld [vmem:[%s1574_s1 + $0x50] sm:$0xff] (!%p170_p2)   ;;  %s1052_s23 = sshll.u32 (!%p170_p2), %s1405_s16, 3  ;;  %p215_p4 = scmp.lt.s32.totalorder (!%p170_p2), %s1405_s16, 1 }
   0x6   : > { %173 = sbr.rel (%p170_p2) target bundleno = 318 (0x13e), region = 28  ;;  %v1299_v1 = vld [vmem:[%s1574_s1 + $0xc0] sm:$0xff] (!%p170_p2)   ;;  %1157 = vmatprep.subr.bf16.mxu0 (!%p170_p2), %v1298_v0  ;;  %v1303_v5 = vld [vmem:[%s1574_s1 + $0xc8] sm:$0xff] (!%p170_p2)   ;;  %v1307_v9 = vld [vmem:[%s1574_s1 + $0xd0] sm:$0xff] (!%p170_p2)   ;;  %p203_p3 = scmp.lt.s32.totalorder (!%p170_p2), %s1052_s23, 15 }
   0x7   : > { %v1300_v2 = vld [vmem:[%s1574_s1] sm:$0xff] (!%p170_p2)   ;;  %1197 = vmatprep.subr.bf16.mxu1 (!%p170_p2), %v1299_v1  ;;  %v1304_v6 = vld [vmem:[%s1574_s1 + $0x8] sm:$0xff] (!%p170_p2)   ;;  %v1308_v10 = vld [vmem:[%s1574_s1 + $0x10] sm:$0xff] (!%p170_p2)  }
   0x8   : > { %v1301_v3 = vld [vmem:[%s1574_s1 + $0x80] sm:$0xff] (!%p170_p2)   ;;  %1158 = vmatpush3.bf16.msra.mxu0 (!%p170_p2), %v1300_v2  ;;  %v1305_v7 = vld [vmem:[%s1574_s1 + $0x88] sm:$0xff] (!%p170_p2)   ;;  %v1309_v11 = vld [vmem:[%s1574_s1 + $0x90] sm:$0xff] (!%p170_p2)  }
   0x9   : > { %1198 = vmatpush3.bf16.msra.mxu1 (!%p170_p2), %v1301_v3  ;;  %1159 = vmatprep.subr.bf16.mxu0 (!%p170_p2), %v1302_v4  ;;  %v1310_v12 = vld [vmem:[%s1574_s1 + $0x58] sm:$0xff] (!%p170_p2)   ;;  %v1314_v16 = vld [vmem:[%s1574_s1 + $0x60] sm:$0xff] (!%p170_p2)   ;;  %v1318_v20 = vld [vmem:[%s1574_s1 + $0x68] sm:$0xff] (!%p170_p2)  }
   0xa   : > { %1199 = vmatprep.subr.bf16.mxu1 (!%p170_p2), %v1303_v5  ;;  %v1311_v13 = vld [vmem:[%s1574_s1 + $0xd8] sm:$0xff] (!%p170_p2)   ;;  %v1315_v17 = vld [vmem:[%s1574_s1 + $0xe0] sm:$0xff] (!%p170_p2)   ;;  %v1319_v21 = vld [vmem:[%s1574_s1 + $0xe8] sm:$0xff] (!%p170_p2)  }
   0xb   : > { %v1312_v14 = vld [vmem:[%s1574_s1 + $0x18] sm:$0xff] (!%p170_p2)   ;;  %v1316_v18 = vld [vmem:[%s1574_s1 + $0x20] sm:$0xff] (!%p170_p2)   ;;  %v1320_v22 = vld [vmem:[%s1574_s1 + $0x28] sm:$0xff] (!%p170_p2)  }
   0xc   : > { %1160 = vmatpush3.bf16.msra.mxu0 (!%p170_p2), %v1304_v6  ;;  %v1313_v15 = vld [vmem:[%s1574_s1 + $0x98] sm:$0xff] (!%p170_p2)   ;;  %v1317_v19 = vld [vmem:[%s1574_s1 + $0xa0] sm:$0xff] (!%p170_p2)   ;;  %v1321_v23 = vld [vmem:[%s1574_s1 + $0xa8] sm:$0xff] (!%p170_p2)  }
   0xd   : > { %1200 = vmatpush3.bf16.msra.mxu1 %v1305_v7  ;;  %1161 = vmatprep.subr.bf16.mxu0 %v1306_v8  ;;  %s1579_s23 = smov (!%p203_p3, %s1052_s23), 15  ;;  %v1322_v24 = vld [vmem:[%s1574_s1 + $0x70] sm:$0xff]   ;;  %v1326_v28 = vld [vmem:[%s1574_s1 + $0x78] sm:$0xff]   ;;  %v1336_v36 = vld [vmem:[%s1574_s1 + $0x100] sm:$0xff]   ;;  %s1581_s16 = smov (!%p215_p4, %s1405_s16), 1 }
   0xe   : > { %1201 = vmatprep.subr.bf16.mxu1 %v1307_v9  ;;  %v1323_v25 = vld [vmem:[%s1574_s1 + $0xf0] sm:$0xff]   ;;  %s1289_s22 = smul.u32 20, %s1579_s23  ;;  %v1327_v29 = vld [vmem:[%s1574_s1 + $0xf8] sm:$0xff]   ;;  %v1337_v37 = vld [vmem:[%s1574_s1 + $0x108] sm:$0xff]   ;;  %s1055_s6 = sshll.u32 %s1579_s23, 2 }
   0xf   : > { %v1324_v26 = vld [vmem:[%s1574_s1 + $0x30] sm:$0xff]   ;;  %v1328_v30 = vld [vmem:[%s1574_s1 + $0x38] sm:$0xff]   ;;  %v1352_v46 = vld [vmem:[%s1574_s1 + $0x120] sm:$0xff]   ;;  %s213_s9 = scalar_lea.vmem %s1575_s2, %s1055_s6  ;;  %s217_s11 = scalar_lea.vmem %s1576_s3, %s1581_s16 }
  0x10   : > { %1162 = vmatpush3.bf16.msra.mxu0 %v1308_v10  ;;  %v1325_v27 = vld [vmem:[%s1574_s1 + $0xb0] sm:$0xff]   ;;  %s1506_s8 = scalar_lea.vmem %s1573_s0, %s1289_s22  ;;  %v1329_v31 = vld [vmem:[%s1574_s1 + $0xb8] sm:$0xff]   ;;  %v1353_v51 = vld [vmem:[%s1574_s1 + $0x128] sm:$0xff]   ;;  %s220_s14 = scalar_lea.vmem %s1577_s4, %s1581_s16 }
  0x11   : > { %1202 = vmatpush3.bf16.msra.mxu1 %v1309_v11  ;;  %1163 = vmatprep.subr.bf16.mxu0 %v1310_v12  ;;  %v1330_v32 = vld [vmem:[%s1506_s8] ss:$20 sps:$4 sm:$0xff]   ;;  %v1332_v33 = vld [vmem:[%s1506_s8 + $0x4] ss:$20 sps:$4 sm:$0xff]   ;;  %v1333_v34 = vld [vmem:[%s1506_s8 + $0x8] ss:$20 sps:$4 sm:$0xff]  }
  0x12   : > { %1203 = vmatprep.subr.bf16.mxu1 %v1311_v13  ;;  %v1335_v35 = vld [vmem:[%s1506_s8 + $0xc] ss:$20 sps:$4 sm:$0xff]   ;;  %702 = vmatprep.mubr.bf16.mxu0 %v1332_v33  ;;  %v1340_v39 = vld [vmem:[%s1506_s8 + $0x34] ss:$20 sps:$4 sm:$0xff]   ;;  %v1343_v42 = vld [vmem:[%s1506_s8 + $0x30] ss:$20 sps:$4 sm:$0xff]  }
  0x13   : > { %767 = vmatprep.mubr.bf16.mxu1 %v1335_v35  ;;  %v1338_v38 = vld [vmem:[%s1506_s8 + $0x2c] ss:$20 sps:$4 sm:$0xff]   ;;  %v1342_v40 = vld [vmem:[%s1506_s8 + $0x28] ss:$20 sps:$4 sm:$0xff]   ;;  %v1344_v41 = vld [vmem:[%s1574_s1 + $0x110] sm:$0xff]  }
  0x14   : > { %1164 = vmatpush3.bf16.msra.mxu0 %v1312_v14  ;;  %v1346_v43 = vld [vmem:[%s1506_s8 + $0x54] ss:$20 sps:$4 sm:$0xff]   ;;  %v1345_v44 = vld [vmem:[%s1574_s1 + $0x118] sm:$0xff]   ;;  %v1350_v47 = vld [vmem:[%s1506_s8 + $0x50] ss:$20 sps:$4 sm:$0xff]  }
  0x15   : > { %1204 = vmatpush3.bf16.msra.mxu1 %v1313_v15  ;;  %1165 = vmatprep.subr.bf16.mxu0 %v1314_v16  ;;  %v1348_v45 = vld [vmem:[%s1506_s8 + $0x5c] ss:$20 sps:$4 sm:$0xff]   ;;  %v1351_v48 = vld [vmem:[%s1506_s8 + $0x58] ss:$20 sps:$4 sm:$0xff]   ;;  %v1359_v54 = vld [vmem:[%s1506_s8 + $0x80] ss:$20 sps:$4 sm:$0xff]  }
  0x16   : > { %1205 = vmatprep.subr.bf16.mxu1 %v1315_v17  ;;  %v1354_v49 = vld [vmem:[%s1506_s8 + $0x7c] ss:$20 sps:$4 sm:$0xff]   ;;  %v1356_v50 = vld [vmem:[%s1506_s8 + $0x84] ss:$20 sps:$4 sm:$0xff]   ;;  %v1363_v56 = vld [vmem:[%s1506_s8 + $0x60] ss:$20 sps:$4 sm:$0xff]  }
  0x17   : > { %v1360_v52 = vld [vmem:[%s1574_s1 + $0x130] sm:$0xff]   ;;  %v1358_v53 = vld [vmem:[%s1506_s8 + $0x78] ss:$20 sps:$4 sm:$0xff]   ;;  %v1365_v59 = vld [vmem:[%s1506_s8 + $0x88] ss:$20 sps:$4 sm:$0xff]  }
  0x18   : > { %1166 = vmatpush3.bf16.msra.mxu0 %v1316_v18  ;;  %v1362_v55 = vld [vmem:[%s1506_s8 + $0x10] ss:$20 sps:$4 sm:$0xff]   ;;  %v1361_v57 = vld [vmem:[%s1574_s1 + $0x138] sm:$0xff]  }
  0x19   : > { %1206 = vmatpush3.bf16.msra.mxu1 %v1317_v19  ;;  %1167 = vmatprep.subr.bf16.mxu0 %v1318_v20  ;;  %v1364_v58 = vld [vmem:[%s1506_s8 + $0x38] ss:$20 sps:$4 sm:$0xff]  }
  0x1a   : > { %1207 = vmatprep.subr.bf16.mxu1 %v1319_v21 }
  0x1c   : > { %1168 = vmatpush3.bf16.msra.mxu0 %v1320_v22 }
  0x1d   : > { %1208 = vmatpush3.bf16.msra.mxu1 %v1321_v23  ;;  %1169 = vmatprep.subr.bf16.mxu0 %v1322_v24 }
  0x1e   : > { %1209 = vmatprep.subr.bf16.mxu1 %v1323_v25 }
  0x20   : > { %1170 = vmatpush3.bf16.msra.mxu0 %v1324_v26 }
  0x21   : > { %1210 = vmatpush3.bf16.msra.mxu1 %v1325_v27  ;;  %1171 = vmatprep.subr.bf16.mxu0 %v1326_v28 }
  0x22   : > { %1211 = vmatprep.subr.bf16.mxu1 %v1327_v29 }
  0x24   : > { %1172 = vmatpush3.bf16.msra.mxu0 %v1328_v30 }
  0x25   : > { %1212 = vmatpush3.bf16.msra.mxu1 %v1329_v31  ;;  %1249 = vmatprep.subr.bf16.mxu0 %v1336_v36 }
  0x26   : > { %1273 = vmatprep.subr.bf16.mxu1 %v1336_v36 }
  0x27   : > { %703 = vmatmul.mubr.bf16.vlgmr.msra.gmra.mrb[0].mxu0 %v1330_v32 }
  0x28   : > { %768 = vmatmul.mubr.bf16.vlgmr.msra.gmra.mrb[0].mxu1 %v1333_v34  ;;  %1250 = vmatpush3.bf16.msra.mxu0 %v1336_v36 }
  0x29   : > { %1281 = vmatpush3.bf16.msra.mxu1 %v1336_v36  ;;  %1251 = vmatprep.subr.bf16.mxu0 %v1337_v37 }
  0x2a   : > { %1274 = vmatprep.subr.bf16.mxu1 %v1337_v37  ;;  %710 = vmatprep.mubr.bf16.mxu0 %v1338_v38 }
  0x2b   : > { %775 = vmatprep.mubr.bf16.mxu1 %v1340_v39 }
  0x2c   : > { %1252 = vmatpush3.bf16.msra.mxu0 %v1337_v37 }
  0x2d   : > { %1282 = vmatpush3.bf16.msra.mxu1 %v1337_v37  ;;  %1253 = vmatprep.subr.bf16.mxu0 %v1344_v41 }
  0x2e   : > { %1275 = vmatprep.subr.bf16.mxu1 %v1344_v41 }
  0x2f   : > { %711 = vmatmul.mubr.bf16.gmra.mrb[4].mxu0 %v1342_v40 }
  0x30   : > { %776 = vmatmul.mubr.bf16.gmra.mrb[4].mxu1 %v1343_v42  ;;  %718 = vmatprep.mubr.bf16.mxu0 %v1346_v43 }
  0x31   : > { %1254 = vmatpush3.bf16.msra.mxu0 %v1344_v41  ;;  %783 = vmatprep.mubr.bf16.mxu1 %v1348_v45 }
  0x32   : > { %1283 = vmatpush3.bf16.msra.mxu1 %v1344_v41  ;;  %1255 = vmatprep.subr.bf16.mxu0 %v1345_v44 }
  0x33   : > { %1276 = vmatprep.subr.bf16.mxu1 %v1345_v44 }
  0x35   : > { %1256 = vmatpush3.bf16.msra.mxu0 %v1345_v44 }
  0x36   : > { %1284 = vmatpush3.bf16.msra.mxu1 %v1345_v44  ;;  %1257 = vmatprep.subr.bf16.mxu0 %v1352_v46 }
  0x37   : > { %719 = vmatmul.mubr.bf16.gmra.mrb[8].mxu0 %v1350_v47  ;;  %1277 = vmatprep.subr.bf16.mxu1 %v1352_v46 }
  0x38   : > { %784 = vmatmul.mubr.bf16.gmra.mrb[8].mxu1 %v1351_v48  ;;  %726 = vmatprep.mubr.bf16.mxu0 %v1354_v49 }
  0x39   : > { %1258 = vmatpush3.bf16.msra.mxu0 %v1352_v46  ;;  %791 = vmatprep.mubr.bf16.mxu1 %v1356_v50 }
  0x3a   : > { %1285 = vmatpush3.bf16.msra.mxu1 %v1352_v46  ;;  %1259 = vmatprep.subr.bf16.mxu0 %v1353_v51 }
  0x3b   : > { %1278 = vmatprep.subr.bf16.mxu1 %v1353_v51 }
  0x3d   : > { %1260 = vmatpush3.bf16.msra.mxu0 %v1353_v51 }
  0x3e   : > { %1286 = vmatpush3.bf16.msra.mxu1 %v1353_v51  ;;  %1261 = vmatprep.subr.bf16.mxu0 %v1360_v52 }
  0x3f   : > { %727 = vmatmul.mubr.bf16.gmra.mrb[12].mxu0 %v1358_v53  ;;  %1279 = vmatprep.subr.bf16.mxu1 %v1360_v52 }
  0x40   : > { %792 = vmatmul.mubr.bf16.gmra.mrb[12].mxu1 %v1359_v54  ;;  %1265 = vmatprep.mubr.bf16.mxu0 %v1362_v55 }
  0x41   : > { %1262 = vmatpush3.bf16.msra.mxu0 %v1360_v52  ;;  %1269 = vmatprep.mubr.bf16.mxu1 %v1363_v56 }
  0x42   : > { %1287 = vmatpush3.bf16.msra.mxu1 %v1360_v52  ;;  %1263 = vmatprep.subr.bf16.mxu0 %v1361_v57 }
  0x43   : > { %1280 = vmatprep.subr.bf16.mxu1 %v1361_v57 }
  0x45   : > { %1264 = vmatpush3.bf16.msra.mxu0 %v1361_v57 }
  0x46   : > { %1288 = vmatpush3.bf16.msra.mxu1 %v1361_v57 }
  0x48   : > { %1266 = vmatmul.mubr.bf16.vlgmr.msra.gmra.mrb[16].mxu0 %v1364_v58 }
  0x49   : > { %1270 = vmatmul.mubr.bf16.vlgmr.msra.gmra.mrb[16].mxu1 %v1365_v59 }
  0xfa   : > { %v1173_v60 = vpop.f32.mrb[0].mxu0 }
  0xfb   : > { %v1213_v61 = vpop.f32.mrb[0].mxu1  ;;  %v1174_v62 = vpop.f32.mrb[1].mxu0 }
  0xfc   : > { %v1175_v63 = vadd.f32 %v1174_v62, %v1173_v60  ;;  %v1214_v0 = vpop.f32.mrb[1].mxu1  ;;  %v1176_v1 = vpop.f32.mrb[2].mxu0 }
  0xfd   : > { %v1215_v2 = vadd.f32 %v1214_v0, %v1213_v61  ;;  %v1216_v3 = vpop.f32.mrb[2].mxu1  ;;  %v1177_v4 = vpop.f32.mrb[3].mxu0 }
  0xfe   : > { %v1178_v5 = vadd.f32 %v1177_v4, %v1176_v1  ;;  %v1217_v6 = vpop.f32.mrb[3].mxu1 }
  0xff   : > { %v1218_v7 = vadd.f32 %v1217_v6, %v1216_v3  ;;  %v770_v8 = vadd.f32 %v1215_v2, %v1175_v63 }
 0x101   : > { %v773_v9 = vadd.f32 %v1218_v7, %v1178_v5 }
 0x102   : > { %v1179_v10 = vpop.f32.mrb[4].mxu0 }
 0x103   : > { %v1219_v11 = vpop.f32.mrb[4].mxu1  ;;  %v1180_v12 = vpop.f32.mrb[5].mxu0 }
 0x104   : > { %v1181_v13 = vadd.f32 %v1180_v12, %v1179_v10  ;;  %v1220_v14 = vpop.f32.mrb[5].mxu1  ;;  %v1182_v15 = vpop.f32.mrb[6].mxu0 }
 0x105   : > { %v1221_v16 = vadd.f32 %v1220_v14, %v1219_v11  ;;  %v1222_v17 = vpop.f32.mrb[6].mxu1  ;;  %v1183_v18 = vpop.f32.mrb[7].mxu0 }
 0x106   : > { %v1184_v19 = vadd.f32 %v1183_v18, %v1182_v15  ;;  %v1223_v20 = vpop.f32.mrb[7].mxu1 }
 0x107   : > { %v1224_v21 = vadd.f32 %v1223_v20, %v1222_v17  ;;  %v778_v22 = vadd.f32 %v1221_v16, %v1181_v13 }
 0x109   : > { %v781_v23 = vadd.f32 %v1224_v21, %v1184_v19 }
 0x10a   : > { %v1185_v24 = vpop.f32.mrb[8].mxu0 }
 0x10b   : > { %v1225_v25 = vpop.f32.mrb[8].mxu1  ;;  %v1186_v26 = vpop.f32.mrb[9].mxu0 }
 0x10c   : > { %v1187_v27 = vadd.f32 %v1186_v26, %v1185_v24  ;;  %v1226_v28 = vpop.f32.mrb[9].mxu1  ;;  %v1188_v29 = vpop.f32.mrb[10].mxu0 }
 0x10d   : > { %v1227_v30 = vadd.f32 %v1226_v28, %v1225_v25  ;;  %v1228_v31 = vpop.f32.mrb[10].mxu1  ;;  %v1189_v32 = vpop.f32.mrb[11].mxu0 }
 0x10e   : > { %v1190_v33 = vadd.f32 %v1189_v32, %v1188_v29  ;;  %v1229_v34 = vpop.f32.mrb[11].mxu1 }
 0x10f   : > { %v1230_v35 = vadd.f32 %v1229_v34, %v1228_v31  ;;  %v786_v36 = vadd.f32 %v1227_v30, %v1187_v27 }
 0x111   : > { %v789_v37 = vadd.f32 %v1230_v35, %v1190_v33 }
 0x112   : > { %v1191_v38 = vpop.f32.mrb[12].mxu0 }
 0x113   : > { %v1231_v39 = vpop.f32.mrb[12].mxu1  ;;  %v1192_v40 = vpop.f32.mrb[13].mxu0 }
 0x114   : > { %v1193_v41 = vadd.f32 %v1192_v40, %v1191_v38  ;;  %v1232_v42 = vpop.f32.mrb[13].mxu1  ;;  %v1194_v43 = vpop.f32.mrb[14].mxu0 }
 0x115   : > { %v1233_v44 = vadd.f32 %v1232_v42, %v1231_v39  ;;  %v1234_v45 = vpop.f32.mrb[14].mxu1  ;;  %v1195_v46 = vpop.f32.mrb[15].mxu0 }
 0x116   : > { %v1196_v47 = vadd.f32 %v1195_v46, %v1194_v43  ;;  %v1235_v48 = vpop.f32.mrb[15].mxu1 }
 0x117   : > { %v1236_v49 = vadd.f32 %v1235_v48, %v1234_v45  ;;  %v794_v50 = vadd.f32 %v1233_v44, %v1193_v41 }
 0x119   : > { %v797_v51 = vadd.f32 %v1236_v49, %v1196_v47 }
 0x11b   : > { %v1267_v52 = vpop.f32.mrb[16].mxu0 }
 0x11c   : > { %v843_v53 = vadd.f32 %v1267_v52, %v778_v22  ;;  %v1271_v54 = vpop.f32.mrb[16].mxu1  ;;  %v834_v55 = vpop.f32.mrb[17].mxu0 }
 0x11d   : > { %v859_v56 = vadd.f32 %v1271_v54, %v794_v50  ;;  %v835_v57 = vadd.f32 %v834_v55, %v770_v8  ;;  %v850_v58 = vpop.f32.mrb[17].mxu1  ;;  %v1268_v59 = vpop.f32.mrb[18].mxu0 }
 0x11e   : > { %v851_v60 = vadd.f32 %v850_v58, %v786_v36  ;;  %v846_v61 = vadd.f32 %v1268_v59, %v781_v23  ;;  %v1272_v62 = vpop.f32.mrb[18].mxu1  ;;  %v837_v63 = vpop.f32.mrb[19].mxu0  ;;  %v881_v12 = vmul.f32 %v843_v53, %v843_v53 }
 0x11f   : > { %v862_v0 = vadd.f32 %v1272_v62, %v797_v51  ;;  %v838_v1 = vadd.f32 %v837_v63, %v773_v9  ;;  %v853_v2 = vpop.f32.mrb[19].mxu1  ;;  %v879_v5 = vmul.f32 %v835_v57, %v835_v57  ;;  %v885_v23 = vmul.f32 %v859_v56, %v859_v56 }
 0x120   : > { %v1142_v3 = vpack.c.bf16 %v846_v61, %v843_v53  ;;  %v854_v4 = vadd.f32 %v853_v2, %v789_v37  ;;  %v882_v15 = vmul.f32 %v846_v61, %v846_v61  ;;  %v883_v17 = vmul.f32 %v851_v60, %v851_v60 }
 0x121   : > { %v1152_v6 = vpack.c.bf16 %v862_v0, %v859_v56  ;;  %v865_v7 = vadd.f32 %v838_v1, %v835_v57  ;;  %v880_v10 = vmul.f32 %v838_v1, %v838_v1  ;;  %v1137_v8 = vpack.c.bf16 %v838_v1, %v835_v57 }
 0x122   : > { %1154 = vst [vmem:[%s213_s9 + $0x8] sm:$0xff] %v1142_v3   ;;  %v1147_v11 = vpack.c.bf16 %v854_v4, %v851_v60  ;;  %v884_v21 = vmul.f32 %v854_v4, %v854_v4  ;;  %v886_v26 = vmul.f32 %v862_v0, %v862_v0 }
 0x123   : > { %1156 = vst [vmem:[%s213_s9 + $0x18] sm:$0xff] %v1152_v6   ;;  %v866_v13 = vadd.f32 %v865_v7, %v843_v53  ;;  %v887_v14 = vadd.f32 %v880_v10, %v879_v5  ;;  %1138 = vst [vmem:[%s213_s9] sm:$0xff] %v1137_v8  }
 0x124   : > { %1155 = vst [vmem:[%s213_s9 + $0x10] sm:$0xff] %v1147_v11  }
 0x125   : > { %v888_v16 = vadd.f32 %v887_v14, %v881_v12  ;;  %v867_v9 = vadd.f32 %v866_v13, %v846_v61 }
 0x127   : > { %v868_v18 = vadd.f32 %v867_v9, %v851_v60  ;;  %v889_v19 = vadd.f32 %v888_v16, %v882_v15 }
 0x129   : > { %v869_v20 = vadd.f32 %v868_v18, %v854_v4  ;;  %v890_v22 = vadd.f32 %v889_v19, %v883_v17 }
 0x12b   : > { %v870_v24 = vadd.f32 %v869_v20, %v859_v56  ;;  %v891_v25 = vadd.f32 %v890_v22, %v884_v21 }
 0x12d   : > { %v871_v27 = vadd.f32 %v870_v24, %v862_v0  ;;  %v892_v28 = vadd.f32 %v891_v25, %v885_v23 }
 0x12f   : > { %v872_v29 = vrot.slane %v871_v27, 4  ;;  %v893_v30 = vadd.f32 %v892_v28, %v886_v26 }
 0x131   : > { %v873_v31 = vadd.f32 %v872_v29, %v871_v27  ;;  %v894_v32 = vrot.slane %v893_v30, 4 }
 0x133   : > { %v874_v33 = vrot.slane %v873_v31, 2  ;;  %v895_v34 = vadd.f32 %v894_v32, %v893_v30 }
 0x135   : > { %v875_v35 = vadd.f32 %v874_v33, %v873_v31  ;;  %v896_v36 = vrot.slane %v895_v34, 2 }
 0x137   : > { %v876_v37 = vrot.slane %v875_v35, 1  ;;  %v897_v38 = vadd.f32 %v896_v36, %v895_v34 }
 0x139   : > { %v877_v39 = vadd.f32 %v876_v37, %v875_v35  ;;  %v898_v40 = vrot.slane %v897_v38, 1 }
 0x13b   : > { %878 = vst [vmem:[%s217_s11] sm:$0x1] %v877_v39  ;;  %v899_v41 = vadd.f32 %v898_v40, %v897_v38 }
 0x13d   : > { %900 = vst [vmem:[%s220_s14] sm:$0x1] %v899_v41 }
 0x13e PF: > { %s15_s15 = sadd.s32 1, %s1372_s15  }
 0x13f   : > { %p12_p5 = scmp.ge.s32.totalorder %s15_s15, 4  }
 0x141   :  { %14 = sbr.rel (!%p12_p5) target bundleno = 1 (0x1), region = 82 }

// kernel: _lambda_.22
= control target key start
LH: loop header
LB: loop body
LE: loop exit
PB: predicated region body
PF: predicated region fallthrough
CT: control target
= control target key end

     0   :  { %s2065_s15 = smov 0   ;;  %s2354_s0 = inlined_call_operand.vmem [shape: bf16[128,1152], index: 0, kind: input, shape index: {}]   ;;  %s2355_s1 = inlined_call_operand.vmem [shape: bf16[1152,128], index: 1, kind: input, shape index: {}]   ;;  %s2356_s2 = inlined_call_operand.vmem [shape: bf16[128,128], index: 2, kind: output, shape index: {0}]   ;;  %s2357_s3 = inlined_call_operand.vmem [shape: f32[2,1,128], index: 3, kind: output, shape index: {1}]   ;;  %s2358_s4 = inlined_call_operand.vmem [shape: f32[2,1,128], index: 4, kind: output, shape index: {2}]  }
   0x1 LB: > { %s2071_s16 = sadd.s32 4294967295, %s2038_s15   ;;  %p1533_p0 = scmp.ge.s32.totalorder %s2038_s15, 1  ;;  %s2038_s15 = sphi %s2065_s15, %s15_s15  }
   0x2   : > { %p169_p1 = scmp.lt.s32.totalorder %s2038_s15, 3 }
   0x4   : > { %p170_p2 = pnand %p1533_p0, %p169_p1 }
   0x5   : > { %v1908_v0 = vld [vmem:[%s2355_s1 + $0x40] sm:$0xff] (!%p170_p2)   ;;  %v1912_v4 = vld [vmem:[%s2355_s1 + $0x48] sm:$0xff] (!%p170_p2)   ;;  %v1916_v8 = vld [vmem:[%s2355_s1 + $0x50] sm:$0xff] (!%p170_p2)   ;;  %s1534_s23 = sshll.u32 (!%p170_p2), %s2071_s16, 3  ;;  %p215_p4 = scmp.lt.s32.totalorder (!%p170_p2), %s2071_s16, 1 }
   0x6   : > { %173 = sbr.rel (%p170_p2) target bundleno = 350 (0x15e), region = 28  ;;  %v1909_v1 = vld [vmem:[%s2355_s1 + $0xc0] sm:$0xff] (!%p170_p2)   ;;  %1687 = vmatprep.subr.bf16.mxu0 (!%p170_p2), %v1908_v0  ;;  %v1913_v5 = vld [vmem:[%s2355_s1 + $0xc8] sm:$0xff] (!%p170_p2)   ;;  %v1917_v9 = vld [vmem:[%s2355_s1 + $0xd0] sm:$0xff] (!%p170_p2)   ;;  %p203_p3 = scmp.lt.s32.totalorder (!%p170_p2), %s1534_s23, 15 }
   0x7   : > { %v1910_v2 = vld [vmem:[%s2355_s1] sm:$0xff] (!%p170_p2)   ;;  %1727 = vmatprep.subr.bf16.mxu1 (!%p170_p2), %v1909_v1  ;;  %v1914_v6 = vld [vmem:[%s2355_s1 + $0x8] sm:$0xff] (!%p170_p2)   ;;  %v1918_v10 = vld [vmem:[%s2355_s1 + $0x10] sm:$0xff] (!%p170_p2)  }
   0x8   : > { %v1911_v3 = vld [vmem:[%s2355_s1 + $0x80] sm:$0xff] (!%p170_p2)   ;;  %1688 = vmatpush3.bf16.msra.mxu0 (!%p170_p2), %v1910_v2  ;;  %v1915_v7 = vld [vmem:[%s2355_s1 + $0x88] sm:$0xff] (!%p170_p2)   ;;  %v1919_v11 = vld [vmem:[%s2355_s1 + $0x90] sm:$0xff] (!%p170_p2)  }
   0x9   : > { %1728 = vmatpush3.bf16.msra.mxu1 (!%p170_p2), %v1911_v3  ;;  %1689 = vmatprep.subr.bf16.mxu0 (!%p170_p2), %v1912_v4  ;;  %v1920_v12 = vld [vmem:[%s2355_s1 + $0x58] sm:$0xff] (!%p170_p2)   ;;  %v1924_v16 = vld [vmem:[%s2355_s1 + $0x60] sm:$0xff] (!%p170_p2)   ;;  %v1928_v20 = vld [vmem:[%s2355_s1 + $0x68] sm:$0xff] (!%p170_p2)  }
   0xa   : > { %1729 = vmatprep.subr.bf16.mxu1 (!%p170_p2), %v1913_v5  ;;  %v1921_v13 = vld [vmem:[%s2355_s1 + $0xd8] sm:$0xff] (!%p170_p2)   ;;  %v1925_v17 = vld [vmem:[%s2355_s1 + $0xe0] sm:$0xff] (!%p170_p2)   ;;  %v1929_v21 = vld [vmem:[%s2355_s1 + $0xe8] sm:$0xff] (!%p170_p2)  }
   0xb   : > { %v1922_v14 = vld [vmem:[%s2355_s1 + $0x18] sm:$0xff] (!%p170_p2)   ;;  %v1926_v18 = vld [vmem:[%s2355_s1 + $0x20] sm:$0xff] (!%p170_p2)   ;;  %v1930_v22 = vld [vmem:[%s2355_s1 + $0x28] sm:$0xff] (!%p170_p2)  }
   0xc   : > { %1690 = vmatpush3.bf16.msra.mxu0 (!%p170_p2), %v1914_v6  ;;  %v1923_v15 = vld [vmem:[%s2355_s1 + $0x98] sm:$0xff] (!%p170_p2)   ;;  %v1927_v19 = vld [vmem:[%s2355_s1 + $0xa0] sm:$0xff] (!%p170_p2)   ;;  %v1931_v23 = vld [vmem:[%s2355_s1 + $0xa8] sm:$0xff] (!%p170_p2)  }
   0xd   : > { %1730 = vmatpush3.bf16.msra.mxu1 %v1915_v7  ;;  %1691 = vmatprep.subr.bf16.mxu0 %v1916_v8  ;;  %s2360_s23 = smov (!%p203_p3, %s1534_s23), 15  ;;  %v1932_v24 = vld [vmem:[%s2355_s1 + $0x70] sm:$0xff]   ;;  %v1936_v28 = vld [vmem:[%s2355_s1 + $0x78] sm:$0xff]   ;;  %v1946_v36 = vld [vmem:[%s2355_s1 + $0x140] sm:$0xff]   ;;  %s2362_s16 = smov (!%p215_p4, %s2071_s16), 1 }
   0xe   : > { %1731 = vmatprep.subr.bf16.mxu1 %v1917_v9  ;;  %v1933_v25 = vld [vmem:[%s2355_s1 + $0xf0] sm:$0xff]   ;;  %s1899_s22 = smul.u32 36, %s2360_s23  ;;  %v1937_v29 = vld [vmem:[%s2355_s1 + $0xf8] sm:$0xff]   ;;  %v1947_v37 = vld [vmem:[%s2355_s1 + $0x1c0] sm:$0xff]   ;;  %s217_s9 = scalar_lea.vmem %s2357_s3, %s2362_s16 }
   0xf   : > { %v1934_v26 = vld [vmem:[%s2355_s1 + $0x30] sm:$0xff]   ;;  %v1938_v30 = vld [vmem:[%s2355_s1 + $0x38] sm:$0xff]   ;;  %v1948_v38 = vld [vmem:[%s2355_s1 + $0x100] sm:$0xff]   ;;  %s220_s12 = scalar_lea.vmem %s2358_s4, %s2362_s16 }
  0x10   : > { %1692 = vmatpush3.bf16.msra.mxu0 %v1918_v10  ;;  %v1935_v27 = vld [vmem:[%s2355_s1 + $0xb0] sm:$0xff]   ;;  %s2172_s8 = scalar_lea.vmem %s2354_s0, %s1899_s22  ;;  %v1939_v31 = vld [vmem:[%s2355_s1 + $0xb8] sm:$0xff]   ;;  %v1949_v39 = vld [vmem:[%s2355_s1 + $0x180] sm:$0xff]  }
  0x11   : > { %1732 = vmatpush3.bf16.msra.mxu1 %v1919_v11  ;;  %1693 = vmatprep.subr.bf16.mxu0 %v1920_v12  ;;  %v1940_v32 = vld [vmem:[%s2172_s8] ss:$36 sps:$4 sm:$0xff]   ;;  %v1943_v34 = vld [vmem:[%s2172_s8 + $0x8] ss:$36 sps:$4 sm:$0xff]   ;;  %v1956_v45 = vld [vmem:[%s2172_s8 + $0x54] ss:$36 sps:$4 sm:$0xff]  }
  0x12   : > { %1733 = vmatprep.subr.bf16.mxu1 %v1921_v13  ;;  %v1942_v33 = vld [vmem:[%s2172_s8 + $0x4] ss:$36 sps:$4 sm:$0xff]   ;;  %v1945_v35 = vld [vmem:[%s2172_s8 + $0xc] ss:$36 sps:$4 sm:$0xff]   ;;  %v1964_v52 = vld [vmem:[%s2355_s1 + $0x158] sm:$0xff]  }
  0x13   : > { %1054 = vmatprep.mubr.bf16.mxu0 %v1942_v33  ;;  %1119 = vmatprep.mubr.bf16.mxu1 %v1945_v35  ;;  %v1950_v40 = vld [vmem:[%s2355_s1 + $0x148] sm:$0xff]   ;;  %v1959_v47 = vld [vmem:[%s2172_s8 + $0x50] ss:$36 sps:$4 sm:$0xff]   ;;  %v1965_v53 = vld [vmem:[%s2355_s1 + $0x1d8] sm:$0xff]  }
  0x14   : > { %1694 = vmatpush3.bf16.msra.mxu0 %v1922_v14  ;;  %v1951_v41 = vld [vmem:[%s2355_s1 + $0x1c8] sm:$0xff]   ;;  %v1960_v48 = vld [vmem:[%s2355_s1 + $0x150] sm:$0xff]   ;;  %v1966_v54 = vld [vmem:[%s2355_s1 + $0x118] sm:$0xff]  }
  0x15   : > { %1734 = vmatpush3.bf16.msra.mxu1 %v1923_v15  ;;  %1695 = vmatprep.subr.bf16.mxu0 %v1924_v16  ;;  %v1952_v42 = vld [vmem:[%s2355_s1 + $0x108] sm:$0xff]   ;;  %v1961_v49 = vld [vmem:[%s2355_s1 + $0x1d0] sm:$0xff]   ;;  %v1967_v55 = vld [vmem:[%s2355_s1 + $0x198] sm:$0xff]  }
  0x16   : > { %1735 = vmatprep.subr.bf16.mxu1 %v1925_v17  ;;  %v1953_v43 = vld [vmem:[%s2355_s1 + $0x188] sm:$0xff]   ;;  %v1962_v50 = vld [vmem:[%s2355_s1 + $0x110] sm:$0xff]   ;;  %v1970_v57 = vld [vmem:[%s2172_s8 + $0x9c] ss:$36 sps:$4 sm:$0xff]  }
  0x17   : > { %v1954_v44 = vld [vmem:[%s2172_s8 + $0x4c] ss:$36 sps:$4 sm:$0xff]   ;;  %v1968_v56 = vld [vmem:[%s2172_s8 + $0x94] ss:$36 sps:$4 sm:$0xff]   ;;  %v1974_v60 = vld [vmem:[%s2355_s1 + $0x160] sm:$0xff]  }
  0x18   : > { %1696 = vmatpush3.bf16.msra.mxu0 %v1926_v18  ;;  %v1958_v46 = vld [vmem:[%s2172_s8 + $0x48] ss:$36 sps:$4 sm:$0xff]   ;;  %v1963_v51 = vld [vmem:[%s2355_s1 + $0x190] sm:$0xff]   ;;  %v1973_v59 = vld [vmem:[%s2172_s8 + $0x98] ss:$36 sps:$4 sm:$0xff]  }
  0x19   : > { %1736 = vmatpush3.bf16.msra.mxu1 %v1927_v19  ;;  %1697 = vmatprep.subr.bf16.mxu0 %v1928_v20  ;;  %v1972_v58 = vld [vmem:[%s2172_s8 + $0x90] ss:$36 sps:$4 sm:$0xff]   ;;  %v1975_v61 = vld [vmem:[%s2355_s1 + $0x1e0] sm:$0xff]   ;;  %v1978_v0 = vld [vmem:[%s2355_s1 + $0x168] sm:$0xff]  }
  0x1a   : > { %1737 = vmatprep.subr.bf16.mxu1 %v1929_v21  ;;  %v1976_v62 = vld [vmem:[%s2355_s1 + $0x120] sm:$0xff]   ;;  %v1979_v1 = vld [vmem:[%s2355_s1 + $0x1e8] sm:$0xff]   ;;  %v1986_v6 = vld [vmem:[%s2172_s8 + $0xd8] ss:$36 sps:$4 sm:$0xff]  }
  0x1b   : > { %v1977_v63 = vld [vmem:[%s2355_s1 + $0x1a0] sm:$0xff]   ;;  %v1980_v2 = vld [vmem:[%s2355_s1 + $0x128] sm:$0xff]   ;;  %v1988_v8 = vld [vmem:[%s2355_s1 + $0x170] sm:$0xff]  }
  0x1c   : > { %1698 = vmatpush3.bf16.msra.mxu0 %v1930_v22  ;;  %v1981_v3 = vld [vmem:[%s2355_s1 + $0x1a8] sm:$0xff]   ;;  %v1982_v4 = vld [vmem:[%s2172_s8 + $0xdc] ss:$36 sps:$4 sm:$0xff]   ;;  %v1989_v9 = vld [vmem:[%s2355_s1 + $0x1f0] sm:$0xff]  }
  0x1d   : > { %1738 = vmatpush3.bf16.msra.mxu1 %v1931_v23  ;;  %1699 = vmatprep.subr.bf16.mxu0 %v1932_v24  ;;  %v1984_v5 = vld [vmem:[%s2172_s8 + $0xe4] ss:$36 sps:$4 sm:$0xff]   ;;  %v1990_v10 = vld [vmem:[%s2355_s1 + $0x130] sm:$0xff]   ;;  %v1992_v12 = vld [vmem:[%s2355_s1 + $0x178] sm:$0xff]  }
  0x1e   : > { %1739 = vmatprep.subr.bf16.mxu1 %v1933_v25  ;;  %v1987_v7 = vld [vmem:[%s2172_s8 + $0xe0] ss:$36 sps:$4 sm:$0xff]   ;;  %v1991_v11 = vld [vmem:[%s2355_s1 + $0x1b0] sm:$0xff]   ;;  %v1993_v13 = vld [vmem:[%s2355_s1 + $0x1f8] sm:$0xff]  }
  0x1f   : > { %v1994_v14 = vld [vmem:[%s2355_s1 + $0x138] sm:$0xff]   ;;  %v1996_v16 = vld [vmem:[%s2172_s8 + $0x10] ss:$36 sps:$4 sm:$0xff]   ;;  %v2002_v20 = vld [vmem:[%s2355_s1 + $0x200] sm:$0xff]  }
  0x20   : > { %1700 = vmatpush3.bf16.msra.mxu0 %v1934_v26  ;;  %v1995_v15 = vld [vmem:[%s2355_s1 + $0x1b8] sm:$0xff]   ;;  %v2003_v21 = vld [vmem:[%s2355_s1 + $0x208] sm:$0xff]   ;;  %v2009_v25 = vld [vmem:[%s2172_s8 + $0x60] ss:$36 sps:$4 sm:$0xff]  }
  0x21   : > { %1740 = vmatpush3.bf16.msra.mxu1 %v1935_v27  ;;  %1701 = vmatprep.subr.bf16.mxu0 %v1936_v28  ;;  %v1998_v17 = vld [vmem:[%s2172_s8 + $0x14] ss:$36 sps:$4 sm:$0xff]   ;;  %v2001_v19 = vld [vmem:[%s2172_s8 + $0x1c] ss:$36 sps:$4 sm:$0xff]   ;;  %v2006_v23 = vld [vmem:[%s2172_s8 + $0x64] ss:$36 sps:$4 sm:$0xff]  }
  0x22   : > { %1741 = vmatprep.subr.bf16.mxu1 %v1937_v29  ;;  %v1999_v18 = vld [vmem:[%s2172_s8 + $0x18] ss:$36 sps:$4 sm:$0xff]   ;;  %v2010_v26 = vld [vmem:[%s2355_s1 + $0x210] sm:$0xff]   ;;  %v2012_v27 = vld [vmem:[%s2172_s8 + $0xa4] ss:$36 sps:$4 sm:$0xff]  }
  0x23   : > { %v2004_v22 = vld [vmem:[%s2172_s8 + $0x5c] ss:$36 sps:$4 sm:$0xff]   ;;  %v2014_v28 = vld [vmem:[%s2172_s8 + $0xac] ss:$36 sps:$4 sm:$0xff]  }
  0x24   : > { %1702 = vmatpush3.bf16.msra.mxu0 %v1938_v30  ;;  %v2008_v24 = vld [vmem:[%s2172_s8 + $0x58] ss:$36 sps:$4 sm:$0xff]   ;;  %v2016_v30 = vld [vmem:[%s2172_s8 + $0xa0] ss:$36 sps:$4 sm:$0xff]   ;;  %v2020_v33 = vld [vmem:[%s2172_s8 + $0xec] ss:$36 sps:$4 sm:$0xff]  }
  0x25   : > { %1742 = vmatpush3.bf16.msra.mxu1 %v1939_v31  ;;  %1767 = vmatprep.subr.bf16.mxu0 %v1946_v36  ;;  %v2011_v29 = vld [vmem:[%s2355_s1 + $0x218] sm:$0xff]   ;;  %v2017_v31 = vld [vmem:[%s2172_s8 + $0xa8] ss:$36 sps:$4 sm:$0xff]  }
  0x26   : > { %1807 = vmatprep.subr.bf16.mxu1 %v1947_v37  ;;  %v2019_v35 = vld [vmem:[%s2355_s1 + $0x228] sm:$0xff]   ;;  %v2026_v37 = vld [vmem:[%s2355_s1 + $0x230] sm:$0xff]  }
  0x27   : > { %1055 = vmatmul.mubr.bf16.vlgmr.msra.gmra.mrb[0].mxu0 %v1940_v32  ;;  %v2018_v32 = vld [vmem:[%s2355_s1 + $0x220] sm:$0xff]   ;;  %v2024_v36 = vld [vmem:[%s2172_s8 + $0xe8] ss:$36 sps:$4 sm:$0xff]  }
  0x28   : > { %1120 = vmatmul.mubr.bf16.vlgmr.msra.gmra.mrb[0].mxu1 %v1943_v34  ;;  %1768 = vmatpush3.bf16.msra.mxu0 %v1948_v38  ;;  %v2022_v34 = vld [vmem:[%s2172_s8 + $0xf4] ss:$36 sps:$4 sm:$0xff]  }
  0x29   : > { %1808 = vmatpush3.bf16.msra.mxu1 %v1949_v39  ;;  %1769 = vmatprep.subr.bf16.mxu0 %v1950_v40  ;;  %v2025_v38 = vld [vmem:[%s2172_s8 + $0xf0] ss:$36 sps:$4 sm:$0xff]   ;;  %v2028_v39 = vld [vmem:[%s2172_s8 + $0x20] ss:$36 sps:$4 sm:$0xff]  }
  0x2a   : > { %1809 = vmatprep.subr.bf16.mxu1 %v1951_v41  ;;  %1062 = vmatprep.mubr.bf16.mxu0 %v1954_v44  ;;  %v2029_v40 = vld [vmem:[%s2172_s8 + $0xb0] ss:$36 sps:$4 sm:$0xff]   ;;  %v2027_v41 = vld [vmem:[%s2355_s1 + $0x238] sm:$0xff]  }
  0x2b   : > { %1127 = vmatprep.mubr.bf16.mxu1 %v1956_v45 }
  0x2c   : > { %1770 = vmatpush3.bf16.msra.mxu0 %v1952_v42  ;;  %v2030_v42 = vld [vmem:[%s2172_s8 + $0x68] ss:$36 sps:$4 sm:$0xff]  }
  0x2d   : > { %1810 = vmatpush3.bf16.msra.mxu1 %v1953_v43  ;;  %1771 = vmatprep.subr.bf16.mxu0 %v1960_v48  ;;  %v2031_v43 = vld [vmem:[%s2172_s8 + $0xf8] ss:$36 sps:$4 sm:$0xff]   ;;  %s1537_s8 = sshll.u32 %s2360_s23, 2 }
  0x2e   : > { %1811 = vmatprep.subr.bf16.mxu1 %v1961_v49  ;;  %s213_s6 = scalar_lea.vmem %s2356_s2, %s1537_s8 }
  0x2f   : > { %1063 = vmatmul.mubr.bf16.gmra.mrb[4].mxu0 %v1958_v46 }
  0x30   : > { %1128 = vmatmul.mubr.bf16.gmra.mrb[4].mxu1 %v1959_v47  ;;  %1772 = vmatpush3.bf16.msra.mxu0 %v1962_v50 }
  0x31   : > { %1812 = vmatpush3.bf16.msra.mxu1 %v1963_v51  ;;  %1773 = vmatprep.subr.bf16.mxu0 %v1964_v52 }
  0x32   : > { %1813 = vmatprep.subr.bf16.mxu1 %v1965_v53  ;;  %1070 = vmatprep.mubr.bf16.mxu0 %v1968_v56 }
  0x33   : > { %1135 = vmatprep.mubr.bf16.mxu1 %v1970_v57 }
  0x34   : > { %1774 = vmatpush3.bf16.msra.mxu0 %v1966_v54 }
  0x35   : > { %1814 = vmatpush3.bf16.msra.mxu1 %v1967_v55  ;;  %1775 = vmatprep.subr.bf16.mxu0 %v1974_v60 }
  0x36   : > { %1815 = vmatprep.subr.bf16.mxu1 %v1975_v61 }
  0x37   : > { %1071 = vmatmul.mubr.bf16.gmra.mrb[8].mxu0 %v1972_v58 }
  0x38   : > { %1136 = vmatmul.mubr.bf16.gmra.mrb[8].mxu1 %v1973_v59  ;;  %1776 = vmatpush3.bf16.msra.mxu0 %v1976_v62 }
  0x39   : > { %1816 = vmatpush3.bf16.msra.mxu1 %v1977_v63  ;;  %1777 = vmatprep.subr.bf16.mxu0 %v1978_v0 }
  0x3a   : > { %1817 = vmatprep.subr.bf16.mxu1 %v1979_v1  ;;  %1078 = vmatprep.mubr.bf16.mxu0 %v1982_v4 }
  0x3b   : > { %1143 = vmatprep.mubr.bf16.mxu1 %v1984_v5 }
  0x3c   : > { %1778 = vmatpush3.bf16.msra.mxu0 %v1980_v2 }
  0x3d   : > { %1818 = vmatpush3.bf16.msra.mxu1 %v1981_v3  ;;  %1779 = vmatprep.subr.bf16.mxu0 %v1988_v8 }
  0x3e   : > { %1819 = vmatprep.subr.bf16.mxu1 %v1989_v9 }
  0x3f   : > { %1079 = vmatmul.mubr.bf16.gmra.mrb[12].mxu0 %v1986_v6 }
  0x40   : > { %1144 = vmatmul.mubr.bf16.gmra.mrb[12].mxu1 %v1987_v7  ;;  %1780 = vmatpush3.bf16.msra.mxu0 %v1990_v10 }
  0x41   : > { %1820 = vmatpush3.bf16.msra.mxu1 %v1991_v11  ;;  %1781 = vmatprep.subr.bf16.mxu0 %v1992_v12 }
  0x42   : > { %1821 = vmatprep.subr.bf16.mxu1 %v1993_v13  ;;  %1184 = vmatprep.mubr.bf16.mxu0 %v1998_v17 }
  0x43   : > { %1249 = vmatprep.mubr.bf16.mxu1 %v2001_v19 }
  0x44   : > { %1782 = vmatpush3.bf16.msra.mxu0 %v1994_v14 }
  0x45   : > { %1822 = vmatpush3.bf16.msra.mxu1 %v1995_v15  ;;  %1859 = vmatprep.subr.bf16.mxu0 %v2002_v20 }
  0x46   : > { %1883 = vmatprep.subr.bf16.mxu1 %v2002_v20 }
  0x47   : > { %1185 = vmatmul.mubr.bf16.vlgmr.msra.gmra.mrb[16].mxu0 %v1996_v16 }
  0x48   : > { %1250 = vmatmul.mubr.bf16.vlgmr.msra.gmra.mrb[16].mxu1 %v1999_v18  ;;  %1860 = vmatpush3.bf16.msra.mxu0 %v2002_v20 }
  0x49   : > { %1891 = vmatpush3.bf16.msra.mxu1 %v2002_v20  ;;  %1861 = vmatprep.subr.bf16.mxu0 %v2003_v21 }
  0x4a   : > { %1884 = vmatprep.subr.bf16.mxu1 %v2003_v21  ;;  %1192 = vmatprep.mubr.bf16.mxu0 %v2004_v22 }
  0x4b   : > { %1257 = vmatprep.mubr.bf16.mxu1 %v2006_v23 }
  0x4c   : > { %1862 = vmatpush3.bf16.msra.mxu0 %v2003_v21 }
  0x4d   : > { %1892 = vmatpush3.bf16.msra.mxu1 %v2003_v21  ;;  %1863 = vmatprep.subr.bf16.mxu0 %v2010_v26 }
  0x4e   : > { %1885 = vmatprep.subr.bf16.mxu1 %v2010_v26 }
  0x4f   : > { %1193 = vmatmul.mubr.bf16.gmra.mrb[20].mxu0 %v2008_v24 }
  0x50   : > { %1258 = vmatmul.mubr.bf16.gmra.mrb[20].mxu1 %v2009_v25  ;;  %1200 = vmatprep.mubr.bf16.mxu0 %v2012_v27 }
  0x51   : > { %1864 = vmatpush3.bf16.msra.mxu0 %v2010_v26  ;;  %1265 = vmatprep.mubr.bf16.mxu1 %v2014_v28 }
  0x52   : > { %1893 = vmatpush3.bf16.msra.mxu1 %v2010_v26  ;;  %1865 = vmatprep.subr.bf16.mxu0 %v2011_v29 }
  0x53   : > { %1886 = vmatprep.subr.bf16.mxu1 %v2011_v29 }
  0x55   : > { %1866 = vmatpush3.bf16.msra.mxu0 %v2011_v29 }
  0x56   : > { %1894 = vmatpush3.bf16.msra.mxu1 %v2011_v29  ;;  %1867 = vmatprep.subr.bf16.mxu0 %v2018_v32 }
  0x57   : > { %1201 = vmatmul.mubr.bf16.gmra.mrb[24].mxu0 %v2016_v30  ;;  %1887 = vmatprep.subr.bf16.mxu1 %v2018_v32 }
  0x58   : > { %1266 = vmatmul.mubr.bf16.gmra.mrb[24].mxu1 %v2017_v31  ;;  %1208 = vmatprep.mubr.bf16.mxu0 %v2020_v33 }
  0x59   : > { %1868 = vmatpush3.bf16.msra.mxu0 %v2018_v32  ;;  %1273 = vmatprep.mubr.bf16.mxu1 %v2022_v34 }
  0x5a   : > { %1895 = vmatpush3.bf16.msra.mxu1 %v2018_v32  ;;  %1869 = vmatprep.subr.bf16.mxu0 %v2019_v35 }
  0x5b   : > { %1888 = vmatprep.subr.bf16.mxu1 %v2019_v35 }
  0x5d   : > { %1870 = vmatpush3.bf16.msra.mxu0 %v2019_v35 }
  0x5e   : > { %1896 = vmatpush3.bf16.msra.mxu1 %v2019_v35  ;;  %1871 = vmatprep.subr.bf16.mxu0 %v2026_v37 }
  0x5f   : > { %1209 = vmatmul.mubr.bf16.gmra.mrb[28].mxu0 %v2024_v36  ;;  %1889 = vmatprep.subr.bf16.mxu1 %v2026_v37 }
  0x60   : > { %1274 = vmatmul.mubr.bf16.gmra.mrb[28].mxu1 %v2025_v38  ;;  %1875 = vmatprep.mubr.bf16.mxu0 %v2028_v39 }
  0x61   : > { %1872 = vmatpush3.bf16.msra.mxu0 %v2026_v37  ;;  %1879 = vmatprep.mubr.bf16.mxu1 %v2029_v40 }
  0x62   : > { %1897 = vmatpush3.bf16.msra.mxu1 %v2026_v37  ;;  %1873 = vmatprep.subr.bf16.mxu0 %v2027_v41 }
  0x63   : > { %1890 = vmatprep.subr.bf16.mxu1 %v2027_v41 }
  0x65   : > { %1874 = vmatpush3.bf16.msra.mxu0 %v2027_v41 }
  0x66   : > { %1898 = vmatpush3.bf16.msra.mxu1 %v2027_v41 }
  0x68   : > { %1876 = vmatmul.mubr.bf16.vlgmr.msra.gmra.mrb[32].mxu0 %v2030_v42 }
  0x69   : > { %1880 = vmatmul.mubr.bf16.vlgmr.msra.gmra.mrb[32].mxu1 %v2031_v43 }
  0xfa   : > { %v1703_v44 = vpop.f32.mrb[0].mxu0 }
  0xfb   : > { %v1743_v45 = vpop.f32.mrb[0].mxu1  ;;  %v1704_v46 = vpop.f32.mrb[1].mxu0 }
  0xfc   : > { %v1705_v47 = vadd.f32 %v1704_v46, %v1703_v44  ;;  %v1744_v48 = vpop.f32.mrb[1].mxu1  ;;  %v1706_v49 = vpop.f32.mrb[2].mxu0 }
  0xfd   : > { %v1745_v50 = vadd.f32 %v1744_v48, %v1743_v45  ;;  %v1746_v51 = vpop.f32.mrb[2].mxu1  ;;  %v1707_v52 = vpop.f32.mrb[3].mxu0 }
  0xfe   : > { %v1708_v53 = vadd.f32 %v1707_v52, %v1706_v49  ;;  %v1747_v54 = vpop.f32.mrb[3].mxu1 }
  0xff   : > { %v1122_v55 = vadd.f32 %v1745_v50, %v1705_v47  ;;  %v1748_v56 = vadd.f32 %v1747_v54, %v1746_v51 }
 0x101   : > { %v1125_v57 = vadd.f32 %v1748_v56, %v1708_v53 }
 0x102   : > { %v1709_v58 = vpop.f32.mrb[4].mxu0 }
 0x103   : > { %v1749_v59 = vpop.f32.mrb[4].mxu1  ;;  %v1710_v60 = vpop.f32.mrb[5].mxu0 }
 0x104   : > { %v1711_v61 = vadd.f32 %v1710_v60, %v1709_v58  ;;  %v1750_v62 = vpop.f32.mrb[5].mxu1  ;;  %v1712_v63 = vpop.f32.mrb[6].mxu0 }
 0x105   : > { %v1751_v0 = vadd.f32 %v1750_v62, %v1749_v59  ;;  %v1752_v1 = vpop.f32.mrb[6].mxu1  ;;  %v1713_v2 = vpop.f32.mrb[7].mxu0 }
 0x106   : > { %v1714_v3 = vadd.f32 %v1713_v2, %v1712_v63  ;;  %v1753_v4 = vpop.f32.mrb[7].mxu1 }
 0x107   : > { %v1130_v5 = vadd.f32 %v1751_v0, %v1711_v61  ;;  %v1754_v6 = vadd.f32 %v1753_v4, %v1752_v1 }
 0x109   : > { %v1133_v7 = vadd.f32 %v1754_v6, %v1714_v3 }
 0x10a   : > { %v1715_v8 = vpop.f32.mrb[8].mxu0 }
 0x10b   : > { %v1755_v9 = vpop.f32.mrb[8].mxu1  ;;  %v1716_v10 = vpop.f32.mrb[9].mxu0 }
 0x10c   : > { %v1717_v11 = vadd.f32 %v1716_v10, %v1715_v8  ;;  %v1756_v12 = vpop.f32.mrb[9].mxu1  ;;  %v1718_v13 = vpop.f32.mrb[10].mxu0 }
 0x10d   : > { %v1757_v14 = vadd.f32 %v1756_v12, %v1755_v9  ;;  %v1758_v15 = vpop.f32.mrb[10].mxu1  ;;  %v1719_v16 = vpop.f32.mrb[11].mxu0 }
 0x10e   : > { %v1720_v17 = vadd.f32 %v1719_v16, %v1718_v13  ;;  %v1759_v18 = vpop.f32.mrb[11].mxu1 }
 0x10f   : > { %v1138_v19 = vadd.f32 %v1757_v14, %v1717_v11  ;;  %v1760_v20 = vadd.f32 %v1759_v18, %v1758_v15 }
 0x111   : > { %v1141_v21 = vadd.f32 %v1760_v20, %v1720_v17 }
 0x112   : > { %v1721_v22 = vpop.f32.mrb[12].mxu0 }
 0x113   : > { %v1761_v23 = vpop.f32.mrb[12].mxu1  ;;  %v1722_v24 = vpop.f32.mrb[13].mxu0 }
 0x114   : > { %v1762_v25 = vpop.f32.mrb[13].mxu1  ;;  %v1723_v26 = vadd.f32 %v1722_v24, %v1721_v22  ;;  %v1724_v28 = vpop.f32.mrb[14].mxu0 }
 0x115   : > { %v1763_v27 = vadd.f32 %v1762_v25, %v1761_v23  ;;  %v1764_v29 = vpop.f32.mrb[14].mxu1  ;;  %v1725_v30 = vpop.f32.mrb[15].mxu0 }
 0x116   : > { %v1765_v31 = vpop.f32.mrb[15].mxu1  ;;  %v1726_v33 = vadd.f32 %v1725_v30, %v1724_v28 }
 0x117   : > { %v1146_v32 = vadd.f32 %v1763_v27, %v1723_v26  ;;  %v1766_v34 = vadd.f32 %v1765_v31, %v1764_v29 }
 0x119   : > { %v1149_v35 = vadd.f32 %v1766_v34, %v1726_v33 }
 0x11a   : > { %v1783_v36 = vpop.f32.mrb[16].mxu0 }
 0x11b   : > { %v1784_v37 = vpop.f32.mrb[17].mxu0  ;;  %v1823_v40 = vpop.f32.mrb[16].mxu1 }
 0x11c   : > { %v1785_v38 = vadd.f32 %v1784_v37, %v1783_v36  ;;  %v1786_v39 = vpop.f32.mrb[18].mxu0  ;;  %v1824_v42 = vpop.f32.mrb[17].mxu1 }
 0x11d   : > { %v1787_v41 = vpop.f32.mrb[19].mxu0  ;;  %v1825_v45 = vadd.f32 %v1824_v42, %v1823_v40  ;;  %v1826_v46 = vpop.f32.mrb[18].mxu1 }
 0x11e   : > { %v1187_v43 = vadd.f32 %v1785_v38, %v1122_v55  ;;  %v1788_v44 = vadd.f32 %v1787_v41, %v1786_v39  ;;  %v1827_v47 = vpop.f32.mrb[19].mxu1 }
 0x11f   : > { %v1828_v49 = vadd.f32 %v1827_v47, %v1826_v46 }
 0x120   : > { %v1190_v48 = vadd.f32 %v1788_v44, %v1125_v57  ;;  %v1252_v50 = vadd.f32 %v1825_v45, %v1187_v43 }
 0x122   : > { %v1789_v51 = vpop.f32.mrb[20].mxu0  ;;  %v2336_v52 = vadd.f32 %v1828_v49, %v1190_v48 }
 0x123   : > { %v1790_v53 = vpop.f32.mrb[21].mxu0  ;;  %v1829_v58 = vpop.f32.mrb[20].mxu1 }
 0x124   : > { %v1791_v54 = vadd.f32 %v1790_v53, %v1789_v51  ;;  %v1792_v56 = vpop.f32.mrb[22].mxu0  ;;  %v1830_v60 = vpop.f32.mrb[21].mxu1 }
 0x125   : > { %v1793_v59 = vpop.f32.mrb[23].mxu0  ;;  %v1831_v63 = vadd.f32 %v1830_v60, %v1829_v58  ;;  %v1832_v55 = vpop.f32.mrb[22].mxu1 }
 0x126   : > { %v1195_v61 = vadd.f32 %v1791_v54, %v1130_v5  ;;  %v1794_v62 = vadd.f32 %v1793_v59, %v1792_v56  ;;  %v1833_v0 = vpop.f32.mrb[23].mxu1 }
 0x127   : > { %v1834_v2 = vadd.f32 %v1833_v0, %v1832_v55 }
 0x128   : > { %v1198_v1 = vadd.f32 %v1794_v62, %v1133_v7  ;;  %v1260_v3 = vadd.f32 %v1831_v63, %v1195_v61 }
 0x12a   : > { %v1795_v57 = vpop.f32.mrb[24].mxu0  ;;  %v1263_v4 = vadd.f32 %v1834_v2, %v1198_v1 }
 0x12b   : > { %v1796_v6 = vpop.f32.mrb[25].mxu0  ;;  %v1835_v10 = vpop.f32.mrb[24].mxu1 }
 0x12c   : > { %v1797_v8 = vadd.f32 %v1796_v6, %v1795_v57  ;;  %v1798_v9 = vpop.f32.mrb[26].mxu0  ;;  %v1836_v12 = vpop.f32.mrb[25].mxu1 }
 0x12d   : > { %v1799_v11 = vpop.f32.mrb[27].mxu0  ;;  %v1837_v15 = vadd.f32 %v1836_v12, %v1835_v10  ;;  %v1838_v16 = vpop.f32.mrb[26].mxu1 }
 0x12e   : > { %v1203_v13 = vadd.f32 %v1797_v8, %v1138_v19  ;;  %v1800_v14 = vadd.f32 %v1799_v11, %v1798_v9  ;;  %v1839_v5 = vpop.f32.mrb[27].mxu1 }
 0x12f   : > { %v1840_v18 = vadd.f32 %v1839_v5, %v1838_v16 }
 0x130   : > { %v1206_v17 = vadd.f32 %v1800_v14, %v1141_v21  ;;  %v1268_v20 = vadd.f32 %v1837_v15, %v1203_v13 }
 0x132   : > { %v1801_v22 = vpop.f32.mrb[28].mxu0  ;;  %v1271_v7 = vadd.f32 %v1840_v18, %v1206_v17 }
 0x133   : > { %v1802_v23 = vpop.f32.mrb[29].mxu0  ;;  %v1841_v26 = vpop.f32.mrb[28].mxu1 }
 0x134   : > { %v1803_v24 = vadd.f32 %v1802_v23, %v1801_v22  ;;  %v1804_v25 = vpop.f32.mrb[30].mxu0  ;;  %v1842_v28 = vpop.f32.mrb[29].mxu1 }
 0x135   : > { %v1805_v27 = vpop.f32.mrb[31].mxu0  ;;  %v1843_v31 = vadd.f32 %v1842_v28, %v1841_v26  ;;  %v1844_v19 = vpop.f32.mrb[30].mxu1 }
 0x136   : > { %v1211_v29 = vadd.f32 %v1803_v24, %v1146_v32  ;;  %v1806_v30 = vadd.f32 %v1805_v27, %v1804_v25  ;;  %v1845_v33 = vpop.f32.mrb[31].mxu1 }
 0x137   : > { %v1846_v36 = vadd.f32 %v1845_v33, %v1844_v19 }
 0x138   : > { %v1214_v34 = vadd.f32 %v1806_v30, %v1149_v35  ;;  %v1276_v37 = vadd.f32 %v1843_v31, %v1211_v29 }
 0x13a   : > { %v1279_v21 = vadd.f32 %v1846_v36, %v1214_v34 }
 0x13b   : > { %v1877_v38 = vpop.f32.mrb[32].mxu0 }
 0x13c   : > { %v1325_v39 = vadd.f32 %v1877_v38, %v1260_v3  ;;  %v1881_v40 = vpop.f32.mrb[32].mxu1  ;;  %v1316_v41 = vpop.f32.mrb[33].mxu0 }
 0x13d   : > { %v1341_v42 = vadd.f32 %v1881_v40, %v1276_v37  ;;  %v1317_v43 = vadd.f32 %v1316_v41, %v1252_v50  ;;  %v1332_v44 = vpop.f32.mrb[33].mxu1  ;;  %v1878_v45 = vpop.f32.mrb[34].mxu0 }
 0x13e   : > { %v1333_v46 = vadd.f32 %v1332_v44, %v1268_v20  ;;  %v1328_v47 = vadd.f32 %v1878_v45, %v1263_v4  ;;  %v1882_v32 = vpop.f32.mrb[34].mxu1  ;;  %v1319_v48 = vpop.f32.mrb[35].mxu0  ;;  %v1363_v62 = vmul.f32 %v1325_v39, %v1325_v39 }
 0x13f   : > { %v1344_v35 = vadd.f32 %v1882_v32, %v1279_v21  ;;  %v1320_v49 = vadd.f32 %v1319_v48, %v2336_v52  ;;  %v1335_v51 = vpop.f32.mrb[35].mxu1  ;;  %v1361_v56 = vmul.f32 %v1317_v43, %v1317_v43  ;;  %v1367_v9 = vmul.f32 %v1341_v42, %v1341_v42 }
 0x140   : > { %v1672_v53 = vpack.c.bf16 %v1328_v47, %v1325_v39  ;;  %v1336_v54 = vadd.f32 %v1335_v51, %v1271_v7  ;;  %v1364_v0 = vmul.f32 %v1328_v47, %v1328_v47  ;;  %v1365_v2 = vmul.f32 %v1333_v46, %v1333_v46 }
 0x141   : > { %v1682_v58 = vpack.c.bf16 %v1344_v35, %v1341_v42  ;;  %v1347_v59 = vadd.f32 %v1320_v49, %v1317_v43  ;;  %v1362_v50 = vmul.f32 %v1320_v49, %v1320_v49  ;;  %v1667_v60 = vpack.c.bf16 %v1320_v49, %v1317_v43 }
 0x142   : > { %1684 = vst [vmem:[%s213_s6 + $0x8] sm:$0xff] %v1672_v53   ;;  %v1677_v61 = vpack.c.bf16 %v1336_v54, %v1333_v46  ;;  %v1366_v6 = vmul.f32 %v1336_v54, %v1336_v54  ;;  %v1368_v12 = vmul.f32 %v1344_v35, %v1344_v35 }
 0x143   : > { %1686 = vst [vmem:[%s213_s6 + $0x18] sm:$0xff] %v1682_v58   ;;  %v1348_v63 = vadd.f32 %v1347_v59, %v1325_v39  ;;  %v1369_v55 = vadd.f32 %v1362_v50, %v1361_v56  ;;  %1668 = vst [vmem:[%s213_s6] sm:$0xff] %v1667_v60  }
 0x144   : > { %1685 = vst [vmem:[%s213_s6 + $0x10] sm:$0xff] %v1677_v61  }
 0x145   : > { %v1370_v1 = vadd.f32 %v1369_v55, %v1363_v62  ;;  %v1349_v52 = vadd.f32 %v1348_v63, %v1328_v47 }
 0x147   : > { %v1350_v3 = vadd.f32 %v1349_v52, %v1333_v46  ;;  %v1371_v57 = vadd.f32 %v1370_v1, %v1364_v0 }
 0x149   : > { %v1351_v4 = vadd.f32 %v1350_v3, %v1336_v54  ;;  %v1372_v8 = vadd.f32 %v1371_v57, %v1365_v2 }
 0x14b   : > { %v1352_v10 = vadd.f32 %v1351_v4, %v1341_v42  ;;  %v1373_v11 = vadd.f32 %v1372_v8, %v1366_v6 }
 0x14d   : > { %v1353_v13 = vadd.f32 %v1352_v10, %v1344_v35  ;;  %v1374_v14 = vadd.f32 %v1373_v11, %v1367_v9 }
 0x14f   : > { %v1354_v15 = vrot.slane %v1353_v13, 4  ;;  %v1375_v16 = vadd.f32 %v1374_v14, %v1368_v12 }
 0x151   : > { %v1355_v5 = vadd.f32 %v1354_v15, %v1353_v13  ;;  %v1376_v17 = vrot.slane %v1375_v16, 4 }
 0x153   : > { %v1356_v18 = vrot.slane %v1355_v5, 2  ;;  %v1377_v20 = vadd.f32 %v1376_v17, %v1375_v16 }
 0x155   : > { %v1357_v22 = vadd.f32 %v1356_v18, %v1355_v5  ;;  %v1378_v7 = vrot.slane %v1377_v20, 2 }
 0x157   : > { %v1358_v23 = vrot.slane %v1357_v22, 1  ;;  %v1379_v24 = vadd.f32 %v1378_v7, %v1377_v20 }
 0x159   : > { %v1359_v25 = vadd.f32 %v1358_v23, %v1357_v22  ;;  %v1380_v26 = vrot.slane %v1379_v24, 1 }
 0x15b   : > { %1360 = vst [vmem:[%s217_s9] sm:$0x1] %v1359_v25  ;;  %v1381_v27 = vadd.f32 %v1380_v26, %v1379_v24 }
 0x15d   : > { %1382 = vst [vmem:[%s220_s12] sm:$0x1] %v1381_v27 }
 0x15e PF: > { %s15_s15 = sadd.s32 1, %s2038_s15  }
 0x15f   : > { %p12_p5 = scmp.ge.s32.totalorder %s15_s15, 4  }
 0x161   :  { %14 = sbr.rel (!%p12_p5) target bundleno = 1 (0x1), region = 82 }

// kernel: _lambda_.25
= control target key start
LH: loop header
LB: loop body
LE: loop exit
PB: predicated region body
PF: predicated region fallthrough
CT: control target
= control target key end

     0   :  { %s326_s12 = smov 0   ;;  %s343_s0 = inlined_call_operand.vmem [shape: bf16[32,128], index: 0, kind: input, shape index: {}]   ;;  %s344_s1 = inlined_call_operand.vmem [shape: f32[1,128], index: 1, kind: input, shape index: {}]   ;;  %s345_s2 = inlined_call_operand.vmem [shape: f32[1,128], index: 2, kind: input, shape index: {}]   ;;  %s346_s3 = inlined_call_operand.vmem [shape: bf16[32,128], index: 3, kind: output, shape index: {}]  }
   0x1 LB: > { %s264_s13 = sadd.s32 4294967295, %s304_s12   ;;  %p268_p0 = scmp.ge.s32.totalorder %s304_s12, 1  ;;  %s304_s12 = sphi %s326_s12, %s13_s12  }
   0x2   : > { %p138_p1 = scmp.lt.s32.totalorder %s304_s12, 3 }
   0x4   : > { %p139_p2 = pnand %p268_p0, %p138_p1 }
   0x5   : > { %s269_s14 = sshll.u32 (!%p139_p2), %s264_s13, 1  ;;  %v273_v1 = vld [vmem:[%s344_s1] ss:$0 sm:$0xff] (!%p139_p2) }
   0x6   : > { %142 = sbr.rel (%p139_p2) target bundleno = 28 (0x1c), region = 32  ;;  %p163_p3 = scmp.lt.s32.totalorder (!%p139_p2), %s269_s14, 3  ;;  %v274_v4 = vld [vmem:[%s345_s2] ss:$0 sm:$0xff] (!%p139_p2) }
   0xd   : > { %s348_s14 = smov (!%p163_p3, %s269_s14), 3 }
   0xe   : > { %s270_s15 = sshll.u32 %s348_s14, 2 }
   0xf   : > { %s166_s18 = scalar_lea.vmem %s343_s0, %s270_s15  ;;  %s172_s25 = scalar_lea.vmem %s346_s3, %s270_s15 }
  0x10   : > { %v282_v0 = vld [vmem:[%s166_s18] sm:$0xff]  }
  0x11   : > { %v283_v2 = vunpack.c.l.bf16 %v282_v0  ;;  %v284_v3 = vunpack.c.h.bf16 %v282_v0 }
  0x13   : > { %v185_v5 = vmul.f32 %v283_v2, %v273_v1  ;;  %v186_v6 = vmul.f32 %v284_v3, %v273_v1 }
  0x15   : > { %v194_v7 = vadd.f32 %v274_v4, %v185_v5  ;;  %v195_v8 = vadd.f32 %v274_v4, %v186_v6 }
  0x17   : > { %v196_v9 = vmax.f32 %v194_v7, 0.0  ;;  %v197_v10 = vmax.f32 %v195_v8, 0.0 }
  0x19   : > { %v288_v11 = vpack.c.bf16 %v197_v10, %v196_v9 }
  0x1b   : > { %289 = vst [vmem:[%s172_s25] sm:$0xff] %v288_v11  }
  0x1c PF: > { %s13_s12 = sadd.s32 1, %s304_s12  }
  0x1d   : > { %p10_p4 = scmp.ge.s32.totalorder %s13_s12, 4  }
  0x1f   :  { %12 = sbr.rel (!%p10_p4) target bundleno = 1 (0x1), region = 62 }

// kernel: tile.6
= control target key start
LH: loop header
LB: loop body
LE: loop exit
PB: predicated region body
PF: predicated region fallthrough
CT: control target
= control target key end

     0   :  { %s22_s0 = inlined_call_operand.vmem [shape: f32[64], index: 0, kind: input, shape index: {}]   ;;  %s23_s1 = inlined_call_operand.vmem [shape: f32[4,64], index: 1, kind: output, shape index: {}]  }
   0x1   :  { %v4_v0 = vld [vmem:[%s22_s0] ss:$0 sm:$0xff] }
   0x2   :  { %5 = vst [vmem:[%s23_s1] sm:$0xf] %v4_v0 }

// kernel: tile.7
= control target key start
LH: loop header
LB: loop body
LE: loop exit
PB: predicated region body
PF: predicated region fallthrough
CT: control target
= control target key end

     0   :  { %s6_s8 = smov 3  ;;  %vm8_vm0 = vcmask 523264   ;;  %s30_s9 = smov 64   ;;  %vm15_vm1 = vcmask 1048064   ;;  %s50_s0 = inlined_call_operand.vmem [shape: f32[4,64], index: 0, kind: input, shape index: {}]   ;;  %s51_s1 = inlined_call_operand.vmem [shape: f32[1,256], index: 1, kind: output, shape index: {}]  }
   0x1   :  { %v4_v0 = vld [vmem:[%s50_s0] sm:$0xf]  ;;  %s11_s0 = smov 3 }
   0x2   :  { %5 = vst [vmem:[#allocation1] sm:$0xf] %v4_v0 }
   0x9   :  { %v12_v1 = vld [vmem:[#allocation1 + $0x1] ss:$2 sm:%s11_s0]   ;;  %v7_v2 = vld [vmem:[#allocation1] ss:$2 sm:%s6_s8]  }
   0xa   :  { %13 = vrot.lane.b32.xlu0 %v12_v1, %s30_s9  ;;  %9 = vst.msk [vmem:[#allocation0] ss:$8 sm:$0x3] %vm8_vm0, %v7_v2  }
  0x7c   :  { %v14_v3 = vpop.permute.xlu0 %13  }
  0x7d   :  { %16 = vst.msk [vmem:[#allocation0] ss:$8 sm:$0x3] %vm15_vm1, %v14_v3  }
  0x84   :  { %v20_v4 = vld [vmem:[#allocation0] sm:$0x1]  ;;  %v24_v5 = vld [vmem:[#allocation0 + $0x8] sm:$0x1] }
  0x85   :  { %22 = vst [vmem:[%s51_s1] sm:$0x1] %v20_v4  ;;  %28 = vst [vmem:[%s51_s1 + $0x1] sm:$0x1] %v24_v5 }

// kernel: _lambda_.24
= control target key start
LH: loop header
LB: loop body
LE: loop exit
PB: predicated region body
PF: predicated region fallthrough
CT: control target
= control target key end

     0   :  { %s1542_s15 = smov 0   ;;  %s1801_s0 = inlined_call_operand.vmem [shape: bf16[32,1152], index: 0, kind: input, shape index: {}]   ;;  %s1802_s1 = inlined_call_operand.vmem [shape: bf16[1152,128], index: 1, kind: input, shape index: {}]   ;;  %s1803_s2 = inlined_call_operand.vmem [shape: bf16[32,128], index: 2, kind: output, shape index: {0}]   ;;  %s1804_s3 = inlined_call_operand.vmem [shape: f32[2,1,128], index: 3, kind: output, shape index: {1}]   ;;  %s1805_s4 = inlined_call_operand.vmem [shape: f32[2,1,128], index: 4, kind: output, shape index: {2}]  }
   0x1 LB: > { %s1548_s16 = sadd.s32 4294967295, %s1513_s15   ;;  %p1197_p0 = scmp.ge.s32.totalorder %s1513_s15, 1  ;;  %s1513_s15 = sphi %s1542_s15, %s15_s15  }
   0x2   : > { %p169_p1 = scmp.lt.s32.totalorder %s1513_s15, 3 }
   0x4   : > { %p170_p2 = pnand %p1197_p0, %p169_p1 }
   0x5   : > { %v1422_v0 = vld [vmem:[%s1802_s1 + $0x40] sm:$0xff] (!%p170_p2)   ;;  %v1426_v4 = vld [vmem:[%s1802_s1 + $0x48] sm:$0xff] (!%p170_p2)   ;;  %v1430_v8 = vld [vmem:[%s1802_s1 + $0x50] sm:$0xff] (!%p170_p2)   ;;  %s1198_s23 = sshll.u32 (!%p170_p2), %s1548_s16, 1  ;;  %vm1516_vm0 = vmmov (!%p170_p2), 0   ;;  %p215_p4 = scmp.lt.s32.totalorder (!%p170_p2), %s1548_s16, 1 }
   0x6   : > { %173 = sbr.rel (%p170_p2) target bundleno = 336 (0x150), region = 28  ;;  %v1423_v1 = vld [vmem:[%s1802_s1 + $0xc0] sm:$0xff] (!%p170_p2)   ;;  %1294 = vmatprep.subr.bf16.mxu0 (!%p170_p2), %v1422_v0  ;;  %v1427_v5 = vld [vmem:[%s1802_s1 + $0xc8] sm:$0xff] (!%p170_p2)   ;;  %v1431_v9 = vld [vmem:[%s1802_s1 + $0xd0] sm:$0xff] (!%p170_p2)   ;;  %p203_p3 = scmp.lt.s32.totalorder (!%p170_p2), %s1198_s23, 3 }
   0x7   : > { %v1424_v2 = vld [vmem:[%s1802_s1] sm:$0xff] (!%p170_p2)   ;;  %1316 = vmatprep.subr.bf16.mxu1 (!%p170_p2), %v1423_v1  ;;  %v1428_v6 = vld [vmem:[%s1802_s1 + $0x8] sm:$0xff] (!%p170_p2)   ;;  %v1432_v10 = vld [vmem:[%s1802_s1 + $0x10] sm:$0xff] (!%p170_p2)  }
   0x8   : > { %v1425_v3 = vld [vmem:[%s1802_s1 + $0x80] sm:$0xff] (!%p170_p2)   ;;  %1295 = vmatpush3.bf16.msra.mxu0 (!%p170_p2), %v1424_v2  ;;  %v1429_v7 = vld [vmem:[%s1802_s1 + $0x88] sm:$0xff] (!%p170_p2)   ;;  %v1433_v11 = vld [vmem:[%s1802_s1 + $0x90] sm:$0xff] (!%p170_p2)  }
   0x9   : > { %1317 = vmatpush3.bf16.msra.mxu1 (!%p170_p2), %v1425_v3  ;;  %1296 = vmatprep.subr.bf16.mxu0 (!%p170_p2), %v1426_v4  ;;  %v1434_v12 = vld [vmem:[%s1802_s1 + $0x58] sm:$0xff] (!%p170_p2)   ;;  %v1438_v16 = vld [vmem:[%s1802_s1 + $0x60] sm:$0xff] (!%p170_p2)   ;;  %v1442_v20 = vld [vmem:[%s1802_s1 + $0x68] sm:$0xff] (!%p170_p2)  }
   0xa   : > { %1318 = vmatprep.subr.bf16.mxu1 (!%p170_p2), %v1427_v5  ;;  %v1435_v13 = vld [vmem:[%s1802_s1 + $0xd8] sm:$0xff] (!%p170_p2)   ;;  %v1439_v17 = vld [vmem:[%s1802_s1 + $0xe0] sm:$0xff] (!%p170_p2)   ;;  %v1443_v21 = vld [vmem:[%s1802_s1 + $0xe8] sm:$0xff] (!%p170_p2)  }
   0xb   : > { %v1436_v14 = vld [vmem:[%s1802_s1 + $0x18] sm:$0xff] (!%p170_p2)   ;;  %v1440_v18 = vld [vmem:[%s1802_s1 + $0x20] sm:$0xff] (!%p170_p2)   ;;  %v1444_v22 = vld [vmem:[%s1802_s1 + $0x28] sm:$0xff] (!%p170_p2)  }
   0xc   : > { %1297 = vmatpush3.bf16.msra.mxu0 (!%p170_p2), %v1428_v6  ;;  %v1437_v15 = vld [vmem:[%s1802_s1 + $0x98] sm:$0xff] (!%p170_p2)   ;;  %v1441_v19 = vld [vmem:[%s1802_s1 + $0xa0] sm:$0xff] (!%p170_p2)   ;;  %v1445_v23 = vld [vmem:[%s1802_s1 + $0xa8] sm:$0xff] (!%p170_p2)   ;;  %v1515_v6 = vmov (!%p170_p2), 0.0  }
   0xd   : > { %1319 = vmatpush3.bf16.msra.mxu1 %v1429_v7  ;;  %1298 = vmatprep.subr.bf16.mxu0 %v1430_v8  ;;  %s1807_s23 = smov (!%p203_p3, %s1198_s23), 3  ;;  %v1446_v24 = vld [vmem:[%s1802_s1 + $0x70] sm:$0xff]   ;;  %v1450_v28 = vld [vmem:[%s1802_s1 + $0x78] sm:$0xff]   ;;  %v1460_v36 = vld [vmem:[%s1802_s1 + $0x140] sm:$0xff]   ;;  %s1809_s16 = smov (!%p215_p4, %s1548_s16), 1 }
   0xe   : > { %1320 = vmatprep.subr.bf16.mxu1 %v1431_v9  ;;  %v1447_v25 = vld [vmem:[%s1802_s1 + $0xf0] sm:$0xff]   ;;  %s1411_s22 = smul.u32 36, %s1807_s23  ;;  %v1451_v29 = vld [vmem:[%s1802_s1 + $0xf8] sm:$0xff]   ;;  %v1461_v37 = vld [vmem:[%s1802_s1 + $0x100] sm:$0xff]   ;;  %s217_s9 = scalar_lea.vmem %s1804_s3, %s1809_s16 }
   0xf   : > { %v1448_v26 = vld [vmem:[%s1802_s1 + $0x30] sm:$0xff]   ;;  %v1452_v30 = vld [vmem:[%s1802_s1 + $0x38] sm:$0xff]   ;;  %v1462_v38 = vld [vmem:[%s1802_s1 + $0x1c0] sm:$0xff]   ;;  %s220_s12 = scalar_lea.vmem %s1805_s4, %s1809_s16 }
  0x10   : > { %1299 = vmatpush3.bf16.msra.mxu0 %v1432_v10  ;;  %v1449_v27 = vld [vmem:[%s1802_s1 + $0xb0] sm:$0xff]   ;;  %s1649_s8 = scalar_lea.vmem %s1801_s0, %s1411_s22  ;;  %v1453_v31 = vld [vmem:[%s1802_s1 + $0xb8] sm:$0xff]   ;;  %v1463_v39 = vld [vmem:[%s1802_s1 + $0x180] sm:$0xff]  }
  0x11   : > { %1321 = vmatpush3.bf16.msra.mxu1 %v1433_v11  ;;  %1300 = vmatprep.subr.bf16.mxu0 %v1434_v12  ;;  %v1454_v32 = vld [vmem:[%s1649_s8] ss:$36 sps:$4 sm:$0xff]   ;;  %v1457_v34 = vld [vmem:[%s1649_s8 + $0x8] ss:$36 sps:$4 sm:$0xff]   ;;  %v1468_v44 = vld [vmem:[%s1802_s1 + $0x150] sm:$0xff]  }
  0x12   : > { %1322 = vmatprep.subr.bf16.mxu1 %v1435_v13  ;;  %v1456_v33 = vld [vmem:[%s1649_s8 + $0x4] ss:$36 sps:$4 sm:$0xff]   ;;  %v1459_v35 = vld [vmem:[%s1649_s8 + $0xc] ss:$36 sps:$4 sm:$0xff]   ;;  %v1472_v48 = vld [vmem:[%s1802_s1 + $0x158] sm:$0xff]  }
  0x13   : > { %886 = vmatprep.mubr.bf16.mxu0 %v1456_v33  ;;  %927 = vmatprep.mubr.bf16.mxu1 %v1459_v35  ;;  %v1464_v40 = vld [vmem:[%s1802_s1 + $0x148] sm:$0xff]   ;;  %v1469_v45 = vld [vmem:[%s1802_s1 + $0x110] sm:$0xff]   ;;  %v1473_v49 = vld [vmem:[%s1802_s1 + $0x118] sm:$0xff]  }
  0x14   : > { %1301 = vmatpush3.bf16.msra.mxu0 %v1436_v14  ;;  %v1465_v41 = vld [vmem:[%s1802_s1 + $0x108] sm:$0xff]   ;;  %v1470_v46 = vld [vmem:[%s1802_s1 + $0x1d0] sm:$0xff]   ;;  %v1474_v50 = vld [vmem:[%s1802_s1 + $0x1d8] sm:$0xff]  }
  0x15   : > { %1323 = vmatpush3.bf16.msra.mxu1 %v1437_v15  ;;  %1302 = vmatprep.subr.bf16.mxu0 %v1438_v16  ;;  %v1466_v42 = vld [vmem:[%s1802_s1 + $0x1c8] sm:$0xff]   ;;  %v1471_v47 = vld [vmem:[%s1802_s1 + $0x190] sm:$0xff]   ;;  %v1475_v51 = vld [vmem:[%s1802_s1 + $0x198] sm:$0xff]  }
  0x16   : > { %1324 = vmatprep.subr.bf16.mxu1 %v1439_v17  ;;  %v1467_v43 = vld [vmem:[%s1802_s1 + $0x188] sm:$0xff]   ;;  %v1476_v52 = vld [vmem:[%s1802_s1 + $0x160] sm:$0xff]   ;;  %v1484_v60 = vld [vmem:[%s1802_s1 + $0x170] sm:$0xff]  }
  0x17   : > { %v1477_v53 = vld [vmem:[%s1802_s1 + $0x120] sm:$0xff]   ;;  %v1480_v56 = vld [vmem:[%s1802_s1 + $0x168] sm:$0xff]   ;;  %v1485_v61 = vld [vmem:[%s1802_s1 + $0x130] sm:$0xff]  }
  0x18   : > { %1303 = vmatpush3.bf16.msra.mxu0 %v1440_v18  ;;  %v1478_v54 = vld [vmem:[%s1802_s1 + $0x1e0] sm:$0xff]   ;;  %v1481_v57 = vld [vmem:[%s1802_s1 + $0x128] sm:$0xff]   ;;  %v1486_v62 = vld [vmem:[%s1802_s1 + $0x1f0] sm:$0xff]  }
  0x19   : > { %1325 = vmatpush3.bf16.msra.mxu1 %v1441_v19  ;;  %1304 = vmatprep.subr.bf16.mxu0 %v1442_v20  ;;  %v1479_v55 = vld [vmem:[%s1802_s1 + $0x1a0] sm:$0xff]   ;;  %v1482_v58 = vld [vmem:[%s1802_s1 + $0x1e8] sm:$0xff]   ;;  %v1487_v63 = vld [vmem:[%s1802_s1 + $0x1b0] sm:$0xff]  }
  0x1a   : > { %1326 = vmatprep.subr.bf16.mxu1 %v1443_v21  ;;  %v1483_v59 = vld [vmem:[%s1802_s1 + $0x1a8] sm:$0xff]   ;;  %v1488_v0 = vld [vmem:[%s1802_s1 + $0x178] sm:$0xff]   ;;  %v1491_v3 = vld [vmem:[%s1649_s8 + $0x10] ss:$36 sps:$4 sm:$0xff]  }
  0x1b   : > { %v1489_v1 = vld [vmem:[%s1802_s1 + $0x138] sm:$0xff]   ;;  %v1498_v9 = vld [vmem:[%s1802_s1 + $0x200] sm:$0xff]   ;;  %v1499_v10 = vld [vmem:[%s1802_s1 + $0x208] sm:$0xff]  }
  0x1c   : > { %1305 = vmatpush3.bf16.msra.mxu0 %v1444_v22  ;;  %v1490_v2 = vld [vmem:[%s1802_s1 + $0x1f8] sm:$0xff]   ;;  %v1500_v11 = vld [vmem:[%s1802_s1 + $0x210] sm:$0xff]   ;;  %v1502_v13 = vld [vmem:[%s1802_s1 + $0x220] sm:$0xff]  }
  0x1d   : > { %1327 = vmatpush3.bf16.msra.mxu1 %v1445_v23  ;;  %1306 = vmatprep.subr.bf16.mxu0 %v1446_v24  ;;  %v1493_v4 = vld [vmem:[%s1649_s8 + $0x14] ss:$36 sps:$4 sm:$0xff]   ;;  %v1497_v8 = vld [vmem:[%s1649_s8 + $0x1c] ss:$36 sps:$4 sm:$0xff]   ;;  %v1503_v14 = vld [vmem:[%s1802_s1 + $0x228] sm:$0xff]  }
  0x1e   : > { %1328 = vmatprep.subr.bf16.mxu1 %v1447_v25  ;;  %v1494_v5 = vld [vmem:[%s1802_s1 + $0x1b8] sm:$0xff]   ;;  %v1504_v15 = vld [vmem:[%s1802_s1 + $0x230] sm:$0xff]   ;;  %v1506_v17 = vld [vmem:[%s1649_s8 + $0x20] ss:$36 sps:$4 sm:$0xff]  }
  0x1f   : > { %v1495_v7 = vld [vmem:[%s1649_s8 + $0x18] ss:$36 sps:$4 sm:$0xff]   ;;  %s1201_s8 = sshll.u32 %s1807_s23, 2 }
  0x20   : > { %1307 = vmatpush3.bf16.msra.mxu0 %v1448_v26  ;;  %v1501_v12 = vld [vmem:[%s1802_s1 + $0x218] sm:$0xff]   ;;  %s213_s6 = scalar_lea.vmem %s1803_s2, %s1201_s8 }
  0x21   : > { %1329 = vmatpush3.bf16.msra.mxu1 %v1449_v27  ;;  %1308 = vmatprep.subr.bf16.mxu0 %v1450_v28  ;;  %v1505_v16 = vld [vmem:[%s1802_s1 + $0x238] sm:$0xff]  }
  0x22   : > { %1330 = vmatprep.subr.bf16.mxu1 %v1451_v29 }
  0x24   : > { %1309 = vmatpush3.bf16.msra.mxu0 %v1452_v30 }
  0x25   : > { %1331 = vmatpush3.bf16.msra.mxu1 %v1453_v31  ;;  %1338 = vmatprep.subr.bf16.mxu0 %v1460_v36 }
  0x26   : > { %1360 = vmatprep.subr.bf16.mxu1 %v1462_v38 }
  0x27   : > { %887 = vmatmul.mubr.bf16.vlgmr.msra.gmra.mrb[0].mxu0 %v1454_v32 }
  0x28   : > { %928 = vmatmul.mubr.bf16.vlgmr.msra.gmra.mrb[0].mxu1 %v1457_v34  ;;  %1339 = vmatpush3.bf16.msra.mxu0 %v1461_v37 }
  0x29   : > { %1361 = vmatpush3.bf16.msra.mxu1 %v1463_v39  ;;  %1340 = vmatprep.subr.bf16.mxu0 %v1464_v40 }
  0x2a   : > { %1362 = vmatprep.subr.bf16.mxu1 %v1466_v42  ;;  %968 = vmatprep.mubr.bf16.mxu0 %v1493_v4 }
  0x2b   : > { %1009 = vmatprep.mubr.bf16.mxu1 %v1497_v8 }
  0x2c   : > { %1341 = vmatpush3.bf16.msra.mxu0 %v1465_v41 }
  0x2d   : > { %1363 = vmatpush3.bf16.msra.mxu1 %v1467_v43  ;;  %1342 = vmatprep.subr.bf16.mxu0 %v1468_v44 }
  0x2e   : > { %1364 = vmatprep.subr.bf16.mxu1 %v1470_v46 }
  0x30   : > { %1343 = vmatpush3.bf16.msra.mxu0 %v1469_v45 }
  0x31   : > { %1365 = vmatpush3.bf16.msra.mxu1 %v1471_v47  ;;  %1344 = vmatprep.subr.bf16.mxu0 %v1472_v48 }
  0x32   : > { %1366 = vmatprep.subr.bf16.mxu1 %v1474_v50 }
  0x34   : > { %1345 = vmatpush3.bf16.msra.mxu0 %v1473_v49 }
  0x35   : > { %1367 = vmatpush3.bf16.msra.mxu1 %v1475_v51  ;;  %1346 = vmatprep.subr.bf16.mxu0 %v1476_v52 }
  0x36   : > { %1368 = vmatprep.subr.bf16.mxu1 %v1478_v54 }
  0x38   : > { %1347 = vmatpush3.bf16.msra.mxu0 %v1477_v53 }
  0x39   : > { %1369 = vmatpush3.bf16.msra.mxu1 %v1479_v55  ;;  %1348 = vmatprep.subr.bf16.mxu0 %v1480_v56 }
  0x3a   : > { %1370 = vmatprep.subr.bf16.mxu1 %v1482_v58 }
  0x3c   : > { %1349 = vmatpush3.bf16.msra.mxu0 %v1481_v57 }
  0x3d   : > { %1371 = vmatpush3.bf16.msra.mxu1 %v1483_v59  ;;  %1350 = vmatprep.subr.bf16.mxu0 %v1484_v60 }
  0x3e   : > { %1372 = vmatprep.subr.bf16.mxu1 %v1486_v62 }
  0x40   : > { %1351 = vmatpush3.bf16.msra.mxu0 %v1485_v61 }
  0x41   : > { %1373 = vmatpush3.bf16.msra.mxu1 %v1487_v63  ;;  %1352 = vmatprep.subr.bf16.mxu0 %v1488_v0 }
  0x42   : > { %1374 = vmatprep.subr.bf16.mxu1 %v1490_v2 }
  0x44   : > { %1353 = vmatpush3.bf16.msra.mxu0 %v1489_v1 }
  0x45   : > { %1391 = vmatprep.subr.bf16.mxu0 %v1515_v6  ;;  %1375 = vmatpush3.bf16.msra.mxu1 %v1494_v5 }
  0x47   : > { %969 = vmatmul.mubr.bf16.vlgmr.msra.gmra.mrb[4].mxu0 %v1491_v3 }
  0x48   : > { %1407 = vmatprep.mubr.msk.bf16.mxu0 %vm1516_vm0, %v1515_v6  ;;  %1392 = vmatpush3.bf16.msra.mxu0 %v1498_v9 }
  0x49   : > { %1010 = vmatmul.mubr.bf16.vlgmr.msra.gmra.mrb[4].mxu1 %v1495_v7  ;;  %1393 = vmatprep.subr.bf16.mxu0 %v1515_v6 }
  0x4c   : > { %1394 = vmatpush3.bf16.msra.mxu0 %v1499_v10 }
  0x4d   : > { %1395 = vmatprep.subr.bf16.mxu0 %v1515_v6 }
  0x50   : > { %1396 = vmatpush3.bf16.msra.mxu0 %v1500_v11 }
  0x51   : > { %1397 = vmatprep.subr.bf16.mxu0 %v1515_v6 }
  0x54   : > { %1398 = vmatpush3.bf16.msra.mxu0 %v1501_v12 }
  0x55   : > { %1399 = vmatprep.subr.bf16.mxu0 %v1515_v6 }
  0x58   : > { %1400 = vmatpush3.bf16.msra.mxu0 %v1502_v13 }
  0x59   : > { %1401 = vmatprep.subr.bf16.mxu0 %v1515_v6 }
  0x5c   : > { %1402 = vmatpush3.bf16.msra.mxu0 %v1503_v14 }
  0x5d   : > { %1403 = vmatprep.subr.bf16.mxu0 %v1515_v6 }
  0x60   : > { %1404 = vmatpush3.bf16.msra.mxu0 %v1504_v15 }
  0x61   : > { %1405 = vmatprep.subr.bf16.mxu0 %v1515_v6 }
  0x64   : > { %1406 = vmatpush3.bf16.msra.mxu0 %v1505_v16 }
  0x67   : > { %1408 = vmatmul.mubr.bf16.vlgmr.msra.gmra.mrb[8].mxu0 %v1506_v17 }
  0xfa   : > { %v1310_v18 = vpop.f32.mrb[0].mxu0 }
  0xfb   : > { %v1332_v19 = vpop.f32.mrb[0].mxu1  ;;  %v1311_v20 = vpop.f32.mrb[1].mxu0 }
  0xfc   : > { %v1312_v21 = vadd.f32 %v1311_v20, %v1310_v18  ;;  %v1333_v22 = vpop.f32.mrb[1].mxu1  ;;  %v1313_v23 = vpop.f32.mrb[2].mxu0 }
  0xfd   : > { %v1334_v24 = vadd.f32 %v1333_v22, %v1332_v19  ;;  %v1335_v25 = vpop.f32.mrb[2].mxu1  ;;  %v1314_v26 = vpop.f32.mrb[3].mxu0 }
  0xfe   : > { %v1315_v27 = vadd.f32 %v1314_v26, %v1313_v23  ;;  %v1336_v28 = vpop.f32.mrb[3].mxu1 }
  0xff   : > { %v930_v29 = vadd.f32 %v1334_v24, %v1312_v21  ;;  %v1337_v30 = vadd.f32 %v1336_v28, %v1335_v25 }
 0x101   : > { %v933_v31 = vadd.f32 %v1337_v30, %v1315_v27 }
 0x11a   : > { %v1354_v32 = vpop.f32.mrb[4].mxu0 }
 0x11b   : > { %v1355_v33 = vpop.f32.mrb[5].mxu0 }
 0x11c   : > { %v1356_v34 = vadd.f32 %v1355_v33, %v1354_v32  ;;  %v1357_v35 = vpop.f32.mrb[6].mxu0  ;;  %v1376_v36 = vpop.f32.mrb[4].mxu1 }
 0x11d   : > { %v1358_v37 = vpop.f32.mrb[7].mxu0  ;;  %v1377_v40 = vpop.f32.mrb[5].mxu1 }
 0x11e   : > { %v971_v38 = vadd.f32 %v1356_v34, %v930_v29  ;;  %v1359_v39 = vadd.f32 %v1358_v37, %v1357_v35  ;;  %v1378_v41 = vadd.f32 %v1377_v40, %v1376_v36  ;;  %v1379_v42 = vpop.f32.mrb[6].mxu1 }
 0x11f   : > { %v1380_v44 = vpop.f32.mrb[7].mxu1 }
 0x120   : > { %v974_v43 = vadd.f32 %v1359_v39, %v933_v31  ;;  %v1381_v45 = vadd.f32 %v1380_v44, %v1379_v42  ;;  %v1012_v46 = vadd.f32 %v1378_v41, %v971_v38 }
 0x122   : > { %v1015_v47 = vadd.f32 %v1381_v45, %v974_v43 }
 0x13a   : > { %v1052_v48 = vpop.f32.mrb[8].mxu0 }
 0x13b   : > { %v1053_v49 = vadd.f32 %v1052_v48, %v1012_v46  ;;  %v1409_v50 = vpop.f32.mrb[9].mxu0 }
 0x13c   : > { %v1055_v51 = vpop.f32.mrb[10].mxu0 }
 0x13d   : > { %v1056_v52 = vadd.f32 %v1055_v51, %v1015_v47  ;;  %v1410_v53 = vpop.f32.mrb[11].mxu0  ;;  %v1067_v54 = vmul.f32 %v1053_v49, %v1053_v49 }
 0x13f   : > { %v1059_v55 = vadd.f32 %v1056_v52, %v1053_v49  ;;  %v1068_v56 = vmul.f32 %v1056_v52, %v1056_v52  ;;  %v1292_v57 = vpack.c.bf16 %v1056_v52, %v1053_v49 }
 0x141   : > { %v1060_v58 = vrot.slane %v1059_v55, 4  ;;  %v1069_v59 = vadd.f32 %v1068_v56, %v1067_v54  ;;  %1293 = vst [vmem:[%s213_s6] sm:$0xff] %v1292_v57  }
 0x143   : > { %v1061_v60 = vadd.f32 %v1060_v58, %v1059_v55  ;;  %v1070_v61 = vrot.slane %v1069_v59, 4 }
 0x145   : > { %v1062_v62 = vrot.slane %v1061_v60, 2  ;;  %v1071_v63 = vadd.f32 %v1070_v61, %v1069_v59 }
 0x147   : > { %v1063_v0 = vadd.f32 %v1062_v62, %v1061_v60  ;;  %v1072_v1 = vrot.slane %v1071_v63, 2 }
 0x149   : > { %v1064_v2 = vrot.slane %v1063_v0, 1  ;;  %v1073_v3 = vadd.f32 %v1072_v1, %v1071_v63 }
 0x14b   : > { %v1065_v4 = vadd.f32 %v1064_v2, %v1063_v0  ;;  %v1074_v5 = vrot.slane %v1073_v3, 1 }
 0x14d   : > { %1066 = vst [vmem:[%s217_s9] sm:$0x1] %v1065_v4  ;;  %v1075_v6 = vadd.f32 %v1074_v5, %v1073_v3 }
 0x14f   : > { %1076 = vst [vmem:[%s220_s12] sm:$0x1] %v1075_v6 }
 0x150 PF: > { %s15_s15 = sadd.s32 1, %s1513_s15  }
 0x151   : > { %p12_p5 = scmp.ge.s32.totalorder %s15_s15, 4  }
 0x153   :  { %14 = sbr.rel (!%p12_p5) target bundleno = 1 (0x1), region = 82 }

// kernel: _lambda_.27
= control target key start
LH: loop header
LB: loop body
LE: loop exit
PB: predicated region body
PF: predicated region fallthrough
CT: control target
= control target key end

     0   :  { %s590_s18 = smov 0   ;;  %s668_s0 = inlined_call_operand.vmem [shape: bf16[32,128], index: 0, kind: input, shape index: {}]   ;;  %s669_s1 = inlined_call_operand.vmem [shape: bf16[128,256], index: 1, kind: input, shape index: {}]   ;;  %s670_s2 = inlined_call_operand.vmem [shape: f32[1,128], index: 2, kind: input, shape index: {}]   ;;  %s671_s3 = inlined_call_operand.vmem [shape: f32[1,128], index: 3, kind: input, shape index: {}]   ;;  %s672_s4 = inlined_call_operand.vmem [shape: f32[1,256], index: 4, kind: input, shape index: {}]   ;;  %s673_s5 = inlined_call_operand.vmem [shape: bf16[32,256], index: 5, kind: output, shape index: {}]  }
   0x1 LB: > { %s479_s19 = sadd.s32 4294967295, %s557_s18   ;;  %p483_p0 = scmp.ge.s32.totalorder %s557_s18, 1  ;;  %s557_s18 = sphi %s590_s18, %s15_s18  }
   0x2   : > { %p188_p1 = scmp.lt.s32.totalorder %s557_s18, 3 }
   0x4   : > { %p189_p2 = pnand %p483_p0, %p188_p1 }
   0x5   : > { %v527_v0 = vld [vmem:[%s669_s1 + $0x4] ss:$8 sps:$4 sm:$0xff] (!%p189_p2)   ;;  %s484_s22 = sshll.u32 (!%p189_p2), %s479_s19, 1  ;;  %v529_v1 = vld [vmem:[%s669_s1] ss:$8 sps:$4 sm:$0xff] (!%p189_p2)   ;;  %v559_v2 = vmov (!%p189_p2), 0   ;;  %v274_v29 = vlaneseq (!%p189_p2) }
   0x6   : > { %192 = sbr.rel (%p189_p2) target bundleno = 258 (0x102), region = 40  ;;  %396 = vmatprep.mubr.bf16.mxu0 (!%p189_p2), %v559_v2  ;;  %p218_p3 = scmp.lt.s32.totalorder (!%p189_p2), %s484_s22, 3  ;;  %364 = vmatprep.subr.bf16.mxu0 (!%p189_p2), %v527_v0  ;;  %v530_v3 = vld [vmem:[%s669_s1 + $0x14] ss:$8 sps:$4 sm:$0xff] (!%p189_p2)   ;;  %v532_v4 = vld [vmem:[%s669_s1 + $0x10] ss:$8 sps:$4 sm:$0xff] (!%p189_p2)  }
   0x7   : > { %365 = vmatpush1.bf16.msra.mxu0 (!%p189_p2), %v529_v1  ;;  %v533_v5 = vld [vmem:[%s669_s1 + $0x24] ss:$8 sps:$4 sm:$0xff] (!%p189_p2)   ;;  %v535_v6 = vld [vmem:[%s669_s1 + $0x20] ss:$8 sps:$4 sm:$0xff] (!%p189_p2)   ;;  %v536_v7 = vld [vmem:[%s669_s1 + $0x34] ss:$8 sps:$4 sm:$0xff] (!%p189_p2)  }
   0x8   : > { %366 = vmatprep.subr.bf16.mxu0 (!%p189_p2), %v530_v3  ;;  %v538_v8 = vld [vmem:[%s669_s1 + $0x30] ss:$8 sps:$4 sm:$0xff] (!%p189_p2)   ;;  %v539_v10 = vld [vmem:[%s669_s1 + $0x44] ss:$8 sps:$4 sm:$0xff] (!%p189_p2)   ;;  %v541_v13 = vld [vmem:[%s669_s1 + $0x40] ss:$8 sps:$4 sm:$0xff] (!%p189_p2)  }
   0x9   : > { %v489_v14 = vld [vmem:[%s670_s2] ss:$0 sm:$0xff] (!%p189_p2)  ;;  %v542_v15 = vld [vmem:[%s669_s1 + $0x54] ss:$8 sps:$4 sm:$0xff] (!%p189_p2)   ;;  %v544_v18 = vld [vmem:[%s669_s1 + $0x50] ss:$8 sps:$4 sm:$0xff] (!%p189_p2)  }
   0xa   : > { %v490_v19 = vld [vmem:[%s671_s3] ss:$0 sm:$0xff] (!%p189_p2)  ;;  %v545_v20 = vld [vmem:[%s669_s1 + $0x64] ss:$8 sps:$4 sm:$0xff] (!%p189_p2)   ;;  %v548_v24 = vld [vmem:[%s669_s1 + $0x74] ss:$8 sps:$4 sm:$0xff] (!%p189_p2)  }
   0xb   : > { %367 = vmatpush1.bf16.msra.mxu0 (!%p189_p2), %v532_v4  ;;  %v547_v23 = vld [vmem:[%s669_s1 + $0x60] ss:$8 sps:$4 sm:$0xff] (!%p189_p2)   ;;  %v550_v27 = vld [vmem:[%s669_s1 + $0x70] ss:$8 sps:$4 sm:$0xff] (!%p189_p2)   ;;  %v275_v30 = vshrl.u32 (!%p189_p2), %v274_v29, 7 }
   0xc   : > { %368 = vmatprep.subr.bf16.mxu0 (!%p189_p2), %v533_v5  ;;  %v272_v32 = vld [vmem:[%s672_s4] sm:$0x3] (!%p189_p2) }
   0xd   : > { %s675_s22 = smov (!%p218_p3, %s484_s22), 3  ;;  %v276_v31 = vsub.s32 0, %v275_v30  ;;  %v280_v33 = vsub.s32 1, %v275_v30 }
   0xe   : > { %s485_s6 = sshll.u32 %s675_s22, 2  ;;  %s511_s15 = sshll.u32 %s675_s22, 3 }
   0xf   : > { %s221_s13 = scalar_lea.vmem %s668_s0, %s485_s6  ;;  %369 = vmatpush1.bf16.msra.mxu0 %v535_v6  ;;  %v277_v34 = vrot.slane %v272_v32, %v276_v31  ;;  %v281_v35 = vrot.slane %v272_v32, %v280_v33  ;;  %s228_s19 = scalar_lea.vmem %s673_s5, %s511_s15 }
  0x10   : > { %v515_v9 = vld [vmem:[%s221_s13] sm:$0xff]   ;;  %370 = vmatprep.subr.bf16.mxu0 %v536_v7 }
  0x11   : > { %v516_v11 = vunpack.c.l.bf16 %v515_v9  ;;  %v517_v12 = vunpack.c.h.bf16 %v515_v9 }
  0x13   : > { %371 = vmatpush1.bf16.msra.mxu0 %v538_v8  ;;  %v242_v16 = vmul.f32 %v516_v11, %v489_v14  ;;  %v243_v17 = vmul.f32 %v517_v12, %v489_v14 }
  0x14   : > { %372 = vmatprep.subr.bf16.mxu0 %v539_v10 }
  0x15   : > { %v251_v21 = vadd.f32 %v490_v19, %v242_v16  ;;  %v252_v22 = vadd.f32 %v490_v19, %v243_v17 }
  0x17   : > { %373 = vmatpush1.bf16.msra.mxu0 %v541_v13  ;;  %v253_v25 = vmax.f32 %v251_v21, 0.0  ;;  %v254_v26 = vmax.f32 %v252_v22, 0.0 }
  0x18   : > { %374 = vmatprep.subr.bf16.mxu0 %v542_v15 }
  0x19   : > { %v255_v28 = vpack.c.bf16 %v254_v26, %v253_v25 }
  0x1b   : > { %375 = vmatpush1.bf16.msra.mxu0 %v544_v18 }
  0x1c   : > { %376 = vmatprep.subr.bf16.mxu0 %v545_v20 }
  0x1f   : > { %377 = vmatpush1.bf16.msra.mxu0 %v547_v23 }
  0x20   : > { %378 = vmatprep.subr.bf16.mxu0 %v548_v24 }
  0x23   : > { %379 = vmatpush1.bf16.msra.mxu0 %v550_v27 }
  0x26   : > { %397 = vmatmul.mubr.bf16.vlgmr.msra.gmra.mrb[0].mxu0 %v255_v28 }
  0xf9   : > { %v398_v36 = vpop.f32.mrb[0].mxu0 }
  0xfa   : > { %v399_v37 = vadd.f32 %v398_v36, %v277_v34  ;;  %v400_v38 = vpop.f32.mrb[1].mxu0 }
  0xfb   : > { %v401_v39 = vadd.f32 %v400_v38, %v281_v35  ;;  %v402_v40 = vpop.f32.mrb[2].mxu0 }
  0xfc   : > { %v403_v41 = vadd.f32 %v402_v40, %v277_v34  ;;  %v404_v42 = vpop.f32.mrb[3].mxu0 }
  0xfd   : > { %v512_v43 = vpack.c.bf16 %v401_v39, %v399_v37  ;;  %v405_v44 = vadd.f32 %v404_v42, %v281_v35 }
  0xff   : > { %419 = vst [vmem:[%s228_s19] sm:$0xff] %v512_v43  ;;  %v513_v45 = vpack.c.bf16 %v405_v44, %v403_v41 }
 0x101   : > { %420 = vst [vmem:[%s228_s19 + $0x8] sm:$0xff] %v513_v45 }
 0x102 PF: > { %s15_s18 = sadd.s32 1, %s557_s18  }
 0x103   : > { %p12_p4 = scmp.ge.s32.totalorder %s15_s18, 4  }
 0x105   :  { %14 = sbr.rel (!%p12_p4) target bundleno = 1 (0x1), region = 70 }

// kernel: _lambda_.29
= control target key start
LH: loop header
LB: loop body
LE: loop exit
PB: predicated region body
PF: predicated region fallthrough
CT: control target
= control target key end

     0   :  { %s409_s12 = smov 0   ;;  %s447_s0 = inlined_call_operand.vmem [shape: bf16[128,64], index: 0, kind: input, shape index: {}]   ;;  %s448_s1 = inlined_call_operand.vmem [shape: f32[1,64], index: 1, kind: input, shape index: {}]   ;;  %s449_s2 = inlined_call_operand.vmem [shape: f32[1,64], index: 2, kind: input, shape index: {}]   ;;  %s450_s3 = inlined_call_operand.vmem [shape: bf16[128,64], index: 3, kind: output, shape index: {}]  }
   0x1 LB: > { %s325_s13 = sadd.s32 4294967295, %s387_s12   ;;  %p329_p0 = scmp.ge.s32.totalorder %s387_s12, 1  ;;  %s387_s12 = sphi %s409_s12, %s13_s12  }
   0x2   : > { %p138_p1 = scmp.lt.s32.totalorder %s387_s12, 3 }
   0x4   : > { %p139_p2 = pnand %p329_p0, %p138_p1 }
   0x5   : > { %s330_s14 = sshll.u32 (!%p139_p2), %s325_s13, 3  ;;  %v334_v0 = vld [vmem:[%s448_s1] ss:$0 sm:$0xff] (!%p139_p2)  ;;  %vm260_vm0 = vcmask (!%p139_p2), 519168  }
   0x6   : > { %142 = sbr.rel (%p139_p2) target bundleno = 31 (0x1f), region = 32  ;;  %p163_p3 = scmp.lt.s32.totalorder (!%p139_p2), %s330_s14, 15  ;;  %v335_v9 = vld [vmem:[%s449_s2] ss:$0 sm:$0xff] (!%p139_p2) }
   0xd   : > { %s452_s14 = smov (!%p163_p3, %s330_s14), 15 }
   0xe   : > { %s331_s15 = sshll.u32 %s452_s14, 2 }
   0xf   : > { %s166_s18 = scalar_lea.vmem %s447_s0, %s331_s15  ;;  %s172_s25 = scalar_lea.vmem %s450_s3, %s331_s15 }
  0x10   : > { %v355_v1 = vld [vmem:[%s166_s18] sm:$0xff]   ;;  %v370_v2 = vld [vmem:[%s166_s18 + $0x8] sm:$0xff]   ;;  %v371_v3 = vld [vmem:[%s166_s18 + $0x10] sm:$0xff]  }
  0x11   : > { %v356_v4 = vunpack.c.l.bf16 %v355_v1  ;;  %v357_v5 = vunpack.c.h.bf16 %v355_v1  ;;  %v360_v6 = vunpack.c.l.bf16 %v370_v2  ;;  %v361_v7 = vunpack.c.h.bf16 %v370_v2  ;;  %v372_v8 = vld [vmem:[%s166_s18 + $0x18] sm:$0xff]  }
  0x12   : > { %v364_v10 = vunpack.c.l.bf16 %v371_v3  ;;  %v365_v11 = vunpack.c.h.bf16 %v371_v3  ;;  %v368_v12 = vunpack.c.l.bf16 %v372_v8  ;;  %v369_v13 = vunpack.c.h.bf16 %v372_v8 }
  0x13   : > { %v197_v14 = vmul.f32 %v356_v4, %v334_v0  ;;  %v198_v15 = vmul.f32 %v357_v5, %v334_v0  ;;  %v199_v16 = vmul.f32 %v360_v6, %v334_v0  ;;  %v200_v17 = vmul.f32 %v361_v7, %v334_v0 }
  0x14   : > { %v201_v18 = vmul.f32 %v364_v10, %v334_v0  ;;  %v202_v19 = vmul.f32 %v365_v11, %v334_v0  ;;  %v203_v20 = vmul.f32 %v368_v12, %v334_v0  ;;  %v204_v21 = vmul.f32 %v369_v13, %v334_v0 }
  0x15   : > { %v212_v22 = vadd.f32 %v335_v9, %v197_v14  ;;  %v213_v23 = vadd.f32 %v335_v9, %v198_v15  ;;  %v214_v24 = vadd.f32 %v335_v9, %v199_v16  ;;  %v215_v25 = vadd.f32 %v335_v9, %v200_v17 }
  0x16   : > { %v216_v26 = vadd.f32 %v335_v9, %v201_v18  ;;  %v217_v27 = vadd.f32 %v335_v9, %v202_v19  ;;  %v218_v28 = vadd.f32 %v335_v9, %v203_v20  ;;  %v219_v29 = vadd.f32 %v335_v9, %v204_v21 }
  0x17   : > { %v220_v30 = vmax.f32 %v212_v22, 0.0  ;;  %v221_v31 = vmax.f32 %v213_v23, 0.0  ;;  %v222_v32 = vmax.f32 %v214_v24, 0.0  ;;  %v223_v33 = vmax.f32 %v215_v25, 0.0 }
  0x18   : > { %v224_v34 = vmax.f32 %v216_v26, 0.0  ;;  %v225_v35 = vmax.f32 %v217_v27, 0.0  ;;  %v226_v36 = vmax.f32 %v218_v28, 0.0  ;;  %v227_v37 = vmax.f32 %v219_v29, 0.0 }
  0x19   : > { %v346_v38 = vpack.c.bf16 %v220_v30, %v220_v30  ;;  %v347_v39 = vpack.c.bf16 %v221_v31, %v221_v31  ;;  %v348_v40 = vpack.c.bf16 %v222_v32, %v222_v32  ;;  %v349_v41 = vpack.c.bf16 %v223_v33, %v223_v33 }
  0x1a   : > { %v350_v42 = vpack.c.bf16 %v224_v34, %v224_v34  ;;  %v351_v43 = vpack.c.bf16 %v225_v35, %v225_v35  ;;  %v352_v44 = vpack.c.bf16 %v226_v36, %v226_v36  ;;  %v353_v45 = vpack.c.bf16 %v227_v37, %v227_v37 }
  0x1b   : > { %261 = vst.msk [vmem:[%s172_s25] sm:$0xf] %vm260_vm0, %v346_v38  ;;  %262 = vst.msk [vmem:[%s172_s25 + $0x4] sm:$0xf] %vm260_vm0, %v347_v39 }
  0x1c   : > { %263 = vst.msk [vmem:[%s172_s25 + $0x8] sm:$0xf] %vm260_vm0, %v348_v40  ;;  %264 = vst.msk [vmem:[%s172_s25 + $0xc] sm:$0xf] %vm260_vm0, %v349_v41 }
  0x1d   : > { %265 = vst.msk [vmem:[%s172_s25 + $0x10] sm:$0xf] %vm260_vm0, %v350_v42  ;;  %266 = vst.msk [vmem:[%s172_s25 + $0x14] sm:$0xf] %vm260_vm0, %v351_v43 }
  0x1e   : > { %267 = vst.msk [vmem:[%s172_s25 + $0x18] sm:$0xf] %vm260_vm0, %v352_v44  ;;  %268 = vst.msk [vmem:[%s172_s25 + $0x1c] sm:$0xf] %vm260_vm0, %v353_v45 }
  0x1f PF: > { %s13_s12 = sadd.s32 1, %s387_s12  }
  0x20   : > { %p10_p4 = scmp.ge.s32.totalorder %s13_s12, 4  }
  0x22   :  { %12 = sbr.rel (!%p10_p4) target bundleno = 1 (0x1), region = 62 }

// kernel: squeeze.1
= control target key start
LH: loop header
LB: loop body
LE: loop exit
PB: predicated region body
PF: predicated region fallthrough
CT: control target
= control target key end

     0   :  { %s207_s0 = inlined_call_operand.vmem [shape: f32[128], index: 0, kind: input, shape index: {}]   ;;  %s208_s1 = inlined_call_operand.hbm [shape: f32[2,8,8], index: 1, kind: output, shape index: {}]  }
   0x1   :  { %v5_v0 = vld [vmem:[%s207_s0] sm:$0x1] }
   0x2   :  { %6 = vst [vmem:[#allocation2] sm:$0x1] %v5_v0 }
   0x3   :  { %2 = vsyncpa [#allocation1], 0  ;;  %s150_s0 = smov 120   ;;  %s151_s8 = smov 104   ;;  %vm8_vm0 = vcmask 64512  }
   0x4   :  { %s152_s9 = smov 112   ;;  %s153_s10 = smov 96  }
   0x5   :  { %s154_s11 = smov 88   ;;  %s155_s12 = smov 80  }
   0x6   :  { %s156_s13 = smov 72   ;;  %s157_s14 = smov 64  }
   0x7   :  { %s158_s15 = smov 56   ;;  %s159_s16 = smov 48  }
   0x8   :  { %s160_s17 = smov 40   ;;  %s161_s18 = smov 32  }
   0x9   :  { %v10_v1 = vld [vmem:[#allocation2] sm:$0x1]   ;;  %s162_s19 = smov 24   ;;  %s163_s20 = smov 16  }
   0xa   :  { %v22_v2 = vld [vmem:[#allocation2] sm:$0x1]   ;;  %11 = vrot.lane.b32.xlu0 %v10_v1, %s150_s0  ;;  %s164_s21 = smov 8   ;;  %s165_s22 = smov [#allocation0]  }
   0xb   :  { %23 = vrot.lane.b32.xlu1 %v22_v2, %s151_s8  ;;  %v16_v3 = vld [vmem:[#allocation2] sm:$0x1]   ;;  %s104_s23 = sshll.u32 %s165_s22, 4  ;;  %s105_s23 = int_to_ptr.vmem [resolvable:$true] %s104_s23 }
   0xc   :  { %v28_v4 = vld [vmem:[#allocation2] sm:$0x1]   ;;  %s126_s24 = scalar_lea.vmem %s105_s23, 256  ;;  %p131_p1 = scmp.lt.s32.totalorder %s105_s23, %s105_s23 }
   0xd   :  { %v34_v5 = vld [vmem:[#allocation2] sm:$0x1]   ;;  %p127_p0 = scmp.ne.s32.totalorder %s105_s23, %s126_s24  ;;  %p132_p2 = scmp.lt.s32.totalorder %s126_s24, %s126_s24 }
   0xe   :  { %17 = vrot.lane.b32.xlu0 %v16_v3, %s152_s9  ;;  %v40_v6 = vld [vmem:[#allocation2] sm:$0x1]  }
   0xf   :  { %29 = vrot.lane.b32.xlu1 %v28_v4, %s153_s10  ;;  %v46_v7 = vld [vmem:[#allocation2] sm:$0x1]   ;;  %p133_p3 = por %p132_p2, %p131_p1 }
  0x10   :  { %v52_v8 = vld [vmem:[#allocation2] sm:$0x1]  }
  0x11   :  { %v58_v9 = vld [vmem:[#allocation2] sm:$0x1]   ;;  %p134_p4 = pnand %p133_p3, %p127_p0 }
  0x12   :  { %35 = vrot.lane.b32.xlu0 %v34_v5, %s154_s11  ;;  %v64_v10 = vld [vmem:[#allocation2] sm:$0x1]  }
  0x13   :  { %41 = vrot.lane.b32.xlu1 %v40_v6, %s155_s12  ;;  %v7_v11 = vld [vmem:[#allocation2] sm:$0x1]  }
  0x14   :  { %9 = vst.msk [vmem:[#allocation0] sm:$0x1] %vm8_vm0, %v7_v11   ;;  %v70_v12 = vld [vmem:[#allocation2] sm:$0x1]  }
  0x15   :  { %v76_v13 = vld [vmem:[#allocation2] sm:$0x1]  }
  0x16   :  { %47 = vrot.lane.b32.xlu0 %v46_v7, %s156_s13  ;;  %v82_v14 = vld [vmem:[#allocation2] sm:$0x1]  }
  0x17   :  { %53 = vrot.lane.b32.xlu1 %v52_v8, %s157_s14  ;;  %v88_v15 = vld [vmem:[#allocation2] sm:$0x1]  }
  0x18   :  { %v94_v16 = vld [vmem:[#allocation2] sm:$0x1]  }
  0x1a   :  { %59 = vrot.lane.b32.xlu0 %v58_v9, %s158_s15 }
  0x1b   :  { %65 = vrot.lane.b32.xlu1 %v64_v10, %s159_s16 }
  0x1e   :  { %71 = vrot.lane.b32.xlu0 %v70_v12, %s160_s17 }
  0x1f   :  { %77 = vrot.lane.b32.xlu1 %v76_v13, %s161_s18 }
  0x22   :  { %83 = vrot.lane.b32.xlu0 %v82_v14, %s162_s19 }
  0x23   :  { %89 = vrot.lane.b32.xlu1 %v88_v15, %s163_s20 }
  0x26   :  { %95 = vrot.lane.b32.xlu0 %v94_v16, %s164_s21 }
  0x7c   :  { %v12_v17 = vpop.permute.xlu0 %11  }
  0x7d   :  { %v24_v18 = vpop.permute.xlu1 %23   ;;  %15 = vst.msk [vmem:[#allocation0 + $0x1] sm:$0x1] %vm8_vm0, %v12_v17  }
  0x7e   :  { %27 = vst.msk [vmem:[#allocation0 + $0x3] sm:$0x1] %vm8_vm0, %v24_v18  }
  0x80   :  { %v18_v19 = vpop.permute.xlu0 %17  }
  0x81   :  { %v30_v20 = vpop.permute.xlu1 %29   ;;  %21 = vst.msk [vmem:[#allocation0 + $0x2] sm:$0x1] %vm8_vm0, %v18_v19  }
  0x82   :  { %33 = vst.msk [vmem:[#allocation0 + $0x4] sm:$0x1] %vm8_vm0, %v30_v20  }
  0x84   :  { %v36_v21 = vpop.permute.xlu0 %35  }
  0x85   :  { %v42_v22 = vpop.permute.xlu1 %41   ;;  %39 = vst.msk [vmem:[#allocation0 + $0x5] sm:$0x1] %vm8_vm0, %v36_v21  }
  0x86   :  { %45 = vst.msk [vmem:[#allocation0 + $0x6] sm:$0x1] %vm8_vm0, %v42_v22  }
  0x88   :  { %v48_v23 = vpop.permute.xlu0 %47  }
  0x89   :  { %v54_v24 = vpop.permute.xlu1 %53   ;;  %51 = vst.msk [vmem:[#allocation0 + $0x7] sm:$0x1] %vm8_vm0, %v48_v23  }
  0x8a   :  { %57 = vst.msk [vmem:[#allocation0 + $0x8] sm:$0x1] %vm8_vm0, %v54_v24  }
  0x8c   :  { %v60_v25 = vpop.permute.xlu0 %59  }
  0x8d   :  { %v66_v26 = vpop.permute.xlu1 %65   ;;  %63 = vst.msk [vmem:[#allocation0 + $0x9] sm:$0x1] %vm8_vm0, %v60_v25  }
  0x8e   :  { %69 = vst.msk [vmem:[#allocation0 + $0xa] sm:$0x1] %vm8_vm0, %v66_v26  }
  0x90   :  { %v72_v27 = vpop.permute.xlu0 %71  }
  0x91   :  { %v78_v28 = vpop.permute.xlu1 %77   ;;  %75 = vst.msk [vmem:[#allocation0 + $0xb] sm:$0x1] %vm8_vm0, %v72_v27  }
  0x92   :  { %81 = vst.msk [vmem:[#allocation0 + $0xc] sm:$0x1] %vm8_vm0, %v78_v28  }
  0x94   :  { %v84_v29 = vpop.permute.xlu0 %83  }
  0x95   :  { %v90_v30 = vpop.permute.xlu1 %89   ;;  %87 = vst.msk [vmem:[#allocation0 + $0xd] sm:$0x1] %vm8_vm0, %v84_v29  }
  0x96   :  { %93 = vst.msk [vmem:[#allocation0 + $0xe] sm:$0x1] %vm8_vm0, %v90_v30  }
  0x98   :  { %v96_v31 = vpop.permute.xlu0 %95  }
  0x99   :  { %99 = vst.msk [vmem:[#allocation0 + $0xf] sm:$0x1] %vm8_vm0, %v96_v31  }
  0x9a   :  { %137 = shalt.err (!%p134_p4)
}
  0x9b   :  { %s138_s27 = scalar_lea.hbm %s208_s1, 256 }
  0x9c   :  { %p139_p5 = scmp.ne.s32.totalorder %s208_s1, %s138_s27  ;;  %p142_p6 = scmp.lt.u32.totalorder %s138_s27, %s208_s1 }
  0x9e   :  { %p144_p7 = pnand %p142_p6, %p139_p5 }
  0xa0   :  { %147 = shalt.err (!%p144_p7)
}
  0xa1   :  { %107 = dma.vmem_to_hbm [thread:$0]  %s105_s23, 256, %s208_s1, [#allocation1]  }
  0xa2   :  { %148 = dma.done.wait [#allocation1], 256  }
  0xa3   :  { %149 = vsyncadd [#allocation1], 4294967040 }
  0xa4   :  { %109 = vsyncpa [#allocation1], 1 }

// kernel: _lambda_.31
= control target key start
LH: loop header
LB: loop body
LE: loop exit
PB: predicated region body
PF: predicated region fallthrough
CT: control target
= control target key end

     0   :  { %s495_s20 = smov 0   ;;  %s541_s0 = inlined_call_operand.vmem [shape: bf16[128,64], index: 0, kind: input, shape index: {}]   ;;  %s542_s1 = inlined_call_operand.vmem [shape: f32[1,64], index: 1, kind: input, shape index: {}]   ;;  %s543_s2 = inlined_call_operand.vmem [shape: f32[1,64], index: 2, kind: input, shape index: {}]   ;;  %s544_s3 = inlined_call_operand.vmem [shape: f32[1,64], index: 3, kind: input, shape index: {}]   ;;  %s545_s4 = inlined_call_operand.<no memory space> [shape: f32[1,1], index: 4, kind: input, shape index: {}]   ;;  %s546_s5 = inlined_call_operand.vmem [shape: f32[128,1], index: 5, kind: output, shape index: {}]  }
   0x1   :  { %v10_v0 = vstv %s545_s4 }
   0x2   :  { %11 = vst [vmem:[#allocation2] sm:$0x1] %v10_v0 }
   0x3 LB: > { %s412_s21 = sadd.s32 4294967295, %s460_s20   ;;  %p416_p0 = scmp.ge.s32.totalorder %s460_s20, 1  ;;  %s460_s20 = sphi %s495_s20, %s17_s20  }
   0x4   : > { %p190_p1 = scmp.lt.s32.totalorder %s460_s20, 3 }
   0x6   : > { %p191_p2 = pnand %p416_p0, %p190_p1 }
   0x7   : > { %s417_s22 = sshll.u32 (!%p191_p2), %s412_s21, 3  ;;  %v421_v1 = vld [vmem:[%s542_s1] ss:$0 sm:$0xff] (!%p191_p2)  ;;  %vm299_vm0 = vcmask (!%p191_p2), 523264   ;;  %vm347_vm1 = vcmask (!%p191_p2), 7168  }
   0x8   : > { %194 = sbr.rel (%p191_p2) target bundleno = 189 (0xbd), region = 40  ;;  %p219_p3 = scmp.lt.s32.totalorder (!%p191_p2), %s417_s22, 15  ;;  %v422_v10 = vld [vmem:[%s543_s2] ss:$0 sm:$0xff] (!%p191_p2) }
   0x9   : > { %v423_v27 = vld [vmem:[%s544_s3] ss:$0 sm:$0xff] (!%p191_p2) }
   0xa   : > { %v424_v56 = vld [vmem:[#allocation2] ss:$0 sm:$0xff] (!%p191_p2) }
   0xf   : > { %s548_s22 = smov (!%p219_p3, %s417_s22), 15 }
  0x10   : > { %s418_s4 = sshll.u32 %s548_s22, 2  ;;  %s420_s7 = sshll.u32 %s548_s22, 3 }
  0x11   : > { %s222_s25 = scalar_lea.vmem %s541_s0, %s418_s4  ;;  %s228_s10 = scalar_lea.vmem %s546_s5, %s420_s7 }
  0x12   : > { %v443_v2 = vld [vmem:[%s222_s25 + $0x8] sm:$0xff]   ;;  %v428_v3 = vld [vmem:[%s222_s25] sm:$0xff]   ;;  %v444_v4 = vld [vmem:[%s222_s25 + $0x10] sm:$0xff]  }
  0x13   : > { %v433_v5 = vunpack.c.l.bf16 %v443_v2  ;;  %v429_v6 = vunpack.c.l.bf16 %v428_v3  ;;  %v434_v7 = vunpack.c.h.bf16 %v443_v2  ;;  %v430_v8 = vunpack.c.h.bf16 %v428_v3  ;;  %v445_v9 = vld [vmem:[%s222_s25 + $0x18] sm:$0xff]  }
  0x14   : > { %v438_v11 = vunpack.c.h.bf16 %v444_v4  ;;  %v437_v12 = vunpack.c.l.bf16 %v444_v4  ;;  %v442_v13 = vunpack.c.h.bf16 %v445_v9  ;;  %v441_v14 = vunpack.c.l.bf16 %v445_v9 }
  0x15   : > { %v255_v15 = vmul.f32 %v433_v5, %v421_v1  ;;  %v253_v16 = vmul.f32 %v429_v6, %v421_v1  ;;  %v256_v17 = vmul.f32 %v434_v7, %v421_v1  ;;  %v254_v18 = vmul.f32 %v430_v8, %v421_v1 }
  0x16   : > { %v258_v19 = vmul.f32 %v438_v11, %v421_v1  ;;  %v257_v20 = vmul.f32 %v437_v12, %v421_v1  ;;  %v260_v21 = vmul.f32 %v442_v13, %v421_v1  ;;  %v259_v22 = vmul.f32 %v441_v14, %v421_v1 }
  0x17   : > { %v270_v23 = vadd.f32 %v422_v10, %v255_v15  ;;  %v268_v24 = vadd.f32 %v422_v10, %v253_v16  ;;  %v271_v25 = vadd.f32 %v422_v10, %v256_v17  ;;  %v269_v26 = vadd.f32 %v422_v10, %v254_v18 }
  0x18   : > { %v273_v28 = vadd.f32 %v422_v10, %v258_v19  ;;  %v272_v29 = vadd.f32 %v422_v10, %v257_v20  ;;  %v275_v36 = vadd.f32 %v422_v10, %v260_v21  ;;  %v274_v37 = vadd.f32 %v422_v10, %v259_v22 }
  0x19   : > { %v278_v30 = vmax.f32 %v270_v23, 0.0  ;;  %v276_v31 = vmax.f32 %v268_v24, 0.0  ;;  %v279_v32 = vmax.f32 %v271_v25, 0.0  ;;  %v277_v33 = vmax.f32 %v269_v26, 0.0 }
  0x1a   : > { %v281_v34 = vmax.f32 %v273_v28, 0.0  ;;  %v280_v35 = vmax.f32 %v272_v29, 0.0  ;;  %v283_v44 = vmax.f32 %v275_v36, 0.0  ;;  %v282_v45 = vmax.f32 %v274_v37, 0.0 }
  0x1b   : > { %v293_v38 = vmul.f32 %v423_v27, %v278_v30  ;;  %v291_v39 = vmul.f32 %v423_v27, %v276_v31  ;;  %v294_v40 = vmul.f32 %v423_v27, %v279_v32  ;;  %v292_v41 = vmul.f32 %v423_v27, %v277_v33 }
  0x1c   : > { %v296_v48 = vmul.f32 %v423_v27, %v281_v34  ;;  %v295_v49 = vmul.f32 %v423_v27, %v280_v35  ;;  %v298_v52 = vmul.f32 %v423_v27, %v283_v44  ;;  %v297_v53 = vmul.f32 %v423_v27, %v282_v45 }
  0x1d   : > { %v306_v42 = vsel %vm299_vm0, %v293_v38, 0.0  ;;  %v300_v43 = vsel %vm299_vm0, %v291_v39, 0.0  ;;  %v309_v46 = vsel %vm299_vm0, %v294_v40, 0.0  ;;  %v303_v47 = vsel %vm299_vm0, %v292_v41, 0.0 }
  0x1e   : > { %307 = vadd.xlane.f32.xlu1 %v306_v42  ;;  %301 = vadd.xlane.f32.xlu0 %v300_v43  ;;  %v315_v50 = vsel %vm299_vm0, %v296_v48, 0.0  ;;  %v312_v51 = vsel %vm299_vm0, %v295_v49, 0.0  ;;  %v321_v54 = vsel %vm299_vm0, %v298_v52, 0.0  ;;  %v318_v55 = vsel %vm299_vm0, %v297_v53, 0.0 }
  0x22   : > { %310 = vadd.xlane.f32.xlu1 %v309_v46  ;;  %304 = vadd.xlane.f32.xlu0 %v303_v47 }
  0x26   : > { %316 = vadd.xlane.f32.xlu1 %v315_v50  ;;  %313 = vadd.xlane.f32.xlu0 %v312_v51 }
  0x2a   : > { %322 = vadd.xlane.f32.xlu1 %v321_v54  ;;  %319 = vadd.xlane.f32.xlu0 %v318_v55 }
  0xab   : > { %v308_v57 = vpop.xlane.xlu1 %307  ;;  %v302_v58 = vpop.xlane.xlu0 %301 }
  0xac   : > { %v333_v59 = vadd.f32 %v424_v56, %v308_v57  ;;  %v331_v60 = vadd.f32 %v424_v56, %v302_v58 }
  0xae   : > { %v341_v61 = vmax.f32 %v333_v59, 0.0  ;;  %v339_v62 = vmax.f32 %v331_v60, 0.0 }
  0xaf   : > { %v311_v63 = vpop.xlane.xlu1 %310  ;;  %v305_v0 = vpop.xlane.xlu0 %304 }
  0xb0   : > { %350 = vst.msk [vmem:[%s228_s10 + $0x10] sm:$0xff] %vm347_vm1, %v341_v61  ;;  %348 = vst.msk [vmem:[%s228_s10] sm:$0xff] %vm347_vm1, %v339_v62  ;;  %v334_v1 = vadd.f32 %v424_v56, %v311_v63  ;;  %v332_v2 = vadd.f32 %v424_v56, %v305_v0 }
  0xb2   : > { %v342_v3 = vmax.f32 %v334_v1, 0.0  ;;  %v340_v4 = vmax.f32 %v332_v2, 0.0 }
  0xb3   : > { %v317_v5 = vpop.xlane.xlu1 %316  ;;  %v314_v6 = vpop.xlane.xlu0 %313 }
  0xb4   : > { %351 = vst.msk [vmem:[%s228_s10 + $0x18] sm:$0xff] %vm347_vm1, %v342_v3  ;;  %349 = vst.msk [vmem:[%s228_s10 + $0x8] sm:$0xff] %vm347_vm1, %v340_v4  ;;  %v336_v7 = vadd.f32 %v424_v56, %v317_v5  ;;  %v335_v8 = vadd.f32 %v424_v56, %v314_v6 }
  0xb6   : > { %v344_v9 = vmax.f32 %v336_v7, 0.0  ;;  %v343_v10 = vmax.f32 %v335_v8, 0.0 }
  0xb7   : > { %v323_v11 = vpop.xlane.xlu1 %322  ;;  %v320_v12 = vpop.xlane.xlu0 %319 }
  0xb8   : > { %353 = vst.msk [vmem:[%s228_s10 + $0x28] sm:$0xff] %vm347_vm1, %v344_v9  ;;  %352 = vst.msk [vmem:[%s228_s10 + $0x20] sm:$0xff] %vm347_vm1, %v343_v10  ;;  %v338_v13 = vadd.f32 %v424_v56, %v323_v11  ;;  %v337_v14 = vadd.f32 %v424_v56, %v320_v12 }
  0xba   : > { %v346_v15 = vmax.f32 %v338_v13, 0.0  ;;  %v345_v16 = vmax.f32 %v337_v14, 0.0 }
  0xbc   : > { %355 = vst.msk [vmem:[%s228_s10 + $0x38] sm:$0xff] %vm347_vm1, %v346_v15  ;;  %354 = vst.msk [vmem:[%s228_s10 + $0x30] sm:$0xff] %vm347_vm1, %v345_v16 }
  0xbd PF: > { %s17_s20 = sadd.s32 1, %s460_s20  }
  0xbe   : > { %p14_p4 = scmp.ge.s32.totalorder %s17_s20, 4  }
  0xc0   :  { %16 = sbr.rel (!%p14_p4) target bundleno = 3 (0x3), region = 70 }

// kernel: _lambda_.28
= control target key start
LH: loop header
LB: loop body
LE: loop exit
PB: predicated region body
PF: predicated region fallthrough
CT: control target
= control target key end

     0   :  { %s2843_s15 = smov 0   ;;  %s3284_s0 = inlined_call_operand.vmem [shape: bf16[128,1792], index: 0, kind: input, shape index: {}]   ;;  %s3285_s1 = inlined_call_operand.vmem [shape: bf16[1792,128], index: 1, kind: input, shape index: {}]   ;;  %s3286_s2 = inlined_call_operand.vmem [shape: bf16[128,128], index: 2, kind: output, shape index: {0}]   ;;  %s3287_s3 = inlined_call_operand.vmem [shape: f32[2,1,128], index: 3, kind: output, shape index: {1}]   ;;  %s3288_s4 = inlined_call_operand.vmem [shape: f32[2,1,128], index: 4, kind: output, shape index: {2}]  }
   0x1 LB: > { %s2849_s16 = sadd.s32 4294967295, %s2816_s15   ;;  %p2095_p0 = scmp.ge.s32.totalorder %s2816_s15, 1  ;;  %s2816_s15 = sphi %s2843_s15, %s15_s15  }
   0x2   : > { %p169_p1 = scmp.lt.s32.totalorder %s2816_s15, 3 }
   0x4   : > { %p170_p2 = pnand %p2095_p0, %p169_p1 }
   0x5   : > { %v2614_v0 = vld [vmem:[%s3285_s1 + $0x40] sm:$0xff] (!%p170_p2)   ;;  %v2618_v4 = vld [vmem:[%s3285_s1 + $0x48] sm:$0xff] (!%p170_p2)   ;;  %v2622_v8 = vld [vmem:[%s3285_s1 + $0x50] sm:$0xff] (!%p170_p2)   ;;  %s2096_s23 = sshll.u32 (!%p170_p2), %s2849_s16, 3  ;;  %p215_p4 = scmp.lt.s32.totalorder (!%p170_p2), %s2849_s16, 1 }
   0x6   : > { %173 = sbr.rel (%p170_p2) target bundleno = 387 (0x183), region = 28  ;;  %v2615_v1 = vld [vmem:[%s3285_s1 + $0xc0] sm:$0xff] (!%p170_p2)   ;;  %2309 = vmatprep.subr.bf16.mxu0 (!%p170_p2), %v2614_v0  ;;  %v2619_v5 = vld [vmem:[%s3285_s1 + $0xc8] sm:$0xff] (!%p170_p2)   ;;  %v2623_v9 = vld [vmem:[%s3285_s1 + $0xd0] sm:$0xff] (!%p170_p2)   ;;  %p203_p3 = scmp.lt.s32.totalorder (!%p170_p2), %s2096_s23, 15 }
   0x7   : > { %v2616_v2 = vld [vmem:[%s3285_s1] sm:$0xff] (!%p170_p2)   ;;  %2349 = vmatprep.subr.bf16.mxu1 (!%p170_p2), %v2615_v1  ;;  %v2620_v6 = vld [vmem:[%s3285_s1 + $0x8] sm:$0xff] (!%p170_p2)   ;;  %v2624_v10 = vld [vmem:[%s3285_s1 + $0x10] sm:$0xff] (!%p170_p2)  }
   0x8   : > { %v2617_v3 = vld [vmem:[%s3285_s1 + $0x80] sm:$0xff] (!%p170_p2)   ;;  %2310 = vmatpush3.bf16.msra.mxu0 (!%p170_p2), %v2616_v2  ;;  %v2621_v7 = vld [vmem:[%s3285_s1 + $0x88] sm:$0xff] (!%p170_p2)   ;;  %v2625_v11 = vld [vmem:[%s3285_s1 + $0x90] sm:$0xff] (!%p170_p2)  }
   0x9   : > { %2350 = vmatpush3.bf16.msra.mxu1 (!%p170_p2), %v2617_v3  ;;  %2311 = vmatprep.subr.bf16.mxu0 (!%p170_p2), %v2618_v4  ;;  %v2626_v12 = vld [vmem:[%s3285_s1 + $0x58] sm:$0xff] (!%p170_p2)   ;;  %v2630_v16 = vld [vmem:[%s3285_s1 + $0x60] sm:$0xff] (!%p170_p2)   ;;  %v2634_v20 = vld [vmem:[%s3285_s1 + $0x68] sm:$0xff] (!%p170_p2)  }
   0xa   : > { %2351 = vmatprep.subr.bf16.mxu1 (!%p170_p2), %v2619_v5  ;;  %v2627_v13 = vld [vmem:[%s3285_s1 + $0xd8] sm:$0xff] (!%p170_p2)   ;;  %v2631_v17 = vld [vmem:[%s3285_s1 + $0xe0] sm:$0xff] (!%p170_p2)   ;;  %v2635_v21 = vld [vmem:[%s3285_s1 + $0xe8] sm:$0xff] (!%p170_p2)  }
   0xb   : > { %v2628_v14 = vld [vmem:[%s3285_s1 + $0x18] sm:$0xff] (!%p170_p2)   ;;  %v2632_v18 = vld [vmem:[%s3285_s1 + $0x20] sm:$0xff] (!%p170_p2)   ;;  %v2636_v22 = vld [vmem:[%s3285_s1 + $0x28] sm:$0xff] (!%p170_p2)  }
   0xc   : > { %2312 = vmatpush3.bf16.msra.mxu0 (!%p170_p2), %v2620_v6  ;;  %v2629_v15 = vld [vmem:[%s3285_s1 + $0x98] sm:$0xff] (!%p170_p2)   ;;  %v2633_v19 = vld [vmem:[%s3285_s1 + $0xa0] sm:$0xff] (!%p170_p2)   ;;  %v2637_v23 = vld [vmem:[%s3285_s1 + $0xa8] sm:$0xff] (!%p170_p2)  }
   0xd   : > { %2352 = vmatpush3.bf16.msra.mxu1 %v2621_v7  ;;  %2313 = vmatprep.subr.bf16.mxu0 %v2622_v8  ;;  %s3290_s23 = smov (!%p203_p3, %s2096_s23), 15  ;;  %v2638_v24 = vld [vmem:[%s3285_s1 + $0x70] sm:$0xff]   ;;  %v2642_v28 = vld [vmem:[%s3285_s1 + $0x78] sm:$0xff]   ;;  %v2652_v36 = vld [vmem:[%s3285_s1 + $0x140] sm:$0xff]   ;;  %s3292_s16 = smov (!%p215_p4, %s2849_s16), 1 }
   0xe   : > { %2353 = vmatprep.subr.bf16.mxu1 %v2623_v9  ;;  %v2639_v25 = vld [vmem:[%s3285_s1 + $0xf0] sm:$0xff]   ;;  %s2605_s22 = smul.u32 56, %s3290_s23  ;;  %v2643_v29 = vld [vmem:[%s3285_s1 + $0xf8] sm:$0xff]   ;;  %v2653_v37 = vld [vmem:[%s3285_s1 + $0x1c0] sm:$0xff]   ;;  %s217_s26 = scalar_lea.vmem %s3287_s3, %s3292_s16 }
   0xf   : > { %v2640_v26 = vld [vmem:[%s3285_s1 + $0x30] sm:$0xff]   ;;  %v2644_v30 = vld [vmem:[%s3285_s1 + $0x38] sm:$0xff]   ;;  %v2654_v38 = vld [vmem:[%s3285_s1 + $0x100] sm:$0xff]   ;;  %s220_s29 = scalar_lea.vmem %s3288_s4, %s3292_s16 }
  0x10   : > { %2314 = vmatpush3.bf16.msra.mxu0 %v2624_v10  ;;  %v2641_v27 = vld [vmem:[%s3285_s1 + $0xb0] sm:$0xff]   ;;  %s2950_s8 = scalar_lea.vmem %s3284_s0, %s2605_s22  ;;  %v2645_v31 = vld [vmem:[%s3285_s1 + $0xb8] sm:$0xff]   ;;  %v2655_v39 = vld [vmem:[%s3285_s1 + $0x180] sm:$0xff]  }
  0x11   : > { %2354 = vmatpush3.bf16.msra.mxu1 %v2625_v11  ;;  %2315 = vmatprep.subr.bf16.mxu0 %v2626_v12  ;;  %v2646_v32 = vld [vmem:[%s2950_s8] ss:$56 sps:$4 sm:$0xff]   ;;  %v2648_v33 = vld [vmem:[%s2950_s8 + $0x4] ss:$56 sps:$4 sm:$0xff]   ;;  %v2656_v40 = vld [vmem:[%s3285_s1 + $0x148] sm:$0xff]  }
  0x12   : > { %2355 = vmatprep.subr.bf16.mxu1 %v2627_v13  ;;  %v2649_v34 = vld [vmem:[%s2950_s8 + $0x8] ss:$56 sps:$4 sm:$0xff]   ;;  %v2651_v35 = vld [vmem:[%s2950_s8 + $0xc] ss:$56 sps:$4 sm:$0xff]   ;;  %1486 = vmatprep.mubr.bf16.mxu0 %v2648_v33  ;;  %v2662_v45 = vld [vmem:[%s2950_s8 + $0x7c] ss:$56 sps:$4 sm:$0xff]  }
  0x13   : > { %1551 = vmatprep.mubr.bf16.mxu1 %v2651_v35  ;;  %v2657_v41 = vld [vmem:[%s3285_s1 + $0x1c8] sm:$0xff]   ;;  %v2665_v47 = vld [vmem:[%s2950_s8 + $0x78] ss:$56 sps:$4 sm:$0xff]   ;;  %v2674_v56 = vld [vmem:[%s2950_s8 + $0xe4] ss:$56 sps:$4 sm:$0xff]  }
  0x14   : > { %2316 = vmatpush3.bf16.msra.mxu0 %v2628_v14  ;;  %v2658_v42 = vld [vmem:[%s3285_s1 + $0x108] sm:$0xff]   ;;  %v2666_v48 = vld [vmem:[%s3285_s1 + $0x150] sm:$0xff]   ;;  %v2670_v52 = vld [vmem:[%s3285_s1 + $0x158] sm:$0xff]  }
  0x15   : > { %2356 = vmatpush3.bf16.msra.mxu1 %v2629_v15  ;;  %2317 = vmatprep.subr.bf16.mxu0 %v2630_v16  ;;  %v2659_v43 = vld [vmem:[%s3285_s1 + $0x188] sm:$0xff]   ;;  %v2667_v49 = vld [vmem:[%s3285_s1 + $0x1d0] sm:$0xff]   ;;  %v2671_v53 = vld [vmem:[%s3285_s1 + $0x1d8] sm:$0xff]  }
  0x16   : > { %2357 = vmatprep.subr.bf16.mxu1 %v2631_v17  ;;  %v2660_v44 = vld [vmem:[%s2950_s8 + $0x74] ss:$56 sps:$4 sm:$0xff]   ;;  %v2664_v46 = vld [vmem:[%s2950_s8 + $0x70] ss:$56 sps:$4 sm:$0xff]   ;;  %v2672_v54 = vld [vmem:[%s3285_s1 + $0x118] sm:$0xff]  }
  0x17   : > { %v2668_v50 = vld [vmem:[%s3285_s1 + $0x110] sm:$0xff]   ;;  %v2673_v55 = vld [vmem:[%s3285_s1 + $0x198] sm:$0xff]   ;;  %v2676_v57 = vld [vmem:[%s2950_s8 + $0xec] ss:$56 sps:$4 sm:$0xff]  }
  0x18   : > { %2318 = vmatpush3.bf16.msra.mxu0 %v2632_v18  ;;  %v2669_v51 = vld [vmem:[%s3285_s1 + $0x190] sm:$0xff]   ;;  %v2678_v58 = vld [vmem:[%s2950_s8 + $0xe0] ss:$56 sps:$4 sm:$0xff]   ;;  %v2684_v0 = vld [vmem:[%s3285_s1 + $0x168] sm:$0xff]  }
  0x19   : > { %2358 = vmatpush3.bf16.msra.mxu1 %v2633_v19  ;;  %2319 = vmatprep.subr.bf16.mxu0 %v2634_v20  ;;  %v2679_v59 = vld [vmem:[%s2950_s8 + $0xe8] ss:$56 sps:$4 sm:$0xff]   ;;  %v2688_v4 = vld [vmem:[%s2950_s8 + $0x154] ss:$56 sps:$4 sm:$0xff]   ;;  %v2693_v7 = vld [vmem:[%s2950_s8 + $0x158] ss:$56 sps:$4 sm:$0xff]  }
  0x1a   : > { %2359 = vmatprep.subr.bf16.mxu1 %v2635_v21  ;;  %v2680_v60 = vld [vmem:[%s3285_s1 + $0x160] sm:$0xff]   ;;  %v2685_v1 = vld [vmem:[%s3285_s1 + $0x1e8] sm:$0xff]   ;;  %v2690_v5 = vld [vmem:[%s2950_s8 + $0x15c] ss:$56 sps:$4 sm:$0xff]  }
  0x1b   : > { %v2681_v61 = vld [vmem:[%s3285_s1 + $0x1e0] sm:$0xff]   ;;  %v2686_v2 = vld [vmem:[%s3285_s1 + $0x128] sm:$0xff]   ;;  %v2694_v8 = vld [vmem:[%s3285_s1 + $0x170] sm:$0xff]  }
  0x1c   : > { %2320 = vmatpush3.bf16.msra.mxu0 %v2636_v22  ;;  %v2682_v62 = vld [vmem:[%s3285_s1 + $0x120] sm:$0xff]   ;;  %v2687_v3 = vld [vmem:[%s3285_s1 + $0x1a8] sm:$0xff]   ;;  %v2695_v9 = vld [vmem:[%s3285_s1 + $0x1f0] sm:$0xff]  }
  0x1d   : > { %2360 = vmatpush3.bf16.msra.mxu1 %v2637_v23  ;;  %2321 = vmatprep.subr.bf16.mxu0 %v2638_v24  ;;  %v2683_v63 = vld [vmem:[%s3285_s1 + $0x1a0] sm:$0xff]   ;;  %v2692_v6 = vld [vmem:[%s2950_s8 + $0x150] ss:$56 sps:$4 sm:$0xff]   ;;  %v2698_v12 = vld [vmem:[%s3285_s1 + $0x178] sm:$0xff]  }
  0x1e   : > { %2361 = vmatprep.subr.bf16.mxu1 %v2639_v25  ;;  %v2696_v10 = vld [vmem:[%s3285_s1 + $0x130] sm:$0xff]   ;;  %v2699_v13 = vld [vmem:[%s3285_s1 + $0x1f8] sm:$0xff]   ;;  %v2708_v20 = vld [vmem:[%s3285_s1 + $0x240] sm:$0xff]  }
  0x1f   : > { %v2697_v11 = vld [vmem:[%s3285_s1 + $0x1b0] sm:$0xff]   ;;  %v2700_v14 = vld [vmem:[%s3285_s1 + $0x138] sm:$0xff]   ;;  %v2709_v21 = vld [vmem:[%s3285_s1 + $0x2c0] sm:$0xff]  }
  0x20   : > { %2322 = vmatpush3.bf16.msra.mxu0 %v2640_v26  ;;  %v2701_v15 = vld [vmem:[%s3285_s1 + $0x1b8] sm:$0xff]   ;;  %v2702_v16 = vld [vmem:[%s2950_s8 + $0x10] ss:$56 sps:$4 sm:$0xff]   ;;  %v2704_v17 = vld [vmem:[%s2950_s8 + $0x14] ss:$56 sps:$4 sm:$0xff]  }
  0x21   : > { %2362 = vmatpush3.bf16.msra.mxu1 %v2641_v27  ;;  %2323 = vmatprep.subr.bf16.mxu0 %v2642_v28  ;;  %v2705_v18 = vld [vmem:[%s2950_s8 + $0x18] ss:$56 sps:$4 sm:$0xff]   ;;  %v2707_v19 = vld [vmem:[%s2950_s8 + $0x1c] ss:$56 sps:$4 sm:$0xff]   ;;  %v2710_v22 = vld [vmem:[%s3285_s1 + $0x200] sm:$0xff]  }
  0x22   : > { %2363 = vmatprep.subr.bf16.mxu1 %v2643_v29  ;;  %v2711_v23 = vld [vmem:[%s3285_s1 + $0x280] sm:$0xff]   ;;  %v2712_v24 = vld [vmem:[%s3285_s1 + $0x248] sm:$0xff]   ;;  %v2723_v33 = vld [vmem:[%s3285_s1 + $0x2d0] sm:$0xff]  }
  0x23   : > { %v2713_v25 = vld [vmem:[%s3285_s1 + $0x2c8] sm:$0xff]   ;;  %v2716_v28 = vld [vmem:[%s2950_s8 + $0x84] ss:$56 sps:$4 sm:$0xff]   ;;  %v2725_v35 = vld [vmem:[%s3285_s1 + $0x290] sm:$0xff]  }
  0x24   : > { %2324 = vmatpush3.bf16.msra.mxu0 %v2644_v30  ;;  %v2714_v26 = vld [vmem:[%s3285_s1 + $0x208] sm:$0xff]   ;;  %v2720_v30 = vld [vmem:[%s2950_s8 + $0x80] ss:$56 sps:$4 sm:$0xff]  }
  0x25   : > { %2364 = vmatpush3.bf16.msra.mxu1 %v2645_v31  ;;  %2389 = vmatprep.subr.bf16.mxu0 %v2652_v36  ;;  %v2715_v27 = vld [vmem:[%s3285_s1 + $0x288] sm:$0xff]   ;;  %v2726_v36 = vld [vmem:[%s3285_s1 + $0x258] sm:$0xff]  }
  0x26   : > { %2429 = vmatprep.subr.bf16.mxu1 %v2653_v37  ;;  %v2718_v29 = vld [vmem:[%s2950_s8 + $0x8c] ss:$56 sps:$4 sm:$0xff]   ;;  %v2721_v31 = vld [vmem:[%s2950_s8 + $0x88] ss:$56 sps:$4 sm:$0xff]   ;;  %v2727_v37 = vld [vmem:[%s3285_s1 + $0x2d8] sm:$0xff]  }
  0x27   : > { %1487 = vmatmul.mubr.bf16.vlgmr.msra.gmra.mrb[0].mxu0 %v2646_v32  ;;  %v2722_v32 = vld [vmem:[%s3285_s1 + $0x250] sm:$0xff]  }
  0x28   : > { %1552 = vmatmul.mubr.bf16.vlgmr.msra.gmra.mrb[0].mxu1 %v2649_v34  ;;  %2390 = vmatpush3.bf16.msra.mxu0 %v2654_v38  ;;  %v2724_v34 = vld [vmem:[%s3285_s1 + $0x210] sm:$0xff]   ;;  %v2728_v38 = vld [vmem:[%s3285_s1 + $0x218] sm:$0xff]  }
  0x29   : > { %2430 = vmatpush3.bf16.msra.mxu1 %v2655_v39  ;;  %2391 = vmatprep.subr.bf16.mxu0 %v2656_v40  ;;  %v2729_v39 = vld [vmem:[%s3285_s1 + $0x298] sm:$0xff]   ;;  %v2730_v40 = vld [vmem:[%s2950_s8 + $0xf4] ss:$56 sps:$4 sm:$0xff]  }
  0x2a   : > { %2431 = vmatprep.subr.bf16.mxu1 %v2657_v41  ;;  %1494 = vmatprep.mubr.bf16.mxu0 %v2660_v44  ;;  %v2732_v41 = vld [vmem:[%s2950_s8 + $0xfc] ss:$56 sps:$4 sm:$0xff]   ;;  %v2736_v44 = vld [vmem:[%s3285_s1 + $0x260] sm:$0xff]  }
  0x2b   : > { %1559 = vmatprep.mubr.bf16.mxu1 %v2662_v45  ;;  %v2737_v45 = vld [vmem:[%s3285_s1 + $0x2e0] sm:$0xff]  }
  0x2c   : > { %2392 = vmatpush3.bf16.msra.mxu0 %v2658_v42  ;;  %v2734_v42 = vld [vmem:[%s2950_s8 + $0xf0] ss:$56 sps:$4 sm:$0xff]  }
  0x2d   : > { %2432 = vmatpush3.bf16.msra.mxu1 %v2659_v43  ;;  %2393 = vmatprep.subr.bf16.mxu0 %v2666_v48  ;;  %v2735_v43 = vld [vmem:[%s2950_s8 + $0xf8] ss:$56 sps:$4 sm:$0xff]   ;;  %v2740_v48 = vld [vmem:[%s3285_s1 + $0x268] sm:$0xff]  }
  0x2e   : > { %2433 = vmatprep.subr.bf16.mxu1 %v2667_v49  ;;  %v2741_v49 = vld [vmem:[%s3285_s1 + $0x2e8] sm:$0xff]  }
  0x2f   : > { %1495 = vmatmul.mubr.bf16.gmra.mrb[4].mxu0 %v2664_v46  ;;  %v2738_v46 = vld [vmem:[%s3285_s1 + $0x220] sm:$0xff]  }
  0x30   : > { %1560 = vmatmul.mubr.bf16.gmra.mrb[4].mxu1 %v2665_v47  ;;  %2394 = vmatpush3.bf16.msra.mxu0 %v2668_v50  ;;  %v2739_v47 = vld [vmem:[%s3285_s1 + $0x2a0] sm:$0xff]   ;;  %v2742_v50 = vld [vmem:[%s3285_s1 + $0x228] sm:$0xff]  }
  0x31   : > { %2434 = vmatpush3.bf16.msra.mxu1 %v2669_v51  ;;  %2395 = vmatprep.subr.bf16.mxu0 %v2670_v52  ;;  %v2743_v51 = vld [vmem:[%s3285_s1 + $0x2a8] sm:$0xff]   ;;  %v2744_v52 = vld [vmem:[%s2950_s8 + $0x164] ss:$56 sps:$4 sm:$0xff]  }
  0x32   : > { %2435 = vmatprep.subr.bf16.mxu1 %v2671_v53  ;;  %1502 = vmatprep.mubr.bf16.mxu0 %v2674_v56  ;;  %v2746_v53 = vld [vmem:[%s2950_s8 + $0x16c] ss:$56 sps:$4 sm:$0xff]   ;;  %v2750_v56 = vld [vmem:[%s3285_s1 + $0x270] sm:$0xff]  }
  0x33   : > { %1567 = vmatprep.mubr.bf16.mxu1 %v2676_v57  ;;  %v2751_v57 = vld [vmem:[%s3285_s1 + $0x2f0] sm:$0xff]  }
  0x34   : > { %2396 = vmatpush3.bf16.msra.mxu0 %v2672_v54  ;;  %v2748_v54 = vld [vmem:[%s2950_s8 + $0x160] ss:$56 sps:$4 sm:$0xff]  }
  0x35   : > { %2436 = vmatpush3.bf16.msra.mxu1 %v2673_v55  ;;  %2397 = vmatprep.subr.bf16.mxu0 %v2680_v60  ;;  %v2749_v55 = vld [vmem:[%s2950_s8 + $0x168] ss:$56 sps:$4 sm:$0xff]   ;;  %v2754_v60 = vld [vmem:[%s3285_s1 + $0x278] sm:$0xff]  }
  0x36   : > { %2437 = vmatprep.subr.bf16.mxu1 %v2681_v61  ;;  %v2755_v61 = vld [vmem:[%s3285_s1 + $0x2f8] sm:$0xff]  }
  0x37   : > { %1503 = vmatmul.mubr.bf16.gmra.mrb[8].mxu0 %v2678_v58  ;;  %v2752_v58 = vld [vmem:[%s3285_s1 + $0x230] sm:$0xff]  }
  0x38   : > { %1568 = vmatmul.mubr.bf16.gmra.mrb[8].mxu1 %v2679_v59  ;;  %2398 = vmatpush3.bf16.msra.mxu0 %v2682_v62  ;;  %v2753_v59 = vld [vmem:[%s3285_s1 + $0x2b0] sm:$0xff]   ;;  %v2756_v62 = vld [vmem:[%s3285_s1 + $0x238] sm:$0xff]  }
  0x39   : > { %2438 = vmatpush3.bf16.msra.mxu1 %v2683_v63  ;;  %2399 = vmatprep.subr.bf16.mxu0 %v2684_v0  ;;  %v2757_v63 = vld [vmem:[%s3285_s1 + $0x2b8] sm:$0xff]  }
  0x3a   : > { %2439 = vmatprep.subr.bf16.mxu1 %v2685_v1  ;;  %1510 = vmatprep.mubr.bf16.mxu0 %v2688_v4  ;;  %v2758_v0 = vld [vmem:[%s2950_s8 + $0x20] ss:$56 sps:$4 sm:$0xff]   ;;  %v2760_v1 = vld [vmem:[%s2950_s8 + $0x24] ss:$56 sps:$4 sm:$0xff]  }
  0x3b   : > { %1575 = vmatprep.mubr.bf16.mxu1 %v2690_v5  ;;  %v2764_v4 = vld [vmem:[%s3285_s1 + $0x340] sm:$0xff]  }
  0x3c   : > { %2400 = vmatpush3.bf16.msra.mxu0 %v2686_v2  ;;  %v2761_v2 = vld [vmem:[%s2950_s8 + $0x28] ss:$56 sps:$4 sm:$0xff]  }
  0x3d   : > { %2440 = vmatpush3.bf16.msra.mxu1 %v2687_v3  ;;  %2401 = vmatprep.subr.bf16.mxu0 %v2694_v8  ;;  %v2763_v3 = vld [vmem:[%s2950_s8 + $0x2c] ss:$56 sps:$4 sm:$0xff]  }
  0x3e   : > { %2441 = vmatprep.subr.bf16.mxu1 %v2695_v9  ;;  %v2765_v5 = vld [vmem:[%s3285_s1 + $0x300] sm:$0xff]   ;;  %v2768_v8 = vld [vmem:[%s2950_s8 + $0x94] ss:$56 sps:$4 sm:$0xff]  }
  0x3f   : > { %1511 = vmatmul.mubr.bf16.gmra.mrb[12].mxu0 %v2692_v6  ;;  %v2766_v6 = vld [vmem:[%s3285_s1 + $0x348] sm:$0xff]   ;;  %v2770_v9 = vld [vmem:[%s2950_s8 + $0x9c] ss:$56 sps:$4 sm:$0xff]  }
  0x40   : > { %1576 = vmatmul.mubr.bf16.gmra.mrb[12].mxu1 %v2693_v7  ;;  %2402 = vmatpush3.bf16.msra.mxu0 %v2696_v10  ;;  %v2767_v7 = vld [vmem:[%s3285_s1 + $0x308] sm:$0xff]  }
  0x41   : > { %2442 = vmatpush3.bf16.msra.mxu1 %v2697_v11  ;;  %2403 = vmatprep.subr.bf16.mxu0 %v2698_v12  ;;  %v2772_v10 = vld [vmem:[%s2950_s8 + $0x90] ss:$56 sps:$4 sm:$0xff]  }
  0x42   : > { %2443 = vmatprep.subr.bf16.mxu1 %v2699_v13  ;;  %1616 = vmatprep.mubr.bf16.mxu0 %v2704_v17  ;;  %v2773_v11 = vld [vmem:[%s2950_s8 + $0x98] ss:$56 sps:$4 sm:$0xff]   ;;  %v2780_v17 = vld [vmem:[%s2950_s8 + $0x10c] ss:$56 sps:$4 sm:$0xff]  }
  0x43   : > { %1681 = vmatprep.mubr.bf16.mxu1 %v2707_v19  ;;  %v2774_v12 = vld [vmem:[%s3285_s1 + $0x350] sm:$0xff]   ;;  %v2783_v19 = vld [vmem:[%s2950_s8 + $0x108] ss:$56 sps:$4 sm:$0xff]  }
  0x44   : > { %2404 = vmatpush3.bf16.msra.mxu0 %v2700_v14  ;;  %v2775_v13 = vld [vmem:[%s3285_s1 + $0x310] sm:$0xff]   ;;  %v2776_v14 = vld [vmem:[%s3285_s1 + $0x358] sm:$0xff]  }
  0x45   : > { %2444 = vmatpush3.bf16.msra.mxu1 %v2701_v15  ;;  %2469 = vmatprep.subr.bf16.mxu0 %v2708_v20  ;;  %v2777_v15 = vld [vmem:[%s3285_s1 + $0x318] sm:$0xff]   ;;  %v2784_v20 = vld [vmem:[%s3285_s1 + $0x360] sm:$0xff]  }
  0x46   : > { %2509 = vmatprep.subr.bf16.mxu1 %v2709_v21  ;;  %v2785_v21 = vld [vmem:[%s3285_s1 + $0x320] sm:$0xff]  }
  0x47   : > { %1617 = vmatmul.mubr.bf16.vlgmr.msra.gmra.mrb[16].mxu0 %v2702_v16  ;;  %v2778_v16 = vld [vmem:[%s2950_s8 + $0x104] ss:$56 sps:$4 sm:$0xff]  }
  0x48   : > { %1682 = vmatmul.mubr.bf16.vlgmr.msra.gmra.mrb[16].mxu1 %v2705_v18  ;;  %2470 = vmatpush3.bf16.msra.mxu0 %v2710_v22  ;;  %v2782_v18 = vld [vmem:[%s2950_s8 + $0x100] ss:$56 sps:$4 sm:$0xff]   ;;  %v2786_v22 = vld [vmem:[%s3285_s1 + $0x368] sm:$0xff]  }
  0x49   : > { %2510 = vmatpush3.bf16.msra.mxu1 %v2711_v23  ;;  %2471 = vmatprep.subr.bf16.mxu0 %v2712_v24  ;;  %v2788_v23 = vld [vmem:[%s2950_s8 + $0x174] ss:$56 sps:$4 sm:$0xff]  }
  0x4a   : > { %2511 = vmatprep.subr.bf16.mxu1 %v2713_v25  ;;  %1624 = vmatprep.mubr.bf16.mxu0 %v2716_v28  ;;  %v2787_v24 = vld [vmem:[%s3285_s1 + $0x328] sm:$0xff]   ;;  %v2790_v25 = vld [vmem:[%s2950_s8 + $0x17c] ss:$56 sps:$4 sm:$0xff]   ;;  %v2793_v28 = vld [vmem:[%s2950_s8 + $0x178] ss:$56 sps:$4 sm:$0xff]  }
  0x4b   : > { %1689 = vmatprep.mubr.bf16.mxu1 %v2718_v29  ;;  %v2795_v29 = vld [vmem:[%s3285_s1 + $0x330] sm:$0xff]  }
  0x4c   : > { %2472 = vmatpush3.bf16.msra.mxu0 %v2714_v26  ;;  %v2794_v26 = vld [vmem:[%s3285_s1 + $0x370] sm:$0xff]  }
  0x4d   : > { %2512 = vmatpush3.bf16.msra.mxu1 %v2715_v27  ;;  %2473 = vmatprep.subr.bf16.mxu0 %v2722_v32  ;;  %v2792_v27 = vld [vmem:[%s2950_s8 + $0x170] ss:$56 sps:$4 sm:$0xff]   ;;  %v2803_v32 = vld [vmem:[%s2950_s8 + $0x114] ss:$56 sps:$4 sm:$0xff]  }
  0x4e   : > { %2513 = vmatprep.subr.bf16.mxu1 %v2723_v33  ;;  %v2797_v33 = vld [vmem:[%s3285_s1 + $0x338] sm:$0xff]  }
  0x4f   : > { %1625 = vmatmul.mubr.bf16.gmra.mrb[20].mxu0 %v2720_v30  ;;  %v2796_v30 = vld [vmem:[%s3285_s1 + $0x378] sm:$0xff]  }
  0x50   : > { %1690 = vmatmul.mubr.bf16.gmra.mrb[20].mxu1 %v2721_v31  ;;  %2474 = vmatpush3.bf16.msra.mxu0 %v2724_v34  ;;  %v2800_v31 = vld [vmem:[%s2950_s8 + $0x34] ss:$56 sps:$4 sm:$0xff]   ;;  %v2798_v34 = vld [vmem:[%s2950_s8 + $0x30] ss:$56 sps:$4 sm:$0xff]  }
  0x51   : > { %2514 = vmatpush3.bf16.msra.mxu1 %v2725_v35  ;;  %2475 = vmatprep.subr.bf16.mxu0 %v2726_v36  ;;  %v2801_v35 = vld [vmem:[%s2950_s8 + $0x110] ss:$56 sps:$4 sm:$0xff]   ;;  %v2804_v36 = vld [vmem:[%s2950_s8 + $0xa4] ss:$56 sps:$4 sm:$0xff]  }
  0x52   : > { %2515 = vmatprep.subr.bf16.mxu1 %v2727_v37  ;;  %1632 = vmatprep.mubr.bf16.mxu0 %v2730_v40  ;;  %v2806_v37 = vld [vmem:[%s2950_s8 + $0x184] ss:$56 sps:$4 sm:$0xff]  }
  0x53   : > { %1697 = vmatprep.mubr.bf16.mxu1 %v2732_v41 }
  0x54   : > { %2476 = vmatpush3.bf16.msra.mxu0 %v2728_v38  ;;  %v2808_v38 = vld [vmem:[%s2950_s8 + $0xa0] ss:$56 sps:$4 sm:$0xff]  }
  0x55   : > { %2516 = vmatpush3.bf16.msra.mxu1 %v2729_v39  ;;  %2477 = vmatprep.subr.bf16.mxu0 %v2736_v44  ;;  %v2809_v39 = vld [vmem:[%s2950_s8 + $0x180] ss:$56 sps:$4 sm:$0xff]   ;;  %s2099_s8 = sshll.u32 %s3290_s23, 2 }
  0x56   : > { %2517 = vmatprep.subr.bf16.mxu1 %v2737_v45  ;;  %s3265_s24 = scalar_lea.vmem %s3286_s2, %s2099_s8 }
  0x57   : > { %1633 = vmatmul.mubr.bf16.gmra.mrb[24].mxu0 %v2734_v42 }
  0x58   : > { %1698 = vmatmul.mubr.bf16.gmra.mrb[24].mxu1 %v2735_v43  ;;  %2478 = vmatpush3.bf16.msra.mxu0 %v2738_v46 }
  0x59   : > { %2518 = vmatpush3.bf16.msra.mxu1 %v2739_v47  ;;  %2479 = vmatprep.subr.bf16.mxu0 %v2740_v48 }
  0x5a   : > { %2519 = vmatprep.subr.bf16.mxu1 %v2741_v49  ;;  %1640 = vmatprep.mubr.bf16.mxu0 %v2744_v52 }
  0x5b   : > { %1705 = vmatprep.mubr.bf16.mxu1 %v2746_v53 }
  0x5c   : > { %2480 = vmatpush3.bf16.msra.mxu0 %v2742_v50 }
  0x5d   : > { %2520 = vmatpush3.bf16.msra.mxu1 %v2743_v51  ;;  %2481 = vmatprep.subr.bf16.mxu0 %v2750_v56 }
  0x5e   : > { %2521 = vmatprep.subr.bf16.mxu1 %v2751_v57 }
  0x5f   : > { %1641 = vmatmul.mubr.bf16.gmra.mrb[28].mxu0 %v2748_v54 }
  0x60   : > { %1706 = vmatmul.mubr.bf16.gmra.mrb[28].mxu1 %v2749_v55  ;;  %2482 = vmatpush3.bf16.msra.mxu0 %v2752_v58 }
  0x61   : > { %2522 = vmatpush3.bf16.msra.mxu1 %v2753_v59  ;;  %2483 = vmatprep.subr.bf16.mxu0 %v2754_v60 }
  0x62   : > { %2523 = vmatprep.subr.bf16.mxu1 %v2755_v61  ;;  %1746 = vmatprep.mubr.bf16.mxu0 %v2760_v1 }
  0x63   : > { %1811 = vmatprep.mubr.bf16.mxu1 %v2763_v3 }
  0x64   : > { %2484 = vmatpush3.bf16.msra.mxu0 %v2756_v62 }
  0x65   : > { %2524 = vmatpush3.bf16.msra.mxu1 %v2757_v63  ;;  %2549 = vmatprep.subr.bf16.mxu0 %v2764_v4 }
  0x66   : > { %2589 = vmatprep.subr.bf16.mxu1 %v2764_v4 }
  0x67   : > { %1747 = vmatmul.mubr.bf16.vlgmr.msra.gmra.mrb[32].mxu0 %v2758_v0 }
  0x68   : > { %1812 = vmatmul.mubr.bf16.vlgmr.msra.gmra.mrb[32].mxu1 %v2761_v2  ;;  %2550 = vmatpush3.bf16.msra.mxu0 %v2765_v5 }
  0x69   : > { %2597 = vmatpush3.bf16.msra.mxu1 %v2765_v5  ;;  %2551 = vmatprep.subr.bf16.mxu0 %v2766_v6 }
  0x6a   : > { %2590 = vmatprep.subr.bf16.mxu1 %v2766_v6  ;;  %1754 = vmatprep.mubr.bf16.mxu0 %v2768_v8 }
  0x6b   : > { %1819 = vmatprep.mubr.bf16.mxu1 %v2770_v9 }
  0x6c   : > { %2552 = vmatpush3.bf16.msra.mxu0 %v2767_v7 }
  0x6d   : > { %2598 = vmatpush3.bf16.msra.mxu1 %v2767_v7  ;;  %2553 = vmatprep.subr.bf16.mxu0 %v2774_v12 }
  0x6e   : > { %2591 = vmatprep.subr.bf16.mxu1 %v2774_v12 }
  0x6f   : > { %1755 = vmatmul.mubr.bf16.gmra.mrb[36].mxu0 %v2772_v10 }
  0x70   : > { %1820 = vmatmul.mubr.bf16.gmra.mrb[36].mxu1 %v2773_v11  ;;  %2554 = vmatpush3.bf16.msra.mxu0 %v2775_v13 }
  0x71   : > { %2599 = vmatpush3.bf16.msra.mxu1 %v2775_v13  ;;  %2555 = vmatprep.subr.bf16.mxu0 %v2776_v14 }
  0x72   : > { %2592 = vmatprep.subr.bf16.mxu1 %v2776_v14  ;;  %1762 = vmatprep.mubr.bf16.mxu0 %v2778_v16 }
  0x73   : > { %1827 = vmatprep.mubr.bf16.mxu1 %v2780_v17 }
  0x74   : > { %2556 = vmatpush3.bf16.msra.mxu0 %v2777_v15 }
  0x75   : > { %2600 = vmatpush3.bf16.msra.mxu1 %v2777_v15  ;;  %2557 = vmatprep.subr.bf16.mxu0 %v2784_v20 }
  0x76   : > { %2593 = vmatprep.subr.bf16.mxu1 %v2784_v20 }
  0x77   : > { %1763 = vmatmul.mubr.bf16.gmra.mrb[40].mxu0 %v2782_v18 }
  0x78   : > { %1828 = vmatmul.mubr.bf16.gmra.mrb[40].mxu1 %v2783_v19  ;;  %2558 = vmatpush3.bf16.msra.mxu0 %v2785_v21 }
  0x79   : > { %2601 = vmatpush3.bf16.msra.mxu1 %v2785_v21  ;;  %2559 = vmatprep.subr.bf16.mxu0 %v2786_v22 }
  0x7a   : > { %2594 = vmatprep.subr.bf16.mxu1 %v2786_v22  ;;  %1770 = vmatprep.mubr.bf16.mxu0 %v2788_v23 }
  0x7b   : > { %1835 = vmatprep.mubr.bf16.mxu1 %v2790_v25 }
  0x7c   : > { %2560 = vmatpush3.bf16.msra.mxu0 %v2787_v24 }
  0x7d   : > { %2602 = vmatpush3.bf16.msra.mxu1 %v2787_v24  ;;  %2561 = vmatprep.subr.bf16.mxu0 %v2794_v26 }
  0x7e   : > { %2595 = vmatprep.subr.bf16.mxu1 %v2794_v26 }
  0x7f   : > { %1771 = vmatmul.mubr.bf16.gmra.mrb[44].mxu0 %v2792_v27 }
  0x80   : > { %1836 = vmatmul.mubr.bf16.gmra.mrb[44].mxu1 %v2793_v28  ;;  %2562 = vmatpush3.bf16.msra.mxu0 %v2795_v29 }
  0x81   : > { %1876 = vmatprep.mubr.bf16.mxu0 %v2800_v31  ;;  %2603 = vmatpush3.bf16.msra.mxu1 %v2795_v29 }
  0x82   : > { %2563 = vmatprep.subr.bf16.mxu0 %v2796_v30  ;;  %2596 = vmatprep.subr.bf16.mxu1 %v2796_v30 }
  0x83   : > { %1892 = vmatprep.mubr.bf16.mxu1 %v2803_v32 }
  0x84   : > { %2564 = vmatpush3.bf16.msra.mxu0 %v2797_v33 }
  0x85   : > { %2604 = vmatpush3.bf16.msra.mxu1 %v2797_v33 }
  0x87   : > { %1877 = vmatmul.mubr.bf16.vlgmr.msra.gmra.mrb[48].mxu0 %v2798_v34 }
  0x88   : > { %1893 = vmatmul.mubr.bf16.vlgmr.msra.gmra.mrb[48].mxu1 %v2801_v35  ;;  %1884 = vmatprep.mubr.bf16.mxu0 %v2804_v36 }
  0x89   : > { %1900 = vmatprep.mubr.bf16.mxu1 %v2806_v37 }
  0x8f   : > { %1885 = vmatmul.mubr.bf16.gmra.mrb[52].mxu0 %v2808_v38 }
  0x90   : > { %1901 = vmatmul.mubr.bf16.gmra.mrb[52].mxu1 %v2809_v39 }
  0xfa   : > { %v2325_v40 = vpop.f32.mrb[0].mxu0 }
  0xfb   : > { %v2365_v41 = vpop.f32.mrb[0].mxu1  ;;  %v2326_v42 = vpop.f32.mrb[1].mxu0 }
  0xfc   : > { %v2327_v43 = vadd.f32 %v2326_v42, %v2325_v40  ;;  %v2366_v44 = vpop.f32.mrb[1].mxu1  ;;  %v2328_v45 = vpop.f32.mrb[2].mxu0 }
  0xfd   : > { %v2367_v46 = vadd.f32 %v2366_v44, %v2365_v41  ;;  %v2368_v47 = vpop.f32.mrb[2].mxu1  ;;  %v2329_v48 = vpop.f32.mrb[3].mxu0 }
  0xfe   : > { %v2330_v49 = vadd.f32 %v2329_v48, %v2328_v45  ;;  %v2369_v50 = vpop.f32.mrb[3].mxu1 }
  0xff   : > { %v1554_v51 = vadd.f32 %v2367_v46, %v2327_v43  ;;  %v2370_v52 = vadd.f32 %v2369_v50, %v2368_v47 }
 0x101   : > { %v1557_v53 = vadd.f32 %v2370_v52, %v2330_v49 }
 0x102   : > { %v2331_v54 = vpop.f32.mrb[4].mxu0 }
 0x103   : > { %v2371_v55 = vpop.f32.mrb[4].mxu1  ;;  %v2332_v56 = vpop.f32.mrb[5].mxu0 }
 0x104   : > { %v2333_v57 = vadd.f32 %v2332_v56, %v2331_v54  ;;  %v2372_v58 = vpop.f32.mrb[5].mxu1  ;;  %v2334_v59 = vpop.f32.mrb[6].mxu0 }
 0x105   : > { %v2373_v60 = vadd.f32 %v2372_v58, %v2371_v55  ;;  %v2374_v61 = vpop.f32.mrb[6].mxu1  ;;  %v2335_v62 = vpop.f32.mrb[7].mxu0 }
 0x106   : > { %v2336_v63 = vadd.f32 %v2335_v62, %v2334_v59  ;;  %v2375_v0 = vpop.f32.mrb[7].mxu1 }
 0x107   : > { %v1562_v1 = vadd.f32 %v2373_v60, %v2333_v57  ;;  %v2376_v2 = vadd.f32 %v2375_v0, %v2374_v61 }
 0x109   : > { %v1565_v3 = vadd.f32 %v2376_v2, %v2336_v63 }
 0x10a   : > { %v2337_v4 = vpop.f32.mrb[8].mxu0 }
 0x10b   : > { %v2377_v5 = vpop.f32.mrb[8].mxu1  ;;  %v2338_v6 = vpop.f32.mrb[9].mxu0 }
 0x10c   : > { %v2339_v7 = vadd.f32 %v2338_v6, %v2337_v4  ;;  %v2378_v8 = vpop.f32.mrb[9].mxu1  ;;  %v2340_v9 = vpop.f32.mrb[10].mxu0 }
 0x10d   : > { %v2379_v10 = vadd.f32 %v2378_v8, %v2377_v5  ;;  %v2380_v11 = vpop.f32.mrb[10].mxu1  ;;  %v2341_v12 = vpop.f32.mrb[11].mxu0 }
 0x10e   : > { %v2342_v13 = vadd.f32 %v2341_v12, %v2340_v9  ;;  %v2381_v14 = vpop.f32.mrb[11].mxu1 }
 0x10f   : > { %v1570_v15 = vadd.f32 %v2379_v10, %v2339_v7  ;;  %v2382_v16 = vadd.f32 %v2381_v14, %v2380_v11 }
 0x111   : > { %v1573_v17 = vadd.f32 %v2382_v16, %v2342_v13 }
 0x112   : > { %v2343_v18 = vpop.f32.mrb[12].mxu0 }
 0x113   : > { %v2383_v19 = vpop.f32.mrb[12].mxu1  ;;  %v2344_v20 = vpop.f32.mrb[13].mxu0 }
 0x114   : > { %v2384_v21 = vpop.f32.mrb[13].mxu1  ;;  %v2345_v22 = vadd.f32 %v2344_v20, %v2343_v18  ;;  %v2346_v24 = vpop.f32.mrb[14].mxu0 }
 0x115   : > { %v2385_v23 = vadd.f32 %v2384_v21, %v2383_v19  ;;  %v2386_v25 = vpop.f32.mrb[14].mxu1  ;;  %v2347_v26 = vpop.f32.mrb[15].mxu0 }
 0x116   : > { %v2387_v27 = vpop.f32.mrb[15].mxu1  ;;  %v2348_v29 = vadd.f32 %v2347_v26, %v2346_v24 }
 0x117   : > { %v1578_v28 = vadd.f32 %v2385_v23, %v2345_v22  ;;  %v2388_v30 = vadd.f32 %v2387_v27, %v2386_v25 }
 0x119   : > { %v1581_v31 = vadd.f32 %v2388_v30, %v2348_v29 }
 0x11a   : > { %v2405_v32 = vpop.f32.mrb[16].mxu0 }
 0x11b   : > { %v2406_v33 = vpop.f32.mrb[17].mxu0  ;;  %v2445_v36 = vpop.f32.mrb[16].mxu1 }
 0x11c   : > { %v2407_v34 = vadd.f32 %v2406_v33, %v2405_v32  ;;  %v2408_v35 = vpop.f32.mrb[18].mxu0  ;;  %v2446_v38 = vpop.f32.mrb[17].mxu1 }
 0x11d   : > { %v2409_v37 = vpop.f32.mrb[19].mxu0  ;;  %v2447_v41 = vadd.f32 %v2446_v38, %v2445_v36  ;;  %v2448_v42 = vpop.f32.mrb[18].mxu1 }
 0x11e   : > { %v1619_v39 = vadd.f32 %v2407_v34, %v1554_v51  ;;  %v2410_v40 = vadd.f32 %v2409_v37, %v2408_v35  ;;  %v2449_v43 = vpop.f32.mrb[19].mxu1 }
 0x11f   : > { %v2450_v46 = vadd.f32 %v2449_v43, %v2448_v42 }
 0x120   : > { %v1622_v44 = vadd.f32 %v2410_v40, %v1557_v53  ;;  %v1684_v45 = vadd.f32 %v2447_v41, %v1619_v39 }
 0x122   : > { %v1687_v47 = vadd.f32 %v2450_v46, %v1622_v44  ;;  %v2411_v48 = vpop.f32.mrb[20].mxu0 }
 0x123   : > { %v2412_v49 = vpop.f32.mrb[21].mxu0  ;;  %v2451_v50 = vpop.f32.mrb[20].mxu1 }
 0x124   : > { %v2413_v52 = vadd.f32 %v2412_v49, %v2411_v48  ;;  %v2414_v54 = vpop.f32.mrb[22].mxu0  ;;  %v2452_v55 = vpop.f32.mrb[21].mxu1 }
 0x125   : > { %v2415_v56 = vpop.f32.mrb[23].mxu0  ;;  %v2453_v57 = vadd.f32 %v2452_v55, %v2451_v50  ;;  %v2454_v58 = vpop.f32.mrb[22].mxu1 }
 0x126   : > { %v1627_v59 = vadd.f32 %v2413_v52, %v1562_v1  ;;  %v2416_v60 = vadd.f32 %v2415_v56, %v2414_v54  ;;  %v2455_v51 = vpop.f32.mrb[23].mxu1 }
 0x127   : > { %v2456_v61 = vadd.f32 %v2455_v51, %v2454_v58 }
 0x128   : > { %v1630_v62 = vadd.f32 %v2416_v60, %v1565_v3  ;;  %v1692_v63 = vadd.f32 %v2453_v57, %v1627_v59 }
 0x12a   : > { %v1695_v0 = vadd.f32 %v2456_v61, %v1630_v62  ;;  %v2417_v53 = vpop.f32.mrb[24].mxu0 }
 0x12b   : > { %v2457_v2 = vpop.f32.mrb[24].mxu1  ;;  %v2418_v4 = vpop.f32.mrb[25].mxu0 }
 0x12c   : > { %v2458_v5 = vpop.f32.mrb[25].mxu1  ;;  %v2419_v6 = vadd.f32 %v2418_v4, %v2417_v53  ;;  %v2420_v7 = vpop.f32.mrb[26].mxu0 }
 0x12d   : > { %v2459_v8 = vadd.f32 %v2458_v5, %v2457_v2  ;;  %v2460_v9 = vpop.f32.mrb[26].mxu1  ;;  %v2421_v10 = vpop.f32.mrb[27].mxu0 }
 0x12e   : > { %v2461_v11 = vpop.f32.mrb[27].mxu1  ;;  %v1635_v12 = vadd.f32 %v2419_v6, %v1570_v15  ;;  %v2422_v13 = vadd.f32 %v2421_v10, %v2420_v7 }
 0x12f   : > { %v2462_v14 = vadd.f32 %v2461_v11, %v2460_v9 }
 0x130   : > { %v1638_v1 = vadd.f32 %v2422_v13, %v1573_v17  ;;  %v1700_v16 = vadd.f32 %v2459_v8, %v1635_v12 }
 0x132   : > { %v1703_v18 = vadd.f32 %v2462_v14, %v1638_v1  ;;  %v2423_v19 = vpop.f32.mrb[28].mxu0 }
 0x133   : > { %v2424_v3 = vpop.f32.mrb[29].mxu0  ;;  %v2463_v20 = vpop.f32.mrb[28].mxu1 }
 0x134   : > { %v2425_v21 = vadd.f32 %v2424_v3, %v2423_v19  ;;  %v2426_v22 = vpop.f32.mrb[30].mxu0  ;;  %v2464_v23 = vpop.f32.mrb[29].mxu1 }
 0x135   : > { %v2427_v24 = vpop.f32.mrb[31].mxu0  ;;  %v2465_v25 = vadd.f32 %v2464_v23, %v2463_v20  ;;  %v2466_v26 = vpop.f32.mrb[30].mxu1 }
 0x136   : > { %v1643_v27 = vadd.f32 %v2425_v21, %v1578_v28  ;;  %v2428_v29 = vadd.f32 %v2427_v24, %v2426_v22  ;;  %v2467_v30 = vpop.f32.mrb[31].mxu1 }
 0x137   : > { %v2468_v32 = vadd.f32 %v2467_v30, %v2466_v26 }
 0x138   : > { %v1646_v33 = vadd.f32 %v2428_v29, %v1581_v31  ;;  %v1708_v15 = vadd.f32 %v2465_v25, %v1643_v27 }
 0x13a   : > { %v1711_v34 = vadd.f32 %v2468_v32, %v1646_v33  ;;  %v2485_v35 = vpop.f32.mrb[32].mxu0 }
 0x13b   : > { %v2486_v17 = vpop.f32.mrb[33].mxu0  ;;  %v2525_v36 = vpop.f32.mrb[32].mxu1 }
 0x13c   : > { %v2487_v37 = vadd.f32 %v2486_v17, %v2485_v35  ;;  %v2488_v38 = vpop.f32.mrb[34].mxu0  ;;  %v2526_v39 = vpop.f32.mrb[33].mxu1 }
 0x13d   : > { %v2489_v40 = vpop.f32.mrb[35].mxu0  ;;  %v2527_v41 = vadd.f32 %v2526_v39, %v2525_v36  ;;  %v2528_v42 = vpop.f32.mrb[34].mxu1 }
 0x13e   : > { %v1749_v43 = vadd.f32 %v2487_v37, %v1684_v45  ;;  %v2490_v44 = vadd.f32 %v2489_v40, %v2488_v38  ;;  %v2529_v46 = vpop.f32.mrb[35].mxu1 }
 0x13f   : > { %v2530_v48 = vadd.f32 %v2529_v46, %v2528_v42 }
 0x140   : > { %v1752_v28 = vadd.f32 %v2490_v44, %v1687_v47  ;;  %v1814_v49 = vadd.f32 %v2527_v41, %v1749_v43 }
 0x142   : > { %v3254_v50 = vadd.f32 %v2530_v48, %v1752_v28  ;;  %v2491_v31 = vpop.f32.mrb[36].mxu0 }
 0x143   : > { %v2492_v52 = vpop.f32.mrb[37].mxu0  ;;  %v2531_v54 = vpop.f32.mrb[36].mxu1 }
 0x144   : > { %v2493_v55 = vadd.f32 %v2492_v52, %v2491_v31  ;;  %v2494_v56 = vpop.f32.mrb[38].mxu0  ;;  %v2532_v57 = vpop.f32.mrb[37].mxu1 }
 0x145   : > { %v2495_v58 = vpop.f32.mrb[39].mxu0  ;;  %v2533_v59 = vadd.f32 %v2532_v57, %v2531_v54  ;;  %v2534_v60 = vpop.f32.mrb[38].mxu1 }
 0x146   : > { %v1757_v51 = vadd.f32 %v2493_v55, %v1692_v63  ;;  %v2496_v61 = vadd.f32 %v2495_v58, %v2494_v56  ;;  %v2535_v62 = vpop.f32.mrb[39].mxu1 }
 0x147   : > { %v2536_v45 = vadd.f32 %v2535_v62, %v2534_v60 }
 0x148   : > { %v1760_v53 = vadd.f32 %v2496_v61, %v1695_v0  ;;  %v3256_v2 = vadd.f32 %v2533_v59, %v1757_v51 }
 0x14a   : > { %v3258_v47 = vadd.f32 %v2536_v45, %v1760_v53  ;;  %v2497_v4 = vpop.f32.mrb[40].mxu0 }
 0x14b   : > { %v2498_v5 = vpop.f32.mrb[41].mxu0  ;;  %v2537_v6 = vpop.f32.mrb[40].mxu1 }
 0x14c   : > { %v2499_v7 = vadd.f32 %v2498_v5, %v2497_v4  ;;  %v2500_v8 = vpop.f32.mrb[42].mxu0  ;;  %v2538_v9 = vpop.f32.mrb[41].mxu1 }
 0x14d   : > { %v2501_v10 = vpop.f32.mrb[43].mxu0  ;;  %v2539_v11 = vadd.f32 %v2538_v9, %v2537_v6  ;;  %v2540_v12 = vpop.f32.mrb[42].mxu1 }
 0x14e   : > { %v1765_v13 = vadd.f32 %v2499_v7, %v1700_v16  ;;  %v2502_v14 = vadd.f32 %v2501_v10, %v2500_v8  ;;  %v2541_v63 = vpop.f32.mrb[43].mxu1 }
 0x14f   : > { %v2542_v1 = vadd.f32 %v2541_v63, %v2540_v12 }
 0x150   : > { %v1768_v19 = vadd.f32 %v2502_v14, %v1703_v18  ;;  %v1830_v3 = vadd.f32 %v2539_v11, %v1765_v13 }
 0x152   : > { %v1833_v0 = vadd.f32 %v2542_v1, %v1768_v19  ;;  %v2503_v20 = vpop.f32.mrb[44].mxu0 }
 0x153   : > { %v2504_v21 = vpop.f32.mrb[45].mxu0  ;;  %v2543_v22 = vpop.f32.mrb[44].mxu1 }
 0x154   : > { %v2505_v23 = vadd.f32 %v2504_v21, %v2503_v20  ;;  %v2506_v24 = vpop.f32.mrb[46].mxu0  ;;  %v2544_v25 = vpop.f32.mrb[45].mxu1 }
 0x155   : > { %v2507_v26 = vpop.f32.mrb[47].mxu0  ;;  %v2545_v27 = vadd.f32 %v2544_v25, %v2543_v22  ;;  %v2546_v29 = vpop.f32.mrb[46].mxu1 }
 0x156   : > { %v1773_v30 = vadd.f32 %v2505_v23, %v1708_v15  ;;  %v2508_v32 = vadd.f32 %v2507_v26, %v2506_v24  ;;  %v2547_v33 = vpop.f32.mrb[47].mxu1 }
 0x157   : > { %v2548_v16 = vadd.f32 %v2547_v33, %v2546_v29 }
 0x158   : > { %v1776_v35 = vadd.f32 %v2508_v32, %v1711_v34  ;;  %v1838_v17 = vadd.f32 %v2545_v27, %v1773_v30 }
 0x15a   : > { %v1841_v36 = vadd.f32 %v2548_v16, %v1776_v35  ;;  %v2565_v18 = vpop.f32.mrb[48].mxu0 }
 0x15b   : > { %v2577_v37 = vpop.f32.mrb[48].mxu1  ;;  %v2566_v38 = vpop.f32.mrb[49].mxu0 }
 0x15c   : > { %v2567_v39 = vadd.f32 %v2566_v38, %v2565_v18  ;;  %v2578_v40 = vpop.f32.mrb[49].mxu1  ;;  %v2568_v41 = vpop.f32.mrb[50].mxu0 }
 0x15d   : > { %v2579_v42 = vadd.f32 %v2578_v40, %v2577_v37  ;;  %v2580_v43 = vpop.f32.mrb[50].mxu1  ;;  %v2569_v44 = vpop.f32.mrb[51].mxu0 }
 0x15e   : > { %v1879_v46 = vadd.f32 %v2567_v39, %v1814_v49  ;;  %v2570_v48 = vadd.f32 %v2569_v44, %v2568_v41  ;;  %v2581_v15 = vpop.f32.mrb[51].mxu1 }
 0x15f   : > { %v1895_v28 = vadd.f32 %v2579_v42, %v1830_v3  ;;  %v2582_v31 = vadd.f32 %v2581_v15, %v2580_v43 }
 0x160   : > { %v1882_v52 = vadd.f32 %v2570_v48, %v3254_v50  ;;  %v1923_v54 = vmul.f32 %v1879_v46, %v1879_v46 }
 0x161   : > { %v1898_v34 = vadd.f32 %v2582_v31, %v1833_v0  ;;  %v1927_v0 = vmul.f32 %v1895_v28, %v1895_v28 }
 0x162   : > { %v1909_v55 = vadd.f32 %v1882_v52, %v1879_v46  ;;  %v1924_v56 = vmul.f32 %v1882_v52, %v1882_v52  ;;  %v2289_v57 = vpack.c.bf16 %v1882_v52, %v1879_v46  ;;  %v2571_v49 = vpop.f32.mrb[52].mxu0 }
 0x163   : > { %v2299_v58 = vpack.c.bf16 %v1898_v34, %v1895_v28  ;;  %v2583_v59 = vpop.f32.mrb[52].mxu1  ;;  %v2572_v60 = vpop.f32.mrb[53].mxu0  ;;  %v1928_v21 = vmul.f32 %v1898_v34, %v1898_v34 }
 0x164   : > { %v1931_v51 = vadd.f32 %v1924_v56, %v1923_v54  ;;  %2290 = vst [vmem:[%s3265_s24] sm:$0xff] %v2289_v57   ;;  %v2573_v61 = vadd.f32 %v2572_v60, %v2571_v49  ;;  %v2584_v50 = vpop.f32.mrb[53].mxu1  ;;  %v2574_v62 = vpop.f32.mrb[54].mxu0 }
 0x165   : > { %2307 = vst [vmem:[%s3265_s24 + $0x10] sm:$0xff] %v2299_v58   ;;  %v2585_v45 = vadd.f32 %v2584_v50, %v2583_v59  ;;  %v2586_v53 = vpop.f32.mrb[54].mxu1  ;;  %v2575_v4 = vpop.f32.mrb[55].mxu0 }
 0x166   : > { %v1887_v5 = vadd.f32 %v2573_v61, %v3256_v2  ;;  %v2576_v6 = vadd.f32 %v2575_v4, %v2574_v62  ;;  %v2587_v7 = vpop.f32.mrb[55].mxu1 }
 0x167   : > { %v1903_v8 = vadd.f32 %v2585_v45, %v1838_v17  ;;  %v2588_v9 = vadd.f32 %v2587_v7, %v2586_v53 }
 0x168   : > { %v1910_v10 = vadd.f32 %v1909_v55, %v1887_v5  ;;  %v1925_v11 = vmul.f32 %v1887_v5, %v1887_v5  ;;  %v1890_v12 = vadd.f32 %v2576_v6, %v3258_v47 }
 0x169   : > { %v1906_v13 = vadd.f32 %v2588_v9, %v1841_v36  ;;  %v1929_v24 = vmul.f32 %v1903_v8, %v1903_v8 }
 0x16a   : > { %v1932_v14 = vadd.f32 %v1931_v51, %v1925_v11  ;;  %v1911_v63 = vadd.f32 %v1910_v10, %v1890_v12  ;;  %v1926_v1 = vmul.f32 %v1890_v12, %v1890_v12  ;;  %v2294_v19 = vpack.c.bf16 %v1890_v12, %v1887_v5 }
 0x16b   : > { %v2304_v3 = vpack.c.bf16 %v1906_v13, %v1903_v8  ;;  %v1930_v27 = vmul.f32 %v1906_v13, %v1906_v13 }
 0x16c   : > { %v1912_v20 = vadd.f32 %v1911_v63, %v1895_v28  ;;  %v1933_v2 = vadd.f32 %v1932_v14, %v1926_v1  ;;  %2306 = vst [vmem:[%s3265_s24 + $0x8] sm:$0xff] %v2294_v19  }
 0x16d   : > { %2308 = vst [vmem:[%s3265_s24 + $0x18] sm:$0xff] %v2304_v3  }
 0x16e   : > { %v1934_v22 = vadd.f32 %v1933_v2, %v1927_v0  ;;  %v1913_v23 = vadd.f32 %v1912_v20, %v1898_v34 }
 0x170   : > { %v1914_v25 = vadd.f32 %v1913_v23, %v1903_v8  ;;  %v1935_v26 = vadd.f32 %v1934_v22, %v1928_v21 }
 0x172   : > { %v1915_v47 = vadd.f32 %v1914_v25, %v1906_v13  ;;  %v1936_v29 = vadd.f32 %v1935_v26, %v1929_v24 }
 0x174   : > { %v1916_v30 = vrot.slane %v1915_v47, 4  ;;  %v1937_v32 = vadd.f32 %v1936_v29, %v1930_v27 }
 0x176   : > { %v1917_v33 = vadd.f32 %v1916_v30, %v1915_v47  ;;  %v1938_v16 = vrot.slane %v1937_v32, 4 }
 0x178   : > { %v1918_v35 = vrot.slane %v1917_v33, 2  ;;  %v1939_v17 = vadd.f32 %v1938_v16, %v1937_v32 }
 0x17a   : > { %v1919_v36 = vadd.f32 %v1918_v35, %v1917_v33  ;;  %v1940_v18 = vrot.slane %v1939_v17, 2 }
 0x17c   : > { %v1920_v37 = vrot.slane %v1919_v36, 1  ;;  %v1941_v38 = vadd.f32 %v1940_v18, %v1939_v17 }
 0x17e   : > { %v1921_v39 = vadd.f32 %v1920_v37, %v1919_v36  ;;  %v1942_v40 = vrot.slane %v1941_v38, 1 }
 0x180   : > { %1922 = vst [vmem:[%s217_s26] sm:$0x1] %v1921_v39  ;;  %v1943_v41 = vadd.f32 %v1942_v40, %v1941_v38 }
 0x182   : > { %1944 = vst [vmem:[%s220_s29] sm:$0x1] %v1943_v41 }
 0x183 PF: > { %s15_s15 = sadd.s32 1, %s2816_s15  }
 0x184   : > { %p12_p5 = scmp.ge.s32.totalorder %s15_s15, 4  }
 0x186   :  { %14 = sbr.rel (!%p12_p5) target bundleno = 1 (0x1), region = 82 }

</bundles_post_ra>
